<compile_context>
chip_gen: v7x
topology: tpu7x:2x2x1
jax: 0.10.0
libtpu: 0.0.40
codegen_flags: <defaults>
</compile_context>

<pallas_src>
import functools

import jax
import jax.numpy as jnp
from jax import lax
from jax.experimental import pallas as pl
from jax.experimental.pallas import tpu as pltpu

# ---------------- problem sizes (small, synthetic) ----------------
B = 16          # batch
D = 32          # data dim (z features)
H = 64          # hidden dim of the odefunc MLP
NUM_STEPS = 16  # fixed RK4 steps replacing dopri5
T_END = 1.0     # CNF T (train_T=False -> sqrt_end_time buffer = sqrt(T))


def _num_batch_tiles(bsz):
    """One grid program per TensorCore.

    v5e/v6e have a single TC per chip -> fold the whole batch into one grid
    program (avoids per-step pipeline overhead and re-DMA of the weights).
    v7x has 2 TCs -> keep 2 "parallel" programs so both cores get a tile.
    """
    try:
        kind = jax.devices()[0].device_kind.lower()
    except Exception:
        return 1
    n = 2 if ("v7" in kind or "7x" in kind) else 1
    if bsz % n != 0 or (bsz // n) % 8 != 0:
        n = 1
    return n


# ---------------- Pallas kernel: RK4 integration of (z, logp) ----------------
def _cnf_rk4_kernel(scal_ref,                      # SMEM (3,) [t0, t1, sum_dtr]
                    z_ref, logp_ref,               # VMEM (TB, D), (TB, 1) f32
                    w1_ref, w2_ref, dtr_ref,       # bf16 (D,H), (H,D), (H,1)
                    b1_ref, bt1_ref, b2_ref,       # f32  (1,H), (1,H), (1,D)
                    z_out_ref, logp_out_ref):      # VMEM (TB, D), (TB, 1)
    tb = z_ref.shape[0]

    t0 = scal_ref[0]
    t1 = scal_ref[1]
    sum_dtr = scal_ref[2]
    dt = (t1 - t0) * jnp.float32(1.0 / NUM_STEPS)
    half_dt = 0.5 * dt
    sixth_dt = dt * jnp.float32(1.0 / 6.0)

    # Weights stay resident in vregs/VMEM for the whole integration.
    w1 = w1_ref[...]          # bf16 (D, H)
    w2 = w2_ref[...]          # bf16 (H, D)
    dtr = dtr_ref[...]        # bf16 (H, 1)  = diag(W2 @ W1) as a column

    # Loop-invariant broadcasts hoisted out of the RK loop (JAX does not CSE
    # broadcast_in_dim inside loops).
    b1b = jnp.broadcast_to(b1_ref[...], (tb, H))
    bt1b = jnp.broadcast_to(bt1_ref[...], (tb, H))
    b2b = jnp.broadcast_to(b2_ref[...], (tb, D))

    def f(bias, z):
        # dz/dt and the non-constant part of dlogp/dt of the odefunc.
        # Matmul operands in bf16 (MXU native), f32 accumulation; elementwise
        # math stays f32 (v5e VPU has no bf16).
        pre = jnp.dot(z.astype(jnp.bfloat16), w1,
                      preferred_element_type=jnp.float32) + bias       # (tb, H)
        h = jnp.tanh(pre)
        dz = jnp.dot(h.astype(jnp.bfloat16), w2,
                     preferred_element_type=jnp.float32) + b2b         # (tb, D)
        # -trace(J) = h^2 @ diag(W2@W1) - sum(diag(W2@W1)).
        # Reduction done as an MXU matvec (MXU is idle anyway) instead of an
        # XLU cross-lane reduce; the constant -sum(...) term integrates
        # exactly to -(t1-t0)*sum(...) under RK4 and is applied after the loop.
        dlp = jnp.dot((h * h).astype(jnp.bfloat16), dtr,
                      preferred_element_type=jnp.float32)              # (tb, 1)
        return dz, dlp

    def rk4_step(i, carry):
        z, lp = carry
        t = t0 + dt * i.astype(jnp.float32)
        bias_a = t * bt1b + b1b
        bias_b = (t + half_dt) * bt1b + b1b        # shared by stages k2 and k3
        bias_c = (t + dt) * bt1b + b1b
        k1z, k1l = f(bias_a, z)
        k2z, k2l = f(bias_b, z + half_dt * k1z)
        k3z, k3l = f(bias_b, z + half_dt * k2z)
        k4z, k4l = f(bias_c, z + dt * k3z)
        z = z + sixth_dt * (k1z + 2.0 * k2z + 2.0 * k3z + k4z)
        lp = lp + sixth_dt * (k1l + 2.0 * k2l + 2.0 * k3l + k4l)
        return (z, lp)

    z0 = z_ref[...].astype(jnp.float32)
    lp0 = logp_ref[...].astype(jnp.float32)
    # Fully unrolled: lets the scheduler overlap the MXU push of one RK stage
    # with the VPU/EUP tail of the previous one.
    zT, lpT = lax.fori_loop(0, NUM_STEPS, rk4_step, (z0, lp0), unroll=True)
    lpT = lpT - (t1 - t0) * sum_dtr     # constant part of the divergence

    z_out_ref[...] = zT.astype(z_out_ref.dtype)
    logp_out_ref[...] = lpT.astype(logp_out_ref.dtype)


@functools.partial(jax.jit, static_argnames=("n_tiles",))
def _cnf_pallas(scalars, z, logpz, w1_bf, w2_bf, dtr_bf, b1, bt1, b2, *,
                n_tiles):
    bsz = z.shape[0]
    tb = bsz // n_tiles
    # NOTE: if the batch ever grows, size tb toward 128 (v5e) / 256 (v6e/v7x)
    # rows to actually fill the MXU; VMEM is not a constraint here.
    return pl.pallas_call(
        _cnf_rk4_kernel,
        out_shape=(jax.ShapeDtypeStruct((bsz, D), z.dtype),
                   jax.ShapeDtypeStruct((bsz, 1), z.dtype)),
        grid=(n_tiles,),
        in_specs=[
            pl.BlockSpec(memory_space=pltpu.MemorySpace.SMEM),  # [t0,t1,sum_dtr]
            pl.BlockSpec((tb, D), lambda i: (i, 0)),            # z
            pl.BlockSpec((tb, 1), lambda i: (i, 0)),            # logpz
            pl.BlockSpec((D, H), lambda i: (0, 0)),             # W1 (bf16)
            pl.BlockSpec((H, D), lambda i: (0, 0)),             # W2 (bf16)
            pl.BlockSpec((H, 1), lambda i: (0, 0)),             # diag(W2@W1) col
            pl.BlockSpec((1, H), lambda i: (0, 0)),             # b1
            pl.BlockSpec((1, H), lambda i: (0, 0)),             # bt1
            pl.BlockSpec((1, D), lambda i: (0, 0)),             # b2
        ],
        out_specs=(pl.BlockSpec((tb, D), lambda i: (i, 0)),
                   pl.BlockSpec((tb, 1), lambda i: (i, 0))),
        compiler_params=pltpu.CompilerParams(
            dimension_semantics=("parallel",)),
    )(scalars, z, logpz, w1_bf, w2_bf, dtr_bf, b1, bt1, b2)


# ---------------- CNF module equivalent (glue in plain JAX) ----------------
def init_cnf_params(key):
    k1, k2, k3, k4, k5 = jax.random.split(key, 5)
    scale1 = 1.0 / jnp.sqrt(jnp.float32(D))
    scale2 = 1.0 / jnp.sqrt(jnp.float32(H))
    w1 = jax.random.normal(k1, (D, H), jnp.float32) * scale1
    w2 = jax.random.normal(k4, (H, D), jnp.float32) * scale2
    diag = jnp.diagonal(w2 @ w1)                      # (H,) exact-trace helper
    params = {
        "sqrt_end_time": jnp.sqrt(jnp.float32(T_END)),  # buffer (train_T=False)
        "W1": w1,
        "b1": jax.random.normal(k2, (1, H), jnp.float32) * 0.1,
        "bt1": jax.random.normal(k3, (1, H), jnp.float32) * 0.1,
        "W2": w2,
        "b2": jax.random.normal(k5, (1, D), jnp.float32) * 0.1,
        "diag_w2w1": diag[None, :],                   # (1, H) f32
        "sum_diag_w2w1": jnp.sum(diag),               # ()     f32
        # bf16 copies for MXU matmul operands (accumulation stays f32)
        "W1_bf16": w1.astype(jnp.bfloat16),
        "W2_bf16": w2.astype(jnp.bfloat16),
        "diag_col_bf16": diag[:, None].astype(jnp.bfloat16),   # (H, 1)
    }
    return params


def cnf_forward(params, z, logpz=None, integration_times=None, reverse=False):
    """Mirrors CNF.forward in eval mode (training-only lec path -> None)."""
    _logpz = jnp.zeros((z.shape[0], 1), z.dtype) if logpz is None else logpz
    if integration_times is None:
        end_time = params["sqrt_end_time"] ** 2
        integration_times = jnp.stack(
            [jnp.float32(0.0), end_time]).astype(z.dtype)
    if reverse:
        integration_times = integration_times[::-1]      # _flip(times, 0)
    # TODO(synk): only the [t_first, t_last] endpoints are integrated; the
    # intermediate states for len(integration_times) > 2 are not materialized.
    scalars = jnp.concatenate(
        [integration_times[:1].astype(jnp.float32),
         integration_times[-1:].astype(jnp.float32),
         jnp.reshape(params["sum_diag_w2w1"], (1,)).astype(jnp.float32)])
    n_tiles = _num_batch_tiles(z.shape[0])
    z_t, logp_t = _cnf_pallas(
        scalars, z, _logpz,
        params["W1_bf16"], params["W2_bf16"], params["diag_col_bf16"],
        params["b1"], params["bt1"], params["b2"], n_tiles=n_tiles)
    lec = None        # eval mode: LEC / poly_reg_error not computed
    return (z_t, logp_t, lec)


# ---------------- reference (pure JAX) for sanity checks ----------------
def _ref_forward(params, z, logpz, reverse=False, match_kernel_precision=True):
    """RK4 reference.  match_kernel_precision=True mirrors the kernel
    (bf16 matmul operands, MXU-matvec divergence, end-of-loop constant term);
    False is the straightforward full-f32 formulation of the same math."""
    t0 = jnp.float32(T_END if reverse else 0.0)
    t1 = jnp.float32(0.0 if reverse else T_END)
    dt = (t1 - t0) / NUM_STEPS
    b1, bt1, b2 = params["b1"], params["bt1"], params["b2"]
    dtr = params["diag_w2w1"]
    sum_dtr = params["sum_diag_w2w1"]
    if match_kernel_precision:
        w1, w2, dtrc = (params["W1_bf16"], params["W2_bf16"],
                        params["diag_col_bf16"])
        cast = lambda a: a.astype(jnp.bfloat16)
    else:
        w1, w2, dtrc = params["W1"], params["W2"], None
        cast = lambda a: a

    def f(t, z):
        h = jnp.tanh(jnp.dot(cast(z), w1, preferred_element_type=jnp.float32)
                     + t * bt1 + b1)
        dz = jnp.dot(cast(h), w2, preferred_element_type=jnp.float32) + b2
        if match_kernel_precision:
            dlp = jnp.dot(cast(h * h), dtrc, preferred_element_type=jnp.float32)
        else:
            dlp = -jnp.sum((1.0 - h * h) * dtr, axis=-1, keepdims=True)
        return dz, dlp

    lp = logpz
    for i in range(NUM_STEPS):
        t = t0 + dt * i
        k1z, k1l = f(t, z)
        k2z, k2l = f(t + 0.5 * dt, z + 0.5 * dt * k1z)
        k3z, k3l = f(t + 0.5 * dt, z + 0.5 * dt * k2z)
        k4z, k4l = f(t + dt, z + dt * k3z)
        z = z + (dt / 6.0) * (k1z + 2 * k2z + 2 * k3z + k4z)
        lp = lp + (dt / 6.0) * (k1l + 2 * k2l + 2 * k3l + k4l)
    if match_kernel_precision:
        lp = lp - (t1 - t0) * sum_dtr
    return z, lp


if __name__ == "__main__":
    key = jax.random.PRNGKey(0)
    kp, kz = jax.random.split(key)
    params = init_cnf_params(kp)
    z = jax.random.normal(kz, (B, D), jnp.float32)

    z_t, logp_t, lec = cnf_forward(params, z)          # density-eval direction
    jax.block_until_ready((z_t, logp_t))
    assert z_t.shape == (B, D) and logp_t.shape == (B, 1) and lec is None

    lp0 = jnp.zeros((B, 1), jnp.float32)
    # tight check vs. a precision-matched reference (same bf16/MXU algorithm)
    z_m, lp_m = _ref_forward(params, z, lp0, match_kernel_precision=True)
    assert jnp.allclose(z_t, z_m, atol=2e-4, rtol=2e-4)
    assert jnp.allclose(logp_t, lp_m, atol=2e-4, rtol=2e-4)
    # loose check vs. the full-f32 straightforward formulation (validates the
    # bf16-operand and divergence-rearrangement substitutions)
    z_f, lp_f = _ref_forward(params, z, lp0, match_kernel_precision=False)
    assert jnp.allclose(z_t, z_f, atol=5e-2, rtol=5e-2)
    assert jnp.allclose(logp_t, lp_f, atol=5e-2, rtol=5e-2)

    # reverse direction (sampling dir) also runs
    z_r, logp_r, _ = cnf_forward(params, z, reverse=True)
    jax.block_until_ready((z_r, logp_r))

    print("KERNEL_OK")
</pallas_src>

<mosaic_0001>
module attributes {stable_mosaic.version = 11 : i64} {
  func.func @_cnf_rk4_kernel(%arg0: i32, %arg1: memref<3xf32, #tpu.memory_space<smem>>, %arg2: memref<16x32xf32, #tpu.memory_space<vmem>>, %arg3: memref<16x1xf32, #tpu.memory_space<vmem>>, %arg4: memref<32x64xbf16, #tpu.memory_space<vmem>>, %arg5: memref<64x32xbf16, #tpu.memory_space<vmem>>, %arg6: memref<64x1xbf16, #tpu.memory_space<vmem>>, %arg7: memref<1x64xf32, #tpu.memory_space<vmem>>, %arg8: memref<1x64xf32, #tpu.memory_space<vmem>>, %arg9: memref<1x32xf32, #tpu.memory_space<vmem>>, %arg10: memref<16x32xf32, #tpu.memory_space<vmem>>, %arg11: memref<16x1xf32, #tpu.memory_space<vmem>>) attributes {dimension_semantics = [#tpu.dimension_semantics<parallel>], iteration_bounds = array<i64: 1>, scalar_prefetch = 0 : i64, scratch_operands = 0 : i64, tpu.core_type = #tpu.core_type<tc>, window_params = [{transform_indices = @transform_0, window_bounds = array<i64: 3>}, {transform_indices = @transform_1, window_bounds = array<i64: 16, 32>}, {transform_indices = @transform_2, window_bounds = array<i64: 16, 1>}, {pipeline_mode = #tpu.pipeline_mode<synchronous>, transform_indices = @transform_3, window_bounds = array<i64: 32, 64>}, {pipeline_mode = #tpu.pipeline_mode<synchronous>, transform_indices = @transform_4, window_bounds = array<i64: 64, 32>}, {pipeline_mode = #tpu.pipeline_mode<synchronous>, transform_indices = @transform_5, window_bounds = array<i64: 64, 1>}, {pipeline_mode = #tpu.pipeline_mode<synchronous>, transform_indices = @transform_6, window_bounds = array<i64: 1, 64>}, {pipeline_mode = #tpu.pipeline_mode<synchronous>, transform_indices = @transform_7, window_bounds = array<i64: 1, 64>}, {pipeline_mode = #tpu.pipeline_mode<synchronous>, transform_indices = @transform_8, window_bounds = array<i64: 1, 32>}, {transform_indices = @transform_9, window_bounds = array<i64: 16, 32>}, {transform_indices = @transform_10, window_bounds = array<i64: 16, 1>}]} {
    %c0 = arith.constant 0 : index
    %0 = memref.load %arg1[%c0] : memref<3xf32, #tpu.memory_space<smem>>
    %c1 = arith.constant 1 : index
    %1 = memref.load %arg1[%c1] : memref<3xf32, #tpu.memory_space<smem>>
    %c2 = arith.constant 2 : index
    %2 = memref.load %arg1[%c2] : memref<3xf32, #tpu.memory_space<smem>>
    %3 = arith.subf %1, %0 : f32
    %cst = arith.constant 6.250000e-02 : f32
    %4 = arith.mulf %3, %cst : f32
    %cst_0 = arith.constant 5.000000e-01 : f32
    %5 = arith.mulf %cst_0, %4 : f32
    %cst_1 = arith.constant 0.166666672 : f32
    %6 = arith.mulf %4, %cst_1 : f32
    %c0_2 = arith.constant 0 : index
    %c0_3 = arith.constant 0 : index
    %7 = vector.load %arg4[%c0_2, %c0_3] : memref<32x64xbf16, #tpu.memory_space<vmem>>, vector<32x64xbf16>
    %c0_4 = arith.constant 0 : index
    %c0_5 = arith.constant 0 : index
    %8 = vector.load %arg5[%c0_4, %c0_5] : memref<64x32xbf16, #tpu.memory_space<vmem>>, vector<64x32xbf16>
    %c0_6 = arith.constant 0 : index
    %c0_7 = arith.constant 0 : index
    %9 = vector.load %arg6[%c0_6, %c0_7] : memref<64x1xbf16, #tpu.memory_space<vmem>>, vector<64x1xbf16>
    %c0_8 = arith.constant 0 : index
    %c0_9 = arith.constant 0 : index
    %10 = vector.load %arg7[%c0_8, %c0_9] : memref<1x64xf32, #tpu.memory_space<vmem>>, vector<1x64xf32>
    %11 = vector.shape_cast %10 : vector<1x64xf32> to vector<1x64xf32>
    %12 = vector.broadcast %11 : vector<1x64xf32> to vector<16x64xf32>
    %c0_10 = arith.constant 0 : index
    %c0_11 = arith.constant 0 : index
    %13 = vector.load %arg8[%c0_10, %c0_11] : memref<1x64xf32, #tpu.memory_space<vmem>>, vector<1x64xf32>
    %14 = vector.shape_cast %13 : vector<1x64xf32> to vector<1x64xf32>
    %15 = vector.broadcast %14 : vector<1x64xf32> to vector<16x64xf32>
    %c0_12 = arith.constant 0 : index
    %c0_13 = arith.constant 0 : index
    %16 = vector.load %arg9[%c0_12, %c0_13] : memref<1x32xf32, #tpu.memory_space<vmem>>, vector<1x32xf32>
    %17 = vector.shape_cast %16 : vector<1x32xf32> to vector<1x32xf32>
    %18 = vector.broadcast %17 : vector<1x32xf32> to vector<16x32xf32>
    %c0_14 = arith.constant 0 : index
    %c0_15 = arith.constant 0 : index
    %19 = vector.load %arg2[%c0_14, %c0_15] : memref<16x32xf32, #tpu.memory_space<vmem>>, vector<16x32xf32>
    %c0_16 = arith.constant 0 : index
    %c0_17 = arith.constant 0 : index
    %20 = vector.load %arg3[%c0_16, %c0_17] : memref<16x1xf32, #tpu.memory_space<vmem>>, vector<16x1xf32>
    %c0_i32 = arith.constant 0 : i32
    %21 = arith.sitofp %c0_i32 : i32 to f32
    %22 = arith.mulf %4, %21 : f32
    %23 = arith.addf %0, %22 : f32
    %24 = vector.broadcast %23 : f32 to vector<16x64xf32>
    %25 = arith.mulf %24, %15 : vector<16x64xf32>
    %26 = arith.addf %25, %12 : vector<16x64xf32>
    %27 = arith.addf %23, %5 : f32
    %28 = vector.broadcast %27 : f32 to vector<16x64xf32>
    %29 = arith.mulf %28, %15 : vector<16x64xf32>
    %30 = arith.addf %29, %12 : vector<16x64xf32>
    %31 = arith.addf %23, %4 : f32
    %32 = vector.broadcast %31 : f32 to vector<16x64xf32>
    %33 = arith.mulf %32, %15 : vector<16x64xf32>
    %34 = arith.addf %33, %12 : vector<16x64xf32>
    %35 = arith.truncf %19 : vector<16x32xf32> to vector<16x32xbf16>
    %cst_18 = arith.constant dense<0.000000e+00> : vector<16x64xf32>
    %36 = tpu.matmul %35, %7, %cst_18 {dimension_numbers = #tpu.dot_dimension_numbers<[1], [0], [0], [1], [0, 0, 1, 1], [], []>} : vector<16x32xbf16>, vector<32x64xbf16>, vector<16x64xf32> -> vector<16x64xf32>
    %37 = arith.addf %36, %26 : vector<16x64xf32>
    %38 = math.tanh %37 : vector<16x64xf32>
    %39 = arith.truncf %38 : vector<16x64xf32> to vector<16x64xbf16>
    %cst_19 = arith.constant dense<0.000000e+00> : vector<16x32xf32>
    %40 = tpu.matmul %39, %8, %cst_19 {dimension_numbers = #tpu.dot_dimension_numbers<[1], [0], [0], [1], [0, 0, 1, 1], [], []>} : vector<16x64xbf16>, vector<64x32xbf16>, vector<16x32xf32> -> vector<16x32xf32>
    %41 = arith.addf %40, %18 : vector<16x32xf32>
    %42 = arith.mulf %38, %38 : vector<16x64xf32>
    %43 = arith.truncf %42 : vector<16x64xf32> to vector<16x64xbf16>
    %cst_20 = arith.constant dense<0.000000e+00> : vector<16x1xf32>
    %44 = tpu.matmul %43, %9, %cst_20 {dimension_numbers = #tpu.dot_dimension_numbers<[1], [0], [0], [1], [0, 0, 1, 1], [], []>} : vector<16x64xbf16>, vector<64x1xbf16>, vector<16x1xf32> -> vector<16x1xf32>
    %45 = vector.broadcast %5 : f32 to vector<16x32xf32>
    %46 = arith.mulf %45, %41 : vector<16x32xf32>
    %47 = arith.addf %19, %46 : vector<16x32xf32>
    %48 = arith.truncf %47 : vector<16x32xf32> to vector<16x32xbf16>
    %cst_21 = arith.constant dense<0.000000e+00> : vector<16x64xf32>
    %49 = tpu.matmul %48, %7, %cst_21 {dimension_numbers = #tpu.dot_dimension_numbers<[1], [0], [0], [1], [0, 0, 1, 1], [], []>} : vector<16x32xbf16>, vector<32x64xbf16>, vector<16x64xf32> -> vector<16x64xf32>
    %50 = arith.addf %49, %30 : vector<16x64xf32>
    %51 = math.tanh %50 : vector<16x64xf32>
    %52 = arith.truncf %51 : vector<16x64xf32> to vector<16x64xbf16>
    %cst_22 = arith.constant dense<0.000000e+00> : vector<16x32xf32>
    %53 = tpu.matmul %52, %8, %cst_22 {dimension_numbers = #tpu.dot_dimension_numbers<[1], [0], [0], [1], [0, 0, 1, 1], [], []>} : vector<16x64xbf16>, vector<64x32xbf16>, vector<16x32xf32> -> vector<16x32xf32>
    %54 = arith.addf %53, %18 : vector<16x32xf32>
    %55 = arith.mulf %51, %51 : vector<16x64xf32>
    %56 = arith.truncf %55 : vector<16x64xf32> to vector<16x64xbf16>
    %cst_23 = arith.constant dense<0.000000e+00> : vector<16x1xf32>
    %57 = tpu.matmul %56, %9, %cst_23 {dimension_numbers = #tpu.dot_dimension_numbers<[1], [0], [0], [1], [0, 0, 1, 1], [], []>} : vector<16x64xbf16>, vector<64x1xbf16>, vector<16x1xf32> -> vector<16x1xf32>
    %58 = vector.broadcast %5 : f32 to vector<16x32xf32>
    %59 = arith.mulf %58, %54 : vector<16x32xf32>
    %60 = arith.addf %19, %59 : vector<16x32xf32>
    %61 = arith.truncf %60 : vector<16x32xf32> to vector<16x32xbf16>
    %cst_24 = arith.constant dense<0.000000e+00> : vector<16x64xf32>
    %62 = tpu.matmul %61, %7, %cst_24 {dimension_numbers = #tpu.dot_dimension_numbers<[1], [0], [0], [1], [0, 0, 1, 1], [], []>} : vector<16x32xbf16>, vector<32x64xbf16>, vector<16x64xf32> -> vector<16x64xf32>
    %63 = arith.addf %62, %30 : vector<16x64xf32>
    %64 = math.tanh %63 : vector<16x64xf32>
    %65 = arith.truncf %64 : vector<16x64xf32> to vector<16x64xbf16>
    %cst_25 = arith.constant dense<0.000000e+00> : vector<16x32xf32>
    %66 = tpu.matmul %65, %8, %cst_25 {dimension_numbers = #tpu.dot_dimension_numbers<[1], [0], [0], [1], [0, 0, 1, 1], [], []>} : vector<16x64xbf16>, vector<64x32xbf16>, vector<16x32xf32> -> vector<16x32xf32>
    %67 = arith.addf %66, %18 : vector<16x32xf32>
    %68 = arith.mulf %64, %64 : vector<16x64xf32>
    %69 = arith.truncf %68 : vector<16x64xf32> to vector<16x64xbf16>
    %cst_26 = arith.constant dense<0.000000e+00> : vector<16x1xf32>
    %70 = tpu.matmul %69, %9, %cst_26 {dimension_numbers = #tpu.dot_dimension_numbers<[1], [0], [0], [1], [0, 0, 1, 1], [], []>} : vector<16x64xbf16>, vector<64x1xbf16>, vector<16x1xf32> -> vector<16x1xf32>
    %71 = vector.broadcast %4 : f32 to vector<16x32xf32>
    %72 = arith.mulf %71, %67 : vector<16x32xf32>
    %73 = arith.addf %19, %72 : vector<16x32xf32>
    %74 = arith.truncf %73 : vector<16x32xf32> to vector<16x32xbf16>
    %cst_27 = arith.constant dense<0.000000e+00> : vector<16x64xf32>
    %75 = tpu.matmul %74, %7, %cst_27 {dimension_numbers = #tpu.dot_dimension_numbers<[1], [0], [0], [1], [0, 0, 1, 1], [], []>} : vector<16x32xbf16>, vector<32x64xbf16>, vector<16x64xf32> -> vector<16x64xf32>
    %76 = arith.addf %75, %34 : vector<16x64xf32>
    %77 = math.tanh %76 : vector<16x64xf32>
    %78 = arith.truncf %77 : vector<16x64xf32> to vector<16x64xbf16>
    %cst_28 = arith.constant dense<0.000000e+00> : vector<16x32xf32>
    %79 = tpu.matmul %78, %8, %cst_28 {dimension_numbers = #tpu.dot_dimension_numbers<[1], [0], [0], [1], [0, 0, 1, 1], [], []>} : vector<16x64xbf16>, vector<64x32xbf16>, vector<16x32xf32> -> vector<16x32xf32>
    %80 = arith.addf %79, %18 : vector<16x32xf32>
    %81 = arith.mulf %77, %77 : vector<16x64xf32>
    %82 = arith.truncf %81 : vector<16x64xf32> to vector<16x64xbf16>
    %cst_29 = arith.constant dense<0.000000e+00> : vector<16x1xf32>
    %83 = tpu.matmul %82, %9, %cst_29 {dimension_numbers = #tpu.dot_dimension_numbers<[1], [0], [0], [1], [0, 0, 1, 1], [], []>} : vector<16x64xbf16>, vector<64x1xbf16>, vector<16x1xf32> -> vector<16x1xf32>
    %cst_30 = arith.constant 2.000000e+00 : f32
    %84 = vector.broadcast %cst_30 : f32 to vector<16x32xf32>
    %85 = arith.mulf %84, %54 : vector<16x32xf32>
    %86 = arith.addf %41, %85 : vector<16x32xf32>
    %cst_31 = arith.constant 2.000000e+00 : f32
    %87 = vector.broadcast %cst_31 : f32 to vector<16x32xf32>
    %88 = arith.mulf %87, %67 : vector<16x32xf32>
    %89 = arith.addf %86, %88 : vector<16x32xf32>
    %90 = arith.addf %89, %80 : vector<16x32xf32>
    %91 = vector.broadcast %6 : f32 to vector<16x32xf32>
    %92 = arith.mulf %91, %90 : vector<16x32xf32>
    %93 = arith.addf %19, %92 : vector<16x32xf32>
    %cst_32 = arith.constant 2.000000e+00 : f32
    %94 = vector.broadcast %cst_32 : f32 to vector<16x1xf32>
    %95 = arith.mulf %94, %57 : vector<16x1xf32>
    %96 = arith.addf %44, %95 : vector<16x1xf32>
    %cst_33 = arith.constant 2.000000e+00 : f32
    %97 = vector.broadcast %cst_33 : f32 to vector<16x1xf32>
    %98 = arith.mulf %97, %70 : vector<16x1xf32>
    %99 = arith.addf %96, %98 : vector<16x1xf32>
    %100 = arith.addf %99, %83 : vector<16x1xf32>
    %101 = vector.broadcast %6 : f32 to vector<16x1xf32>
    %102 = arith.mulf %101, %100 : vector<16x1xf32>
    %103 = arith.addf %20, %102 : vector<16x1xf32>
    %c1_i32 = arith.constant 1 : i32
    %104 = arith.sitofp %c1_i32 : i32 to f32
    %105 = arith.mulf %4, %104 : f32
    %106 = arith.addf %0, %105 : f32
    %107 = vector.broadcast %106 : f32 to vector<16x64xf32>
    %108 = arith.mulf %107, %15 : vector<16x64xf32>
    %109 = arith.addf %108, %12 : vector<16x64xf32>
    %110 = arith.addf %106, %5 : f32
    %111 = vector.broadcast %110 : f32 to vector<16x64xf32>
    %112 = arith.mulf %111, %15 : vector<16x64xf32>
    %113 = arith.addf %112, %12 : vector<16x64xf32>
    %114 = arith.addf %106, %4 : f32
    %115 = vector.broadcast %114 : f32 to vector<16x64xf32>
    %116 = arith.mulf %115, %15 : vector<16x64xf32>
    %117 = arith.addf %116, %12 : vector<16x64xf32>
    %118 = arith.truncf %93 : vector<16x32xf32> to vector<16x32xbf16>
    %cst_34 = arith.constant dense<0.000000e+00> : vector<16x64xf32>
    %119 = tpu.matmul %118, %7, %cst_34 {dimension_numbers = #tpu.dot_dimension_numbers<[1], [0], [0], [1], [0, 0, 1, 1], [], []>} : vector<16x32xbf16>, vector<32x64xbf16>, vector<16x64xf32> -> vector<16x64xf32>
    %120 = arith.addf %119, %109 : vector<16x64xf32>
    %121 = math.tanh %120 : vector<16x64xf32>
    %122 = arith.truncf %121 : vector<16x64xf32> to vector<16x64xbf16>
    %cst_35 = arith.constant dense<0.000000e+00> : vector<16x32xf32>
    %123 = tpu.matmul %122, %8, %cst_35 {dimension_numbers = #tpu.dot_dimension_numbers<[1], [0], [0], [1], [0, 0, 1, 1], [], []>} : vector<16x64xbf16>, vector<64x32xbf16>, vector<16x32xf32> -> vector<16x32xf32>
    %124 = arith.addf %123, %18 : vector<16x32xf32>
    %125 = arith.mulf %121, %121 : vector<16x64xf32>
    %126 = arith.truncf %125 : vector<16x64xf32> to vector<16x64xbf16>
    %cst_36 = arith.constant dense<0.000000e+00> : vector<16x1xf32>
    %127 = tpu.matmul %126, %9, %cst_36 {dimension_numbers = #tpu.dot_dimension_numbers<[1], [0], [0], [1], [0, 0, 1, 1], [], []>} : vector<16x64xbf16>, vector<64x1xbf16>, vector<16x1xf32> -> vector<16x1xf32>
    %128 = vector.broadcast %5 : f32 to vector<16x32xf32>
    %129 = arith.mulf %128, %124 : vector<16x32xf32>
    %130 = arith.addf %93, %129 : vector<16x32xf32>
    %131 = arith.truncf %130 : vector<16x32xf32> to vector<16x32xbf16>
    %cst_37 = arith.constant dense<0.000000e+00> : vector<16x64xf32>
    %132 = tpu.matmul %131, %7, %cst_37 {dimension_numbers = #tpu.dot_dimension_numbers<[1], [0], [0], [1], [0, 0, 1, 1], [], []>} : vector<16x32xbf16>, vector<32x64xbf16>, vector<16x64xf32> -> vector<16x64xf32>
    %133 = arith.addf %132, %113 : vector<16x64xf32>
    %134 = math.tanh %133 : vector<16x64xf32>
    %135 = arith.truncf %134 : vector<16x64xf32> to vector<16x64xbf16>
    %cst_38 = arith.constant dense<0.000000e+00> : vector<16x32xf32>
    %136 = tpu.matmul %135, %8, %cst_38 {dimension_numbers = #tpu.dot_dimension_numbers<[1], [0], [0], [1], [0, 0, 1, 1], [], []>} : vector<16x64xbf16>, vector<64x32xbf16>, vector<16x32xf32> -> vector<16x32xf32>
    %137 = arith.addf %136, %18 : vector<16x32xf32>
    %138 = arith.mulf %134, %134 : vector<16x64xf32>
    %139 = arith.truncf %138 : vector<16x64xf32> to vector<16x64xbf16>
    %cst_39 = arith.constant dense<0.000000e+00> : vector<16x1xf32>
    %140 = tpu.matmul %139, %9, %cst_39 {dimension_numbers = #tpu.dot_dimension_numbers<[1], [0], [0], [1], [0, 0, 1, 1], [], []>} : vector<16x64xbf16>, vector<64x1xbf16>, vector<16x1xf32> -> vector<16x1xf32>
    %141 = vector.broadcast %5 : f32 to vector<16x32xf32>
    %142 = arith.mulf %141, %137 : vector<16x32xf32>
    %143 = arith.addf %93, %142 : vector<16x32xf32>
    %144 = arith.truncf %143 : vector<16x32xf32> to vector<16x32xbf16>
    %cst_40 = arith.constant dense<0.000000e+00> : vector<16x64xf32>
    %145 = tpu.matmul %144, %7, %cst_40 {dimension_numbers = #tpu.dot_dimension_numbers<[1], [0], [0], [1], [0, 0, 1, 1], [], []>} : vector<16x32xbf16>, vector<32x64xbf16>, vector<16x64xf32> -> vector<16x64xf32>
    %146 = arith.addf %145, %113 : vector<16x64xf32>
    %147 = math.tanh %146 : vector<16x64xf32>
    %148 = arith.truncf %147 : vector<16x64xf32> to vector<16x64xbf16>
    %cst_41 = arith.constant dense<0.000000e+00> : vector<16x32xf32>
    %149 = tpu.matmul %148, %8, %cst_41 {dimension_numbers = #tpu.dot_dimension_numbers<[1], [0], [0], [1], [0, 0, 1, 1], [], []>} : vector<16x64xbf16>, vector<64x32xbf16>, vector<16x32xf32> -> vector<16x32xf32>
    %150 = arith.addf %149, %18 : vector<16x32xf32>
    %151 = arith.mulf %147, %147 : vector<16x64xf32>
    %152 = arith.truncf %151 : vector<16x64xf32> to vector<16x64xbf16>
    %cst_42 = arith.constant dense<0.000000e+00> : vector<16x1xf32>
    %153 = tpu.matmul %152, %9, %cst_42 {dimension_numbers = #tpu.dot_dimension_numbers<[1], [0], [0], [1], [0, 0, 1, 1], [], []>} : vector<16x64xbf16>, vector<64x1xbf16>, vector<16x1xf32> -> vector<16x1xf32>
    %154 = vector.broadcast %4 : f32 to vector<16x32xf32>
    %155 = arith.mulf %154, %150 : vector<16x32xf32>
    %156 = arith.addf %93, %155 : vector<16x32xf32>
    %157 = arith.truncf %156 : vector<16x32xf32> to vector<16x32xbf16>
    %cst_43 = arith.constant dense<0.000000e+00> : vector<16x64xf32>
    %158 = tpu.matmul %157, %7, %cst_43 {dimension_numbers = #tpu.dot_dimension_numbers<[1], [0], [0], [1], [0, 0, 1, 1], [], []>} : vector<16x32xbf16>, vector<32x64xbf16>, vector<16x64xf32> -> vector<16x64xf32>
    %159 = arith.addf %158, %117 : vector<16x64xf32>
    %160 = math.tanh %159 : vector<16x64xf32>
    %161 = arith.truncf %160 : vector<16x64xf32> to vector<16x64xbf16>
    %cst_44 = arith.constant dense<0.000000e+00> : vector<16x32xf32>
    %162 = tpu.matmul %161, %8, %cst_44 {dimension_numbers = #tpu.dot_dimension_numbers<[1], [0], [0], [1], [0, 0, 1, 1], [], []>} : vector<16x64xbf16>, vector<64x32xbf16>, vector<16x32xf32> -> vector<16x32xf32>
    %163 = arith.addf %162, %18 : vector<16x32xf32>
    %164 = arith.mulf %160, %160 : vector<16x64xf32>
    %165 = arith.truncf %164 : vector<16x64xf32> to vector<16x64xbf16>
    %cst_45 = arith.constant dense<0.000000e+00> : vector<16x1xf32>
    %166 = tpu.matmul %165, %9, %cst_45 {dimension_numbers = #tpu.dot_dimension_numbers<[1], [0], [0], [1], [0, 0, 1, 1], [], []>} : vector<16x64xbf16>, vector<64x1xbf16>, vector<16x1xf32> -> vector<16x1xf32>
    %cst_46 = arith.constant 2.000000e+00 : f32
    %167 = vector.broadcast %cst_46 : f32 to vector<16x32xf32>
    %168 = arith.mulf %167, %137 : vector<16x32xf32>
    %169 = arith.addf %124, %168 : vector<16x32xf32>
    %cst_47 = arith.constant 2.000000e+00 : f32
    %170 = vector.broadcast %cst_47 : f32 to vector<16x32xf32>
    %171 = arith.mulf %170, %150 : vector<16x32xf32>
    %172 = arith.addf %169, %171 : vector<16x32xf32>
    %173 = arith.addf %172, %163 : vector<16x32xf32>
    %174 = vector.broadcast %6 : f32 to vector<16x32xf32>
    %175 = arith.mulf %174, %173 : vector<16x32xf32>
    %176 = arith.addf %93, %175 : vector<16x32xf32>
    %cst_48 = arith.constant 2.000000e+00 : f32
    %177 = vector.broadcast %cst_48 : f32 to vector<16x1xf32>
    %178 = arith.mulf %177, %140 : vector<16x1xf32>
    %179 = arith.addf %127, %178 : vector<16x1xf32>
    %cst_49 = arith.constant 2.000000e+00 : f32
    %180 = vector.broadcast %cst_49 : f32 to vector<16x1xf32>
    %181 = arith.mulf %180, %153 : vector<16x1xf32>
    %182 = arith.addf %179, %181 : vector<16x1xf32>
    %183 = arith.addf %182, %166 : vector<16x1xf32>
    %184 = vector.broadcast %6 : f32 to vector<16x1xf32>
    %185 = arith.mulf %184, %183 : vector<16x1xf32>
    %186 = arith.addf %103, %185 : vector<16x1xf32>
    %c2_i32 = arith.constant 2 : i32
    %187 = arith.sitofp %c2_i32 : i32 to f32
    %188 = arith.mulf %4, %187 : f32
    %189 = arith.addf %0, %188 : f32
    %190 = vector.broadcast %189 : f32 to vector<16x64xf32>
    %191 = arith.mulf %190, %15 : vector<16x64xf32>
    %192 = arith.addf %191, %12 : vector<16x64xf32>
    %193 = arith.addf %189, %5 : f32
    %194 = vector.broadcast %193 : f32 to vector<16x64xf32>
    %195 = arith.mulf %194, %15 : vector<16x64xf32>
    %196 = arith.addf %195, %12 : vector<16x64xf32>
    %197 = arith.addf %189, %4 : f32
    %198 = vector.broadcast %197 : f32 to vector<16x64xf32>
    %199 = arith.mulf %198, %15 : vector<16x64xf32>
    %200 = arith.addf %199, %12 : vector<16x64xf32>
    %201 = arith.truncf %176 : vector<16x32xf32> to vector<16x32xbf16>
    %cst_50 = arith.constant dense<0.000000e+00> : vector<16x64xf32>
    %202 = tpu.matmul %201, %7, %cst_50 {dimension_numbers = #tpu.dot_dimension_numbers<[1], [0], [0], [1], [0, 0, 1, 1], [], []>} : vector<16x32xbf16>, vector<32x64xbf16>, vector<16x64xf32> -> vector<16x64xf32>
    %203 = arith.addf %202, %192 : vector<16x64xf32>
    %204 = math.tanh %203 : vector<16x64xf32>
    %205 = arith.truncf %204 : vector<16x64xf32> to vector<16x64xbf16>
    %cst_51 = arith.constant dense<0.000000e+00> : vector<16x32xf32>
    %206 = tpu.matmul %205, %8, %cst_51 {dimension_numbers = #tpu.dot_dimension_numbers<[1], [0], [0], [1], [0, 0, 1, 1], [], []>} : vector<16x64xbf16>, vector<64x32xbf16>, vector<16x32xf32> -> vector<16x32xf32>
    %207 = arith.addf %206, %18 : vector<16x32xf32>
    %208 = arith.mulf %204, %204 : vector<16x64xf32>
    %209 = arith.truncf %208 : vector<16x64xf32> to vector<16x64xbf16>
    %cst_52 = arith.constant dense<0.000000e+00> : vector<16x1xf32>
    %210 = tpu.matmul %209, %9, %cst_52 {dimension_numbers = #tpu.dot_dimension_numbers<[1], [0], [0], [1], [0, 0, 1, 1], [], []>} : vector<16x64xbf16>, vector<64x1xbf16>, vector<16x1xf32> -> vector<16x1xf32>
    %211 = vector.broadcast %5 : f32 to vector<16x32xf32>
    %212 = arith.mulf %211, %207 : vector<16x32xf32>
    %213 = arith.addf %176, %212 : vector<16x32xf32>
    %214 = arith.truncf %213 : vector<16x32xf32> to vector<16x32xbf16>
    %cst_53 = arith.constant dense<0.000000e+00> : vector<16x64xf32>
    %215 = tpu.matmul %214, %7, %cst_53 {dimension_numbers = #tpu.dot_dimension_numbers<[1], [0], [0], [1], [0, 0, 1, 1], [], []>} : vector<16x32xbf16>, vector<32x64xbf16>, vector<16x64xf32> -> vector<16x64xf32>
    %216 = arith.addf %215, %196 : vector<16x64xf32>
    %217 = math.tanh %216 : vector<16x64xf32>
    %218 = arith.truncf %217 : vector<16x64xf32> to vector<16x64xbf16>
    %cst_54 = arith.constant dense<0.000000e+00> : vector<16x32xf32>
    %219 = tpu.matmul %218, %8, %cst_54 {dimension_numbers = #tpu.dot_dimension_numbers<[1], [0], [0], [1], [0, 0, 1, 1], [], []>} : vector<16x64xbf16>, vector<64x32xbf16>, vector<16x32xf32> -> vector<16x32xf32>
    %220 = arith.addf %219, %18 : vector<16x32xf32>
    %221 = arith.mulf %217, %217 : vector<16x64xf32>
    %222 = arith.truncf %221 : vector<16x64xf32> to vector<16x64xbf16>
    %cst_55 = arith.constant dense<0.000000e+00> : vector<16x1xf32>
    %223 = tpu.matmul %222, %9, %cst_55 {dimension_numbers = #tpu.dot_dimension_numbers<[1], [0], [0], [1], [0, 0, 1, 1], [], []>} : vector<16x64xbf16>, vector<64x1xbf16>, vector<16x1xf32> -> vector<16x1xf32>
    %224 = vector.broadcast %5 : f32 to vector<16x32xf32>
    %225 = arith.mulf %224, %220 : vector<16x32xf32>
    %226 = arith.addf %176, %225 : vector<16x32xf32>
    %227 = arith.truncf %226 : vector<16x32xf32> to vector<16x32xbf16>
    %cst_56 = arith.constant dense<0.000000e+00> : vector<16x64xf32>
    %228 = tpu.matmul %227, %7, %cst_56 {dimension_numbers = #tpu.dot_dimension_numbers<[1], [0], [0], [1], [0, 0, 1, 1], [], []>} : vector<16x32xbf16>, vector<32x64xbf16>, vector<16x64xf32> -> vector<16x64xf32>
    %229 = arith.addf %228, %196 : vector<16x64xf32>
    %230 = math.tanh %229 : vector<16x64xf32>
    %231 = arith.truncf %230 : vector<16x64xf32> to vector<16x64xbf16>
    %cst_57 = arith.constant dense<0.000000e+00> : vector<16x32xf32>
    %232 = tpu.matmul %231, %8, %cst_57 {dimension_numbers = #tpu.dot_dimension_numbers<[1], [0], [0], [1], [0, 0, 1, 1], [], []>} : vector<16x64xbf16>, vector<64x32xbf16>, vector<16x32xf32> -> vector<16x32xf32>
    %233 = arith.addf %232, %18 : vector<16x32xf32>
    %234 = arith.mulf %230, %230 : vector<16x64xf32>
    %235 = arith.truncf %234 : vector<16x64xf32> to vector<16x64xbf16>
    %cst_58 = arith.constant dense<0.000000e+00> : vector<16x1xf32>
    %236 = tpu.matmul %235, %9, %cst_58 {dimension_numbers = #tpu.dot_dimension_numbers<[1], [0], [0], [1], [0, 0, 1, 1], [], []>} : vector<16x64xbf16>, vector<64x1xbf16>, vector<16x1xf32> -> vector<16x1xf32>
    %237 = vector.broadcast %4 : f32 to vector<16x32xf32>
    %238 = arith.mulf %237, %233 : vector<16x32xf32>
    %239 = arith.addf %176, %238 : vector<16x32xf32>
    %240 = arith.truncf %239 : vector<16x32xf32> to vector<16x32xbf16>
    %cst_59 = arith.constant dense<0.000000e+00> : vector<16x64xf32>
    %241 = tpu.matmul %240, %7, %cst_59 {dimension_numbers = #tpu.dot_dimension_numbers<[1], [0], [0], [1], [0, 0, 1, 1], [], []>} : vector<16x32xbf16>, vector<32x64xbf16>, vector<16x64xf32> -> vector<16x64xf32>
    %242 = arith.addf %241, %200 : vector<16x64xf32>
    %243 = math.tanh %242 : vector<16x64xf32>
    %244 = arith.truncf %243 : vector<16x64xf32> to vector<16x64xbf16>
    %cst_60 = arith.constant dense<0.000000e+00> : vector<16x32xf32>
    %245 = tpu.matmul %244, %8, %cst_60 {dimension_numbers = #tpu.dot_dimension_numbers<[1], [0], [0], [1], [0, 0, 1, 1], [], []>} : vector<16x64xbf16>, vector<64x32xbf16>, vector<16x32xf32> -> vector<16x32xf32>
    %246 = arith.addf %245, %18 : vector<16x32xf32>
    %247 = arith.mulf %243, %243 : vector<16x64xf32>
    %248 = arith.truncf %247 : vector<16x64xf32> to vector<16x64xbf16>
    %cst_61 = arith.constant dense<0.000000e+00> : vector<16x1xf32>
    %249 = tpu.matmul %248, %9, %cst_61 {dimension_numbers = #tpu.dot_dimension_numbers<[1], [0], [0], [1], [0, 0, 1, 1], [], []>} : vector<16x64xbf16>, vector<64x1xbf16>, vector<16x1xf32> -> vector<16x1xf32>
    %cst_62 = arith.constant 2.000000e+00 : f32
    %250 = vector.broadcast %cst_62 : f32 to vector<16x32xf32>
    %251 = arith.mulf %250, %220 : vector<16x32xf32>
    %252 = arith.addf %207, %251 : vector<16x32xf32>
    %cst_63 = arith.constant 2.000000e+00 : f32
    %253 = vector.broadcast %cst_63 : f32 to vector<16x32xf32>
    %254 = arith.mulf %253, %233 : vector<16x32xf32>
    %255 = arith.addf %252, %254 : vector<16x32xf32>
    %256 = arith.addf %255, %246 : vector<16x32xf32>
    %257 = vector.broadcast %6 : f32 to vector<16x32xf32>
    %258 = arith.mulf %257, %256 : vector<16x32xf32>
    %259 = arith.addf %176, %258 : vector<16x32xf32>
    %cst_64 = arith.constant 2.000000e+00 : f32
    %260 = vector.broadcast %cst_64 : f32 to vector<16x1xf32>
    %261 = arith.mulf %260, %223 : vector<16x1xf32>
    %262 = arith.addf %210, %261 : vector<16x1xf32>
    %cst_65 = arith.constant 2.000000e+00 : f32
    %263 = vector.broadcast %cst_65 : f32 to vector<16x1xf32>
    %264 = arith.mulf %263, %236 : vector<16x1xf32>
    %265 = arith.addf %262, %264 : vector<16x1xf32>
    %266 = arith.addf %265, %249 : vector<16x1xf32>
    %267 = vector.broadcast %6 : f32 to vector<16x1xf32>
    %268 = arith.mulf %267, %266 : vector<16x1xf32>
    %269 = arith.addf %186, %268 : vector<16x1xf32>
    %c3_i32 = arith.constant 3 : i32
    %270 = arith.sitofp %c3_i32 : i32 to f32
    %271 = arith.mulf %4, %270 : f32
    %272 = arith.addf %0, %271 : f32
    %273 = vector.broadcast %272 : f32 to vector<16x64xf32>
    %274 = arith.mulf %273, %15 : vector<16x64xf32>
    %275 = arith.addf %274, %12 : vector<16x64xf32>
    %276 = arith.addf %272, %5 : f32
    %277 = vector.broadcast %276 : f32 to vector<16x64xf32>
    %278 = arith.mulf %277, %15 : vector<16x64xf32>
    %279 = arith.addf %278, %12 : vector<16x64xf32>
    %280 = arith.addf %272, %4 : f32
    %281 = vector.broadcast %280 : f32 to vector<16x64xf32>
    %282 = arith.mulf %281, %15 : vector<16x64xf32>
    %283 = arith.addf %282, %12 : vector<16x64xf32>
    %284 = arith.truncf %259 : vector<16x32xf32> to vector<16x32xbf16>
    %cst_66 = arith.constant dense<0.000000e+00> : vector<16x64xf32>
    %285 = tpu.matmul %284, %7, %cst_66 {dimension_numbers = #tpu.dot_dimension_numbers<[1], [0], [0], [1], [0, 0, 1, 1], [], []>} : vector<16x32xbf16>, vector<32x64xbf16>, vector<16x64xf32> -> vector<16x64xf32>
    %286 = arith.addf %285, %275 : vector<16x64xf32>
    %287 = math.tanh %286 : vector<16x64xf32>
    %288 = arith.truncf %287 : vector<16x64xf32> to vector<16x64xbf16>
    %cst_67 = arith.constant dense<0.000000e+00> : vector<16x32xf32>
    %289 = tpu.matmul %288, %8, %cst_67 {dimension_numbers = #tpu.dot_dimension_numbers<[1], [0], [0], [1], [0, 0, 1, 1], [], []>} : vector<16x64xbf16>, vector<64x32xbf16>, vector<16x32xf32> -> vector<16x32xf32>
    %290 = arith.addf %289, %18 : vector<16x32xf32>
    %291 = arith.mulf %287, %287 : vector<16x64xf32>
    %292 = arith.truncf %291 : vector<16x64xf32> to vector<16x64xbf16>
    %cst_68 = arith.constant dense<0.000000e+00> : vector<16x1xf32>
    %293 = tpu.matmul %292, %9, %cst_68 {dimension_numbers = #tpu.dot_dimension_numbers<[1], [0], [0], [1], [0, 0, 1, 1], [], []>} : vector<16x64xbf16>, vector<64x1xbf16>, vector<16x1xf32> -> vector<16x1xf32>
    %294 = vector.broadcast %5 : f32 to vector<16x32xf32>
    %295 = arith.mulf %294, %290 : vector<16x32xf32>
    %296 = arith.addf %259, %295 : vector<16x32xf32>
    %297 = arith.truncf %296 : vector<16x32xf32> to vector<16x32xbf16>
    %cst_69 = arith.constant dense<0.000000e+00> : vector<16x64xf32>
    %298 = tpu.matmul %297, %7, %cst_69 {dimension_numbers = #tpu.dot_dimension_numbers<[1], [0], [0], [1], [0, 0, 1, 1], [], []>} : vector<16x32xbf16>, vector<32x64xbf16>, vector<16x64xf32> -> vector<16x64xf32>
    %299 = arith.addf %298, %279 : vector<16x64xf32>
    %300 = math.tanh %299 : vector<16x64xf32>
    %301 = arith.truncf %300 : vector<16x64xf32> to vector<16x64xbf16>
    %cst_70 = arith.constant dense<0.000000e+00> : vector<16x32xf32>
    %302 = tpu.matmul %301, %8, %cst_70 {dimension_numbers = #tpu.dot_dimension_numbers<[1], [0], [0], [1], [0, 0, 1, 1], [], []>} : vector<16x64xbf16>, vector<64x32xbf16>, vector<16x32xf32> -> vector<16x32xf32>
    %303 = arith.addf %302, %18 : vector<16x32xf32>
    %304 = arith.mulf %300, %300 : vector<16x64xf32>
    %305 = arith.truncf %304 : vector<16x64xf32> to vector<16x64xbf16>
    %cst_71 = arith.constant dense<0.000000e+00> : vector<16x1xf32>
    %306 = tpu.matmul %305, %9, %cst_71 {dimension_numbers = #tpu.dot_dimension_numbers<[1], [0], [0], [1], [0, 0, 1, 1], [], []>} : vector<16x64xbf16>, vector<64x1xbf16>, vector<16x1xf32> -> vector<16x1xf32>
    %307 = vector.broadcast %5 : f32 to vector<16x32xf32>
    %308 = arith.mulf %307, %303 : vector<16x32xf32>
    %309 = arith.addf %259, %308 : vector<16x32xf32>
    %310 = arith.truncf %309 : vector<16x32xf32> to vector<16x32xbf16>
    %cst_72 = arith.constant dense<0.000000e+00> : vector<16x64xf32>
    %311 = tpu.matmul %310, %7, %cst_72 {dimension_numbers = #tpu.dot_dimension_numbers<[1], [0], [0], [1], [0, 0, 1, 1], [], []>} : vector<16x32xbf16>, vector<32x64xbf16>, vector<16x64xf32> -> vector<16x64xf32>
    %312 = arith.addf %311, %279 : vector<16x64xf32>
    %313 = math.tanh %312 : vector<16x64xf32>
    %314 = arith.truncf %313 : vector<16x64xf32> to vector<16x64xbf16>
    %cst_73 = arith.constant dense<0.000000e+00> : vector<16x32xf32>
    %315 = tpu.matmul %314, %8, %cst_73 {dimension_numbers = #tpu.dot_dimension_numbers<[1], [0], [0], [1], [0, 0, 1, 1], [], []>} : vector<16x64xbf16>, vector<64x32xbf16>, vector<16x32xf32> -> vector<16x32xf32>
    %316 = arith.addf %315, %18 : vector<16x32xf32>
    %317 = arith.mulf %313, %313 : vector<16x64xf32>
    %318 = arith.truncf %317 : vector<16x64xf32> to vector<16x64xbf16>
    %cst_74 = arith.constant dense<0.000000e+00> : vector<16x1xf32>
    %319 = tpu.matmul %318, %9, %cst_74 {dimension_numbers = #tpu.dot_dimension_numbers<[1], [0], [0], [1], [0, 0, 1, 1], [], []>} : vector<16x64xbf16>, vector<64x1xbf16>, vector<16x1xf32> -> vector<16x1xf32>
    %320 = vector.broadcast %4 : f32 to vector<16x32xf32>
    %321 = arith.mulf %320, %316 : vector<16x32xf32>
    %322 = arith.addf %259, %321 : vector<16x32xf32>
    %323 = arith.truncf %322 : vector<16x32xf32> to vector<16x32xbf16>
    %cst_75 = arith.constant dense<0.000000e+00> : vector<16x64xf32>
    %324 = tpu.matmul %323, %7, %cst_75 {dimension_numbers = #tpu.dot_dimension_numbers<[1], [0], [0], [1], [0, 0, 1, 1], [], []>} : vector<16x32xbf16>, vector<32x64xbf16>, vector<16x64xf32> -> vector<16x64xf32>
    %325 = arith.addf %324, %283 : vector<16x64xf32>
    %326 = math.tanh %325 : vector<16x64xf32>
    %327 = arith.truncf %326 : vector<16x64xf32> to vector<16x64xbf16>
    %cst_76 = arith.constant dense<0.000000e+00> : vector<16x32xf32>
    %328 = tpu.matmul %327, %8, %cst_76 {dimension_numbers = #tpu.dot_dimension_numbers<[1], [0], [0], [1], [0, 0, 1, 1], [], []>} : vector<16x64xbf16>, vector<64x32xbf16>, vector<16x32xf32> -> vector<16x32xf32>
    %329 = arith.addf %328, %18 : vector<16x32xf32>
    %330 = arith.mulf %326, %326 : vector<16x64xf32>
    %331 = arith.truncf %330 : vector<16x64xf32> to vector<16x64xbf16>
    %cst_77 = arith.constant dense<0.000000e+00> : vector<16x1xf32>
    %332 = tpu.matmul %331, %9, %cst_77 {dimension_numbers = #tpu.dot_dimension_numbers<[1], [0], [0], [1], [0, 0, 1, 1], [], []>} : vector<16x64xbf16>, vector<64x1xbf16>, vector<16x1xf32> -> vector<16x1xf32>
    %cst_78 = arith.constant 2.000000e+00 : f32
    %333 = vector.broadcast %cst_78 : f32 to vector<16x32xf32>
    %334 = arith.mulf %333, %303 : vector<16x32xf32>
    %335 = arith.addf %290, %334 : vector<16x32xf32>
    %cst_79 = arith.constant 2.000000e+00 : f32
    %336 = vector.broadcast %cst_79 : f32 to vector<16x32xf32>
    %337 = arith.mulf %336, %316 : vector<16x32xf32>
    %338 = arith.addf %335, %337 : vector<16x32xf32>
    %339 = arith.addf %338, %329 : vector<16x32xf32>
    %340 = vector.broadcast %6 : f32 to vector<16x32xf32>
    %341 = arith.mulf %340, %339 : vector<16x32xf32>
    %342 = arith.addf %259, %341 : vector<16x32xf32>
    %cst_80 = arith.constant 2.000000e+00 : f32
    %343 = vector.broadcast %cst_80 : f32 to vector<16x1xf32>
    %344 = arith.mulf %343, %306 : vector<16x1xf32>
    %345 = arith.addf %293, %344 : vector<16x1xf32>
    %cst_81 = arith.constant 2.000000e+00 : f32
    %346 = vector.broadcast %cst_81 : f32 to vector<16x1xf32>
    %347 = arith.mulf %346, %319 : vector<16x1xf32>
    %348 = arith.addf %345, %347 : vector<16x1xf32>
    %349 = arith.addf %348, %332 : vector<16x1xf32>
    %350 = vector.broadcast %6 : f32 to vector<16x1xf32>
    %351 = arith.mulf %350, %349 : vector<16x1xf32>
    %352 = arith.addf %269, %351 : vector<16x1xf32>
    %c4_i32 = arith.constant 4 : i32
    %353 = arith.sitofp %c4_i32 : i32 to f32
    %354 = arith.mulf %4, %353 : f32
    %355 = arith.addf %0, %354 : f32
    %356 = vector.broadcast %355 : f32 to vector<16x64xf32>
    %357 = arith.mulf %356, %15 : vector<16x64xf32>
    %358 = arith.addf %357, %12 : vector<16x64xf32>
    %359 = arith.addf %355, %5 : f32
    %360 = vector.broadcast %359 : f32 to vector<16x64xf32>
    %361 = arith.mulf %360, %15 : vector<16x64xf32>
    %362 = arith.addf %361, %12 : vector<16x64xf32>
    %363 = arith.addf %355, %4 : f32
    %364 = vector.broadcast %363 : f32 to vector<16x64xf32>
    %365 = arith.mulf %364, %15 : vector<16x64xf32>
    %366 = arith.addf %365, %12 : vector<16x64xf32>
    %367 = arith.truncf %342 : vector<16x32xf32> to vector<16x32xbf16>
    %cst_82 = arith.constant dense<0.000000e+00> : vector<16x64xf32>
    %368 = tpu.matmul %367, %7, %cst_82 {dimension_numbers = #tpu.dot_dimension_numbers<[1], [0], [0], [1], [0, 0, 1, 1], [], []>} : vector<16x32xbf16>, vector<32x64xbf16>, vector<16x64xf32> -> vector<16x64xf32>
    %369 = arith.addf %368, %358 : vector<16x64xf32>
    %370 = math.tanh %369 : vector<16x64xf32>
    %371 = arith.truncf %370 : vector<16x64xf32> to vector<16x64xbf16>
    %cst_83 = arith.constant dense<0.000000e+00> : vector<16x32xf32>
    %372 = tpu.matmul %371, %8, %cst_83 {dimension_numbers = #tpu.dot_dimension_numbers<[1], [0], [0], [1], [0, 0, 1, 1], [], []>} : vector<16x64xbf16>, vector<64x32xbf16>, vector<16x32xf32> -> vector<16x32xf32>
    %373 = arith.addf %372, %18 : vector<16x32xf32>
    %374 = arith.mulf %370, %370 : vector<16x64xf32>
    %375 = arith.truncf %374 : vector<16x64xf32> to vector<16x64xbf16>
    %cst_84 = arith.constant dense<0.000000e+00> : vector<16x1xf32>
    %376 = tpu.matmul %375, %9, %cst_84 {dimension_numbers = #tpu.dot_dimension_numbers<[1], [0], [0], [1], [0, 0, 1, 1], [], []>} : vector<16x64xbf16>, vector<64x1xbf16>, vector<16x1xf32> -> vector<16x1xf32>
    %377 = vector.broadcast %5 : f32 to vector<16x32xf32>
    %378 = arith.mulf %377, %373 : vector<16x32xf32>
    %379 = arith.addf %342, %378 : vector<16x32xf32>
    %380 = arith.truncf %379 : vector<16x32xf32> to vector<16x32xbf16>
    %cst_85 = arith.constant dense<0.000000e+00> : vector<16x64xf32>
    %381 = tpu.matmul %380, %7, %cst_85 {dimension_numbers = #tpu.dot_dimension_numbers<[1], [0], [0], [1], [0, 0, 1, 1], [], []>} : vector<16x32xbf16>, vector<32x64xbf16>, vector<16x64xf32> -> vector<16x64xf32>
    %382 = arith.addf %381, %362 : vector<16x64xf32>
    %383 = math.tanh %382 : vector<16x64xf32>
    %384 = arith.truncf %383 : vector<16x64xf32> to vector<16x64xbf16>
    %cst_86 = arith.constant dense<0.000000e+00> : vector<16x32xf32>
    %385 = tpu.matmul %384, %8, %cst_86 {dimension_numbers = #tpu.dot_dimension_numbers<[1], [0], [0], [1], [0, 0, 1, 1], [], []>} : vector<16x64xbf16>, vector<64x32xbf16>, vector<16x32xf32> -> vector<16x32xf32>
    %386 = arith.addf %385, %18 : vector<16x32xf32>
    %387 = arith.mulf %383, %383 : vector<16x64xf32>
    %388 = arith.truncf %387 : vector<16x64xf32> to vector<16x64xbf16>
    %cst_87 = arith.constant dense<0.000000e+00> : vector<16x1xf32>
    %389 = tpu.matmul %388, %9, %cst_87 {dimension_numbers = #tpu.dot_dimension_numbers<[1], [0], [0], [1], [0, 0, 1, 1], [], []>} : vector<16x64xbf16>, vector<64x1xbf16>, vector<16x1xf32> -> vector<16x1xf32>
    %390 = vector.broadcast %5 : f32 to vector<16x32xf32>
    %391 = arith.mulf %390, %386 : vector<16x32xf32>
    %392 = arith.addf %342, %391 : vector<16x32xf32>
    %393 = arith.truncf %392 : vector<16x32xf32> to vector<16x32xbf16>
    %cst_88 = arith.constant dense<0.000000e+00> : vector<16x64xf32>
    %394 = tpu.matmul %393, %7, %cst_88 {dimension_numbers = #tpu.dot_dimension_numbers<[1], [0], [0], [1], [0, 0, 1, 1], [], []>} : vector<16x32xbf16>, vector<32x64xbf16>, vector<16x64xf32> -> vector<16x64xf32>
    %395 = arith.addf %394, %362 : vector<16x64xf32>
    %396 = math.tanh %395 : vector<16x64xf32>
    %397 = arith.truncf %396 : vector<16x64xf32> to vector<16x64xbf16>
    %cst_89 = arith.constant dense<0.000000e+00> : vector<16x32xf32>
    %398 = tpu.matmul %397, %8, %cst_89 {dimension_numbers = #tpu.dot_dimension_numbers<[1], [0], [0], [1], [0, 0, 1, 1], [], []>} : vector<16x64xbf16>, vector<64x32xbf16>, vector<16x32xf32> -> vector<16x32xf32>
    %399 = arith.addf %398, %18 : vector<16x32xf32>
    %400 = arith.mulf %396, %396 : vector<16x64xf32>
    %401 = arith.truncf %400 : vector<16x64xf32> to vector<16x64xbf16>
    %cst_90 = arith.constant dense<0.000000e+00> : vector<16x1xf32>
    %402 = tpu.matmul %401, %9, %cst_90 {dimension_numbers = #tpu.dot_dimension_numbers<[1], [0], [0], [1], [0, 0, 1, 1], [], []>} : vector<16x64xbf16>, vector<64x1xbf16>, vector<16x1xf32> -> vector<16x1xf32>
    %403 = vector.broadcast %4 : f32 to vector<16x32xf32>
    %404 = arith.mulf %403, %399 : vector<16x32xf32>
    %405 = arith.addf %342, %404 : vector<16x32xf32>
    %406 = arith.truncf %405 : vector<16x32xf32> to vector<16x32xbf16>
    %cst_91 = arith.constant dense<0.000000e+00> : vector<16x64xf32>
    %407 = tpu.matmul %406, %7, %cst_91 {dimension_numbers = #tpu.dot_dimension_numbers<[1], [0], [0], [1], [0, 0, 1, 1], [], []>} : vector<16x32xbf16>, vector<32x64xbf16>, vector<16x64xf32> -> vector<16x64xf32>
    %408 = arith.addf %407, %366 : vector<16x64xf32>
    %409 = math.tanh %408 : vector<16x64xf32>
    %410 = arith.truncf %409 : vector<16x64xf32> to vector<16x64xbf16>
    %cst_92 = arith.constant dense<0.000000e+00> : vector<16x32xf32>
    %411 = tpu.matmul %410, %8, %cst_92 {dimension_numbers = #tpu.dot_dimension_numbers<[1], [0], [0], [1], [0, 0, 1, 1], [], []>} : vector<16x64xbf16>, vector<64x32xbf16>, vector<16x32xf32> -> vector<16x32xf32>
    %412 = arith.addf %411, %18 : vector<16x32xf32>
    %413 = arith.mulf %409, %409 : vector<16x64xf32>
    %414 = arith.truncf %413 : vector<16x64xf32> to vector<16x64xbf16>
    %cst_93 = arith.constant dense<0.000000e+00> : vector<16x1xf32>
    %415 = tpu.matmul %414, %9, %cst_93 {dimension_numbers = #tpu.dot_dimension_numbers<[1], [0], [0], [1], [0, 0, 1, 1], [], []>} : vector<16x64xbf16>, vector<64x1xbf16>, vector<16x1xf32> -> vector<16x1xf32>
    %cst_94 = arith.constant 2.000000e+00 : f32
    %416 = vector.broadcast %cst_94 : f32 to vector<16x32xf32>
    %417 = arith.mulf %416, %386 : vector<16x32xf32>
    %418 = arith.addf %373, %417 : vector<16x32xf32>
    %cst_95 = arith.constant 2.000000e+00 : f32
    %419 = vector.broadcast %cst_95 : f32 to vector<16x32xf32>
    %420 = arith.mulf %419, %399 : vector<16x32xf32>
    %421 = arith.addf %418, %420 : vector<16x32xf32>
    %422 = arith.addf %421, %412 : vector<16x32xf32>
    %423 = vector.broadcast %6 : f32 to vector<16x32xf32>
    %424 = arith.mulf %423, %422 : vector<16x32xf32>
    %425 = arith.addf %342, %424 : vector<16x32xf32>
    %cst_96 = arith.constant 2.000000e+00 : f32
    %426 = vector.broadcast %cst_96 : f32 to vector<16x1xf32>
    %427 = arith.mulf %426, %389 : vector<16x1xf32>
    %428 = arith.addf %376, %427 : vector<16x1xf32>
    %cst_97 = arith.constant 2.000000e+00 : f32
    %429 = vector.broadcast %cst_97 : f32 to vector<16x1xf32>
    %430 = arith.mulf %429, %402 : vector<16x1xf32>
    %431 = arith.addf %428, %430 : vector<16x1xf32>
    %432 = arith.addf %431, %415 : vector<16x1xf32>
    %433 = vector.broadcast %6 : f32 to vector<16x1xf32>
    %434 = arith.mulf %433, %432 : vector<16x1xf32>
    %435 = arith.addf %352, %434 : vector<16x1xf32>
    %c5_i32 = arith.constant 5 : i32
    %436 = arith.sitofp %c5_i32 : i32 to f32
    %437 = arith.mulf %4, %436 : f32
    %438 = arith.addf %0, %437 : f32
    %439 = vector.broadcast %438 : f32 to vector<16x64xf32>
    %440 = arith.mulf %439, %15 : vector<16x64xf32>
    %441 = arith.addf %440, %12 : vector<16x64xf32>
    %442 = arith.addf %438, %5 : f32
    %443 = vector.broadcast %442 : f32 to vector<16x64xf32>
    %444 = arith.mulf %443, %15 : vector<16x64xf32>
    %445 = arith.addf %444, %12 : vector<16x64xf32>
    %446 = arith.addf %438, %4 : f32
    %447 = vector.broadcast %446 : f32 to vector<16x64xf32>
    %448 = arith.mulf %447, %15 : vector<16x64xf32>
    %449 = arith.addf %448, %12 : vector<16x64xf32>
    %450 = arith.truncf %425 : vector<16x32xf32> to vector<16x32xbf16>
    %cst_98 = arith.constant dense<0.000000e+00> : vector<16x64xf32>
    %451 = tpu.matmul %450, %7, %cst_98 {dimension_numbers = #tpu.dot_dimension_numbers<[1], [0], [0], [1], [0, 0, 1, 1], [], []>} : vector<16x32xbf16>, vector<32x64xbf16>, vector<16x64xf32> -> vector<16x64xf32>
    %452 = arith.addf %451, %441 : vector<16x64xf32>
    %453 = math.tanh %452 : vector<16x64xf32>
    %454 = arith.truncf %453 : vector<16x64xf32> to vector<16x64xbf16>
    %cst_99 = arith.constant dense<0.000000e+00> : vector<16x32xf32>
    %455 = tpu.matmul %454, %8, %cst_99 {dimension_numbers = #tpu.dot_dimension_numbers<[1], [0], [0], [1], [0, 0, 1, 1], [], []>} : vector<16x64xbf16>, vector<64x32xbf16>, vector<16x32xf32> -> vector<16x32xf32>
    %456 = arith.addf %455, %18 : vector<16x32xf32>
    %457 = arith.mulf %453, %453 : vector<16x64xf32>
    %458 = arith.truncf %457 : vector<16x64xf32> to vector<16x64xbf16>
    %cst_100 = arith.constant dense<0.000000e+00> : vector<16x1xf32>
    %459 = tpu.matmul %458, %9, %cst_100 {dimension_numbers = #tpu.dot_dimension_numbers<[1], [0], [0], [1], [0, 0, 1, 1], [], []>} : vector<16x64xbf16>, vector<64x1xbf16>, vector<16x1xf32> -> vector<16x1xf32>
    %460 = vector.broadcast %5 : f32 to vector<16x32xf32>
    %461 = arith.mulf %460, %456 : vector<16x32xf32>
    %462 = arith.addf %425, %461 : vector<16x32xf32>
    %463 = arith.truncf %462 : vector<16x32xf32> to vector<16x32xbf16>
    %cst_101 = arith.constant dense<0.000000e+00> : vector<16x64xf32>
    %464 = tpu.matmul %463, %7, %cst_101 {dimension_numbers = #tpu.dot_dimension_numbers<[1], [0], [0], [1], [0, 0, 1, 1], [], []>} : vector<16x32xbf16>, vector<32x64xbf16>, vector<16x64xf32> -> vector<16x64xf32>
    %465 = arith.addf %464, %445 : vector<16x64xf32>
    %466 = math.tanh %465 : vector<16x64xf32>
    %467 = arith.truncf %466 : vector<16x64xf32> to vector<16x64xbf16>
    %cst_102 = arith.constant dense<0.000000e+00> : vector<16x32xf32>
    %468 = tpu.matmul %467, %8, %cst_102 {dimension_numbers = #tpu.dot_dimension_numbers<[1], [0], [0], [1], [0, 0, 1, 1], [], []>} : vector<16x64xbf16>, vector<64x32xbf16>, vector<16x32xf32> -> vector<16x32xf32>
    %469 = arith.addf %468, %18 : vector<16x32xf32>
    %470 = arith.mulf %466, %466 : vector<16x64xf32>
    %471 = arith.truncf %470 : vector<16x64xf32> to vector<16x64xbf16>
    %cst_103 = arith.constant dense<0.000000e+00> : vector<16x1xf32>
    %472 = tpu.matmul %471, %9, %cst_103 {dimension_numbers = #tpu.dot_dimension_numbers<[1], [0], [0], [1], [0, 0, 1, 1], [], []>} : vector<16x64xbf16>, vector<64x1xbf16>, vector<16x1xf32> -> vector<16x1xf32>
    %473 = vector.broadcast %5 : f32 to vector<16x32xf32>
    %474 = arith.mulf %473, %469 : vector<16x32xf32>
    %475 = arith.addf %425, %474 : vector<16x32xf32>
    %476 = arith.truncf %475 : vector<16x32xf32> to vector<16x32xbf16>
    %cst_104 = arith.constant dense<0.000000e+00> : vector<16x64xf32>
    %477 = tpu.matmul %476, %7, %cst_104 {dimension_numbers = #tpu.dot_dimension_numbers<[1], [0], [0], [1], [0, 0, 1, 1], [], []>} : vector<16x32xbf16>, vector<32x64xbf16>, vector<16x64xf32> -> vector<16x64xf32>
    %478 = arith.addf %477, %445 : vector<16x64xf32>
    %479 = math.tanh %478 : vector<16x64xf32>
    %480 = arith.truncf %479 : vector<16x64xf32> to vector<16x64xbf16>
    %cst_105 = arith.constant dense<0.000000e+00> : vector<16x32xf32>
    %481 = tpu.matmul %480, %8, %cst_105 {dimension_numbers = #tpu.dot_dimension_numbers<[1], [0], [0], [1], [0, 0, 1, 1], [], []>} : vector<16x64xbf16>, vector<64x32xbf16>, vector<16x32xf32> -> vector<16x32xf32>
    %482 = arith.addf %481, %18 : vector<16x32xf32>
    %483 = arith.mulf %479, %479 : vector<16x64xf32>
    %484 = arith.truncf %483 : vector<16x64xf32> to vector<16x64xbf16>
    %cst_106 = arith.constant dense<0.000000e+00> : vector<16x1xf32>
    %485 = tpu.matmul %484, %9, %cst_106 {dimension_numbers = #tpu.dot_dimension_numbers<[1], [0], [0], [1], [0, 0, 1, 1], [], []>} : vector<16x64xbf16>, vector<64x1xbf16>, vector<16x1xf32> -> vector<16x1xf32>
    %486 = vector.broadcast %4 : f32 to vector<16x32xf32>
    %487 = arith.mulf %486, %482 : vector<16x32xf32>
    %488 = arith.addf %425, %487 : vector<16x32xf32>
    %489 = arith.truncf %488 : vector<16x32xf32> to vector<16x32xbf16>
    %cst_107 = arith.constant dense<0.000000e+00> : vector<16x64xf32>
    %490 = tpu.matmul %489, %7, %cst_107 {dimension_numbers = #tpu.dot_dimension_numbers<[1], [0], [0], [1], [0, 0, 1, 1], [], []>} : vector<16x32xbf16>, vector<32x64xbf16>, vector<16x64xf32> -> vector<16x64xf32>
    %491 = arith.addf %490, %449 : vector<16x64xf32>
    %492 = math.tanh %491 : vector<16x64xf32>
    %493 = arith.truncf %492 : vector<16x64xf32> to vector<16x64xbf16>
    %cst_108 = arith.constant dense<0.000000e+00> : vector<16x32xf32>
    %494 = tpu.matmul %493, %8, %cst_108 {dimension_numbers = #tpu.dot_dimension_numbers<[1], [0], [0], [1], [0, 0, 1, 1], [], []>} : vector<16x64xbf16>, vector<64x32xbf16>, vector<16x32xf32> -> vector<16x32xf32>
    %495 = arith.addf %494, %18 : vector<16x32xf32>
    %496 = arith.mulf %492, %492 : vector<16x64xf32>
    %497 = arith.truncf %496 : vector<16x64xf32> to vector<16x64xbf16>
    %cst_109 = arith.constant dense<0.000000e+00> : vector<16x1xf32>
    %498 = tpu.matmul %497, %9, %cst_109 {dimension_numbers = #tpu.dot_dimension_numbers<[1], [0], [0], [1], [0, 0, 1, 1], [], []>} : vector<16x64xbf16>, vector<64x1xbf16>, vector<16x1xf32> -> vector<16x1xf32>
    %cst_110 = arith.constant 2.000000e+00 : f32
    %499 = vector.broadcast %cst_110 : f32 to vector<16x32xf32>
    %500 = arith.mulf %499, %469 : vector<16x32xf32>
    %501 = arith.addf %456, %500 : vector<16x32xf32>
    %cst_111 = arith.constant 2.000000e+00 : f32
    %502 = vector.broadcast %cst_111 : f32 to vector<16x32xf32>
    %503 = arith.mulf %502, %482 : vector<16x32xf32>
    %504 = arith.addf %501, %503 : vector<16x32xf32>
    %505 = arith.addf %504, %495 : vector<16x32xf32>
    %506 = vector.broadcast %6 : f32 to vector<16x32xf32>
    %507 = arith.mulf %506, %505 : vector<16x32xf32>
    %508 = arith.addf %425, %507 : vector<16x32xf32>
    %cst_112 = arith.constant 2.000000e+00 : f32
    %509 = vector.broadcast %cst_112 : f32 to vector<16x1xf32>
    %510 = arith.mulf %509, %472 : vector<16x1xf32>
    %511 = arith.addf %459, %510 : vector<16x1xf32>
    %cst_113 = arith.constant 2.000000e+00 : f32
    %512 = vector.broadcast %cst_113 : f32 to vector<16x1xf32>
    %513 = arith.mulf %512, %485 : vector<16x1xf32>
    %514 = arith.addf %511, %513 : vector<16x1xf32>
    %515 = arith.addf %514, %498 : vector<16x1xf32>
    %516 = vector.broadcast %6 : f32 to vector<16x1xf32>
    %517 = arith.mulf %516, %515 : vector<16x1xf32>
    %518 = arith.addf %435, %517 : vector<16x1xf32>
    %c6_i32 = arith.constant 6 : i32
    %519 = arith.sitofp %c6_i32 : i32 to f32
    %520 = arith.mulf %4, %519 : f32
    %521 = arith.addf %0, %520 : f32
    %522 = vector.broadcast %521 : f32 to vector<16x64xf32>
    %523 = arith.mulf %522, %15 : vector<16x64xf32>
    %524 = arith.addf %523, %12 : vector<16x64xf32>
    %525 = arith.addf %521, %5 : f32
    %526 = vector.broadcast %525 : f32 to vector<16x64xf32>
    %527 = arith.mulf %526, %15 : vector<16x64xf32>
    %528 = arith.addf %527, %12 : vector<16x64xf32>
    %529 = arith.addf %521, %4 : f32
    %530 = vector.broadcast %529 : f32 to vector<16x64xf32>
    %531 = arith.mulf %530, %15 : vector<16x64xf32>
    %532 = arith.addf %531, %12 : vector<16x64xf32>
    %533 = arith.truncf %508 : vector<16x32xf32> to vector<16x32xbf16>
    %cst_114 = arith.constant dense<0.000000e+00> : vector<16x64xf32>
    %534 = tpu.matmul %533, %7, %cst_114 {dimension_numbers = #tpu.dot_dimension_numbers<[1], [0], [0], [1], [0, 0, 1, 1], [], []>} : vector<16x32xbf16>, vector<32x64xbf16>, vector<16x64xf32> -> vector<16x64xf32>
    %535 = arith.addf %534, %524 : vector<16x64xf32>
    %536 = math.tanh %535 : vector<16x64xf32>
    %537 = arith.truncf %536 : vector<16x64xf32> to vector<16x64xbf16>
    %cst_115 = arith.constant dense<0.000000e+00> : vector<16x32xf32>
    %538 = tpu.matmul %537, %8, %cst_115 {dimension_numbers = #tpu.dot_dimension_numbers<[1], [0], [0], [1], [0, 0, 1, 1], [], []>} : vector<16x64xbf16>, vector<64x32xbf16>, vector<16x32xf32> -> vector<16x32xf32>
    %539 = arith.addf %538, %18 : vector<16x32xf32>
    %540 = arith.mulf %536, %536 : vector<16x64xf32>
    %541 = arith.truncf %540 : vector<16x64xf32> to vector<16x64xbf16>
    %cst_116 = arith.constant dense<0.000000e+00> : vector<16x1xf32>
    %542 = tpu.matmul %541, %9, %cst_116 {dimension_numbers = #tpu.dot_dimension_numbers<[1], [0], [0], [1], [0, 0, 1, 1], [], []>} : vector<16x64xbf16>, vector<64x1xbf16>, vector<16x1xf32> -> vector<16x1xf32>
    %543 = vector.broadcast %5 : f32 to vector<16x32xf32>
    %544 = arith.mulf %543, %539 : vector<16x32xf32>
    %545 = arith.addf %508, %544 : vector<16x32xf32>
    %546 = arith.truncf %545 : vector<16x32xf32> to vector<16x32xbf16>
    %cst_117 = arith.constant dense<0.000000e+00> : vector<16x64xf32>
    %547 = tpu.matmul %546, %7, %cst_117 {dimension_numbers = #tpu.dot_dimension_numbers<[1], [0], [0], [1], [0, 0, 1, 1], [], []>} : vector<16x32xbf16>, vector<32x64xbf16>, vector<16x64xf32> -> vector<16x64xf32>
    %548 = arith.addf %547, %528 : vector<16x64xf32>
    %549 = math.tanh %548 : vector<16x64xf32>
    %550 = arith.truncf %549 : vector<16x64xf32> to vector<16x64xbf16>
    %cst_118 = arith.constant dense<0.000000e+00> : vector<16x32xf32>
    %551 = tpu.matmul %550, %8, %cst_118 {dimension_numbers = #tpu.dot_dimension_numbers<[1], [0], [0], [1], [0, 0, 1, 1], [], []>} : vector<16x64xbf16>, vector<64x32xbf16>, vector<16x32xf32> -> vector<16x32xf32>
    %552 = arith.addf %551, %18 : vector<16x32xf32>
    %553 = arith.mulf %549, %549 : vector<16x64xf32>
    %554 = arith.truncf %553 : vector<16x64xf32> to vector<16x64xbf16>
    %cst_119 = arith.constant dense<0.000000e+00> : vector<16x1xf32>
    %555 = tpu.matmul %554, %9, %cst_119 {dimension_numbers = #tpu.dot_dimension_numbers<[1], [0], [0], [1], [0, 0, 1, 1], [], []>} : vector<16x64xbf16>, vector<64x1xbf16>, vector<16x1xf32> -> vector<16x1xf32>
    %556 = vector.broadcast %5 : f32 to vector<16x32xf32>
    %557 = arith.mulf %556, %552 : vector<16x32xf32>
    %558 = arith.addf %508, %557 : vector<16x32xf32>
    %559 = arith.truncf %558 : vector<16x32xf32> to vector<16x32xbf16>
    %cst_120 = arith.constant dense<0.000000e+00> : vector<16x64xf32>
    %560 = tpu.matmul %559, %7, %cst_120 {dimension_numbers = #tpu.dot_dimension_numbers<[1], [0], [0], [1], [0, 0, 1, 1], [], []>} : vector<16x32xbf16>, vector<32x64xbf16>, vector<16x64xf32> -> vector<16x64xf32>
    %561 = arith.addf %560, %528 : vector<16x64xf32>
    %562 = math.tanh %561 : vector<16x64xf32>
    %563 = arith.truncf %562 : vector<16x64xf32> to vector<16x64xbf16>
    %cst_121 = arith.constant dense<0.000000e+00> : vector<16x32xf32>
    %564 = tpu.matmul %563, %8, %cst_121 {dimension_numbers = #tpu.dot_dimension_numbers<[1], [0], [0], [1], [0, 0, 1, 1], [], []>} : vector<16x64xbf16>, vector<64x32xbf16>, vector<16x32xf32> -> vector<16x32xf32>
    %565 = arith.addf %564, %18 : vector<16x32xf32>
    %566 = arith.mulf %562, %562 : vector<16x64xf32>
    %567 = arith.truncf %566 : vector<16x64xf32> to vector<16x64xbf16>
    %cst_122 = arith.constant dense<0.000000e+00> : vector<16x1xf32>
    %568 = tpu.matmul %567, %9, %cst_122 {dimension_numbers = #tpu.dot_dimension_numbers<[1], [0], [0], [1], [0, 0, 1, 1], [], []>} : vector<16x64xbf16>, vector<64x1xbf16>, vector<16x1xf32> -> vector<16x1xf32>
    %569 = vector.broadcast %4 : f32 to vector<16x32xf32>
    %570 = arith.mulf %569, %565 : vector<16x32xf32>
    %571 = arith.addf %508, %570 : vector<16x32xf32>
    %572 = arith.truncf %571 : vector<16x32xf32> to vector<16x32xbf16>
    %cst_123 = arith.constant dense<0.000000e+00> : vector<16x64xf32>
    %573 = tpu.matmul %572, %7, %cst_123 {dimension_numbers = #tpu.dot_dimension_numbers<[1], [0], [0], [1], [0, 0, 1, 1], [], []>} : vector<16x32xbf16>, vector<32x64xbf16>, vector<16x64xf32> -> vector<16x64xf32>
    %574 = arith.addf %573, %532 : vector<16x64xf32>
    %575 = math.tanh %574 : vector<16x64xf32>
    %576 = arith.truncf %575 : vector<16x64xf32> to vector<16x64xbf16>
    %cst_124 = arith.constant dense<0.000000e+00> : vector<16x32xf32>
    %577 = tpu.matmul %576, %8, %cst_124 {dimension_numbers = #tpu.dot_dimension_numbers<[1], [0], [0], [1], [0, 0, 1, 1], [], []>} : vector<16x64xbf16>, vector<64x32xbf16>, vector<16x32xf32> -> vector<16x32xf32>
    %578 = arith.addf %577, %18 : vector<16x32xf32>
    %579 = arith.mulf %575, %575 : vector<16x64xf32>
    %580 = arith.truncf %579 : vector<16x64xf32> to vector<16x64xbf16>
    %cst_125 = arith.constant dense<0.000000e+00> : vector<16x1xf32>
    %581 = tpu.matmul %580, %9, %cst_125 {dimension_numbers = #tpu.dot_dimension_numbers<[1], [0], [0], [1], [0, 0, 1, 1], [], []>} : vector<16x64xbf16>, vector<64x1xbf16>, vector<16x1xf32> -> vector<16x1xf32>
    %cst_126 = arith.constant 2.000000e+00 : f32
    %582 = vector.broadcast %cst_126 : f32 to vector<16x32xf32>
    %583 = arith.mulf %582, %552 : vector<16x32xf32>
    %584 = arith.addf %539, %583 : vector<16x32xf32>
    %cst_127 = arith.constant 2.000000e+00 : f32
    %585 = vector.broadcast %cst_127 : f32 to vector<16x32xf32>
    %586 = arith.mulf %585, %565 : vector<16x32xf32>
    %587 = arith.addf %584, %586 : vector<16x32xf32>
    %588 = arith.addf %587, %578 : vector<16x32xf32>
    %589 = vector.broadcast %6 : f32 to vector<16x32xf32>
    %590 = arith.mulf %589, %588 : vector<16x32xf32>
    %591 = arith.addf %508, %590 : vector<16x32xf32>
    %cst_128 = arith.constant 2.000000e+00 : f32
    %592 = vector.broadcast %cst_128 : f32 to vector<16x1xf32>
    %593 = arith.mulf %592, %555 : vector<16x1xf32>
    %594 = arith.addf %542, %593 : vector<16x1xf32>
    %cst_129 = arith.constant 2.000000e+00 : f32
    %595 = vector.broadcast %cst_129 : f32 to vector<16x1xf32>
    %596 = arith.mulf %595, %568 : vector<16x1xf32>
    %597 = arith.addf %594, %596 : vector<16x1xf32>
    %598 = arith.addf %597, %581 : vector<16x1xf32>
    %599 = vector.broadcast %6 : f32 to vector<16x1xf32>
    %600 = arith.mulf %599, %598 : vector<16x1xf32>
    %601 = arith.addf %518, %600 : vector<16x1xf32>
    %c7_i32 = arith.constant 7 : i32
    %602 = arith.sitofp %c7_i32 : i32 to f32
    %603 = arith.mulf %4, %602 : f32
    %604 = arith.addf %0, %603 : f32
    %605 = vector.broadcast %604 : f32 to vector<16x64xf32>
    %606 = arith.mulf %605, %15 : vector<16x64xf32>
    %607 = arith.addf %606, %12 : vector<16x64xf32>
    %608 = arith.addf %604, %5 : f32
    %609 = vector.broadcast %608 : f32 to vector<16x64xf32>
    %610 = arith.mulf %609, %15 : vector<16x64xf32>
    %611 = arith.addf %610, %12 : vector<16x64xf32>
    %612 = arith.addf %604, %4 : f32
    %613 = vector.broadcast %612 : f32 to vector<16x64xf32>
    %614 = arith.mulf %613, %15 : vector<16x64xf32>
    %615 = arith.addf %614, %12 : vector<16x64xf32>
    %616 = arith.truncf %591 : vector<16x32xf32> to vector<16x32xbf16>
    %cst_130 = arith.constant dense<0.000000e+00> : vector<16x64xf32>
    %617 = tpu.matmul %616, %7, %cst_130 {dimension_numbers = #tpu.dot_dimension_numbers<[1], [0], [0], [1], [0, 0, 1, 1], [], []>} : vector<16x32xbf16>, vector<32x64xbf16>, vector<16x64xf32> -> vector<16x64xf32>
    %618 = arith.addf %617, %607 : vector<16x64xf32>
    %619 = math.tanh %618 : vector<16x64xf32>
    %620 = arith.truncf %619 : vector<16x64xf32> to vector<16x64xbf16>
    %cst_131 = arith.constant dense<0.000000e+00> : vector<16x32xf32>
    %621 = tpu.matmul %620, %8, %cst_131 {dimension_numbers = #tpu.dot_dimension_numbers<[1], [0], [0], [1], [0, 0, 1, 1], [], []>} : vector<16x64xbf16>, vector<64x32xbf16>, vector<16x32xf32> -> vector<16x32xf32>
    %622 = arith.addf %621, %18 : vector<16x32xf32>
    %623 = arith.mulf %619, %619 : vector<16x64xf32>
    %624 = arith.truncf %623 : vector<16x64xf32> to vector<16x64xbf16>
    %cst_132 = arith.constant dense<0.000000e+00> : vector<16x1xf32>
    %625 = tpu.matmul %624, %9, %cst_132 {dimension_numbers = #tpu.dot_dimension_numbers<[1], [0], [0], [1], [0, 0, 1, 1], [], []>} : vector<16x64xbf16>, vector<64x1xbf16>, vector<16x1xf32> -> vector<16x1xf32>
    %626 = vector.broadcast %5 : f32 to vector<16x32xf32>
    %627 = arith.mulf %626, %622 : vector<16x32xf32>
    %628 = arith.addf %591, %627 : vector<16x32xf32>
    %629 = arith.truncf %628 : vector<16x32xf32> to vector<16x32xbf16>
    %cst_133 = arith.constant dense<0.000000e+00> : vector<16x64xf32>
    %630 = tpu.matmul %629, %7, %cst_133 {dimension_numbers = #tpu.dot_dimension_numbers<[1], [0], [0], [1], [0, 0, 1, 1], [], []>} : vector<16x32xbf16>, vector<32x64xbf16>, vector<16x64xf32> -> vector<16x64xf32>
    %631 = arith.addf %630, %611 : vector<16x64xf32>
    %632 = math.tanh %631 : vector<16x64xf32>
    %633 = arith.truncf %632 : vector<16x64xf32> to vector<16x64xbf16>
    %cst_134 = arith.constant dense<0.000000e+00> : vector<16x32xf32>
    %634 = tpu.matmul %633, %8, %cst_134 {dimension_numbers = #tpu.dot_dimension_numbers<[1], [0], [0], [1], [0, 0, 1, 1], [], []>} : vector<16x64xbf16>, vector<64x32xbf16>, vector<16x32xf32> -> vector<16x32xf32>
    %635 = arith.addf %634, %18 : vector<16x32xf32>
    %636 = arith.mulf %632, %632 : vector<16x64xf32>
    %637 = arith.truncf %636 : vector<16x64xf32> to vector<16x64xbf16>
    %cst_135 = arith.constant dense<0.000000e+00> : vector<16x1xf32>
    %638 = tpu.matmul %637, %9, %cst_135 {dimension_numbers = #tpu.dot_dimension_numbers<[1], [0], [0], [1], [0, 0, 1, 1], [], []>} : vector<16x64xbf16>, vector<64x1xbf16>, vector<16x1xf32> -> vector<16x1xf32>
    %639 = vector.broadcast %5 : f32 to vector<16x32xf32>
    %640 = arith.mulf %639, %635 : vector<16x32xf32>
    %641 = arith.addf %591, %640 : vector<16x32xf32>
    %642 = arith.truncf %641 : vector<16x32xf32> to vector<16x32xbf16>
    %cst_136 = arith.constant dense<0.000000e+00> : vector<16x64xf32>
    %643 = tpu.matmul %642, %7, %cst_136 {dimension_numbers = #tpu.dot_dimension_numbers<[1], [0], [0], [1], [0, 0, 1, 1], [], []>} : vector<16x32xbf16>, vector<32x64xbf16>, vector<16x64xf32> -> vector<16x64xf32>
    %644 = arith.addf %643, %611 : vector<16x64xf32>
    %645 = math.tanh %644 : vector<16x64xf32>
    %646 = arith.truncf %645 : vector<16x64xf32> to vector<16x64xbf16>
    %cst_137 = arith.constant dense<0.000000e+00> : vector<16x32xf32>
    %647 = tpu.matmul %646, %8, %cst_137 {dimension_numbers = #tpu.dot_dimension_numbers<[1], [0], [0], [1], [0, 0, 1, 1], [], []>} : vector<16x64xbf16>, vector<64x32xbf16>, vector<16x32xf32> -> vector<16x32xf32>
    %648 = arith.addf %647, %18 : vector<16x32xf32>
    %649 = arith.mulf %645, %645 : vector<16x64xf32>
    %650 = arith.truncf %649 : vector<16x64xf32> to vector<16x64xbf16>
    %cst_138 = arith.constant dense<0.000000e+00> : vector<16x1xf32>
    %651 = tpu.matmul %650, %9, %cst_138 {dimension_numbers = #tpu.dot_dimension_numbers<[1], [0], [0], [1], [0, 0, 1, 1], [], []>} : vector<16x64xbf16>, vector<64x1xbf16>, vector<16x1xf32> -> vector<16x1xf32>
    %652 = vector.broadcast %4 : f32 to vector<16x32xf32>
    %653 = arith.mulf %652, %648 : vector<16x32xf32>
    %654 = arith.addf %591, %653 : vector<16x32xf32>
    %655 = arith.truncf %654 : vector<16x32xf32> to vector<16x32xbf16>
    %cst_139 = arith.constant dense<0.000000e+00> : vector<16x64xf32>
    %656 = tpu.matmul %655, %7, %cst_139 {dimension_numbers = #tpu.dot_dimension_numbers<[1], [0], [0], [1], [0, 0, 1, 1], [], []>} : vector<16x32xbf16>, vector<32x64xbf16>, vector<16x64xf32> -> vector<16x64xf32>
    %657 = arith.addf %656, %615 : vector<16x64xf32>
    %658 = math.tanh %657 : vector<16x64xf32>
    %659 = arith.truncf %658 : vector<16x64xf32> to vector<16x64xbf16>
    %cst_140 = arith.constant dense<0.000000e+00> : vector<16x32xf32>
    %660 = tpu.matmul %659, %8, %cst_140 {dimension_numbers = #tpu.dot_dimension_numbers<[1], [0], [0], [1], [0, 0, 1, 1], [], []>} : vector<16x64xbf16>, vector<64x32xbf16>, vector<16x32xf32> -> vector<16x32xf32>
    %661 = arith.addf %660, %18 : vector<16x32xf32>
    %662 = arith.mulf %658, %658 : vector<16x64xf32>
    %663 = arith.truncf %662 : vector<16x64xf32> to vector<16x64xbf16>
    %cst_141 = arith.constant dense<0.000000e+00> : vector<16x1xf32>
    %664 = tpu.matmul %663, %9, %cst_141 {dimension_numbers = #tpu.dot_dimension_numbers<[1], [0], [0], [1], [0, 0, 1, 1], [], []>} : vector<16x64xbf16>, vector<64x1xbf16>, vector<16x1xf32> -> vector<16x1xf32>
    %cst_142 = arith.constant 2.000000e+00 : f32
    %665 = vector.broadcast %cst_142 : f32 to vector<16x32xf32>
    %666 = arith.mulf %665, %635 : vector<16x32xf32>
    %667 = arith.addf %622, %666 : vector<16x32xf32>
    %cst_143 = arith.constant 2.000000e+00 : f32
    %668 = vector.broadcast %cst_143 : f32 to vector<16x32xf32>
    %669 = arith.mulf %668, %648 : vector<16x32xf32>
    %670 = arith.addf %667, %669 : vector<16x32xf32>
    %671 = arith.addf %670, %661 : vector<16x32xf32>
    %672 = vector.broadcast %6 : f32 to vector<16x32xf32>
    %673 = arith.mulf %672, %671 : vector<16x32xf32>
    %674 = arith.addf %591, %673 : vector<16x32xf32>
    %cst_144 = arith.constant 2.000000e+00 : f32
    %675 = vector.broadcast %cst_144 : f32 to vector<16x1xf32>
    %676 = arith.mulf %675, %638 : vector<16x1xf32>
    %677 = arith.addf %625, %676 : vector<16x1xf32>
    %cst_145 = arith.constant 2.000000e+00 : f32
    %678 = vector.broadcast %cst_145 : f32 to vector<16x1xf32>
    %679 = arith.mulf %678, %651 : vector<16x1xf32>
    %680 = arith.addf %677, %679 : vector<16x1xf32>
    %681 = arith.addf %680, %664 : vector<16x1xf32>
    %682 = vector.broadcast %6 : f32 to vector<16x1xf32>
    %683 = arith.mulf %682, %681 : vector<16x1xf32>
    %684 = arith.addf %601, %683 : vector<16x1xf32>
    %c8_i32 = arith.constant 8 : i32
    %685 = arith.sitofp %c8_i32 : i32 to f32
    %686 = arith.mulf %4, %685 : f32
    %687 = arith.addf %0, %686 : f32
    %688 = vector.broadcast %687 : f32 to vector<16x64xf32>
    %689 = arith.mulf %688, %15 : vector<16x64xf32>
    %690 = arith.addf %689, %12 : vector<16x64xf32>
    %691 = arith.addf %687, %5 : f32
    %692 = vector.broadcast %691 : f32 to vector<16x64xf32>
    %693 = arith.mulf %692, %15 : vector<16x64xf32>
    %694 = arith.addf %693, %12 : vector<16x64xf32>
    %695 = arith.addf %687, %4 : f32
    %696 = vector.broadcast %695 : f32 to vector<16x64xf32>
    %697 = arith.mulf %696, %15 : vector<16x64xf32>
    %698 = arith.addf %697, %12 : vector<16x64xf32>
    %699 = arith.truncf %674 : vector<16x32xf32> to vector<16x32xbf16>
    %cst_146 = arith.constant dense<0.000000e+00> : vector<16x64xf32>
    %700 = tpu.matmul %699, %7, %cst_146 {dimension_numbers = #tpu.dot_dimension_numbers<[1], [0], [0], [1], [0, 0, 1, 1], [], []>} : vector<16x32xbf16>, vector<32x64xbf16>, vector<16x64xf32> -> vector<16x64xf32>
    %701 = arith.addf %700, %690 : vector<16x64xf32>
    %702 = math.tanh %701 : vector<16x64xf32>
    %703 = arith.truncf %702 : vector<16x64xf32> to vector<16x64xbf16>
    %cst_147 = arith.constant dense<0.000000e+00> : vector<16x32xf32>
    %704 = tpu.matmul %703, %8, %cst_147 {dimension_numbers = #tpu.dot_dimension_numbers<[1], [0], [0], [1], [0, 0, 1, 1], [], []>} : vector<16x64xbf16>, vector<64x32xbf16>, vector<16x32xf32> -> vector<16x32xf32>
    %705 = arith.addf %704, %18 : vector<16x32xf32>
    %706 = arith.mulf %702, %702 : vector<16x64xf32>
    %707 = arith.truncf %706 : vector<16x64xf32> to vector<16x64xbf16>
    %cst_148 = arith.constant dense<0.000000e+00> : vector<16x1xf32>
    %708 = tpu.matmul %707, %9, %cst_148 {dimension_numbers = #tpu.dot_dimension_numbers<[1], [0], [0], [1], [0, 0, 1, 1], [], []>} : vector<16x64xbf16>, vector<64x1xbf16>, vector<16x1xf32> -> vector<16x1xf32>
    %709 = vector.broadcast %5 : f32 to vector<16x32xf32>
    %710 = arith.mulf %709, %705 : vector<16x32xf32>
    %711 = arith.addf %674, %710 : vector<16x32xf32>
    %712 = arith.truncf %711 : vector<16x32xf32> to vector<16x32xbf16>
    %cst_149 = arith.constant dense<0.000000e+00> : vector<16x64xf32>
    %713 = tpu.matmul %712, %7, %cst_149 {dimension_numbers = #tpu.dot_dimension_numbers<[1], [0], [0], [1], [0, 0, 1, 1], [], []>} : vector<16x32xbf16>, vector<32x64xbf16>, vector<16x64xf32> -> vector<16x64xf32>
    %714 = arith.addf %713, %694 : vector<16x64xf32>
    %715 = math.tanh %714 : vector<16x64xf32>
    %716 = arith.truncf %715 : vector<16x64xf32> to vector<16x64xbf16>
    %cst_150 = arith.constant dense<0.000000e+00> : vector<16x32xf32>
    %717 = tpu.matmul %716, %8, %cst_150 {dimension_numbers = #tpu.dot_dimension_numbers<[1], [0], [0], [1], [0, 0, 1, 1], [], []>} : vector<16x64xbf16>, vector<64x32xbf16>, vector<16x32xf32> -> vector<16x32xf32>
    %718 = arith.addf %717, %18 : vector<16x32xf32>
    %719 = arith.mulf %715, %715 : vector<16x64xf32>
    %720 = arith.truncf %719 : vector<16x64xf32> to vector<16x64xbf16>
    %cst_151 = arith.constant dense<0.000000e+00> : vector<16x1xf32>
    %721 = tpu.matmul %720, %9, %cst_151 {dimension_numbers = #tpu.dot_dimension_numbers<[1], [0], [0], [1], [0, 0, 1, 1], [], []>} : vector<16x64xbf16>, vector<64x1xbf16>, vector<16x1xf32> -> vector<16x1xf32>
    %722 = vector.broadcast %5 : f32 to vector<16x32xf32>
    %723 = arith.mulf %722, %718 : vector<16x32xf32>
    %724 = arith.addf %674, %723 : vector<16x32xf32>
    %725 = arith.truncf %724 : vector<16x32xf32> to vector<16x32xbf16>
    %cst_152 = arith.constant dense<0.000000e+00> : vector<16x64xf32>
    %726 = tpu.matmul %725, %7, %cst_152 {dimension_numbers = #tpu.dot_dimension_numbers<[1], [0], [0], [1], [0, 0, 1, 1], [], []>} : vector<16x32xbf16>, vector<32x64xbf16>, vector<16x64xf32> -> vector<16x64xf32>
    %727 = arith.addf %726, %694 : vector<16x64xf32>
    %728 = math.tanh %727 : vector<16x64xf32>
    %729 = arith.truncf %728 : vector<16x64xf32> to vector<16x64xbf16>
    %cst_153 = arith.constant dense<0.000000e+00> : vector<16x32xf32>
    %730 = tpu.matmul %729, %8, %cst_153 {dimension_numbers = #tpu.dot_dimension_numbers<[1], [0], [0], [1], [0, 0, 1, 1], [], []>} : vector<16x64xbf16>, vector<64x32xbf16>, vector<16x32xf32> -> vector<16x32xf32>
    %731 = arith.addf %730, %18 : vector<16x32xf32>
    %732 = arith.mulf %728, %728 : vector<16x64xf32>
    %733 = arith.truncf %732 : vector<16x64xf32> to vector<16x64xbf16>
    %cst_154 = arith.constant dense<0.000000e+00> : vector<16x1xf32>
    %734 = tpu.matmul %733, %9, %cst_154 {dimension_numbers = #tpu.dot_dimension_numbers<[1], [0], [0], [1], [0, 0, 1, 1], [], []>} : vector<16x64xbf16>, vector<64x1xbf16>, vector<16x1xf32> -> vector<16x1xf32>
    %735 = vector.broadcast %4 : f32 to vector<16x32xf32>
    %736 = arith.mulf %735, %731 : vector<16x32xf32>
    %737 = arith.addf %674, %736 : vector<16x32xf32>
    %738 = arith.truncf %737 : vector<16x32xf32> to vector<16x32xbf16>
    %cst_155 = arith.constant dense<0.000000e+00> : vector<16x64xf32>
    %739 = tpu.matmul %738, %7, %cst_155 {dimension_numbers = #tpu.dot_dimension_numbers<[1], [0], [0], [1], [0, 0, 1, 1], [], []>} : vector<16x32xbf16>, vector<32x64xbf16>, vector<16x64xf32> -> vector<16x64xf32>
    %740 = arith.addf %739, %698 : vector<16x64xf32>
    %741 = math.tanh %740 : vector<16x64xf32>
    %742 = arith.truncf %741 : vector<16x64xf32> to vector<16x64xbf16>
    %cst_156 = arith.constant dense<0.000000e+00> : vector<16x32xf32>
    %743 = tpu.matmul %742, %8, %cst_156 {dimension_numbers = #tpu.dot_dimension_numbers<[1], [0], [0], [1], [0, 0, 1, 1], [], []>} : vector<16x64xbf16>, vector<64x32xbf16>, vector<16x32xf32> -> vector<16x32xf32>
    %744 = arith.addf %743, %18 : vector<16x32xf32>
    %745 = arith.mulf %741, %741 : vector<16x64xf32>
    %746 = arith.truncf %745 : vector<16x64xf32> to vector<16x64xbf16>
    %cst_157 = arith.constant dense<0.000000e+00> : vector<16x1xf32>
    %747 = tpu.matmul %746, %9, %cst_157 {dimension_numbers = #tpu.dot_dimension_numbers<[1], [0], [0], [1], [0, 0, 1, 1], [], []>} : vector<16x64xbf16>, vector<64x1xbf16>, vector<16x1xf32> -> vector<16x1xf32>
    %cst_158 = arith.constant 2.000000e+00 : f32
    %748 = vector.broadcast %cst_158 : f32 to vector<16x32xf32>
    %749 = arith.mulf %748, %718 : vector<16x32xf32>
    %750 = arith.addf %705, %749 : vector<16x32xf32>
    %cst_159 = arith.constant 2.000000e+00 : f32
    %751 = vector.broadcast %cst_159 : f32 to vector<16x32xf32>
    %752 = arith.mulf %751, %731 : vector<16x32xf32>
    %753 = arith.addf %750, %752 : vector<16x32xf32>
    %754 = arith.addf %753, %744 : vector<16x32xf32>
    %755 = vector.broadcast %6 : f32 to vector<16x32xf32>
    %756 = arith.mulf %755, %754 : vector<16x32xf32>
    %757 = arith.addf %674, %756 : vector<16x32xf32>
    %cst_160 = arith.constant 2.000000e+00 : f32
    %758 = vector.broadcast %cst_160 : f32 to vector<16x1xf32>
    %759 = arith.mulf %758, %721 : vector<16x1xf32>
    %760 = arith.addf %708, %759 : vector<16x1xf32>
    %cst_161 = arith.constant 2.000000e+00 : f32
    %761 = vector.broadcast %cst_161 : f32 to vector<16x1xf32>
    %762 = arith.mulf %761, %734 : vector<16x1xf32>
    %763 = arith.addf %760, %762 : vector<16x1xf32>
    %764 = arith.addf %763, %747 : vector<16x1xf32>
    %765 = vector.broadcast %6 : f32 to vector<16x1xf32>
    %766 = arith.mulf %765, %764 : vector<16x1xf32>
    %767 = arith.addf %684, %766 : vector<16x1xf32>
    %c9_i32 = arith.constant 9 : i32
    %768 = arith.sitofp %c9_i32 : i32 to f32
    %769 = arith.mulf %4, %768 : f32
    %770 = arith.addf %0, %769 : f32
    %771 = vector.broadcast %770 : f32 to vector<16x64xf32>
    %772 = arith.mulf %771, %15 : vector<16x64xf32>
    %773 = arith.addf %772, %12 : vector<16x64xf32>
    %774 = arith.addf %770, %5 : f32
    %775 = vector.broadcast %774 : f32 to vector<16x64xf32>
    %776 = arith.mulf %775, %15 : vector<16x64xf32>
    %777 = arith.addf %776, %12 : vector<16x64xf32>
    %778 = arith.addf %770, %4 : f32
    %779 = vector.broadcast %778 : f32 to vector<16x64xf32>
    %780 = arith.mulf %779, %15 : vector<16x64xf32>
    %781 = arith.addf %780, %12 : vector<16x64xf32>
    %782 = arith.truncf %757 : vector<16x32xf32> to vector<16x32xbf16>
    %cst_162 = arith.constant dense<0.000000e+00> : vector<16x64xf32>
    %783 = tpu.matmul %782, %7, %cst_162 {dimension_numbers = #tpu.dot_dimension_numbers<[1], [0], [0], [1], [0, 0, 1, 1], [], []>} : vector<16x32xbf16>, vector<32x64xbf16>, vector<16x64xf32> -> vector<16x64xf32>
    %784 = arith.addf %783, %773 : vector<16x64xf32>
    %785 = math.tanh %784 : vector<16x64xf32>
    %786 = arith.truncf %785 : vector<16x64xf32> to vector<16x64xbf16>
    %cst_163 = arith.constant dense<0.000000e+00> : vector<16x32xf32>
    %787 = tpu.matmul %786, %8, %cst_163 {dimension_numbers = #tpu.dot_dimension_numbers<[1], [0], [0], [1], [0, 0, 1, 1], [], []>} : vector<16x64xbf16>, vector<64x32xbf16>, vector<16x32xf32> -> vector<16x32xf32>
    %788 = arith.addf %787, %18 : vector<16x32xf32>
    %789 = arith.mulf %785, %785 : vector<16x64xf32>
    %790 = arith.truncf %789 : vector<16x64xf32> to vector<16x64xbf16>
    %cst_164 = arith.constant dense<0.000000e+00> : vector<16x1xf32>
    %791 = tpu.matmul %790, %9, %cst_164 {dimension_numbers = #tpu.dot_dimension_numbers<[1], [0], [0], [1], [0, 0, 1, 1], [], []>} : vector<16x64xbf16>, vector<64x1xbf16>, vector<16x1xf32> -> vector<16x1xf32>
    %792 = vector.broadcast %5 : f32 to vector<16x32xf32>
    %793 = arith.mulf %792, %788 : vector<16x32xf32>
    %794 = arith.addf %757, %793 : vector<16x32xf32>
    %795 = arith.truncf %794 : vector<16x32xf32> to vector<16x32xbf16>
    %cst_165 = arith.constant dense<0.000000e+00> : vector<16x64xf32>
    %796 = tpu.matmul %795, %7, %cst_165 {dimension_numbers = #tpu.dot_dimension_numbers<[1], [0], [0], [1], [0, 0, 1, 1], [], []>} : vector<16x32xbf16>, vector<32x64xbf16>, vector<16x64xf32> -> vector<16x64xf32>
    %797 = arith.addf %796, %777 : vector<16x64xf32>
    %798 = math.tanh %797 : vector<16x64xf32>
    %799 = arith.truncf %798 : vector<16x64xf32> to vector<16x64xbf16>
    %cst_166 = arith.constant dense<0.000000e+00> : vector<16x32xf32>
    %800 = tpu.matmul %799, %8, %cst_166 {dimension_numbers = #tpu.dot_dimension_numbers<[1], [0], [0], [1], [0, 0, 1, 1], [], []>} : vector<16x64xbf16>, vector<64x32xbf16>, vector<16x32xf32> -> vector<16x32xf32>
    %801 = arith.addf %800, %18 : vector<16x32xf32>
    %802 = arith.mulf %798, %798 : vector<16x64xf32>
    %803 = arith.truncf %802 : vector<16x64xf32> to vector<16x64xbf16>
    %cst_167 = arith.constant dense<0.000000e+00> : vector<16x1xf32>
    %804 = tpu.matmul %803, %9, %cst_167 {dimension_numbers = #tpu.dot_dimension_numbers<[1], [0], [0], [1], [0, 0, 1, 1], [], []>} : vector<16x64xbf16>, vector<64x1xbf16>, vector<16x1xf32> -> vector<16x1xf32>
    %805 = vector.broadcast %5 : f32 to vector<16x32xf32>
    %806 = arith.mulf %805, %801 : vector<16x32xf32>
    %807 = arith.addf %757, %806 : vector<16x32xf32>
    %808 = arith.truncf %807 : vector<16x32xf32> to vector<16x32xbf16>
    %cst_168 = arith.constant dense<0.000000e+00> : vector<16x64xf32>
    %809 = tpu.matmul %808, %7, %cst_168 {dimension_numbers = #tpu.dot_dimension_numbers<[1], [0], [0], [1], [0, 0, 1, 1], [], []>} : vector<16x32xbf16>, vector<32x64xbf16>, vector<16x64xf32> -> vector<16x64xf32>
    %810 = arith.addf %809, %777 : vector<16x64xf32>
    %811 = math.tanh %810 : vector<16x64xf32>
    %812 = arith.truncf %811 : vector<16x64xf32> to vector<16x64xbf16>
    %cst_169 = arith.constant dense<0.000000e+00> : vector<16x32xf32>
    %813 = tpu.matmul %812, %8, %cst_169 {dimension_numbers = #tpu.dot_dimension_numbers<[1], [0], [0], [1], [0, 0, 1, 1], [], []>} : vector<16x64xbf16>, vector<64x32xbf16>, vector<16x32xf32> -> vector<16x32xf32>
    %814 = arith.addf %813, %18 : vector<16x32xf32>
    %815 = arith.mulf %811, %811 : vector<16x64xf32>
    %816 = arith.truncf %815 : vector<16x64xf32> to vector<16x64xbf16>
    %cst_170 = arith.constant dense<0.000000e+00> : vector<16x1xf32>
    %817 = tpu.matmul %816, %9, %cst_170 {dimension_numbers = #tpu.dot_dimension_numbers<[1], [0], [0], [1], [0, 0, 1, 1], [], []>} : vector<16x64xbf16>, vector<64x1xbf16>, vector<16x1xf32> -> vector<16x1xf32>
    %818 = vector.broadcast %4 : f32 to vector<16x32xf32>
    %819 = arith.mulf %818, %814 : vector<16x32xf32>
    %820 = arith.addf %757, %819 : vector<16x32xf32>
    %821 = arith.truncf %820 : vector<16x32xf32> to vector<16x32xbf16>
    %cst_171 = arith.constant dense<0.000000e+00> : vector<16x64xf32>
    %822 = tpu.matmul %821, %7, %cst_171 {dimension_numbers = #tpu.dot_dimension_numbers<[1], [0], [0], [1], [0, 0, 1, 1], [], []>} : vector<16x32xbf16>, vector<32x64xbf16>, vector<16x64xf32> -> vector<16x64xf32>
    %823 = arith.addf %822, %781 : vector<16x64xf32>
    %824 = math.tanh %823 : vector<16x64xf32>
    %825 = arith.truncf %824 : vector<16x64xf32> to vector<16x64xbf16>
    %cst_172 = arith.constant dense<0.000000e+00> : vector<16x32xf32>
    %826 = tpu.matmul %825, %8, %cst_172 {dimension_numbers = #tpu.dot_dimension_numbers<[1], [0], [0], [1], [0, 0, 1, 1], [], []>} : vector<16x64xbf16>, vector<64x32xbf16>, vector<16x32xf32> -> vector<16x32xf32>
    %827 = arith.addf %826, %18 : vector<16x32xf32>
    %828 = arith.mulf %824, %824 : vector<16x64xf32>
    %829 = arith.truncf %828 : vector<16x64xf32> to vector<16x64xbf16>
    %cst_173 = arith.constant dense<0.000000e+00> : vector<16x1xf32>
    %830 = tpu.matmul %829, %9, %cst_173 {dimension_numbers = #tpu.dot_dimension_numbers<[1], [0], [0], [1], [0, 0, 1, 1], [], []>} : vector<16x64xbf16>, vector<64x1xbf16>, vector<16x1xf32> -> vector<16x1xf32>
    %cst_174 = arith.constant 2.000000e+00 : f32
    %831 = vector.broadcast %cst_174 : f32 to vector<16x32xf32>
    %832 = arith.mulf %831, %801 : vector<16x32xf32>
    %833 = arith.addf %788, %832 : vector<16x32xf32>
    %cst_175 = arith.constant 2.000000e+00 : f32
    %834 = vector.broadcast %cst_175 : f32 to vector<16x32xf32>
    %835 = arith.mulf %834, %814 : vector<16x32xf32>
    %836 = arith.addf %833, %835 : vector<16x32xf32>
    %837 = arith.addf %836, %827 : vector<16x32xf32>
    %838 = vector.broadcast %6 : f32 to vector<16x32xf32>
    %839 = arith.mulf %838, %837 : vector<16x32xf32>
    %840 = arith.addf %757, %839 : vector<16x32xf32>
    %cst_176 = arith.constant 2.000000e+00 : f32
    %841 = vector.broadcast %cst_176 : f32 to vector<16x1xf32>
    %842 = arith.mulf %841, %804 : vector<16x1xf32>
    %843 = arith.addf %791, %842 : vector<16x1xf32>
    %cst_177 = arith.constant 2.000000e+00 : f32
    %844 = vector.broadcast %cst_177 : f32 to vector<16x1xf32>
    %845 = arith.mulf %844, %817 : vector<16x1xf32>
    %846 = arith.addf %843, %845 : vector<16x1xf32>
    %847 = arith.addf %846, %830 : vector<16x1xf32>
    %848 = vector.broadcast %6 : f32 to vector<16x1xf32>
    %849 = arith.mulf %848, %847 : vector<16x1xf32>
    %850 = arith.addf %767, %849 : vector<16x1xf32>
    %c10_i32 = arith.constant 10 : i32
    %851 = arith.sitofp %c10_i32 : i32 to f32
    %852 = arith.mulf %4, %851 : f32
    %853 = arith.addf %0, %852 : f32
    %854 = vector.broadcast %853 : f32 to vector<16x64xf32>
    %855 = arith.mulf %854, %15 : vector<16x64xf32>
    %856 = arith.addf %855, %12 : vector<16x64xf32>
    %857 = arith.addf %853, %5 : f32
    %858 = vector.broadcast %857 : f32 to vector<16x64xf32>
    %859 = arith.mulf %858, %15 : vector<16x64xf32>
    %860 = arith.addf %859, %12 : vector<16x64xf32>
    %861 = arith.addf %853, %4 : f32
    %862 = vector.broadcast %861 : f32 to vector<16x64xf32>
    %863 = arith.mulf %862, %15 : vector<16x64xf32>
    %864 = arith.addf %863, %12 : vector<16x64xf32>
    %865 = arith.truncf %840 : vector<16x32xf32> to vector<16x32xbf16>
    %cst_178 = arith.constant dense<0.000000e+00> : vector<16x64xf32>
    %866 = tpu.matmul %865, %7, %cst_178 {dimension_numbers = #tpu.dot_dimension_numbers<[1], [0], [0], [1], [0, 0, 1, 1], [], []>} : vector<16x32xbf16>, vector<32x64xbf16>, vector<16x64xf32> -> vector<16x64xf32>
    %867 = arith.addf %866, %856 : vector<16x64xf32>
    %868 = math.tanh %867 : vector<16x64xf32>
    %869 = arith.truncf %868 : vector<16x64xf32> to vector<16x64xbf16>
    %cst_179 = arith.constant dense<0.000000e+00> : vector<16x32xf32>
    %870 = tpu.matmul %869, %8, %cst_179 {dimension_numbers = #tpu.dot_dimension_numbers<[1], [0], [0], [1], [0, 0, 1, 1], [], []>} : vector<16x64xbf16>, vector<64x32xbf16>, vector<16x32xf32> -> vector<16x32xf32>
    %871 = arith.addf %870, %18 : vector<16x32xf32>
    %872 = arith.mulf %868, %868 : vector<16x64xf32>
    %873 = arith.truncf %872 : vector<16x64xf32> to vector<16x64xbf16>
    %cst_180 = arith.constant dense<0.000000e+00> : vector<16x1xf32>
    %874 = tpu.matmul %873, %9, %cst_180 {dimension_numbers = #tpu.dot_dimension_numbers<[1], [0], [0], [1], [0, 0, 1, 1], [], []>} : vector<16x64xbf16>, vector<64x1xbf16>, vector<16x1xf32> -> vector<16x1xf32>
    %875 = vector.broadcast %5 : f32 to vector<16x32xf32>
    %876 = arith.mulf %875, %871 : vector<16x32xf32>
    %877 = arith.addf %840, %876 : vector<16x32xf32>
    %878 = arith.truncf %877 : vector<16x32xf32> to vector<16x32xbf16>
    %cst_181 = arith.constant dense<0.000000e+00> : vector<16x64xf32>
    %879 = tpu.matmul %878, %7, %cst_181 {dimension_numbers = #tpu.dot_dimension_numbers<[1], [0], [0], [1], [0, 0, 1, 1], [], []>} : vector<16x32xbf16>, vector<32x64xbf16>, vector<16x64xf32> -> vector<16x64xf32>
    %880 = arith.addf %879, %860 : vector<16x64xf32>
    %881 = math.tanh %880 : vector<16x64xf32>
    %882 = arith.truncf %881 : vector<16x64xf32> to vector<16x64xbf16>
    %cst_182 = arith.constant dense<0.000000e+00> : vector<16x32xf32>
    %883 = tpu.matmul %882, %8, %cst_182 {dimension_numbers = #tpu.dot_dimension_numbers<[1], [0], [0], [1], [0, 0, 1, 1], [], []>} : vector<16x64xbf16>, vector<64x32xbf16>, vector<16x32xf32> -> vector<16x32xf32>
    %884 = arith.addf %883, %18 : vector<16x32xf32>
    %885 = arith.mulf %881, %881 : vector<16x64xf32>
    %886 = arith.truncf %885 : vector<16x64xf32> to vector<16x64xbf16>
    %cst_183 = arith.constant dense<0.000000e+00> : vector<16x1xf32>
    %887 = tpu.matmul %886, %9, %cst_183 {dimension_numbers = #tpu.dot_dimension_numbers<[1], [0], [0], [1], [0, 0, 1, 1], [], []>} : vector<16x64xbf16>, vector<64x1xbf16>, vector<16x1xf32> -> vector<16x1xf32>
    %888 = vector.broadcast %5 : f32 to vector<16x32xf32>
    %889 = arith.mulf %888, %884 : vector<16x32xf32>
    %890 = arith.addf %840, %889 : vector<16x32xf32>
    %891 = arith.truncf %890 : vector<16x32xf32> to vector<16x32xbf16>
    %cst_184 = arith.constant dense<0.000000e+00> : vector<16x64xf32>
    %892 = tpu.matmul %891, %7, %cst_184 {dimension_numbers = #tpu.dot_dimension_numbers<[1], [0], [0], [1], [0, 0, 1, 1], [], []>} : vector<16x32xbf16>, vector<32x64xbf16>, vector<16x64xf32> -> vector<16x64xf32>
    %893 = arith.addf %892, %860 : vector<16x64xf32>
    %894 = math.tanh %893 : vector<16x64xf32>
    %895 = arith.truncf %894 : vector<16x64xf32> to vector<16x64xbf16>
    %cst_185 = arith.constant dense<0.000000e+00> : vector<16x32xf32>
    %896 = tpu.matmul %895, %8, %cst_185 {dimension_numbers = #tpu.dot_dimension_numbers<[1], [0], [0], [1], [0, 0, 1, 1], [], []>} : vector<16x64xbf16>, vector<64x32xbf16>, vector<16x32xf32> -> vector<16x32xf32>
    %897 = arith.addf %896, %18 : vector<16x32xf32>
    %898 = arith.mulf %894, %894 : vector<16x64xf32>
    %899 = arith.truncf %898 : vector<16x64xf32> to vector<16x64xbf16>
    %cst_186 = arith.constant dense<0.000000e+00> : vector<16x1xf32>
    %900 = tpu.matmul %899, %9, %cst_186 {dimension_numbers = #tpu.dot_dimension_numbers<[1], [0], [0], [1], [0, 0, 1, 1], [], []>} : vector<16x64xbf16>, vector<64x1xbf16>, vector<16x1xf32> -> vector<16x1xf32>
    %901 = vector.broadcast %4 : f32 to vector<16x32xf32>
    %902 = arith.mulf %901, %897 : vector<16x32xf32>
    %903 = arith.addf %840, %902 : vector<16x32xf32>
    %904 = arith.truncf %903 : vector<16x32xf32> to vector<16x32xbf16>
    %cst_187 = arith.constant dense<0.000000e+00> : vector<16x64xf32>
    %905 = tpu.matmul %904, %7, %cst_187 {dimension_numbers = #tpu.dot_dimension_numbers<[1], [0], [0], [1], [0, 0, 1, 1], [], []>} : vector<16x32xbf16>, vector<32x64xbf16>, vector<16x64xf32> -> vector<16x64xf32>
    %906 = arith.addf %905, %864 : vector<16x64xf32>
    %907 = math.tanh %906 : vector<16x64xf32>
    %908 = arith.truncf %907 : vector<16x64xf32> to vector<16x64xbf16>
    %cst_188 = arith.constant dense<0.000000e+00> : vector<16x32xf32>
    %909 = tpu.matmul %908, %8, %cst_188 {dimension_numbers = #tpu.dot_dimension_numbers<[1], [0], [0], [1], [0, 0, 1, 1], [], []>} : vector<16x64xbf16>, vector<64x32xbf16>, vector<16x32xf32> -> vector<16x32xf32>
    %910 = arith.addf %909, %18 : vector<16x32xf32>
    %911 = arith.mulf %907, %907 : vector<16x64xf32>
    %912 = arith.truncf %911 : vector<16x64xf32> to vector<16x64xbf16>
    %cst_189 = arith.constant dense<0.000000e+00> : vector<16x1xf32>
    %913 = tpu.matmul %912, %9, %cst_189 {dimension_numbers = #tpu.dot_dimension_numbers<[1], [0], [0], [1], [0, 0, 1, 1], [], []>} : vector<16x64xbf16>, vector<64x1xbf16>, vector<16x1xf32> -> vector<16x1xf32>
    %cst_190 = arith.constant 2.000000e+00 : f32
    %914 = vector.broadcast %cst_190 : f32 to vector<16x32xf32>
    %915 = arith.mulf %914, %884 : vector<16x32xf32>
    %916 = arith.addf %871, %915 : vector<16x32xf32>
    %cst_191 = arith.constant 2.000000e+00 : f32
    %917 = vector.broadcast %cst_191 : f32 to vector<16x32xf32>
    %918 = arith.mulf %917, %897 : vector<16x32xf32>
    %919 = arith.addf %916, %918 : vector<16x32xf32>
    %920 = arith.addf %919, %910 : vector<16x32xf32>
    %921 = vector.broadcast %6 : f32 to vector<16x32xf32>
    %922 = arith.mulf %921, %920 : vector<16x32xf32>
    %923 = arith.addf %840, %922 : vector<16x32xf32>
    %cst_192 = arith.constant 2.000000e+00 : f32
    %924 = vector.broadcast %cst_192 : f32 to vector<16x1xf32>
    %925 = arith.mulf %924, %887 : vector<16x1xf32>
    %926 = arith.addf %874, %925 : vector<16x1xf32>
    %cst_193 = arith.constant 2.000000e+00 : f32
    %927 = vector.broadcast %cst_193 : f32 to vector<16x1xf32>
    %928 = arith.mulf %927, %900 : vector<16x1xf32>
    %929 = arith.addf %926, %928 : vector<16x1xf32>
    %930 = arith.addf %929, %913 : vector<16x1xf32>
    %931 = vector.broadcast %6 : f32 to vector<16x1xf32>
    %932 = arith.mulf %931, %930 : vector<16x1xf32>
    %933 = arith.addf %850, %932 : vector<16x1xf32>
    %c11_i32 = arith.constant 11 : i32
    %934 = arith.sitofp %c11_i32 : i32 to f32
    %935 = arith.mulf %4, %934 : f32
    %936 = arith.addf %0, %935 : f32
    %937 = vector.broadcast %936 : f32 to vector<16x64xf32>
    %938 = arith.mulf %937, %15 : vector<16x64xf32>
    %939 = arith.addf %938, %12 : vector<16x64xf32>
    %940 = arith.addf %936, %5 : f32
    %941 = vector.broadcast %940 : f32 to vector<16x64xf32>
    %942 = arith.mulf %941, %15 : vector<16x64xf32>
    %943 = arith.addf %942, %12 : vector<16x64xf32>
    %944 = arith.addf %936, %4 : f32
    %945 = vector.broadcast %944 : f32 to vector<16x64xf32>
    %946 = arith.mulf %945, %15 : vector<16x64xf32>
    %947 = arith.addf %946, %12 : vector<16x64xf32>
    %948 = arith.truncf %923 : vector<16x32xf32> to vector<16x32xbf16>
    %cst_194 = arith.constant dense<0.000000e+00> : vector<16x64xf32>
    %949 = tpu.matmul %948, %7, %cst_194 {dimension_numbers = #tpu.dot_dimension_numbers<[1], [0], [0], [1], [0, 0, 1, 1], [], []>} : vector<16x32xbf16>, vector<32x64xbf16>, vector<16x64xf32> -> vector<16x64xf32>
    %950 = arith.addf %949, %939 : vector<16x64xf32>
    %951 = math.tanh %950 : vector<16x64xf32>
    %952 = arith.truncf %951 : vector<16x64xf32> to vector<16x64xbf16>
    %cst_195 = arith.constant dense<0.000000e+00> : vector<16x32xf32>
    %953 = tpu.matmul %952, %8, %cst_195 {dimension_numbers = #tpu.dot_dimension_numbers<[1], [0], [0], [1], [0, 0, 1, 1], [], []>} : vector<16x64xbf16>, vector<64x32xbf16>, vector<16x32xf32> -> vector<16x32xf32>
    %954 = arith.addf %953, %18 : vector<16x32xf32>
    %955 = arith.mulf %951, %951 : vector<16x64xf32>
    %956 = arith.truncf %955 : vector<16x64xf32> to vector<16x64xbf16>
    %cst_196 = arith.constant dense<0.000000e+00> : vector<16x1xf32>
    %957 = tpu.matmul %956, %9, %cst_196 {dimension_numbers = #tpu.dot_dimension_numbers<[1], [0], [0], [1], [0, 0, 1, 1], [], []>} : vector<16x64xbf16>, vector<64x1xbf16>, vector<16x1xf32> -> vector<16x1xf32>
    %958 = vector.broadcast %5 : f32 to vector<16x32xf32>
    %959 = arith.mulf %958, %954 : vector<16x32xf32>
    %960 = arith.addf %923, %959 : vector<16x32xf32>
    %961 = arith.truncf %960 : vector<16x32xf32> to vector<16x32xbf16>
    %cst_197 = arith.constant dense<0.000000e+00> : vector<16x64xf32>
    %962 = tpu.matmul %961, %7, %cst_197 {dimension_numbers = #tpu.dot_dimension_numbers<[1], [0], [0], [1], [0, 0, 1, 1], [], []>} : vector<16x32xbf16>, vector<32x64xbf16>, vector<16x64xf32> -> vector<16x64xf32>
    %963 = arith.addf %962, %943 : vector<16x64xf32>
    %964 = math.tanh %963 : vector<16x64xf32>
    %965 = arith.truncf %964 : vector<16x64xf32> to vector<16x64xbf16>
    %cst_198 = arith.constant dense<0.000000e+00> : vector<16x32xf32>
    %966 = tpu.matmul %965, %8, %cst_198 {dimension_numbers = #tpu.dot_dimension_numbers<[1], [0], [0], [1], [0, 0, 1, 1], [], []>} : vector<16x64xbf16>, vector<64x32xbf16>, vector<16x32xf32> -> vector<16x32xf32>
    %967 = arith.addf %966, %18 : vector<16x32xf32>
    %968 = arith.mulf %964, %964 : vector<16x64xf32>
    %969 = arith.truncf %968 : vector<16x64xf32> to vector<16x64xbf16>
    %cst_199 = arith.constant dense<0.000000e+00> : vector<16x1xf32>
    %970 = tpu.matmul %969, %9, %cst_199 {dimension_numbers = #tpu.dot_dimension_numbers<[1], [0], [0], [1], [0, 0, 1, 1], [], []>} : vector<16x64xbf16>, vector<64x1xbf16>, vector<16x1xf32> -> vector<16x1xf32>
    %971 = vector.broadcast %5 : f32 to vector<16x32xf32>
    %972 = arith.mulf %971, %967 : vector<16x32xf32>
    %973 = arith.addf %923, %972 : vector<16x32xf32>
    %974 = arith.truncf %973 : vector<16x32xf32> to vector<16x32xbf16>
    %cst_200 = arith.constant dense<0.000000e+00> : vector<16x64xf32>
    %975 = tpu.matmul %974, %7, %cst_200 {dimension_numbers = #tpu.dot_dimension_numbers<[1], [0], [0], [1], [0, 0, 1, 1], [], []>} : vector<16x32xbf16>, vector<32x64xbf16>, vector<16x64xf32> -> vector<16x64xf32>
    %976 = arith.addf %975, %943 : vector<16x64xf32>
    %977 = math.tanh %976 : vector<16x64xf32>
    %978 = arith.truncf %977 : vector<16x64xf32> to vector<16x64xbf16>
    %cst_201 = arith.constant dense<0.000000e+00> : vector<16x32xf32>
    %979 = tpu.matmul %978, %8, %cst_201 {dimension_numbers = #tpu.dot_dimension_numbers<[1], [0], [0], [1], [0, 0, 1, 1], [], []>} : vector<16x64xbf16>, vector<64x32xbf16>, vector<16x32xf32> -> vector<16x32xf32>
    %980 = arith.addf %979, %18 : vector<16x32xf32>
    %981 = arith.mulf %977, %977 : vector<16x64xf32>
    %982 = arith.truncf %981 : vector<16x64xf32> to vector<16x64xbf16>
    %cst_202 = arith.constant dense<0.000000e+00> : vector<16x1xf32>
    %983 = tpu.matmul %982, %9, %cst_202 {dimension_numbers = #tpu.dot_dimension_numbers<[1], [0], [0], [1], [0, 0, 1, 1], [], []>} : vector<16x64xbf16>, vector<64x1xbf16>, vector<16x1xf32> -> vector<16x1xf32>
    %984 = vector.broadcast %4 : f32 to vector<16x32xf32>
    %985 = arith.mulf %984, %980 : vector<16x32xf32>
    %986 = arith.addf %923, %985 : vector<16x32xf32>
    %987 = arith.truncf %986 : vector<16x32xf32> to vector<16x32xbf16>
    %cst_203 = arith.constant dense<0.000000e+00> : vector<16x64xf32>
    %988 = tpu.matmul %987, %7, %cst_203 {dimension_numbers = #tpu.dot_dimension_numbers<[1], [0], [0], [1], [0, 0, 1, 1], [], []>} : vector<16x32xbf16>, vector<32x64xbf16>, vector<16x64xf32> -> vector<16x64xf32>
    %989 = arith.addf %988, %947 : vector<16x64xf32>
    %990 = math.tanh %989 : vector<16x64xf32>
    %991 = arith.truncf %990 : vector<16x64xf32> to vector<16x64xbf16>
    %cst_204 = arith.constant dense<0.000000e+00> : vector<16x32xf32>
    %992 = tpu.matmul %991, %8, %cst_204 {dimension_numbers = #tpu.dot_dimension_numbers<[1], [0], [0], [1], [0, 0, 1, 1], [], []>} : vector<16x64xbf16>, vector<64x32xbf16>, vector<16x32xf32> -> vector<16x32xf32>
    %993 = arith.addf %992, %18 : vector<16x32xf32>
    %994 = arith.mulf %990, %990 : vector<16x64xf32>
    %995 = arith.truncf %994 : vector<16x64xf32> to vector<16x64xbf16>
    %cst_205 = arith.constant dense<0.000000e+00> : vector<16x1xf32>
    %996 = tpu.matmul %995, %9, %cst_205 {dimension_numbers = #tpu.dot_dimension_numbers<[1], [0], [0], [1], [0, 0, 1, 1], [], []>} : vector<16x64xbf16>, vector<64x1xbf16>, vector<16x1xf32> -> vector<16x1xf32>
    %cst_206 = arith.constant 2.000000e+00 : f32
    %997 = vector.broadcast %cst_206 : f32 to vector<16x32xf32>
    %998 = arith.mulf %997, %967 : vector<16x32xf32>
    %999 = arith.addf %954, %998 : vector<16x32xf32>
    %cst_207 = arith.constant 2.000000e+00 : f32
    %1000 = vector.broadcast %cst_207 : f32 to vector<16x32xf32>
    %1001 = arith.mulf %1000, %980 : vector<16x32xf32>
    %1002 = arith.addf %999, %1001 : vector<16x32xf32>
    %1003 = arith.addf %1002, %993 : vector<16x32xf32>
    %1004 = vector.broadcast %6 : f32 to vector<16x32xf32>
    %1005 = arith.mulf %1004, %1003 : vector<16x32xf32>
    %1006 = arith.addf %923, %1005 : vector<16x32xf32>
    %cst_208 = arith.constant 2.000000e+00 : f32
    %1007 = vector.broadcast %cst_208 : f32 to vector<16x1xf32>
    %1008 = arith.mulf %1007, %970 : vector<16x1xf32>
    %1009 = arith.addf %957, %1008 : vector<16x1xf32>
    %cst_209 = arith.constant 2.000000e+00 : f32
    %1010 = vector.broadcast %cst_209 : f32 to vector<16x1xf32>
    %1011 = arith.mulf %1010, %983 : vector<16x1xf32>
    %1012 = arith.addf %1009, %1011 : vector<16x1xf32>
    %1013 = arith.addf %1012, %996 : vector<16x1xf32>
    %1014 = vector.broadcast %6 : f32 to vector<16x1xf32>
    %1015 = arith.mulf %1014, %1013 : vector<16x1xf32>
    %1016 = arith.addf %933, %1015 : vector<16x1xf32>
    %c12_i32 = arith.constant 12 : i32
    %1017 = arith.sitofp %c12_i32 : i32 to f32
    %1018 = arith.mulf %4, %1017 : f32
    %1019 = arith.addf %0, %1018 : f32
    %1020 = vector.broadcast %1019 : f32 to vector<16x64xf32>
    %1021 = arith.mulf %1020, %15 : vector<16x64xf32>
    %1022 = arith.addf %1021, %12 : vector<16x64xf32>
    %1023 = arith.addf %1019, %5 : f32
    %1024 = vector.broadcast %1023 : f32 to vector<16x64xf32>
    %1025 = arith.mulf %1024, %15 : vector<16x64xf32>
    %1026 = arith.addf %1025, %12 : vector<16x64xf32>
    %1027 = arith.addf %1019, %4 : f32
    %1028 = vector.broadcast %1027 : f32 to vector<16x64xf32>
    %1029 = arith.mulf %1028, %15 : vector<16x64xf32>
    %1030 = arith.addf %1029, %12 : vector<16x64xf32>
    %1031 = arith.truncf %1006 : vector<16x32xf32> to vector<16x32xbf16>
    %cst_210 = arith.constant dense<0.000000e+00> : vector<16x64xf32>
    %1032 = tpu.matmul %1031, %7, %cst_210 {dimension_numbers = #tpu.dot_dimension_numbers<[1], [0], [0], [1], [0, 0, 1, 1], [], []>} : vector<16x32xbf16>, vector<32x64xbf16>, vector<16x64xf32> -> vector<16x64xf32>
    %1033 = arith.addf %1032, %1022 : vector<16x64xf32>
    %1034 = math.tanh %1033 : vector<16x64xf32>
    %1035 = arith.truncf %1034 : vector<16x64xf32> to vector<16x64xbf16>
    %cst_211 = arith.constant dense<0.000000e+00> : vector<16x32xf32>
    %1036 = tpu.matmul %1035, %8, %cst_211 {dimension_numbers = #tpu.dot_dimension_numbers<[1], [0], [0], [1], [0, 0, 1, 1], [], []>} : vector<16x64xbf16>, vector<64x32xbf16>, vector<16x32xf32> -> vector<16x32xf32>
    %1037 = arith.addf %1036, %18 : vector<16x32xf32>
    %1038 = arith.mulf %1034, %1034 : vector<16x64xf32>
    %1039 = arith.truncf %1038 : vector<16x64xf32> to vector<16x64xbf16>
    %cst_212 = arith.constant dense<0.000000e+00> : vector<16x1xf32>
    %1040 = tpu.matmul %1039, %9, %cst_212 {dimension_numbers = #tpu.dot_dimension_numbers<[1], [0], [0], [1], [0, 0, 1, 1], [], []>} : vector<16x64xbf16>, vector<64x1xbf16>, vector<16x1xf32> -> vector<16x1xf32>
    %1041 = vector.broadcast %5 : f32 to vector<16x32xf32>
    %1042 = arith.mulf %1041, %1037 : vector<16x32xf32>
    %1043 = arith.addf %1006, %1042 : vector<16x32xf32>
    %1044 = arith.truncf %1043 : vector<16x32xf32> to vector<16x32xbf16>
    %cst_213 = arith.constant dense<0.000000e+00> : vector<16x64xf32>
    %1045 = tpu.matmul %1044, %7, %cst_213 {dimension_numbers = #tpu.dot_dimension_numbers<[1], [0], [0], [1], [0, 0, 1, 1], [], []>} : vector<16x32xbf16>, vector<32x64xbf16>, vector<16x64xf32> -> vector<16x64xf32>
    %1046 = arith.addf %1045, %1026 : vector<16x64xf32>
    %1047 = math.tanh %1046 : vector<16x64xf32>
    %1048 = arith.truncf %1047 : vector<16x64xf32> to vector<16x64xbf16>
    %cst_214 = arith.constant dense<0.000000e+00> : vector<16x32xf32>
    %1049 = tpu.matmul %1048, %8, %cst_214 {dimension_numbers = #tpu.dot_dimension_numbers<[1], [0], [0], [1], [0, 0, 1, 1], [], []>} : vector<16x64xbf16>, vector<64x32xbf16>, vector<16x32xf32> -> vector<16x32xf32>
    %1050 = arith.addf %1049, %18 : vector<16x32xf32>
    %1051 = arith.mulf %1047, %1047 : vector<16x64xf32>
    %1052 = arith.truncf %1051 : vector<16x64xf32> to vector<16x64xbf16>
    %cst_215 = arith.constant dense<0.000000e+00> : vector<16x1xf32>
    %1053 = tpu.matmul %1052, %9, %cst_215 {dimension_numbers = #tpu.dot_dimension_numbers<[1], [0], [0], [1], [0, 0, 1, 1], [], []>} : vector<16x64xbf16>, vector<64x1xbf16>, vector<16x1xf32> -> vector<16x1xf32>
    %1054 = vector.broadcast %5 : f32 to vector<16x32xf32>
    %1055 = arith.mulf %1054, %1050 : vector<16x32xf32>
    %1056 = arith.addf %1006, %1055 : vector<16x32xf32>
    %1057 = arith.truncf %1056 : vector<16x32xf32> to vector<16x32xbf16>
    %cst_216 = arith.constant dense<0.000000e+00> : vector<16x64xf32>
    %1058 = tpu.matmul %1057, %7, %cst_216 {dimension_numbers = #tpu.dot_dimension_numbers<[1], [0], [0], [1], [0, 0, 1, 1], [], []>} : vector<16x32xbf16>, vector<32x64xbf16>, vector<16x64xf32> -> vector<16x64xf32>
    %1059 = arith.addf %1058, %1026 : vector<16x64xf32>
    %1060 = math.tanh %1059 : vector<16x64xf32>
    %1061 = arith.truncf %1060 : vector<16x64xf32> to vector<16x64xbf16>
    %cst_217 = arith.constant dense<0.000000e+00> : vector<16x32xf32>
    %1062 = tpu.matmul %1061, %8, %cst_217 {dimension_numbers = #tpu.dot_dimension_numbers<[1], [0], [0], [1], [0, 0, 1, 1], [], []>} : vector<16x64xbf16>, vector<64x32xbf16>, vector<16x32xf32> -> vector<16x32xf32>
    %1063 = arith.addf %1062, %18 : vector<16x32xf32>
    %1064 = arith.mulf %1060, %1060 : vector<16x64xf32>
    %1065 = arith.truncf %1064 : vector<16x64xf32> to vector<16x64xbf16>
    %cst_218 = arith.constant dense<0.000000e+00> : vector<16x1xf32>
    %1066 = tpu.matmul %1065, %9, %cst_218 {dimension_numbers = #tpu.dot_dimension_numbers<[1], [0], [0], [1], [0, 0, 1, 1], [], []>} : vector<16x64xbf16>, vector<64x1xbf16>, vector<16x1xf32> -> vector<16x1xf32>
    %1067 = vector.broadcast %4 : f32 to vector<16x32xf32>
    %1068 = arith.mulf %1067, %1063 : vector<16x32xf32>
    %1069 = arith.addf %1006, %1068 : vector<16x32xf32>
    %1070 = arith.truncf %1069 : vector<16x32xf32> to vector<16x32xbf16>
    %cst_219 = arith.constant dense<0.000000e+00> : vector<16x64xf32>
    %1071 = tpu.matmul %1070, %7, %cst_219 {dimension_numbers = #tpu.dot_dimension_numbers<[1], [0], [0], [1], [0, 0, 1, 1], [], []>} : vector<16x32xbf16>, vector<32x64xbf16>, vector<16x64xf32> -> vector<16x64xf32>
    %1072 = arith.addf %1071, %1030 : vector<16x64xf32>
    %1073 = math.tanh %1072 : vector<16x64xf32>
    %1074 = arith.truncf %1073 : vector<16x64xf32> to vector<16x64xbf16>
    %cst_220 = arith.constant dense<0.000000e+00> : vector<16x32xf32>
    %1075 = tpu.matmul %1074, %8, %cst_220 {dimension_numbers = #tpu.dot_dimension_numbers<[1], [0], [0], [1], [0, 0, 1, 1], [], []>} : vector<16x64xbf16>, vector<64x32xbf16>, vector<16x32xf32> -> vector<16x32xf32>
    %1076 = arith.addf %1075, %18 : vector<16x32xf32>
    %1077 = arith.mulf %1073, %1073 : vector<16x64xf32>
    %1078 = arith.truncf %1077 : vector<16x64xf32> to vector<16x64xbf16>
    %cst_221 = arith.constant dense<0.000000e+00> : vector<16x1xf32>
    %1079 = tpu.matmul %1078, %9, %cst_221 {dimension_numbers = #tpu.dot_dimension_numbers<[1], [0], [0], [1], [0, 0, 1, 1], [], []>} : vector<16x64xbf16>, vector<64x1xbf16>, vector<16x1xf32> -> vector<16x1xf32>
    %cst_222 = arith.constant 2.000000e+00 : f32
    %1080 = vector.broadcast %cst_222 : f32 to vector<16x32xf32>
    %1081 = arith.mulf %1080, %1050 : vector<16x32xf32>
    %1082 = arith.addf %1037, %1081 : vector<16x32xf32>
    %cst_223 = arith.constant 2.000000e+00 : f32
    %1083 = vector.broadcast %cst_223 : f32 to vector<16x32xf32>
    %1084 = arith.mulf %1083, %1063 : vector<16x32xf32>
    %1085 = arith.addf %1082, %1084 : vector<16x32xf32>
    %1086 = arith.addf %1085, %1076 : vector<16x32xf32>
    %1087 = vector.broadcast %6 : f32 to vector<16x32xf32>
    %1088 = arith.mulf %1087, %1086 : vector<16x32xf32>
    %1089 = arith.addf %1006, %1088 : vector<16x32xf32>
    %cst_224 = arith.constant 2.000000e+00 : f32
    %1090 = vector.broadcast %cst_224 : f32 to vector<16x1xf32>
    %1091 = arith.mulf %1090, %1053 : vector<16x1xf32>
    %1092 = arith.addf %1040, %1091 : vector<16x1xf32>
    %cst_225 = arith.constant 2.000000e+00 : f32
    %1093 = vector.broadcast %cst_225 : f32 to vector<16x1xf32>
    %1094 = arith.mulf %1093, %1066 : vector<16x1xf32>
    %1095 = arith.addf %1092, %1094 : vector<16x1xf32>
    %1096 = arith.addf %1095, %1079 : vector<16x1xf32>
    %1097 = vector.broadcast %6 : f32 to vector<16x1xf32>
    %1098 = arith.mulf %1097, %1096 : vector<16x1xf32>
    %1099 = arith.addf %1016, %1098 : vector<16x1xf32>
    %c13_i32 = arith.constant 13 : i32
    %1100 = arith.sitofp %c13_i32 : i32 to f32
    %1101 = arith.mulf %4, %1100 : f32
    %1102 = arith.addf %0, %1101 : f32
    %1103 = vector.broadcast %1102 : f32 to vector<16x64xf32>
    %1104 = arith.mulf %1103, %15 : vector<16x64xf32>
    %1105 = arith.addf %1104, %12 : vector<16x64xf32>
    %1106 = arith.addf %1102, %5 : f32
    %1107 = vector.broadcast %1106 : f32 to vector<16x64xf32>
    %1108 = arith.mulf %1107, %15 : vector<16x64xf32>
    %1109 = arith.addf %1108, %12 : vector<16x64xf32>
    %1110 = arith.addf %1102, %4 : f32
    %1111 = vector.broadcast %1110 : f32 to vector<16x64xf32>
    %1112 = arith.mulf %1111, %15 : vector<16x64xf32>
    %1113 = arith.addf %1112, %12 : vector<16x64xf32>
    %1114 = arith.truncf %1089 : vector<16x32xf32> to vector<16x32xbf16>
    %cst_226 = arith.constant dense<0.000000e+00> : vector<16x64xf32>
    %1115 = tpu.matmul %1114, %7, %cst_226 {dimension_numbers = #tpu.dot_dimension_numbers<[1], [0], [0], [1], [0, 0, 1, 1], [], []>} : vector<16x32xbf16>, vector<32x64xbf16>, vector<16x64xf32> -> vector<16x64xf32>
    %1116 = arith.addf %1115, %1105 : vector<16x64xf32>
    %1117 = math.tanh %1116 : vector<16x64xf32>
    %1118 = arith.truncf %1117 : vector<16x64xf32> to vector<16x64xbf16>
    %cst_227 = arith.constant dense<0.000000e+00> : vector<16x32xf32>
    %1119 = tpu.matmul %1118, %8, %cst_227 {dimension_numbers = #tpu.dot_dimension_numbers<[1], [0], [0], [1], [0, 0, 1, 1], [], []>} : vector<16x64xbf16>, vector<64x32xbf16>, vector<16x32xf32> -> vector<16x32xf32>
    %1120 = arith.addf %1119, %18 : vector<16x32xf32>
    %1121 = arith.mulf %1117, %1117 : vector<16x64xf32>
    %1122 = arith.truncf %1121 : vector<16x64xf32> to vector<16x64xbf16>
    %cst_228 = arith.constant dense<0.000000e+00> : vector<16x1xf32>
    %1123 = tpu.matmul %1122, %9, %cst_228 {dimension_numbers = #tpu.dot_dimension_numbers<[1], [0], [0], [1], [0, 0, 1, 1], [], []>} : vector<16x64xbf16>, vector<64x1xbf16>, vector<16x1xf32> -> vector<16x1xf32>
    %1124 = vector.broadcast %5 : f32 to vector<16x32xf32>
    %1125 = arith.mulf %1124, %1120 : vector<16x32xf32>
    %1126 = arith.addf %1089, %1125 : vector<16x32xf32>
    %1127 = arith.truncf %1126 : vector<16x32xf32> to vector<16x32xbf16>
    %cst_229 = arith.constant dense<0.000000e+00> : vector<16x64xf32>
    %1128 = tpu.matmul %1127, %7, %cst_229 {dimension_numbers = #tpu.dot_dimension_numbers<[1], [0], [0], [1], [0, 0, 1, 1], [], []>} : vector<16x32xbf16>, vector<32x64xbf16>, vector<16x64xf32> -> vector<16x64xf32>
    %1129 = arith.addf %1128, %1109 : vector<16x64xf32>
    %1130 = math.tanh %1129 : vector<16x64xf32>
    %1131 = arith.truncf %1130 : vector<16x64xf32> to vector<16x64xbf16>
    %cst_230 = arith.constant dense<0.000000e+00> : vector<16x32xf32>
    %1132 = tpu.matmul %1131, %8, %cst_230 {dimension_numbers = #tpu.dot_dimension_numbers<[1], [0], [0], [1], [0, 0, 1, 1], [], []>} : vector<16x64xbf16>, vector<64x32xbf16>, vector<16x32xf32> -> vector<16x32xf32>
    %1133 = arith.addf %1132, %18 : vector<16x32xf32>
    %1134 = arith.mulf %1130, %1130 : vector<16x64xf32>
    %1135 = arith.truncf %1134 : vector<16x64xf32> to vector<16x64xbf16>
    %cst_231 = arith.constant dense<0.000000e+00> : vector<16x1xf32>
    %1136 = tpu.matmul %1135, %9, %cst_231 {dimension_numbers = #tpu.dot_dimension_numbers<[1], [0], [0], [1], [0, 0, 1, 1], [], []>} : vector<16x64xbf16>, vector<64x1xbf16>, vector<16x1xf32> -> vector<16x1xf32>
    %1137 = vector.broadcast %5 : f32 to vector<16x32xf32>
    %1138 = arith.mulf %1137, %1133 : vector<16x32xf32>
    %1139 = arith.addf %1089, %1138 : vector<16x32xf32>
    %1140 = arith.truncf %1139 : vector<16x32xf32> to vector<16x32xbf16>
    %cst_232 = arith.constant dense<0.000000e+00> : vector<16x64xf32>
    %1141 = tpu.matmul %1140, %7, %cst_232 {dimension_numbers = #tpu.dot_dimension_numbers<[1], [0], [0], [1], [0, 0, 1, 1], [], []>} : vector<16x32xbf16>, vector<32x64xbf16>, vector<16x64xf32> -> vector<16x64xf32>
    %1142 = arith.addf %1141, %1109 : vector<16x64xf32>
    %1143 = math.tanh %1142 : vector<16x64xf32>
    %1144 = arith.truncf %1143 : vector<16x64xf32> to vector<16x64xbf16>
    %cst_233 = arith.constant dense<0.000000e+00> : vector<16x32xf32>
    %1145 = tpu.matmul %1144, %8, %cst_233 {dimension_numbers = #tpu.dot_dimension_numbers<[1], [0], [0], [1], [0, 0, 1, 1], [], []>} : vector<16x64xbf16>, vector<64x32xbf16>, vector<16x32xf32> -> vector<16x32xf32>
    %1146 = arith.addf %1145, %18 : vector<16x32xf32>
    %1147 = arith.mulf %1143, %1143 : vector<16x64xf32>
    %1148 = arith.truncf %1147 : vector<16x64xf32> to vector<16x64xbf16>
    %cst_234 = arith.constant dense<0.000000e+00> : vector<16x1xf32>
    %1149 = tpu.matmul %1148, %9, %cst_234 {dimension_numbers = #tpu.dot_dimension_numbers<[1], [0], [0], [1], [0, 0, 1, 1], [], []>} : vector<16x64xbf16>, vector<64x1xbf16>, vector<16x1xf32> -> vector<16x1xf32>
    %1150 = vector.broadcast %4 : f32 to vector<16x32xf32>
    %1151 = arith.mulf %1150, %1146 : vector<16x32xf32>
    %1152 = arith.addf %1089, %1151 : vector<16x32xf32>
    %1153 = arith.truncf %1152 : vector<16x32xf32> to vector<16x32xbf16>
    %cst_235 = arith.constant dense<0.000000e+00> : vector<16x64xf32>
    %1154 = tpu.matmul %1153, %7, %cst_235 {dimension_numbers = #tpu.dot_dimension_numbers<[1], [0], [0], [1], [0, 0, 1, 1], [], []>} : vector<16x32xbf16>, vector<32x64xbf16>, vector<16x64xf32> -> vector<16x64xf32>
    %1155 = arith.addf %1154, %1113 : vector<16x64xf32>
    %1156 = math.tanh %1155 : vector<16x64xf32>
    %1157 = arith.truncf %1156 : vector<16x64xf32> to vector<16x64xbf16>
    %cst_236 = arith.constant dense<0.000000e+00> : vector<16x32xf32>
    %1158 = tpu.matmul %1157, %8, %cst_236 {dimension_numbers = #tpu.dot_dimension_numbers<[1], [0], [0], [1], [0, 0, 1, 1], [], []>} : vector<16x64xbf16>, vector<64x32xbf16>, vector<16x32xf32> -> vector<16x32xf32>
    %1159 = arith.addf %1158, %18 : vector<16x32xf32>
    %1160 = arith.mulf %1156, %1156 : vector<16x64xf32>
    %1161 = arith.truncf %1160 : vector<16x64xf32> to vector<16x64xbf16>
    %cst_237 = arith.constant dense<0.000000e+00> : vector<16x1xf32>
    %1162 = tpu.matmul %1161, %9, %cst_237 {dimension_numbers = #tpu.dot_dimension_numbers<[1], [0], [0], [1], [0, 0, 1, 1], [], []>} : vector<16x64xbf16>, vector<64x1xbf16>, vector<16x1xf32> -> vector<16x1xf32>
    %cst_238 = arith.constant 2.000000e+00 : f32
    %1163 = vector.broadcast %cst_238 : f32 to vector<16x32xf32>
    %1164 = arith.mulf %1163, %1133 : vector<16x32xf32>
    %1165 = arith.addf %1120, %1164 : vector<16x32xf32>
    %cst_239 = arith.constant 2.000000e+00 : f32
    %1166 = vector.broadcast %cst_239 : f32 to vector<16x32xf32>
    %1167 = arith.mulf %1166, %1146 : vector<16x32xf32>
    %1168 = arith.addf %1165, %1167 : vector<16x32xf32>
    %1169 = arith.addf %1168, %1159 : vector<16x32xf32>
    %1170 = vector.broadcast %6 : f32 to vector<16x32xf32>
    %1171 = arith.mulf %1170, %1169 : vector<16x32xf32>
    %1172 = arith.addf %1089, %1171 : vector<16x32xf32>
    %cst_240 = arith.constant 2.000000e+00 : f32
    %1173 = vector.broadcast %cst_240 : f32 to vector<16x1xf32>
    %1174 = arith.mulf %1173, %1136 : vector<16x1xf32>
    %1175 = arith.addf %1123, %1174 : vector<16x1xf32>
    %cst_241 = arith.constant 2.000000e+00 : f32
    %1176 = vector.broadcast %cst_241 : f32 to vector<16x1xf32>
    %1177 = arith.mulf %1176, %1149 : vector<16x1xf32>
    %1178 = arith.addf %1175, %1177 : vector<16x1xf32>
    %1179 = arith.addf %1178, %1162 : vector<16x1xf32>
    %1180 = vector.broadcast %6 : f32 to vector<16x1xf32>
    %1181 = arith.mulf %1180, %1179 : vector<16x1xf32>
    %1182 = arith.addf %1099, %1181 : vector<16x1xf32>
    %c14_i32 = arith.constant 14 : i32
    %1183 = arith.sitofp %c14_i32 : i32 to f32
    %1184 = arith.mulf %4, %1183 : f32
    %1185 = arith.addf %0, %1184 : f32
    %1186 = vector.broadcast %1185 : f32 to vector<16x64xf32>
    %1187 = arith.mulf %1186, %15 : vector<16x64xf32>
    %1188 = arith.addf %1187, %12 : vector<16x64xf32>
    %1189 = arith.addf %1185, %5 : f32
    %1190 = vector.broadcast %1189 : f32 to vector<16x64xf32>
    %1191 = arith.mulf %1190, %15 : vector<16x64xf32>
    %1192 = arith.addf %1191, %12 : vector<16x64xf32>
    %1193 = arith.addf %1185, %4 : f32
    %1194 = vector.broadcast %1193 : f32 to vector<16x64xf32>
    %1195 = arith.mulf %1194, %15 : vector<16x64xf32>
    %1196 = arith.addf %1195, %12 : vector<16x64xf32>
    %1197 = arith.truncf %1172 : vector<16x32xf32> to vector<16x32xbf16>
    %cst_242 = arith.constant dense<0.000000e+00> : vector<16x64xf32>
    %1198 = tpu.matmul %1197, %7, %cst_242 {dimension_numbers = #tpu.dot_dimension_numbers<[1], [0], [0], [1], [0, 0, 1, 1], [], []>} : vector<16x32xbf16>, vector<32x64xbf16>, vector<16x64xf32> -> vector<16x64xf32>
    %1199 = arith.addf %1198, %1188 : vector<16x64xf32>
    %1200 = math.tanh %1199 : vector<16x64xf32>
    %1201 = arith.truncf %1200 : vector<16x64xf32> to vector<16x64xbf16>
    %cst_243 = arith.constant dense<0.000000e+00> : vector<16x32xf32>
    %1202 = tpu.matmul %1201, %8, %cst_243 {dimension_numbers = #tpu.dot_dimension_numbers<[1], [0], [0], [1], [0, 0, 1, 1], [], []>} : vector<16x64xbf16>, vector<64x32xbf16>, vector<16x32xf32> -> vector<16x32xf32>
    %1203 = arith.addf %1202, %18 : vector<16x32xf32>
    %1204 = arith.mulf %1200, %1200 : vector<16x64xf32>
    %1205 = arith.truncf %1204 : vector<16x64xf32> to vector<16x64xbf16>
    %cst_244 = arith.constant dense<0.000000e+00> : vector<16x1xf32>
    %1206 = tpu.matmul %1205, %9, %cst_244 {dimension_numbers = #tpu.dot_dimension_numbers<[1], [0], [0], [1], [0, 0, 1, 1], [], []>} : vector<16x64xbf16>, vector<64x1xbf16>, vector<16x1xf32> -> vector<16x1xf32>
    %1207 = vector.broadcast %5 : f32 to vector<16x32xf32>
    %1208 = arith.mulf %1207, %1203 : vector<16x32xf32>
    %1209 = arith.addf %1172, %1208 : vector<16x32xf32>
    %1210 = arith.truncf %1209 : vector<16x32xf32> to vector<16x32xbf16>
    %cst_245 = arith.constant dense<0.000000e+00> : vector<16x64xf32>
    %1211 = tpu.matmul %1210, %7, %cst_245 {dimension_numbers = #tpu.dot_dimension_numbers<[1], [0], [0], [1], [0, 0, 1, 1], [], []>} : vector<16x32xbf16>, vector<32x64xbf16>, vector<16x64xf32> -> vector<16x64xf32>
    %1212 = arith.addf %1211, %1192 : vector<16x64xf32>
    %1213 = math.tanh %1212 : vector<16x64xf32>
    %1214 = arith.truncf %1213 : vector<16x64xf32> to vector<16x64xbf16>
    %cst_246 = arith.constant dense<0.000000e+00> : vector<16x32xf32>
    %1215 = tpu.matmul %1214, %8, %cst_246 {dimension_numbers = #tpu.dot_dimension_numbers<[1], [0], [0], [1], [0, 0, 1, 1], [], []>} : vector<16x64xbf16>, vector<64x32xbf16>, vector<16x32xf32> -> vector<16x32xf32>
    %1216 = arith.addf %1215, %18 : vector<16x32xf32>
    %1217 = arith.mulf %1213, %1213 : vector<16x64xf32>
    %1218 = arith.truncf %1217 : vector<16x64xf32> to vector<16x64xbf16>
    %cst_247 = arith.constant dense<0.000000e+00> : vector<16x1xf32>
    %1219 = tpu.matmul %1218, %9, %cst_247 {dimension_numbers = #tpu.dot_dimension_numbers<[1], [0], [0], [1], [0, 0, 1, 1], [], []>} : vector<16x64xbf16>, vector<64x1xbf16>, vector<16x1xf32> -> vector<16x1xf32>
    %1220 = vector.broadcast %5 : f32 to vector<16x32xf32>
    %1221 = arith.mulf %1220, %1216 : vector<16x32xf32>
    %1222 = arith.addf %1172, %1221 : vector<16x32xf32>
    %1223 = arith.truncf %1222 : vector<16x32xf32> to vector<16x32xbf16>
    %cst_248 = arith.constant dense<0.000000e+00> : vector<16x64xf32>
    %1224 = tpu.matmul %1223, %7, %cst_248 {dimension_numbers = #tpu.dot_dimension_numbers<[1], [0], [0], [1], [0, 0, 1, 1], [], []>} : vector<16x32xbf16>, vector<32x64xbf16>, vector<16x64xf32> -> vector<16x64xf32>
    %1225 = arith.addf %1224, %1192 : vector<16x64xf32>
    %1226 = math.tanh %1225 : vector<16x64xf32>
    %1227 = arith.truncf %1226 : vector<16x64xf32> to vector<16x64xbf16>
    %cst_249 = arith.constant dense<0.000000e+00> : vector<16x32xf32>
    %1228 = tpu.matmul %1227, %8, %cst_249 {dimension_numbers = #tpu.dot_dimension_numbers<[1], [0], [0], [1], [0, 0, 1, 1], [], []>} : vector<16x64xbf16>, vector<64x32xbf16>, vector<16x32xf32> -> vector<16x32xf32>
    %1229 = arith.addf %1228, %18 : vector<16x32xf32>
    %1230 = arith.mulf %1226, %1226 : vector<16x64xf32>
    %1231 = arith.truncf %1230 : vector<16x64xf32> to vector<16x64xbf16>
    %cst_250 = arith.constant dense<0.000000e+00> : vector<16x1xf32>
    %1232 = tpu.matmul %1231, %9, %cst_250 {dimension_numbers = #tpu.dot_dimension_numbers<[1], [0], [0], [1], [0, 0, 1, 1], [], []>} : vector<16x64xbf16>, vector<64x1xbf16>, vector<16x1xf32> -> vector<16x1xf32>
    %1233 = vector.broadcast %4 : f32 to vector<16x32xf32>
    %1234 = arith.mulf %1233, %1229 : vector<16x32xf32>
    %1235 = arith.addf %1172, %1234 : vector<16x32xf32>
    %1236 = arith.truncf %1235 : vector<16x32xf32> to vector<16x32xbf16>
    %cst_251 = arith.constant dense<0.000000e+00> : vector<16x64xf32>
    %1237 = tpu.matmul %1236, %7, %cst_251 {dimension_numbers = #tpu.dot_dimension_numbers<[1], [0], [0], [1], [0, 0, 1, 1], [], []>} : vector<16x32xbf16>, vector<32x64xbf16>, vector<16x64xf32> -> vector<16x64xf32>
    %1238 = arith.addf %1237, %1196 : vector<16x64xf32>
    %1239 = math.tanh %1238 : vector<16x64xf32>
    %1240 = arith.truncf %1239 : vector<16x64xf32> to vector<16x64xbf16>
    %cst_252 = arith.constant dense<0.000000e+00> : vector<16x32xf32>
    %1241 = tpu.matmul %1240, %8, %cst_252 {dimension_numbers = #tpu.dot_dimension_numbers<[1], [0], [0], [1], [0, 0, 1, 1], [], []>} : vector<16x64xbf16>, vector<64x32xbf16>, vector<16x32xf32> -> vector<16x32xf32>
    %1242 = arith.addf %1241, %18 : vector<16x32xf32>
    %1243 = arith.mulf %1239, %1239 : vector<16x64xf32>
    %1244 = arith.truncf %1243 : vector<16x64xf32> to vector<16x64xbf16>
    %cst_253 = arith.constant dense<0.000000e+00> : vector<16x1xf32>
    %1245 = tpu.matmul %1244, %9, %cst_253 {dimension_numbers = #tpu.dot_dimension_numbers<[1], [0], [0], [1], [0, 0, 1, 1], [], []>} : vector<16x64xbf16>, vector<64x1xbf16>, vector<16x1xf32> -> vector<16x1xf32>
    %cst_254 = arith.constant 2.000000e+00 : f32
    %1246 = vector.broadcast %cst_254 : f32 to vector<16x32xf32>
    %1247 = arith.mulf %1246, %1216 : vector<16x32xf32>
    %1248 = arith.addf %1203, %1247 : vector<16x32xf32>
    %cst_255 = arith.constant 2.000000e+00 : f32
    %1249 = vector.broadcast %cst_255 : f32 to vector<16x32xf32>
    %1250 = arith.mulf %1249, %1229 : vector<16x32xf32>
    %1251 = arith.addf %1248, %1250 : vector<16x32xf32>
    %1252 = arith.addf %1251, %1242 : vector<16x32xf32>
    %1253 = vector.broadcast %6 : f32 to vector<16x32xf32>
    %1254 = arith.mulf %1253, %1252 : vector<16x32xf32>
    %1255 = arith.addf %1172, %1254 : vector<16x32xf32>
    %cst_256 = arith.constant 2.000000e+00 : f32
    %1256 = vector.broadcast %cst_256 : f32 to vector<16x1xf32>
    %1257 = arith.mulf %1256, %1219 : vector<16x1xf32>
    %1258 = arith.addf %1206, %1257 : vector<16x1xf32>
    %cst_257 = arith.constant 2.000000e+00 : f32
    %1259 = vector.broadcast %cst_257 : f32 to vector<16x1xf32>
    %1260 = arith.mulf %1259, %1232 : vector<16x1xf32>
    %1261 = arith.addf %1258, %1260 : vector<16x1xf32>
    %1262 = arith.addf %1261, %1245 : vector<16x1xf32>
    %1263 = vector.broadcast %6 : f32 to vector<16x1xf32>
    %1264 = arith.mulf %1263, %1262 : vector<16x1xf32>
    %1265 = arith.addf %1182, %1264 : vector<16x1xf32>
    %c15_i32 = arith.constant 15 : i32
    %1266 = arith.sitofp %c15_i32 : i32 to f32
    %1267 = arith.mulf %4, %1266 : f32
    %1268 = arith.addf %0, %1267 : f32
    %1269 = vector.broadcast %1268 : f32 to vector<16x64xf32>
    %1270 = arith.mulf %1269, %15 : vector<16x64xf32>
    %1271 = arith.addf %1270, %12 : vector<16x64xf32>
    %1272 = arith.addf %1268, %5 : f32
    %1273 = vector.broadcast %1272 : f32 to vector<16x64xf32>
    %1274 = arith.mulf %1273, %15 : vector<16x64xf32>
    %1275 = arith.addf %1274, %12 : vector<16x64xf32>
    %1276 = arith.addf %1268, %4 : f32
    %1277 = vector.broadcast %1276 : f32 to vector<16x64xf32>
    %1278 = arith.mulf %1277, %15 : vector<16x64xf32>
    %1279 = arith.addf %1278, %12 : vector<16x64xf32>
    %1280 = arith.truncf %1255 : vector<16x32xf32> to vector<16x32xbf16>
    %cst_258 = arith.constant dense<0.000000e+00> : vector<16x64xf32>
    %1281 = tpu.matmul %1280, %7, %cst_258 {dimension_numbers = #tpu.dot_dimension_numbers<[1], [0], [0], [1], [0, 0, 1, 1], [], []>} : vector<16x32xbf16>, vector<32x64xbf16>, vector<16x64xf32> -> vector<16x64xf32>
    %1282 = arith.addf %1281, %1271 : vector<16x64xf32>
    %1283 = math.tanh %1282 : vector<16x64xf32>
    %1284 = arith.truncf %1283 : vector<16x64xf32> to vector<16x64xbf16>
    %cst_259 = arith.constant dense<0.000000e+00> : vector<16x32xf32>
    %1285 = tpu.matmul %1284, %8, %cst_259 {dimension_numbers = #tpu.dot_dimension_numbers<[1], [0], [0], [1], [0, 0, 1, 1], [], []>} : vector<16x64xbf16>, vector<64x32xbf16>, vector<16x32xf32> -> vector<16x32xf32>
    %1286 = arith.addf %1285, %18 : vector<16x32xf32>
    %1287 = arith.mulf %1283, %1283 : vector<16x64xf32>
    %1288 = arith.truncf %1287 : vector<16x64xf32> to vector<16x64xbf16>
    %cst_260 = arith.constant dense<0.000000e+00> : vector<16x1xf32>
    %1289 = tpu.matmul %1288, %9, %cst_260 {dimension_numbers = #tpu.dot_dimension_numbers<[1], [0], [0], [1], [0, 0, 1, 1], [], []>} : vector<16x64xbf16>, vector<64x1xbf16>, vector<16x1xf32> -> vector<16x1xf32>
    %1290 = vector.broadcast %5 : f32 to vector<16x32xf32>
    %1291 = arith.mulf %1290, %1286 : vector<16x32xf32>
    %1292 = arith.addf %1255, %1291 : vector<16x32xf32>
    %1293 = arith.truncf %1292 : vector<16x32xf32> to vector<16x32xbf16>
    %cst_261 = arith.constant dense<0.000000e+00> : vector<16x64xf32>
    %1294 = tpu.matmul %1293, %7, %cst_261 {dimension_numbers = #tpu.dot_dimension_numbers<[1], [0], [0], [1], [0, 0, 1, 1], [], []>} : vector<16x32xbf16>, vector<32x64xbf16>, vector<16x64xf32> -> vector<16x64xf32>
    %1295 = arith.addf %1294, %1275 : vector<16x64xf32>
    %1296 = math.tanh %1295 : vector<16x64xf32>
    %1297 = arith.truncf %1296 : vector<16x64xf32> to vector<16x64xbf16>
    %cst_262 = arith.constant dense<0.000000e+00> : vector<16x32xf32>
    %1298 = tpu.matmul %1297, %8, %cst_262 {dimension_numbers = #tpu.dot_dimension_numbers<[1], [0], [0], [1], [0, 0, 1, 1], [], []>} : vector<16x64xbf16>, vector<64x32xbf16>, vector<16x32xf32> -> vector<16x32xf32>
    %1299 = arith.addf %1298, %18 : vector<16x32xf32>
    %1300 = arith.mulf %1296, %1296 : vector<16x64xf32>
    %1301 = arith.truncf %1300 : vector<16x64xf32> to vector<16x64xbf16>
    %cst_263 = arith.constant dense<0.000000e+00> : vector<16x1xf32>
    %1302 = tpu.matmul %1301, %9, %cst_263 {dimension_numbers = #tpu.dot_dimension_numbers<[1], [0], [0], [1], [0, 0, 1, 1], [], []>} : vector<16x64xbf16>, vector<64x1xbf16>, vector<16x1xf32> -> vector<16x1xf32>
    %1303 = vector.broadcast %5 : f32 to vector<16x32xf32>
    %1304 = arith.mulf %1303, %1299 : vector<16x32xf32>
    %1305 = arith.addf %1255, %1304 : vector<16x32xf32>
    %1306 = arith.truncf %1305 : vector<16x32xf32> to vector<16x32xbf16>
    %cst_264 = arith.constant dense<0.000000e+00> : vector<16x64xf32>
    %1307 = tpu.matmul %1306, %7, %cst_264 {dimension_numbers = #tpu.dot_dimension_numbers<[1], [0], [0], [1], [0, 0, 1, 1], [], []>} : vector<16x32xbf16>, vector<32x64xbf16>, vector<16x64xf32> -> vector<16x64xf32>
    %1308 = arith.addf %1307, %1275 : vector<16x64xf32>
    %1309 = math.tanh %1308 : vector<16x64xf32>
    %1310 = arith.truncf %1309 : vector<16x64xf32> to vector<16x64xbf16>
    %cst_265 = arith.constant dense<0.000000e+00> : vector<16x32xf32>
    %1311 = tpu.matmul %1310, %8, %cst_265 {dimension_numbers = #tpu.dot_dimension_numbers<[1], [0], [0], [1], [0, 0, 1, 1], [], []>} : vector<16x64xbf16>, vector<64x32xbf16>, vector<16x32xf32> -> vector<16x32xf32>
    %1312 = arith.addf %1311, %18 : vector<16x32xf32>
    %1313 = arith.mulf %1309, %1309 : vector<16x64xf32>
    %1314 = arith.truncf %1313 : vector<16x64xf32> to vector<16x64xbf16>
    %cst_266 = arith.constant dense<0.000000e+00> : vector<16x1xf32>
    %1315 = tpu.matmul %1314, %9, %cst_266 {dimension_numbers = #tpu.dot_dimension_numbers<[1], [0], [0], [1], [0, 0, 1, 1], [], []>} : vector<16x64xbf16>, vector<64x1xbf16>, vector<16x1xf32> -> vector<16x1xf32>
    %1316 = vector.broadcast %4 : f32 to vector<16x32xf32>
    %1317 = arith.mulf %1316, %1312 : vector<16x32xf32>
    %1318 = arith.addf %1255, %1317 : vector<16x32xf32>
    %1319 = arith.truncf %1318 : vector<16x32xf32> to vector<16x32xbf16>
    %cst_267 = arith.constant dense<0.000000e+00> : vector<16x64xf32>
    %1320 = tpu.matmul %1319, %7, %cst_267 {dimension_numbers = #tpu.dot_dimension_numbers<[1], [0], [0], [1], [0, 0, 1, 1], [], []>} : vector<16x32xbf16>, vector<32x64xbf16>, vector<16x64xf32> -> vector<16x64xf32>
    %1321 = arith.addf %1320, %1279 : vector<16x64xf32>
    %1322 = math.tanh %1321 : vector<16x64xf32>
    %1323 = arith.truncf %1322 : vector<16x64xf32> to vector<16x64xbf16>
    %cst_268 = arith.constant dense<0.000000e+00> : vector<16x32xf32>
    %1324 = tpu.matmul %1323, %8, %cst_268 {dimension_numbers = #tpu.dot_dimension_numbers<[1], [0], [0], [1], [0, 0, 1, 1], [], []>} : vector<16x64xbf16>, vector<64x32xbf16>, vector<16x32xf32> -> vector<16x32xf32>
    %1325 = arith.addf %1324, %18 : vector<16x32xf32>
    %1326 = arith.mulf %1322, %1322 : vector<16x64xf32>
    %1327 = arith.truncf %1326 : vector<16x64xf32> to vector<16x64xbf16>
    %cst_269 = arith.constant dense<0.000000e+00> : vector<16x1xf32>
    %1328 = tpu.matmul %1327, %9, %cst_269 {dimension_numbers = #tpu.dot_dimension_numbers<[1], [0], [0], [1], [0, 0, 1, 1], [], []>} : vector<16x64xbf16>, vector<64x1xbf16>, vector<16x1xf32> -> vector<16x1xf32>
    %cst_270 = arith.constant 2.000000e+00 : f32
    %1329 = vector.broadcast %cst_270 : f32 to vector<16x32xf32>
    %1330 = arith.mulf %1329, %1299 : vector<16x32xf32>
    %1331 = arith.addf %1286, %1330 : vector<16x32xf32>
    %cst_271 = arith.constant 2.000000e+00 : f32
    %1332 = vector.broadcast %cst_271 : f32 to vector<16x32xf32>
    %1333 = arith.mulf %1332, %1312 : vector<16x32xf32>
    %1334 = arith.addf %1331, %1333 : vector<16x32xf32>
    %1335 = arith.addf %1334, %1325 : vector<16x32xf32>
    %1336 = vector.broadcast %6 : f32 to vector<16x32xf32>
    %1337 = arith.mulf %1336, %1335 : vector<16x32xf32>
    %1338 = arith.addf %1255, %1337 : vector<16x32xf32>
    %cst_272 = arith.constant 2.000000e+00 : f32
    %1339 = vector.broadcast %cst_272 : f32 to vector<16x1xf32>
    %1340 = arith.mulf %1339, %1302 : vector<16x1xf32>
    %1341 = arith.addf %1289, %1340 : vector<16x1xf32>
    %cst_273 = arith.constant 2.000000e+00 : f32
    %1342 = vector.broadcast %cst_273 : f32 to vector<16x1xf32>
    %1343 = arith.mulf %1342, %1315 : vector<16x1xf32>
    %1344 = arith.addf %1341, %1343 : vector<16x1xf32>
    %1345 = arith.addf %1344, %1328 : vector<16x1xf32>
    %1346 = vector.broadcast %6 : f32 to vector<16x1xf32>
    %1347 = arith.mulf %1346, %1345 : vector<16x1xf32>
    %1348 = arith.addf %1265, %1347 : vector<16x1xf32>
    %c16_i32 = arith.constant 16 : i32
    %1349 = arith.subf %1, %0 : f32
    %1350 = arith.mulf %1349, %2 : f32
    %1351 = vector.broadcast %1350 : f32 to vector<16x1xf32>
    %1352 = arith.subf %1348, %1351 : vector<16x1xf32>
    %c0_274 = arith.constant 0 : index
    %c0_275 = arith.constant 0 : index
    %1353 = vector.load %arg10[%c0_274, %c0_275] : memref<16x32xf32, #tpu.memory_space<vmem>>, vector<16x32xf32>
    tpu.vector_store %arg10[%c0_274, %c0_275], %1338 {strides = array<i32>} : memref<16x32xf32, #tpu.memory_space<vmem>>, vector<16x32xf32>,
    %c0_276 = arith.constant 0 : index
    %c0_277 = arith.constant 0 : index
    %1354 = vector.load %arg11[%c0_276, %c0_277] : memref<16x1xf32, #tpu.memory_space<vmem>>, vector<16x1xf32>
    tpu.vector_store %arg11[%c0_276, %c0_277], %1352 {strides = array<i32>} : memref<16x1xf32, #tpu.memory_space<vmem>>, vector<16x1xf32>,
    return
  }
  func.func @transform_0(%arg0: i32) -> i32 {
    %c0_i32 = arith.constant 0 : i32
    %c0_i32_0 = arith.constant 0 : i32
    return %c0_i32 : i32
  }
  func.func @transform_1(%arg0: i32) -> (i32, i32) {
    %c0_i32 = arith.constant 0 : i32
    %c0_i32_0 = arith.constant 0 : i32
    return %arg0, %c0_i32 : i32, i32
  }
  func.func @transform_2(%arg0: i32) -> (i32, i32) {
    %c0_i32 = arith.constant 0 : i32
    %c0_i32_0 = arith.constant 0 : i32
    return %arg0, %c0_i32 : i32, i32
  }
  func.func @transform_3(%arg0: i32) -> (i32, i32) {
    %c0_i32 = arith.constant 0 : i32
    %c0_i32_0 = arith.constant 0 : i32
    %c0_i32_1 = arith.constant 0 : i32
    return %c0_i32, %c0_i32_0 : i32, i32
  }
  func.func @transform_4(%arg0: i32) -> (i32, i32) {
    %c0_i32 = arith.constant 0 : i32
    %c0_i32_0 = arith.constant 0 : i32
    %c0_i32_1 = arith.constant 0 : i32
    return %c0_i32, %c0_i32_0 : i32, i32
  }
  func.func @transform_5(%arg0: i32) -> (i32, i32) {
    %c0_i32 = arith.constant 0 : i32
    %c0_i32_0 = arith.constant 0 : i32
    %c0_i32_1 = arith.constant 0 : i32
    return %c0_i32, %c0_i32_0 : i32, i32
  }
  func.func @transform_6(%arg0: i32) -> (i32, i32) {
    %c0_i32 = arith.constant 0 : i32
    %c0_i32_0 = arith.constant 0 : i32
    %c0_i32_1 = arith.constant 0 : i32
    return %c0_i32, %c0_i32_0 : i32, i32
  }
  func.func @transform_7(%arg0: i32) -> (i32, i32) {
    %c0_i32 = arith.constant 0 : i32
    %c0_i32_0 = arith.constant 0 : i32
    %c0_i32_1 = arith.constant 0 : i32
    return %c0_i32, %c0_i32_0 : i32, i32
  }
  func.func @transform_8(%arg0: i32) -> (i32, i32) {
    %c0_i32 = arith.constant 0 : i32
    %c0_i32_0 = arith.constant 0 : i32
    %c0_i32_1 = arith.constant 0 : i32
    return %c0_i32, %c0_i32_0 : i32, i32
  }
  func.func @transform_9(%arg0: i32) -> (i32, i32) {
    %c0_i32 = arith.constant 0 : i32
    %c0_i32_0 = arith.constant 0 : i32
    return %arg0, %c0_i32 : i32, i32
  }
  func.func @transform_10(%arg0: i32) -> (i32, i32) {
    %c0_i32 = arith.constant 0 : i32
    %c0_i32_0 = arith.constant 0 : i32
    return %arg0, %c0_i32 : i32, i32
  }
}

</mosaic_0001>

<bundles_post_ra>
// kernel: _cnf_pallas.1
= control target key start
LH: loop header
LB: loop body
LE: loop exit
PB: predicated region body
PF: predicated region fallthrough
CT: control target
= control target key end

     0   :  { %16 = vsyncpa [#allocation4], 0  ;;  %s17341_s0 = inlined_call_operand.vmem [shape: f32[3], index: 0, kind: input, shape index: {}]   ;;  %s17342_s1 = inlined_call_operand.vmem [shape: f32[16,32], index: 1, kind: input, shape index: {}]   ;;  %s17343_s2 = inlined_call_operand.vmem [shape: f32[16,1], index: 2, kind: input, shape index: {}]   ;;  %s17344_s3 = inlined_call_operand.vmem [shape: bf16[32,64], index: 3, kind: input, shape index: {}]   ;;  %s17345_s4 = inlined_call_operand.vmem [shape: bf16[64,32], index: 4, kind: input, shape index: {}]   ;;  %s17346_s5 = inlined_call_operand.vmem [shape: bf16[64,1], index: 5, kind: input, shape index: {}]   ;;  %s17347_s6 = inlined_call_operand.vmem [shape: f32[1,64], index: 6, kind: input, shape index: {}]   ;;  %s17348_s7 = inlined_call_operand.vmem [shape: f32[1,64], index: 7, kind: input, shape index: {}]   ;;  %s17349_s8 = inlined_call_operand.vmem [shape: f32[1,32], index: 8, kind: input, shape index: {}]   ;;  %s17350_s9 = inlined_call_operand.hbm [shape: f32[16,32], index: 9, kind: output, shape index: {0}]   ;;  %s17351_s10 = inlined_call_operand.vmem [shape: f32[16,1], index: 10, kind: output, shape index: {1}]  }
   0x1   :  { %17 = vsyncpa [#allocation3], 0  ;;  %s24_s15 = sshll.u32 %s17341_s0, 4  ;;  %s25_s15 = int_to_ptr.vmem [resolvable:$true] %s24_s15 }
   0x2   :  { %s13483_s16 = scalar_lea.vmem %s25_s15, 16  ;;  %p13488_p1 = scmp.lt.s32.totalorder %s25_s15, %s25_s15 }
   0x3   :  { %p13484_p0 = scmp.ne.s32.totalorder %s25_s15, %s13483_s16  ;;  %p13489_p2 = scmp.lt.s32.totalorder %s13483_s16, %s13483_s16 }
   0x5   :  { %p13490_p3 = por %p13489_p2, %p13488_p1 }
   0x7   :  { %p13491_p4 = pnand %p13490_p3, %p13484_p0 }
   0x9   :  { %13494 = shalt.err (!%p13491_p4)
}
   0xa   :  { %s13521_s17 = smov [#allocation2]  }
   0xb   :  { %27 = dma.vmem_to_smem %s25_s15, 16, %s13521_s17, [#allocation4]  }
   0xc   :  { %13517 = dma.done.wait [#allocation4], 16  }
   0xd   :  { %13518 = vsyncadd [#allocation4], 4294967280 }
   0xe   :  { %47 = sfence }
   0xf   :  { %v13588_v0 = vld [vmem:[%s17344_s3] sm:$0xff]   ;;  %v13522_v1 = vmov 0.0   ;;  %v13596_v2 = vld [vmem:[%s17344_s3 + $0x8] sm:$0xff]   ;;  %vm13523_vm0 = vmmov 0   ;;  %vm127_vm1 = vcmask 261120   ;;  %v13640_v8 = vld [vmem:[%s17345_s4 + $0x10] sm:$0xff]  }
  0x10   :  { %10946 = vmatprep.subr.bf16.mxu0 %v13522_v1  ;;  %10954 = vmatprep.subr.bf16.mxu1 %v13522_v1  ;;  %v13603_v3 = vld [vmem:[%s17342_s1] sm:$0xff]  ;;  %v13608_v4 = vld [vmem:[%s17342_s1 + $0x8] sm:$0xff]  ;;  %v13647_v9 = vld [vmem:[%s17345_s4 + $0x18] sm:$0xff]   ;;  %s13652_s12 = sld [smem:[#allocation2]]  ;;  %s9907_s13 = sld [smem:[#allocation2 + $0x1]]  ;;  %vm199_vm2 = vcmask 523264  }
  0x11   :  { %10947 = vmatpush3.bf16.msra.mxu0 %v13588_v0  ;;  %10950 = vmatprep.mubr.msk.bf16.mxu0 %vm13523_vm0, %v13522_v1  ;;  %v114_v5 = vpack.c.bf16 %v13608_v4, %v13603_v3  ;;  %v13627_v6 = vld [vmem:[%s17345_s4] sm:$0xff]   ;;  %v13634_v7 = vld [vmem:[%s17345_s4 + $0x8] sm:$0xff]   ;;  %v13736_v42 = vld [vmem:[%s17346_s5 + $0x10] sm:$0xff]  }
  0x12   :  { %10948 = vmatprep.subr.bf16.mxu0 %v13522_v1  ;;  %10962 = vmatprep.mubr.msk.bf16.mxu1 %vm13523_vm0, %v13522_v1  ;;  %v13667_v10 = vld [vmem:[%s17348_s7] ss:$0 sm:$0xff]  ;;  %v13729_v41 = vld [vmem:[%s17346_s5 + $0x8] sm:$0xff]   ;;  %v13743_v43 = vld [vmem:[%s17346_s5 + $0x18] sm:$0xff]  }
  0x13   :  { %10955 = vmatpush3.bf16.msra.mxu1 %v13627_v6  ;;  %v13674_v13 = vld [vmem:[%s17347_s6] ss:$0 sm:$0xff] }
  0x14   :  { %10956 = vmatprep.subr.bf16.mxu1 %v13522_v1  ;;  %v13692_v27 = vld [vmem:[%s17349_s8] ss:$0 sm:$0xff] }
  0x15   :  { %10949 = vmatpush3.bf16.msra.mxu0 %v13596_v2  ;;  %v13723_v40 = vld [vmem:[%s17346_s5] sm:$0xff]  }
  0x16   :  { %10966 = vmatprep.subr.bf16.mxu0 %v13522_v1  ;;  %s13655_s14 = ssub.f32 %s9907_s13, %s13652_s12 }
  0x17   :  { %10957 = vmatpush3.bf16.msra.mxu1 %v13634_v7 }
  0x18   :  { %10951 = vmatmul.mubr.msk.bf16.vlgmr.msra.gmra.mrb[0].mxu0 %vm127_vm1, %v114_v5  ;;  %10958 = vmatprep.subr.bf16.mxu1 %v13522_v1  ;;  %s13658_s15 = smul.f32 0.0625, %s13655_s14 }
  0x19   :  { %10967 = vmatpush3.bf16.msra.mxu0 %v13588_v0  ;;  %10970 = vmatprep.mubr.msk.bf16.mxu0 %vm13523_vm0, %v13522_v1 }
  0x1a   :  { %10968 = vmatprep.subr.bf16.mxu0 %v13522_v1  ;;  %s101_s16 = smul.f32 0.0, %s13658_s15 }
  0x1b   :  { %10959 = vmatpush3.bf16.msra.mxu1 %v13640_v8  ;;  %s13687_s21 = smul.f32 0.5, %s13658_s15 }
  0x1c   :  { %10960 = vmatprep.subr.bf16.mxu1 %v13522_v1  ;;  %s13662_s17 = sadd.f32 %s101_s16, %s13652_s12  ;;  %s55_s16 = smul.f32 0.16666667, %s13658_s15 }
  0x1d   :  { %10969 = vmatpush3.bf16.msra.mxu0 %v13596_v2  ;;  %v13695_v29 = vstv %s13687_s21  ;;  %s1379_s30 = smul.f32 2.0, %s13658_s15 }
  0x1e   :  { %10974 = vmatprep.subr.bf16.mxu0 %v13522_v1  ;;  %v103_v11 = vstv %s13662_s17  ;;  %s106_s11 = sadd.f32 %s13662_s17, %s13687_s21  ;;  %s2593_s0 = smul.f32 4.0, %s13658_s15 }
  0x1f   :  { %10961 = vmatpush3.bf16.msra.mxu1 %v13647_v9  ;;  %v104_v12 = vmul.f32 %v13667_v10, %v103_v11  ;;  %s110_s13 = sadd.f32 %s13662_s17, %s13658_s15  ;;  %s4414_s27 = smul.f32 7.0, %s13658_s15 }
  0x20   :  { %10986 = vmatprep.subr.bf16.mxu1 %v13522_v1  ;;  %v107_v44 = vstv %s106_s11  ;;  %s13903_s17 = sadd.f32 %s13658_s15, %s13652_s12  ;;  %s9270_s23 = smul.f32 15.0, %s13658_s15 }
  0x21   :  { %v105_v14 = vadd.f32 %v13674_v13, %v104_v12  ;;  %v108_v45 = vmul.f32 %v13667_v10, %v107_v44  ;;  %s14129_s11 = sadd.f32 %s1379_s30, %s13652_s12 }
  0x22   :  { %s777_s18 = sadd.f32 %s13903_s17, %s13687_s21 }
  0x23   :  { %v109_v46 = vadd.f32 %v13674_v13, %v108_v45  ;;  %s781_s19 = sadd.f32 %s13903_s17, %s13658_s15 }
  0x24   :  { %s1384_s1 = sadd.f32 %s14129_s11, %s13687_s21 }
  0x25   :  { %s14579_s20 = sadd.f32 %s2593_s0, %s13652_s12  ;;  %s6842_s0 = smul.f32 11.0, %s13658_s15 }
  0x26   :  { %s15327_s28 = sadd.f32 %s4414_s27, %s13652_s12  ;;  %s6235_s27 = smul.f32 10.0, %s13658_s15 }
  0x27   :  { %s2598_s25 = sadd.f32 %s14579_s20, %s13687_s21 }
  0x28   :  { %s4419_s29 = sadd.f32 %s15327_s28, %s13687_s21 }
  0x29   :  { %s16207_s22 = sadd.f32 %s6842_s0, %s13652_s12 }
  0x2b   :  { %s6851_s24 = sadd.f32 %s16207_s22, %s13658_s15 }
  0xeb   :  { %v165_v15 = vpop.f32.mrb[0].mxu0 }
  0xec   :  { %v166_v16 = vadd.f32 %v165_v15, %v105_v14  ;;  %v10952_v17 = vpop.f32.mrb[1].mxu0 }
  0xed   :  { %v168_v18 = vpop.f32.mrb[2].mxu0 }
  0xee   :  { %13138 = vtanh.f32 %v166_v16  ;;  %v169_v19 = vadd.f32 %v168_v18, %v105_v14  ;;  %v10953_v20 = vpop.f32.mrb[3].mxu0 }
  0xf0   :  { %13140 = vtanh.f32 %v169_v19 }
  0xf8   :  { %v13139_v21 = vpop.eup %13138 }
  0xf9   :  { %v13677_v24 = vmul.f32 %v13139_v21, %v13139_v21 }
  0xfa   :  { %v13141_v22 = vpop.eup %13140 }
  0xfb   :  { %v174_v23 = vpack.c.bf16 %v13141_v22, %v13139_v21  ;;  %v13679_v25 = vmul.f32 %v13141_v22, %v13141_v22 }
  0xfd   :  { %10963 = vmatmul.mubr.msk.bf16.vlgmr.msra.gmra.mrb[0].mxu1 %vm199_vm2, %v174_v23  ;;  %v246_v26 = vpack.c.bf16 %v13679_v25, %v13677_v24 }
  0xfe   :  { %10994 = vmatprep.mubr.msk.bf16.mxu1 %vm13523_vm0, %v13522_v1  ;;  %10987 = vmatpush3.bf16.msra.mxu1 %v13723_v40 }
  0xff   :  { %10988 = vmatprep.subr.bf16.mxu1 %v13522_v1 }
 0x102   :  { %10989 = vmatpush3.bf16.msra.mxu1 %v13729_v41 }
 0x103   :  { %10990 = vmatprep.subr.bf16.mxu1 %v13522_v1 }
 0x106   :  { %10991 = vmatpush3.bf16.msra.mxu1 %v13736_v42 }
 0x107   :  { %10992 = vmatprep.subr.bf16.mxu1 %v13522_v1 }
 0x10a   :  { %10993 = vmatpush3.bf16.msra.mxu1 %v13743_v43 }
 0x10b   :  { %11006 = vmatprep.subr.bf16.mxu1 %v13522_v1 }
 0x1d0   :  { %v237_v28 = vpop.f32.mrb[0].mxu1 }
 0x1d1   :  { %v13698_v30 = vadd.f32 %v13692_v27, %v237_v28  ;;  %v10964_v31 = vpop.f32.mrb[1].mxu1 }
 0x1d2   :  { %v240_v32 = vpop.f32.mrb[2].mxu1 }
 0x1d3   :  { %v248_v33 = vmul.f32 %v13695_v29, %v13698_v30  ;;  %v13703_v34 = vadd.f32 %v13692_v27, %v240_v32  ;;  %v10965_v35 = vpop.f32.mrb[3].mxu1 }
 0x1d5   :  { %v249_v36 = vmul.f32 %v13695_v29, %v13703_v34  ;;  %v250_v37 = vadd.f32 %v248_v33, %v13603_v3 }
 0x1d7   :  { %v251_v38 = vadd.f32 %v249_v36, %v13608_v4 }
 0x1d9   :  { %v252_v39 = vpack.c.bf16 %v251_v38, %v250_v37 }
 0x1db   :  { %10971 = vmatmul.mubr.msk.bf16.vlgmr.msra.gmra.mrb[4].mxu0 %vm127_vm1, %v252_v39 }
 0x1dc   :  { %10975 = vmatpush3.bf16.msra.mxu0 %v13627_v6  ;;  %10982 = vmatprep.mubr.msk.bf16.mxu0 %vm13523_vm0, %v13522_v1 }
 0x1dd   :  { %10976 = vmatprep.subr.bf16.mxu0 %v13522_v1 }
 0x1e0   :  { %10977 = vmatpush3.bf16.msra.mxu0 %v13634_v7 }
 0x1e1   :  { %10978 = vmatprep.subr.bf16.mxu0 %v13522_v1 }
 0x1e4   :  { %10979 = vmatpush3.bf16.msra.mxu0 %v13640_v8 }
 0x1e5   :  { %10980 = vmatprep.subr.bf16.mxu0 %v13522_v1 }
 0x1e8   :  { %10981 = vmatpush3.bf16.msra.mxu0 %v13647_v9 }
 0x1e9   :  { %10998 = vmatprep.subr.bf16.mxu0 %v13522_v1 }
 0x2ae   :  { %v290_v47 = vpop.f32.mrb[4].mxu0 }
 0x2af   :  { %v291_v48 = vadd.f32 %v290_v47, %v109_v46  ;;  %v10972_v49 = vpop.f32.mrb[5].mxu0 }
 0x2b0   :  { %v293_v50 = vpop.f32.mrb[6].mxu0 }
 0x2b1   :  { %13142 = vtanh.f32 %v291_v48  ;;  %v294_v51 = vadd.f32 %v293_v50, %v109_v46  ;;  %v10973_v52 = vpop.f32.mrb[7].mxu0 }
 0x2b3   :  { %13144 = vtanh.f32 %v294_v51 }
 0x2bb   :  { %v13143_v53 = vpop.eup %13142 }
 0x2bc   :  { %v344_v56 = vmul.f32 %v13143_v53, %v13143_v53 }
 0x2bd   :  { %v13145_v54 = vpop.eup %13144 }
 0x2be   :  { %v299_v55 = vpack.c.bf16 %v13145_v54, %v13143_v53  ;;  %v345_v57 = vmul.f32 %v13145_v54, %v13145_v54 }
 0x2c0   :  { %10983 = vmatmul.mubr.msk.bf16.vlgmr.msra.gmra.mrb[8].mxu0 %vm199_vm2, %v299_v55  ;;  %v346_v58 = vpack.c.bf16 %v345_v57, %v344_v56 }
 0x2c1   :  { %10999 = vmatpush3.bf16.msra.mxu0 %v13588_v0  ;;  %11002 = vmatprep.mubr.msk.bf16.mxu0 %vm13523_vm0, %v13522_v1 }
 0x2c2   :  { %10995 = vmatmul.mubr.msk.bf16.vlgmr.msra.gmra.mrb[4].mxu1 %vm199_vm2, %v346_v58  ;;  %11000 = vmatprep.subr.bf16.mxu0 %v13522_v1 }
 0x2c3   :  { %11007 = vmatpush3.bf16.msra.mxu1 %v13627_v6  ;;  %11014 = vmatprep.mubr.msk.bf16.mxu1 %vm13523_vm0, %v13522_v1 }
 0x2c4   :  { %11008 = vmatprep.subr.bf16.mxu1 %v13522_v1 }
 0x2c5   :  { %11001 = vmatpush3.bf16.msra.mxu0 %v13596_v2 }
 0x2c6   :  { %11018 = vmatprep.subr.bf16.mxu0 %v13522_v1 }
 0x2c7   :  { %11009 = vmatpush3.bf16.msra.mxu1 %v13634_v7 }
 0x2c8   :  { %11010 = vmatprep.subr.bf16.mxu1 %v13522_v1 }
 0x2cb   :  { %11011 = vmatpush3.bf16.msra.mxu1 %v13640_v8 }
 0x2cc   :  { %11012 = vmatprep.subr.bf16.mxu1 %v13522_v1 }
 0x2cf   :  { %11013 = vmatpush3.bf16.msra.mxu1 %v13647_v9 }
 0x2d0   :  { %11050 = vmatprep.subr.bf16.mxu1 %v13522_v1 }
 0x393   :  { %v337_v59 = vpop.f32.mrb[8].mxu0 }
 0x394   :  { %v338_v60 = vadd.f32 %v13692_v27, %v337_v59  ;;  %v10984_v61 = vpop.f32.mrb[9].mxu0 }
 0x395   :  { %v340_v62 = vpop.f32.mrb[10].mxu0  ;;  %v13771_v63 = vpop.f32.mrb[4].mxu1 }
 0x396   :  { %v415_v5 = vmul.f32 %v338_v60, %v13695_v29  ;;  %v341_v11 = vadd.f32 %v13692_v27, %v340_v62  ;;  %v10985_v12 = vpop.f32.mrb[11].mxu0  ;;  %v10996_v14 = vpop.f32.mrb[5].mxu1  ;;  %v702_v44 = vmul.f32 2.0, %v338_v60 }
 0x397   :  { %v13775_v15 = vpop.f32.mrb[6].mxu1 }
 0x398   :  { %v416_v16 = vmul.f32 %v341_v11, %v13695_v29  ;;  %v10997_v17 = vpop.f32.mrb[7].mxu1  ;;  %v417_v18 = vadd.f32 %v415_v5, %v13603_v3  ;;  %v703_v47 = vmul.f32 2.0, %v341_v11  ;;  %v704_v57 = vadd.f32 %v702_v44, %v13698_v30 }
 0x399   :  { %v111_v30 = vstv %s110_s13  ;;  %v13869_v44 = vstv %s55_s16  ;;  %s1388_s16 = sadd.f32 %s14129_s11, %s13658_s15 }
 0x39a   :  { %v418_v19 = vadd.f32 %v416_v16, %v13608_v4  ;;  %v705_v59 = vadd.f32 %v703_v47, %v13703_v34  ;;  %v112_v34 = vmul.f32 %v13667_v10, %v111_v30 }
 0x39c   :  { %v419_v20 = vpack.c.bf16 %v418_v19, %v417_v18  ;;  %v113_v17 = vadd.f32 %v13674_v13, %v112_v34 }
 0x39e   :  { %11003 = vmatmul.mubr.msk.bf16.vlgmr.msra.gmra.mrb[12].mxu0 %vm127_vm1, %v419_v20 }
 0x39f   :  { %11019 = vmatpush3.bf16.msra.mxu0 %v13723_v40  ;;  %11026 = vmatprep.mubr.msk.bf16.mxu0 %vm13523_vm0, %v13522_v1 }
 0x3a0   :  { %11020 = vmatprep.subr.bf16.mxu0 %v13522_v1 }
 0x3a3   :  { %11021 = vmatpush3.bf16.msra.mxu0 %v13729_v41 }
 0x3a4   :  { %11022 = vmatprep.subr.bf16.mxu0 %v13522_v1 }
 0x3a7   :  { %11023 = vmatpush3.bf16.msra.mxu0 %v13736_v42 }
 0x3a8   :  { %11024 = vmatprep.subr.bf16.mxu0 %v13522_v1 }
 0x3ab   :  { %11025 = vmatpush3.bf16.msra.mxu0 %v13743_v43 }
 0x3ac   :  { %11030 = vmatprep.subr.bf16.mxu0 %v13522_v1 }
 0x471   :  { %v457_v21 = vpop.f32.mrb[12].mxu0 }
 0x472   :  { %v458_v22 = vadd.f32 %v457_v21, %v109_v46  ;;  %v11004_v23 = vpop.f32.mrb[13].mxu0 }
 0x473   :  { %v460_v28 = vpop.f32.mrb[14].mxu0 }
 0x474   :  { %13146 = vtanh.f32 %v458_v22  ;;  %v461_v31 = vadd.f32 %v460_v28, %v109_v46  ;;  %v11005_v32 = vpop.f32.mrb[15].mxu0  ;;  %v13810_v46 = vstv %s13658_s15 }
 0x476   :  { %13148 = vtanh.f32 %v461_v31 }
 0x47e   :  { %v13147_v33 = vpop.eup %13146 }
 0x47f   :  { %v511_v37 = vmul.f32 %v13147_v33, %v13147_v33 }
 0x480   :  { %v13149_v35 = vpop.eup %13148 }
 0x481   :  { %v466_v36 = vpack.c.bf16 %v13149_v35, %v13147_v33  ;;  %v512_v38 = vmul.f32 %v13149_v35, %v13149_v35 }
 0x483   :  { %11015 = vmatmul.mubr.msk.bf16.vlgmr.msra.gmra.mrb[8].mxu1 %vm199_vm2, %v466_v36  ;;  %v513_v39 = vpack.c.bf16 %v512_v38, %v511_v37 }
 0x484   :  { %11051 = vmatpush3.bf16.msra.mxu1 %v13723_v40  ;;  %11058 = vmatprep.mubr.msk.bf16.mxu1 %vm13523_vm0, %v13522_v1 }
 0x485   :  { %11027 = vmatmul.mubr.msk.bf16.vlgmr.msra.gmra.mrb[16].mxu0 %vm199_vm2, %v513_v39  ;;  %11052 = vmatprep.subr.bf16.mxu1 %v13522_v1 }
 0x486   :  { %11031 = vmatpush3.bf16.msra.mxu0 %v13588_v0  ;;  %11034 = vmatprep.mubr.msk.bf16.mxu0 %vm13523_vm0, %v13522_v1 }
 0x487   :  { %11032 = vmatprep.subr.bf16.mxu0 %v13522_v1 }
 0x488   :  { %11053 = vmatpush3.bf16.msra.mxu1 %v13729_v41 }
 0x489   :  { %11054 = vmatprep.subr.bf16.mxu1 %v13522_v1 }
 0x48a   :  { %11033 = vmatpush3.bf16.msra.mxu0 %v13596_v2 }
 0x48b   :  { %11038 = vmatprep.subr.bf16.mxu0 %v13522_v1 }
 0x48c   :  { %11055 = vmatpush3.bf16.msra.mxu1 %v13736_v42 }
 0x48d   :  { %11056 = vmatprep.subr.bf16.mxu1 %v13522_v1 }
 0x490   :  { %11057 = vmatpush3.bf16.msra.mxu1 %v13743_v43 }
 0x491   :  { %11062 = vmatprep.subr.bf16.mxu1 %v13522_v1 }
 0x556   :  { %v504_v45 = vpop.f32.mrb[8].mxu1 }
 0x557   :  { %v505_v48 = vadd.f32 %v13692_v27, %v504_v45  ;;  %v11016_v49 = vpop.f32.mrb[9].mxu1 }
 0x558   :  { %v507_v50 = vpop.f32.mrb[10].mxu1  ;;  %v13813_v51 = vpop.f32.mrb[16].mxu0 }
 0x559   :  { %v559_v52 = vmul.f32 %v13810_v46, %v505_v48  ;;  %v706_v53 = vmul.f32 2.0, %v505_v48  ;;  %v508_v54 = vadd.f32 %v13692_v27, %v507_v50  ;;  %v11017_v55 = vpop.f32.mrb[11].mxu1  ;;  %v11028_v56 = vpop.f32.mrb[17].mxu0 }
 0x55a   :  { %v13818_v58 = vpop.f32.mrb[18].mxu0 }
 0x55b   :  { %v560_v60 = vmul.f32 %v13810_v46, %v508_v54  ;;  %v707_v61 = vmul.f32 2.0, %v508_v54  ;;  %v11029_v62 = vpop.f32.mrb[19].mxu0  ;;  %v708_v5 = vadd.f32 %v706_v53, %v704_v57  ;;  %v561_v11 = vadd.f32 %v559_v52, %v13603_v3 }
 0x55c   :  { %v717_v54 = vmul.f32 2.0, %v13771_v63 }
 0x55d   :  { %v562_v12 = vadd.f32 %v560_v60, %v13608_v4  ;;  %v709_v14 = vadd.f32 %v707_v61, %v705_v59  ;;  %v764_v60 = vmul.f32 2.0, %v13818_v58 }
 0x55f   :  { %v563_v16 = vpack.c.bf16 %v562_v12, %v561_v11 }
 0x561   :  { %11035 = vmatmul.mubr.msk.bf16.vlgmr.msra.gmra.mrb[20].mxu0 %vm127_vm1, %v563_v16 }
 0x562   :  { %11039 = vmatpush3.bf16.msra.mxu0 %v13627_v6  ;;  %11046 = vmatprep.mubr.msk.bf16.mxu0 %vm13523_vm0, %v13522_v1 }
 0x563   :  { %11040 = vmatprep.subr.bf16.mxu0 %v13522_v1 }
 0x566   :  { %11041 = vmatpush3.bf16.msra.mxu0 %v13634_v7 }
 0x567   :  { %11042 = vmatprep.subr.bf16.mxu0 %v13522_v1 }
 0x56a   :  { %11043 = vmatpush3.bf16.msra.mxu0 %v13640_v8 }
 0x56b   :  { %11044 = vmatprep.subr.bf16.mxu0 %v13522_v1 }
 0x56e   :  { %11045 = vmatpush3.bf16.msra.mxu0 %v13647_v9 }
 0x56f   :  { %11074 = vmatprep.subr.bf16.mxu0 %v13522_v1 }
 0x634   :  { %v601_v18 = vpop.f32.mrb[20].mxu0 }
 0x635   :  { %v602_v19 = vadd.f32 %v601_v18, %v113_v17  ;;  %v11036_v20 = vpop.f32.mrb[21].mxu0 }
 0x636   :  { %v604_v21 = vpop.f32.mrb[22].mxu0 }
 0x637   :  { %13150 = vtanh.f32 %v602_v19  ;;  %v605_v22 = vadd.f32 %v604_v21, %v113_v17  ;;  %v11037_v23 = vpop.f32.mrb[23].mxu0 }
 0x639   :  { %13152 = vtanh.f32 %v605_v22 }
 0x641   :  { %v13151_v28 = vpop.eup %13150 }
 0x642   :  { %v655_v33 = vmul.f32 %v13151_v28, %v13151_v28 }
 0x643   :  { %v13153_v31 = vpop.eup %13152 }
 0x644   :  { %v610_v32 = vpack.c.bf16 %v13153_v31, %v13151_v28  ;;  %v656_v35 = vmul.f32 %v13153_v31, %v13153_v31 }
 0x646   :  { %11047 = vmatmul.mubr.msk.bf16.vlgmr.msra.gmra.mrb[24].mxu0 %vm199_vm2, %v610_v32  ;;  %v657_v36 = vpack.c.bf16 %v656_v35, %v655_v33 }
 0x647   :  { %11075 = vmatpush3.bf16.msra.mxu0 %v13588_v0  ;;  %11078 = vmatprep.mubr.msk.bf16.mxu0 %vm13523_vm0, %v13522_v1 }
 0x648   :  { %11059 = vmatmul.mubr.msk.bf16.vlgmr.msra.gmra.mrb[12].mxu1 %vm199_vm2, %v657_v36  ;;  %11076 = vmatprep.subr.bf16.mxu0 %v13522_v1 }
 0x649   :  { %11063 = vmatpush3.bf16.msra.mxu1 %v13723_v40  ;;  %11070 = vmatprep.mubr.msk.bf16.mxu1 %vm13523_vm0, %v13522_v1 }
 0x64a   :  { %11064 = vmatprep.subr.bf16.mxu1 %v13522_v1 }
 0x64b   :  { %11077 = vmatpush3.bf16.msra.mxu0 %v13596_v2 }
 0x64c   :  { %11082 = vmatprep.subr.bf16.mxu0 %v13522_v1 }
 0x64d   :  { %11065 = vmatpush3.bf16.msra.mxu1 %v13729_v41 }
 0x64e   :  { %11066 = vmatprep.subr.bf16.mxu1 %v13522_v1 }
 0x651   :  { %11067 = vmatpush3.bf16.msra.mxu1 %v13736_v42 }
 0x652   :  { %11068 = vmatprep.subr.bf16.mxu1 %v13522_v1 }
 0x655   :  { %11069 = vmatpush3.bf16.msra.mxu1 %v13743_v43 }
 0x656   :  { %11094 = vmatprep.subr.bf16.mxu1 %v13522_v1 }
 0x658   :  { %11071 = vmatmul.mubr.msk.bf16.vlgmr.msra.gmra.mrb[12].mxu1 %vm199_vm2, %v246_v26 }
 0x659   :  { %11095 = vmatpush3.bf16.msra.mxu1 %v13588_v0  ;;  %11098 = vmatprep.mubr.msk.bf16.mxu1 %vm13523_vm0, %v13522_v1 }
 0x65a   :  { %11096 = vmatprep.subr.bf16.mxu1 %v13522_v1 }
 0x65d   :  { %11097 = vmatpush3.bf16.msra.mxu1 %v13596_v2 }
 0x65e   :  { %11114 = vmatprep.subr.bf16.mxu1 %v13522_v1 }
 0x719   :  { %v648_v37 = vpop.f32.mrb[24].mxu0 }
 0x71a   :  { %v649_v38 = vadd.f32 %v13692_v27, %v648_v37  ;;  %v11048_v39 = vpop.f32.mrb[25].mxu0 }
 0x71b   :  { %v651_v24 = vpop.f32.mrb[26].mxu0 }
 0x71c   :  { %v710_v25 = vadd.f32 %v708_v5, %v649_v38  ;;  %v652_v26 = vadd.f32 %v13692_v27, %v651_v24  ;;  %v11049_v45 = vpop.f32.mrb[27].mxu0 }
 0x71e   :  { %v713_v47 = vmul.f32 %v13869_v44, %v710_v25  ;;  %v711_v48 = vadd.f32 %v709_v14, %v652_v26  ;;  %v778_v25 = vstv %s777_s18 }
 0x71f   :  { %v779_v26 = vmul.f32 %v13667_v10, %v778_v25 }
 0x720   :  { %v714_v49 = vmul.f32 %v13869_v44, %v711_v48  ;;  %v13875_v50 = vadd.f32 %v713_v47, %v13603_v3  ;;  %v718_v3 = vmul.f32 2.0, %v13775_v15  ;;  %v774_v15 = vstv %s13903_s17 }
 0x721   :  { %v780_v45 = vadd.f32 %v13674_v13, %v779_v26 }
 0x722   :  { %v13878_v52 = vadd.f32 %v714_v49, %v13608_v4  ;;  %v763_v4 = vmul.f32 2.0, %v13813_v51  ;;  %v775_v51 = vmul.f32 %v13667_v10, %v774_v15 }
 0x724   :  { %v785_v53 = vpack.c.bf16 %v13878_v52, %v13875_v50  ;;  %v776_v58 = vadd.f32 %v13674_v13, %v775_v51 }
 0x726   :  { %11079 = vmatmul.mubr.msk.bf16.vlgmr.msra.gmra.mrb[28].mxu0 %vm127_vm1, %v785_v53 }
 0x727   :  { %11083 = vmatpush3.bf16.msra.mxu0 %v13627_v6  ;;  %11090 = vmatprep.mubr.msk.bf16.mxu0 %vm13523_vm0, %v13522_v1 }
 0x728   :  { %11084 = vmatprep.subr.bf16.mxu0 %v13522_v1 }
 0x72b   :  { %v756_v55 = vpop.f32.mrb[12].mxu1  ;;  %11085 = vmatpush3.bf16.msra.mxu0 %v13634_v7 }
 0x72c   :  { %v757_v56 = vadd.f32 %v756_v55, %v717_v54  ;;  %v11072_v57 = vpop.f32.mrb[13].mxu1  ;;  %11086 = vmatprep.subr.bf16.mxu0 %v13522_v1 }
 0x72d   :  { %v759_v59 = vpop.f32.mrb[14].mxu1 }
 0x72e   :  { %v13893_v61 = vadd.f32 %v763_v4, %v757_v56  ;;  %v760_v62 = vadd.f32 %v759_v59, %v718_v3  ;;  %v11073_v63 = vpop.f32.mrb[15].mxu1 }
 0x72f   :  { %11087 = vmatpush3.bf16.msra.mxu0 %v13640_v8 }
 0x730   :  { %v13896_v5 = vadd.f32 %v764_v60, %v760_v62  ;;  %11088 = vmatprep.subr.bf16.mxu0 %v13522_v1 }
 0x733   :  { %11089 = vmatpush3.bf16.msra.mxu0 %v13647_v9 }
 0x734   :  { %11102 = vmatprep.subr.bf16.mxu0 %v13522_v1 }
 0x7f9   :  { %v823_v11 = vpop.f32.mrb[28].mxu0 }
 0x7fa   :  { %v824_v12 = vadd.f32 %v823_v11, %v776_v58  ;;  %v11080_v14 = vpop.f32.mrb[29].mxu0 }
 0x7fb   :  { %v826_v16 = vpop.f32.mrb[30].mxu0 }
 0x7fc   :  { %13154 = vtanh.f32 %v824_v12  ;;  %v827_v30 = vadd.f32 %v826_v16, %v776_v58  ;;  %v11081_v34 = vpop.f32.mrb[31].mxu0 }
 0x7fe   :  { %13156 = vtanh.f32 %v827_v30 }
 0x806   :  { %v13155_v17 = vpop.eup %13154 }
 0x807   :  { %v13908_v20 = vmul.f32 %v13155_v17, %v13155_v17 }
 0x808   :  { %v13157_v18 = vpop.eup %13156 }
 0x809   :  { %v832_v19 = vpack.c.bf16 %v13157_v18, %v13155_v17  ;;  %v13910_v21 = vmul.f32 %v13157_v18, %v13157_v18 }
 0x80b   :  { %11091 = vmatmul.mubr.msk.bf16.vlgmr.msra.gmra.mrb[32].mxu0 %vm199_vm2, %v832_v19  ;;  %v879_v22 = vpack.c.bf16 %v13910_v21, %v13908_v20 }
 0x80c   :  { %11103 = vmatpush3.bf16.msra.mxu0 %v13627_v6  ;;  %11110 = vmatprep.mubr.msk.bf16.mxu0 %vm13523_vm0, %v13522_v1 }
 0x80d   :  { %11104 = vmatprep.subr.bf16.mxu0 %v13522_v1 }
 0x810   :  { %11105 = vmatpush3.bf16.msra.mxu0 %v13634_v7 }
 0x811   :  { %11106 = vmatprep.subr.bf16.mxu0 %v13522_v1 }
 0x814   :  { %11107 = vmatpush3.bf16.msra.mxu0 %v13640_v8 }
 0x815   :  { %11108 = vmatprep.subr.bf16.mxu0 %v13522_v1 }
 0x818   :  { %11109 = vmatpush3.bf16.msra.mxu0 %v13647_v9 }
 0x819   :  { %11126 = vmatprep.subr.bf16.mxu0 %v13522_v1 }
 0x8de   :  { %v870_v23 = vpop.f32.mrb[32].mxu0 }
 0x8df   :  { %v13926_v28 = vadd.f32 %v13692_v27, %v870_v23  ;;  %v11092_v31 = vpop.f32.mrb[33].mxu0 }
 0x8e0   :  { %v873_v32 = vpop.f32.mrb[34].mxu0 }
 0x8e1   :  { %v880_v33 = vmul.f32 %v13926_v28, %v13695_v29  ;;  %v13931_v35 = vadd.f32 %v13692_v27, %v873_v32  ;;  %v11093_v36 = vpop.f32.mrb[35].mxu0 }
 0x8e3   :  { %v881_v37 = vmul.f32 %v13931_v35, %v13695_v29  ;;  %v882_v38 = vadd.f32 %v880_v33, %v13875_v50 }
 0x8e5   :  { %v883_v39 = vadd.f32 %v881_v37, %v13878_v52 }
 0x8e7   :  { %v884_v24 = vpack.c.bf16 %v883_v39, %v882_v38 }
 0x8e9   :  { %11099 = vmatmul.mubr.msk.bf16.vlgmr.msra.gmra.mrb[16].mxu1 %vm127_vm1, %v884_v24 }
 0x8ea   :  { %11115 = vmatpush3.bf16.msra.mxu1 %v13723_v40  ;;  %11122 = vmatprep.mubr.msk.bf16.mxu1 %vm13523_vm0, %v13522_v1 }
 0x8eb   :  { %11116 = vmatprep.subr.bf16.mxu1 %v13522_v1 }
 0x8ee   :  { %11117 = vmatpush3.bf16.msra.mxu1 %v13729_v41 }
 0x8ef   :  { %11118 = vmatprep.subr.bf16.mxu1 %v13522_v1 }
 0x8f2   :  { %11119 = vmatpush3.bf16.msra.mxu1 %v13736_v42 }
 0x8f3   :  { %11120 = vmatprep.subr.bf16.mxu1 %v13522_v1 }
 0x8f6   :  { %11121 = vmatpush3.bf16.msra.mxu1 %v13743_v43 }
 0x8f7   :  { %11134 = vmatprep.subr.bf16.mxu1 %v13522_v1 }
 0x9bc   :  { %v922_v47 = vpop.f32.mrb[16].mxu1 }
 0x9bd   :  { %v923_v48 = vadd.f32 %v922_v47, %v780_v45  ;;  %v11100_v49 = vpop.f32.mrb[17].mxu1 }
 0x9be   :  { %v925_v53 = vpop.f32.mrb[18].mxu1 }
 0x9bf   :  { %13158 = vtanh.f32 %v923_v48  ;;  %v926_v54 = vadd.f32 %v925_v53, %v780_v45  ;;  %v11101_v55 = vpop.f32.mrb[19].mxu1 }
 0x9c1   :  { %13160 = vtanh.f32 %v926_v54 }
 0x9c9   :  { %v13159_v3 = vpop.eup %13158 }
 0x9ca   :  { %v976_v57 = vmul.f32 %v13159_v3, %v13159_v3 }
 0x9cb   :  { %v13161_v4 = vpop.eup %13160 }
 0x9cc   :  { %v931_v56 = vpack.c.bf16 %v13161_v4, %v13159_v3  ;;  %v977_v59 = vmul.f32 %v13161_v4, %v13161_v4 }
 0x9ce   :  { %11111 = vmatmul.mubr.msk.bf16.vlgmr.msra.gmra.mrb[36].mxu0 %vm199_vm2, %v931_v56  ;;  %v978_v60 = vpack.c.bf16 %v977_v59, %v976_v57 }
 0x9cf   :  { %11127 = vmatpush3.bf16.msra.mxu0 %v13588_v0  ;;  %11130 = vmatprep.mubr.msk.bf16.mxu0 %vm13523_vm0, %v13522_v1 }
 0x9d0   :  { %11123 = vmatmul.mubr.msk.bf16.vlgmr.msra.gmra.mrb[20].mxu1 %vm199_vm2, %v978_v60  ;;  %11128 = vmatprep.subr.bf16.mxu0 %v13522_v1 }
 0x9d1   :  { %11135 = vmatpush3.bf16.msra.mxu1 %v13627_v6  ;;  %11142 = vmatprep.mubr.msk.bf16.mxu1 %vm13523_vm0, %v13522_v1 }
 0x9d2   :  { %11136 = vmatprep.subr.bf16.mxu1 %v13522_v1 }
 0x9d3   :  { %11129 = vmatpush3.bf16.msra.mxu0 %v13596_v2 }
 0x9d4   :  { %11146 = vmatprep.subr.bf16.mxu0 %v13522_v1 }
 0x9d5   :  { %11137 = vmatpush3.bf16.msra.mxu1 %v13634_v7 }
 0x9d6   :  { %11138 = vmatprep.subr.bf16.mxu1 %v13522_v1 }
 0x9d9   :  { %11139 = vmatpush3.bf16.msra.mxu1 %v13640_v8 }
 0x9da   :  { %11140 = vmatprep.subr.bf16.mxu1 %v13522_v1 }
 0x9dd   :  { %11141 = vmatpush3.bf16.msra.mxu1 %v13647_v9 }
 0x9de   :  { %11158 = vmatprep.subr.bf16.mxu1 %v13522_v1 }
 0xaa1   :  { %v969_v62 = vpop.f32.mrb[36].mxu0 }
 0xaa2   :  { %v970_v63 = vadd.f32 %v13692_v27, %v969_v62  ;;  %v11112_v15 = vpop.f32.mrb[37].mxu0 }
 0xaa3   :  { %v972_v51 = vpop.f32.mrb[38].mxu0  ;;  %v13971_v58 = vpop.f32.mrb[20].mxu1 }
 0xaa4   :  { %v1023_v11 = vmul.f32 %v970_v63, %v13695_v29  ;;  %v973_v12 = vadd.f32 %v13692_v27, %v972_v51  ;;  %v11113_v14 = vpop.f32.mrb[39].mxu0  ;;  %v11124_v16 = vpop.f32.mrb[21].mxu1 }
 0xaa5   :  { %v13975_v30 = vpop.f32.mrb[22].mxu1 }
 0xaa6   :  { %v1024_v34 = vmul.f32 %v973_v12, %v13695_v29  ;;  %v11125_v17 = vpop.f32.mrb[23].mxu1  ;;  %v1025_v18 = vadd.f32 %v1023_v11, %v13875_v50  ;;  %v1310_v53 = vmul.f32 2.0, %v973_v12 }
 0xaa8   :  { %v1026_v19 = vadd.f32 %v1024_v34, %v13878_v52 }
 0xaaa   :  { %v1027_v23 = vpack.c.bf16 %v1026_v19, %v1025_v18 }
 0xaac   :  { %11131 = vmatmul.mubr.msk.bf16.vlgmr.msra.gmra.mrb[40].mxu0 %vm127_vm1, %v1027_v23 }
 0xaad   :  { %11147 = vmatpush3.bf16.msra.mxu0 %v13723_v40  ;;  %11154 = vmatprep.mubr.msk.bf16.mxu0 %vm13523_vm0, %v13522_v1 }
 0xaae   :  { %11148 = vmatprep.subr.bf16.mxu0 %v13522_v1 }
 0xab1   :  { %11149 = vmatpush3.bf16.msra.mxu0 %v13729_v41 }
 0xab2   :  { %11150 = vmatprep.subr.bf16.mxu0 %v13522_v1 }
 0xab5   :  { %11151 = vmatpush3.bf16.msra.mxu0 %v13736_v42 }
 0xab6   :  { %11152 = vmatprep.subr.bf16.mxu0 %v13522_v1 }
 0xab9   :  { %11153 = vmatpush3.bf16.msra.mxu0 %v13743_v43 }
 0xaba   :  { %11166 = vmatprep.subr.bf16.mxu0 %v13522_v1 }
 0xb7f   :  { %v1065_v31 = vpop.f32.mrb[40].mxu0 }
 0xb80   :  { %v1066_v32 = vadd.f32 %v1065_v31, %v780_v45  ;;  %v11132_v33 = vpop.f32.mrb[41].mxu0 }
 0xb81   :  { %v1068_v36 = vpop.f32.mrb[42].mxu0 }
 0xb82   :  { %13162 = vtanh.f32 %v1066_v32  ;;  %v1069_v37 = vadd.f32 %v1068_v36, %v780_v45  ;;  %v11133_v38 = vpop.f32.mrb[43].mxu0  ;;  %v1309_v45 = vmul.f32 2.0, %v970_v63  ;;  %v1312_v63 = vadd.f32 %v1310_v53, %v13931_v35 }
 0xb84   :  { %13164 = vtanh.f32 %v1069_v37 }
 0xb8c   :  { %v13163_v39 = vpop.eup %13162 }
 0xb8d   :  { %v1119_v26 = vmul.f32 %v13163_v39, %v13163_v39 }
 0xb8e   :  { %v13165_v24 = vpop.eup %13164 }
 0xb8f   :  { %v1074_v25 = vpack.c.bf16 %v13165_v24, %v13163_v39  ;;  %v1120_v47 = vmul.f32 %v13165_v24, %v13165_v24 }
 0xb91   :  { %11143 = vmatmul.mubr.msk.bf16.vlgmr.msra.gmra.mrb[24].mxu1 %vm199_vm2, %v1074_v25  ;;  %v1121_v48 = vpack.c.bf16 %v1120_v47, %v1119_v26 }
 0xb92   :  { %11159 = vmatpush3.bf16.msra.mxu1 %v13588_v0  ;;  %11162 = vmatprep.mubr.msk.bf16.mxu1 %vm13523_vm0, %v13522_v1 }
 0xb93   :  { %11155 = vmatmul.mubr.msk.bf16.vlgmr.msra.gmra.mrb[44].mxu0 %vm199_vm2, %v1121_v48  ;;  %11160 = vmatprep.subr.bf16.mxu1 %v13522_v1 }
 0xb94   :  { %11167 = vmatpush3.bf16.msra.mxu0 %v13627_v6  ;;  %11174 = vmatprep.mubr.msk.bf16.mxu0 %vm13523_vm0, %v13522_v1 }
 0xb95   :  { %11168 = vmatprep.subr.bf16.mxu0 %v13522_v1 }
 0xb96   :  { %11161 = vmatpush3.bf16.msra.mxu1 %v13596_v2 }
 0xb97   :  { %11178 = vmatprep.subr.bf16.mxu1 %v13522_v1 }
 0xb98   :  { %11169 = vmatpush3.bf16.msra.mxu0 %v13634_v7 }
 0xb99   :  { %11170 = vmatprep.subr.bf16.mxu0 %v13522_v1 }
 0xb9c   :  { %11171 = vmatpush3.bf16.msra.mxu0 %v13640_v8 }
 0xb9d   :  { %11172 = vmatprep.subr.bf16.mxu0 %v13522_v1 }
 0xba0   :  { %11173 = vmatpush3.bf16.msra.mxu0 %v13647_v9  ;;  %v1311_v9 = vadd.f32 %v1309_v45, %v13926_v28  ;;  %v782_v28 = vstv %s781_s19 }
 0xba1   :  { %11202 = vmatprep.subr.bf16.mxu0 %v13522_v1  ;;  %v783_v35 = vmul.f32 %v13667_v10, %v782_v28 }
 0xba3   :  { %v784_v18 = vadd.f32 %v13674_v13, %v783_v35  ;;  %v14141_v35 = vld [vmem:[%s17347_s6] ss:$0 sm:$0xff] }
 0xc64   :  { %v1112_v49 = vpop.f32.mrb[24].mxu1 }
 0xc65   :  { %v1113_v54 = vadd.f32 %v13692_v27, %v1112_v49  ;;  %v11144_v55 = vpop.f32.mrb[25].mxu1 }
 0xc66   :  { %v1115_v3 = vpop.f32.mrb[26].mxu1  ;;  %v14010_v4 = vpop.f32.mrb[44].mxu0 }
 0xc67   :  { %v1166_v56 = vmul.f32 %v1113_v54, %v13810_v46  ;;  %v1313_v57 = vmul.f32 2.0, %v1113_v54  ;;  %v1116_v8 = vadd.f32 %v13692_v27, %v1115_v3  ;;  %v11145_v59 = vpop.f32.mrb[27].mxu1  ;;  %v11156_v60 = vpop.f32.mrb[45].mxu0 }
 0xc68   :  { %v14015_v62 = vpop.f32.mrb[46].mxu0 }
 0xc69   :  { %v1167_v15 = vmul.f32 %v1116_v8, %v13810_v46  ;;  %v1314_v51 = vmul.f32 2.0, %v1116_v8  ;;  %v11157_v11 = vpop.f32.mrb[47].mxu0  ;;  %v1315_v12 = vadd.f32 %v1313_v57, %v1311_v9  ;;  %v1168_v14 = vadd.f32 %v1166_v56, %v13875_v50 }
 0xc6a   :  { %v1369_v57 = vmul.f32 2.0, %v14010_v4  ;;  %v100_v4 = vld [vmem:[%s17343_s2 + $0x8] sm:$0xff] }
 0xc6b   :  { %v1169_v16 = vadd.f32 %v1167_v15, %v13878_v52  ;;  %v1316_v34 = vadd.f32 %v1314_v51, %v1312_v63  ;;  %v14110_v63 = vld [vmem:[%s17345_s4 + $0x10] sm:$0xff]  }
 0xc6d   :  { %v1170_v17 = vpack.c.bf16 %v1169_v16, %v1168_v14  ;;  %v14121_v14 = vld [vmem:[%s17345_s4 + $0x18] sm:$0xff]  }
 0xc6f   :  { %11163 = vmatmul.mubr.msk.bf16.vlgmr.msra.gmra.mrb[28].mxu1 %vm127_vm1, %v1170_v17  ;;  %v14135_v17 = vld [vmem:[%s17348_s7] ss:$0 sm:$0xff] }
 0xc70   :  { %11179 = vmatpush3.bf16.msra.mxu1 %v13723_v40  ;;  %11186 = vmatprep.mubr.msk.bf16.mxu1 %vm13523_vm0, %v13522_v1 }
 0xc71   :  { %11180 = vmatprep.subr.bf16.mxu1 %v13522_v1 }
 0xc74   :  { %11181 = vmatpush3.bf16.msra.mxu1 %v13729_v41 }
 0xc75   :  { %11182 = vmatprep.subr.bf16.mxu1 %v13522_v1 }
 0xc78   :  { %11183 = vmatpush3.bf16.msra.mxu1 %v13736_v42 }
 0xc79   :  { %11184 = vmatprep.subr.bf16.mxu1 %v13522_v1 }
 0xc7c   :  { %11185 = vmatpush3.bf16.msra.mxu1 %v13743_v43 }
 0xc7d   :  { %11190 = vmatprep.subr.bf16.mxu1 %v13522_v1 }
 0xd42   :  { %v1208_v19 = vpop.f32.mrb[28].mxu1 }
 0xd43   :  { %v1209_v23 = vadd.f32 %v1208_v19, %v784_v18  ;;  %v11164_v31 = vpop.f32.mrb[29].mxu1 }
 0xd44   :  { %v1211_v32 = vpop.f32.mrb[30].mxu1 }
 0xd45   :  { %13166 = vtanh.f32 %v1209_v23  ;;  %v1212_v33 = vadd.f32 %v1211_v32, %v784_v18  ;;  %v11165_v36 = vpop.f32.mrb[31].mxu1 }
 0xd47   :  { %13168 = vtanh.f32 %v1212_v33 }
 0xd4f   :  { %v13167_v37 = vpop.eup %13166 }
 0xd50   :  { %v1262_v24 = vmul.f32 %v13167_v37, %v13167_v37 }
 0xd51   :  { %v13169_v38 = vpop.eup %13168 }
 0xd52   :  { %v1217_v39 = vpack.c.bf16 %v13169_v38, %v13167_v37  ;;  %v1263_v25 = vmul.f32 %v13169_v38, %v13169_v38 }
 0xd54   :  { %11175 = vmatmul.mubr.msk.bf16.vlgmr.msra.gmra.mrb[48].mxu0 %vm199_vm2, %v1217_v39  ;;  %v1264_v26 = vpack.c.bf16 %v1263_v25, %v1262_v24 }
 0xd55   :  { %11203 = vmatpush3.bf16.msra.mxu0 %v13588_v0  ;;  %11206 = vmatprep.mubr.msk.bf16.mxu0 %vm13523_vm0, %v13522_v1  ;;  %v14061_v0 = vld [vmem:[%s17344_s3] sm:$0xff]  }
 0xd56   :  { %11187 = vmatmul.mubr.msk.bf16.vlgmr.msra.gmra.mrb[32].mxu1 %vm199_vm2, %v1264_v26  ;;  %11204 = vmatprep.subr.bf16.mxu0 %v13522_v1 }
 0xd57   :  { %11191 = vmatpush3.bf16.msra.mxu1 %v13723_v40  ;;  %11198 = vmatprep.mubr.msk.bf16.mxu1 %vm13523_vm0, %v13522_v1 }
 0xd58   :  { %11192 = vmatprep.subr.bf16.mxu1 %v13522_v1 }
 0xd59   :  { %11205 = vmatpush3.bf16.msra.mxu0 %v13596_v2  ;;  %v14070_v2 = vld [vmem:[%s17344_s3 + $0x8] sm:$0xff]  }
 0xd5a   :  { %11210 = vmatprep.subr.bf16.mxu0 %v13522_v1 }
 0xd5b   :  { %11193 = vmatpush3.bf16.msra.mxu1 %v13729_v41 }
 0xd5c   :  { %11194 = vmatprep.subr.bf16.mxu1 %v13522_v1 }
 0xd5f   :  { %11195 = vmatpush3.bf16.msra.mxu1 %v13736_v42 }
 0xd60   :  { %11196 = vmatprep.subr.bf16.mxu1 %v13522_v1 }
 0xd63   :  { %11197 = vmatpush3.bf16.msra.mxu1 %v13743_v43 }
 0xd64   :  { %11222 = vmatprep.subr.bf16.mxu1 %v13522_v1 }
 0xd66   :  { %11199 = vmatmul.mubr.msk.bf16.vlgmr.msra.gmra.mrb[32].mxu1 %vm199_vm2, %v879_v22 }
 0xd67   :  { %11223 = vmatpush3.bf16.msra.mxu1 %v14061_v0  ;;  %11226 = vmatprep.mubr.msk.bf16.mxu1 %vm13523_vm0, %v13522_v1 }
 0xd68   :  { %11224 = vmatprep.subr.bf16.mxu1 %v13522_v1 }
 0xd6b   :  { %11225 = vmatpush3.bf16.msra.mxu1 %v14070_v2 }
 0xd6c   :  { %11242 = vmatprep.subr.bf16.mxu1 %v13522_v1 }
 0xe27   :  { %v1255_v10 = vpop.f32.mrb[48].mxu0 }
 0xe28   :  { %v1256_v13 = vadd.f32 %v13692_v27, %v1255_v10  ;;  %v11176_v20 = vpop.f32.mrb[49].mxu0  ;;  %v14154_v10 = vld [vmem:[%s17345_s4] sm:$0xff]  }
 0xe29   :  { %v1258_v21 = vpop.f32.mrb[50].mxu0 }
 0xe2a   :  { %v1317_v22 = vadd.f32 %v1315_v12, %v1256_v13  ;;  %v1259_v47 = vadd.f32 %v13692_v27, %v1258_v21  ;;  %v11177_v48 = vpop.f32.mrb[51].mxu0  ;;  %v1323_v27 = vmul.f32 2.0, %v13971_v58  ;;  %v770_v58 = vmul.f32 %v13896_v5, %v13869_v44  ;;  %v14163_v13 = vld [vmem:[%s17345_s4 + $0x8] sm:$0xff]   ;;  %v14174_v21 = vld [vmem:[%s17349_s8] ss:$0 sm:$0xff] }
 0xe2c   :  { %v1319_v45 = vmul.f32 %v1317_v22, %v13869_v44  ;;  %v1318_v49 = vadd.f32 %v1316_v34, %v1259_v47  ;;  %v772_v51 = vadd.f32 %v770_v58, %v100_v4  ;;  %v1381_v34 = vstv %s14129_s11  ;;  %s1986_s11 = smul.f32 3.0, %s13658_s15 }
 0xe2d   :  { %v1382_v28 = vmul.f32 %v14135_v17, %v1381_v34 }
 0xe2e   :  { %v1320_v53 = vmul.f32 %v1318_v49, %v13869_v44  ;;  %v14079_v54 = vadd.f32 %v1319_v45, %v13875_v50  ;;  %v769_v50 = vmul.f32 %v13893_v61, %v13869_v44  ;;  %s14378_s17 = sadd.f32 %s1986_s11, %s13652_s12  ;;  %s3807_s11 = smul.f32 6.0, %s13658_s15 }
 0xe2f   :  { %v1383_v18 = vadd.f32 %v14141_v35, %v1382_v28 }
 0xe30   :  { %v14082_v55 = vadd.f32 %v1320_v53, %v13878_v52  ;;  %v1324_v52 = vmul.f32 2.0, %v13975_v30  ;;  %s1991_s18 = sadd.f32 %s14378_s17, %s13687_s21 }
 0xe31   :  { %s1995_s19 = sadd.f32 %s14378_s17, %s13658_s15 }
 0xe32   :  { %v1392_v3 = vpack.c.bf16 %v14082_v55, %v14079_v54 }
 0xe34   :  { %11207 = vmatmul.mubr.msk.bf16.vlgmr.msra.gmra.mrb[52].mxu0 %vm127_vm1, %v1392_v3 }
 0xe35   :  { %11211 = vmatpush3.bf16.msra.mxu0 %v13627_v6  ;;  %11218 = vmatprep.mubr.msk.bf16.mxu0 %vm13523_vm0, %v13522_v1  ;;  %v99_v6 = vld [vmem:[%s17343_s2] sm:$0xff]  ;;  %s2602_s2 = sadd.f32 %s14579_s20, %s13658_s15 }
 0xe36   :  { %11212 = vmatprep.subr.bf16.mxu0 %v13522_v1  ;;  %v771_v15 = vadd.f32 %v769_v50, %v99_v6 }
 0xe39   :  { %v1362_v56 = vpop.f32.mrb[32].mxu1  ;;  %11213 = vmatpush3.bf16.msra.mxu0 %v13634_v7  ;;  %v1370_v7 = vmul.f32 2.0, %v14015_v62 }
 0xe3a   :  { %v1363_v8 = vadd.f32 %v1362_v56, %v1323_v27  ;;  %v11200_v59 = vpop.f32.mrb[33].mxu1  ;;  %11214 = vmatprep.subr.bf16.mxu0 %v13522_v1 }
 0xe3b   :  { %v1365_v60 = vpop.f32.mrb[34].mxu1 }
 0xe3c   :  { %v1371_v9 = vadd.f32 %v1369_v57, %v1363_v8  ;;  %v1366_v61 = vadd.f32 %v1365_v60, %v1324_v52  ;;  %v11201_v30 = vpop.f32.mrb[35].mxu1  ;;  %v1385_v52 = vstv %s1384_s1 }
 0xe3d   :  { %11215 = vmatpush3.bf16.msra.mxu0 %v14110_v63 }
 0xe3e   :  { %v1375_v5 = vmul.f32 %v1371_v9, %v13869_v44  ;;  %v1372_v62 = vadd.f32 %v1370_v7, %v1366_v61  ;;  %11216 = vmatprep.subr.bf16.mxu0 %v13522_v1 }
 0xe40   :  { %v14115_v11 = vadd.f32 %v1375_v5, %v771_v15  ;;  %v1376_v12 = vmul.f32 %v1372_v62, %v13869_v44 }
 0xe41   :  { %11217 = vmatpush3.bf16.msra.mxu0 %v14121_v14 }
 0xe42   :  { %v14124_v16 = vadd.f32 %v1376_v12, %v772_v51  ;;  %11230 = vmatprep.subr.bf16.mxu0 %v13522_v1 }
 0xf07   :  { %v1430_v19 = vpop.f32.mrb[52].mxu0 }
 0xf08   :  { %v1431_v23 = vadd.f32 %v1430_v19, %v1383_v18  ;;  %v11208_v31 = vpop.f32.mrb[53].mxu0 }
 0xf09   :  { %v1433_v32 = vpop.f32.mrb[54].mxu0 }
 0xf0a   :  { %13170 = vtanh.f32 %v1431_v23  ;;  %v1434_v33 = vadd.f32 %v1433_v32, %v1383_v18  ;;  %v11209_v36 = vpop.f32.mrb[55].mxu0 }
 0xf0c   :  { %13172 = vtanh.f32 %v1434_v33 }
 0xf14   :  { %v13171_v37 = vpop.eup %13170 }
 0xf15   :  { %v14144_v24 = vmul.f32 %v13171_v37, %v13171_v37 }
 0xf16   :  { %v13173_v38 = vpop.eup %13172 }
 0xf17   :  { %v1439_v39 = vpack.c.bf16 %v13173_v38, %v13171_v37  ;;  %v14146_v25 = vmul.f32 %v13173_v38, %v13173_v38  ;;  %v14239_v37 = vld [vmem:[%s17346_s5] sm:$0xff]   ;;  %v14248_v38 = vld [vmem:[%s17346_s5 + $0x8] sm:$0xff]  }
 0xf19   :  { %11219 = vmatmul.mubr.msk.bf16.vlgmr.msra.gmra.mrb[56].mxu0 %vm199_vm2, %v1439_v39  ;;  %v1486_v26 = vpack.c.bf16 %v14146_v25, %v14144_v24  ;;  %v14255_v39 = vld [vmem:[%s17346_s5 + $0x10] sm:$0xff]  }
 0xf1a   :  { %11231 = vmatpush3.bf16.msra.mxu0 %v14154_v10  ;;  %11238 = vmatprep.mubr.msk.bf16.mxu0 %vm13523_vm0, %v13522_v1 }
 0xf1b   :  { %11232 = vmatprep.subr.bf16.mxu0 %v13522_v1 }
 0xf1e   :  { %11233 = vmatpush3.bf16.msra.mxu0 %v14163_v13 }
 0xf1f   :  { %11234 = vmatprep.subr.bf16.mxu0 %v13522_v1 }
 0xf22   :  { %11235 = vmatpush3.bf16.msra.mxu0 %v14110_v63 }
 0xf23   :  { %11236 = vmatprep.subr.bf16.mxu0 %v13522_v1 }
 0xf26   :  { %11237 = vmatpush3.bf16.msra.mxu0 %v14121_v14 }
 0xf27   :  { %11254 = vmatprep.subr.bf16.mxu0 %v13522_v1 }
 0xfec   :  { %v1477_v20 = vpop.f32.mrb[56].mxu0 }
 0xfed   :  { %v14177_v22 = vadd.f32 %v14174_v21, %v1477_v20  ;;  %v11220_v47 = vpop.f32.mrb[57].mxu0  ;;  %v14262_v20 = vld [vmem:[%s17346_s5 + $0x18] sm:$0xff]  }
 0xfee   :  { %v1480_v48 = vpop.f32.mrb[58].mxu0 }
 0xfef   :  { %v1487_v45 = vmul.f32 %v14177_v22, %v13695_v29  ;;  %v14182_v49 = vadd.f32 %v14174_v21, %v1480_v48  ;;  %v11221_v53 = vpop.f32.mrb[59].mxu0 }
 0xff1   :  { %v1488_v3 = vmul.f32 %v14182_v49, %v13695_v29  ;;  %v1489_v27 = vadd.f32 %v1487_v45, %v14079_v54 }
 0xff3   :  { %v1490_v56 = vadd.f32 %v1488_v3, %v14082_v55 }
 0xff5   :  { %v1491_v50 = vpack.c.bf16 %v1490_v56, %v1489_v27 }
 0xff7   :  { %11227 = vmatmul.mubr.msk.bf16.vlgmr.msra.gmra.mrb[36].mxu1 %vm127_vm1, %v1491_v50 }
 0xff8   :  { %11243 = vmatpush3.bf16.msra.mxu1 %v13723_v40  ;;  %11250 = vmatprep.mubr.msk.bf16.mxu1 %vm13523_vm0, %v13522_v1  ;;  %v1386_v40 = vmul.f32 %v14135_v17, %v1385_v52 }
 0xff9   :  { %11244 = vmatprep.subr.bf16.mxu1 %v13522_v1 }
 0xffa   :  { %v14203_v57 = vadd.f32 %v14141_v35, %v1386_v40 }
 0xffc   :  { %11245 = vmatpush3.bf16.msra.mxu1 %v13729_v41 }
 0xffd   :  { %11246 = vmatprep.subr.bf16.mxu1 %v13522_v1 }
0x1000   :  { %11247 = vmatpush3.bf16.msra.mxu1 %v13736_v42 }
0x1001   :  { %11248 = vmatprep.subr.bf16.mxu1 %v13522_v1 }
0x1004   :  { %11249 = vmatpush3.bf16.msra.mxu1 %v13743_v43 }
0x1005   :  { %11262 = vmatprep.subr.bf16.mxu1 %v13522_v1 }
0x10ca   :  { %v1529_v8 = vpop.f32.mrb[36].mxu1 }
0x10cb   :  { %v1530_v41 = vadd.f32 %v1529_v8, %v14203_v57  ;;  %v11228_v59 = vpop.f32.mrb[37].mxu1 }
0x10cc   :  { %v1532_v6 = vpop.f32.mrb[38].mxu1 }
0x10cd   :  { %13174 = vtanh.f32 %v1530_v41  ;;  %v1533_v42 = vadd.f32 %v1532_v6, %v14203_v57  ;;  %v11229_v60 = vpop.f32.mrb[39].mxu1 }
0x10cf   :  { %13176 = vtanh.f32 %v1533_v42 }
0x10d7   :  { %v13175_v43 = vpop.eup %13174 }
0x10d8   :  { %v1583_v9 = vmul.f32 %v13175_v43, %v13175_v43 }
0x10d9   :  { %v13177_v58 = vpop.eup %13176 }
0x10da   :  { %v1538_v7 = vpack.c.bf16 %v13177_v58, %v13175_v43  ;;  %v1584_v61 = vmul.f32 %v13177_v58, %v13177_v58 }
0x10dc   :  { %11239 = vmatmul.mubr.msk.bf16.vlgmr.msra.gmra.mrb[60].mxu0 %vm199_vm2, %v1538_v7  ;;  %v1585_v30 = vpack.c.bf16 %v1584_v61, %v1583_v9 }
0x10dd   :  { %11255 = vmatpush3.bf16.msra.mxu0 %v14061_v0  ;;  %11258 = vmatprep.mubr.msk.bf16.mxu0 %vm13523_vm0, %v13522_v1 }
0x10de   :  { %11251 = vmatmul.mubr.msk.bf16.vlgmr.msra.gmra.mrb[40].mxu1 %vm199_vm2, %v1585_v30  ;;  %11256 = vmatprep.subr.bf16.mxu0 %v13522_v1 }
0x10df   :  { %11263 = vmatpush3.bf16.msra.mxu1 %v14154_v10  ;;  %11270 = vmatprep.mubr.msk.bf16.mxu1 %vm13523_vm0, %v13522_v1 }
0x10e0   :  { %11264 = vmatprep.subr.bf16.mxu1 %v13522_v1 }
0x10e1   :  { %11257 = vmatpush3.bf16.msra.mxu0 %v14070_v2 }
0x10e2   :  { %11274 = vmatprep.subr.bf16.mxu0 %v13522_v1 }
0x10e3   :  { %11265 = vmatpush3.bf16.msra.mxu1 %v14163_v13 }
0x10e4   :  { %11266 = vmatprep.subr.bf16.mxu1 %v13522_v1 }
0x10e7   :  { %11267 = vmatpush3.bf16.msra.mxu1 %v14110_v63 }
0x10e8   :  { %11268 = vmatprep.subr.bf16.mxu1 %v13522_v1 }
0x10eb   :  { %11269 = vmatpush3.bf16.msra.mxu1 %v14121_v14 }
0x10ec   :  { %11286 = vmatprep.subr.bf16.mxu1 %v13522_v1 }
0x11af   :  { %v1576_v4 = vpop.f32.mrb[60].mxu0 }
0x11b0   :  { %v1577_v15 = vadd.f32 %v14174_v21, %v1576_v4  ;;  %v11240_v5 = vpop.f32.mrb[61].mxu0 }
0x11b1   :  { %v1579_v62 = vpop.f32.mrb[62].mxu0  ;;  %v14226_v51 = vpop.f32.mrb[40].mxu1 }
0x11b2   :  { %v1630_v12 = vmul.f32 %v1577_v15, %v13695_v29  ;;  %v1580_v34 = vadd.f32 %v14174_v21, %v1579_v62  ;;  %v11241_v28 = vpop.f32.mrb[63].mxu0  ;;  %v11252_v18 = vpop.f32.mrb[41].mxu1 }
0x11b3   :  { %v14230_v19 = vpop.f32.mrb[42].mxu1 }
0x11b4   :  { %v1631_v23 = vmul.f32 %v1580_v34, %v13695_v29  ;;  %v11253_v31 = vpop.f32.mrb[43].mxu1  ;;  %v1632_v32 = vadd.f32 %v1630_v12, %v14079_v54  ;;  %v1917_v6 = vmul.f32 2.0, %v1580_v34 }
0x11b6   :  { %v1633_v33 = vadd.f32 %v1631_v23, %v14082_v55 }
0x11b8   :  { %v1634_v36 = vpack.c.bf16 %v1633_v33, %v1632_v32 }
0x11ba   :  { %11259 = vmatmul.mubr.msk.bf16.vlgmr.msra.gmra.mrb[64].mxu0 %vm127_vm1, %v1634_v36 }
0x11bb   :  { %11275 = vmatpush3.bf16.msra.mxu0 %v14239_v37  ;;  %11282 = vmatprep.mubr.msk.bf16.mxu0 %vm13523_vm0, %v13522_v1 }
0x11bc   :  { %11276 = vmatprep.subr.bf16.mxu0 %v13522_v1 }
0x11bf   :  { %11277 = vmatpush3.bf16.msra.mxu0 %v14248_v38 }
0x11c0   :  { %11278 = vmatprep.subr.bf16.mxu0 %v13522_v1 }
0x11c3   :  { %11279 = vmatpush3.bf16.msra.mxu0 %v14255_v39 }
0x11c4   :  { %11280 = vmatprep.subr.bf16.mxu0 %v13522_v1 }
0x11c7   :  { %11281 = vmatpush3.bf16.msra.mxu0 %v14262_v20 }
0x11c8   :  { %11294 = vmatprep.subr.bf16.mxu0 %v13522_v1 }
0x128d   :  { %v1672_v47 = vpop.f32.mrb[64].mxu0 }
0x128e   :  { %v1673_v48 = vadd.f32 %v1672_v47, %v14203_v57  ;;  %v11260_v45 = vpop.f32.mrb[65].mxu0 }
0x128f   :  { %v1675_v53 = vpop.f32.mrb[66].mxu0 }
0x1290   :  { %13178 = vtanh.f32 %v1673_v48  ;;  %v1676_v3 = vadd.f32 %v1675_v53, %v14203_v57  ;;  %v11261_v27 = vpop.f32.mrb[67].mxu0  ;;  %v1916_v57 = vmul.f32 2.0, %v1577_v15  ;;  %v1919_v15 = vadd.f32 %v1917_v6, %v14182_v49 }
0x1292   :  { %13180 = vtanh.f32 %v1676_v3  ;;  %v1918_v5 = vadd.f32 %v1916_v57, %v14177_v22  ;;  %v1389_v22 = vstv %s1388_s16 }
0x1293   :  { %v1390_v49 = vmul.f32 %v14135_v17, %v1389_v22 }
0x1295   :  { %v1391_v36 = vadd.f32 %v14141_v35, %v1390_v49 }
0x129a   :  { %v13179_v56 = vpop.eup %13178 }
0x129b   :  { %v1726_v40 = vmul.f32 %v13179_v56, %v13179_v56 }
0x129c   :  { %v13181_v50 = vpop.eup %13180 }
0x129d   :  { %v1681_v52 = vpack.c.bf16 %v13181_v50, %v13179_v56  ;;  %v1727_v8 = vmul.f32 %v13181_v50, %v13181_v50 }
0x129f   :  { %11271 = vmatmul.mubr.msk.bf16.vlgmr.msra.gmra.mrb[44].mxu1 %vm199_vm2, %v1681_v52  ;;  %v1728_v41 = vpack.c.bf16 %v1727_v8, %v1726_v40 }
0x12a0   :  { %11287 = vmatpush3.bf16.msra.mxu1 %v14061_v0  ;;  %11290 = vmatprep.mubr.msk.bf16.mxu1 %vm13523_vm0, %v13522_v1 }
0x12a1   :  { %11283 = vmatmul.mubr.msk.bf16.vlgmr.msra.gmra.mrb[68].mxu0 %vm199_vm2, %v1728_v41  ;;  %11288 = vmatprep.subr.bf16.mxu1 %v13522_v1 }
0x12a2   :  { %11295 = vmatpush3.bf16.msra.mxu0 %v14154_v10  ;;  %11302 = vmatprep.mubr.msk.bf16.mxu0 %vm13523_vm0, %v13522_v1 }
0x12a3   :  { %11296 = vmatprep.subr.bf16.mxu0 %v13522_v1 }
0x12a4   :  { %11289 = vmatpush3.bf16.msra.mxu1 %v14070_v2 }
0x12a5   :  { %11306 = vmatprep.subr.bf16.mxu1 %v13522_v1 }
0x12a6   :  { %11297 = vmatpush3.bf16.msra.mxu0 %v14163_v13 }
0x12a7   :  { %11298 = vmatprep.subr.bf16.mxu0 %v13522_v1 }
0x12aa   :  { %11299 = vmatpush3.bf16.msra.mxu0 %v14110_v63 }
0x12ab   :  { %11300 = vmatprep.subr.bf16.mxu0 %v13522_v1 }
0x12ae   :  { %11301 = vmatpush3.bf16.msra.mxu0 %v14121_v14 }
0x12af   :  { %11330 = vmatprep.subr.bf16.mxu0 %v13522_v1 }
0x1372   :  { %v1719_v59 = vpop.f32.mrb[44].mxu1 }
0x1373   :  { %v1720_v42 = vadd.f32 %v14174_v21, %v1719_v59  ;;  %v11272_v60 = vpop.f32.mrb[45].mxu1 }
0x1374   :  { %v1722_v43 = vpop.f32.mrb[46].mxu1  ;;  %v14287_v58 = vpop.f32.mrb[68].mxu0 }
0x1375   :  { %v1773_v7 = vmul.f32 %v1720_v42, %v13810_v46  ;;  %v1920_v9 = vmul.f32 2.0, %v1720_v42  ;;  %v1723_v61 = vadd.f32 %v14174_v21, %v1722_v43  ;;  %v11273_v30 = vpop.f32.mrb[47].mxu1  ;;  %v11284_v4 = vpop.f32.mrb[69].mxu0 }
0x1376   :  { %v14292_v62 = vpop.f32.mrb[70].mxu0  ;;  %v1930_v4 = vmul.f32 2.0, %v14226_v51 }
0x1377   :  { %v1774_v12 = vmul.f32 %v1723_v61, %v13810_v46  ;;  %v1921_v34 = vmul.f32 2.0, %v1723_v61  ;;  %v11285_v28 = vpop.f32.mrb[71].mxu0  ;;  %v1922_v18 = vadd.f32 %v1920_v9, %v1918_v5  ;;  %v1775_v23 = vadd.f32 %v1773_v7, %v14079_v54 }
0x1378   :  { %v1977_v28 = vmul.f32 2.0, %v14292_v62 }
0x1379   :  { %v1776_v31 = vadd.f32 %v1774_v12, %v14082_v55  ;;  %v1923_v32 = vadd.f32 %v1921_v34, %v1919_v15 }
0x137b   :  { %v1777_v33 = vpack.c.bf16 %v1776_v31, %v1775_v23 }
0x137d   :  { %11291 = vmatmul.mubr.msk.bf16.vlgmr.msra.gmra.mrb[48].mxu1 %vm127_vm1, %v1777_v33  ;;  %v1988_v33 = vstv %s14378_s17  ;;  %s15052_s17 = sadd.f32 %s3807_s11, %s13652_s12 }
0x137e   :  { %11307 = vmatpush3.bf16.msra.mxu1 %v14239_v37  ;;  %11314 = vmatprep.mubr.msk.bf16.mxu1 %vm13523_vm0, %v13522_v1  ;;  %v1989_v22 = vmul.f32 %v14135_v17, %v1988_v33 }
0x137f   :  { %11308 = vmatprep.subr.bf16.mxu1 %v13522_v1 }
0x1380   :  { %v1990_v49 = vadd.f32 %v14141_v35, %v1989_v22 }
0x1382   :  { %11309 = vmatpush3.bf16.msra.mxu1 %v14248_v38 }
0x1383   :  { %11310 = vmatprep.subr.bf16.mxu1 %v13522_v1 }
0x1386   :  { %11311 = vmatpush3.bf16.msra.mxu1 %v14255_v39 }
0x1387   :  { %11312 = vmatprep.subr.bf16.mxu1 %v13522_v1 }
0x138a   :  { %11313 = vmatpush3.bf16.msra.mxu1 %v14262_v20 }
0x138b   :  { %11318 = vmatprep.subr.bf16.mxu1 %v13522_v1 }
0x1450   :  { %v1815_v47 = vpop.f32.mrb[48].mxu1 }
0x1451   :  { %v1816_v48 = vadd.f32 %v1815_v47, %v1391_v36  ;;  %v11292_v45 = vpop.f32.mrb[49].mxu1 }
0x1452   :  { %v1818_v53 = vpop.f32.mrb[50].mxu1 }
0x1453   :  { %13182 = vtanh.f32 %v1816_v48  ;;  %v1819_v3 = vadd.f32 %v1818_v53, %v1391_v36  ;;  %v11293_v27 = vpop.f32.mrb[51].mxu1 }
0x1455   :  { %13184 = vtanh.f32 %v1819_v3 }
0x145d   :  { %v13183_v56 = vpop.eup %13182 }
0x145e   :  { %v1869_v40 = vmul.f32 %v13183_v56, %v13183_v56 }
0x145f   :  { %v13185_v50 = vpop.eup %13184 }
0x1460   :  { %v1824_v52 = vpack.c.bf16 %v13185_v50, %v13183_v56  ;;  %v1870_v8 = vmul.f32 %v13185_v50, %v13185_v50 }
0x1462   :  { %11303 = vmatmul.mubr.msk.bf16.vlgmr.msra.gmra.mrb[72].mxu0 %vm199_vm2, %v1824_v52  ;;  %v1871_v41 = vpack.c.bf16 %v1870_v8, %v1869_v40 }
0x1463   :  { %11331 = vmatpush3.bf16.msra.mxu0 %v14061_v0  ;;  %11334 = vmatprep.mubr.msk.bf16.mxu0 %vm13523_vm0, %v13522_v1 }
0x1464   :  { %11315 = vmatmul.mubr.msk.bf16.vlgmr.msra.gmra.mrb[52].mxu1 %vm199_vm2, %v1871_v41  ;;  %11332 = vmatprep.subr.bf16.mxu0 %v13522_v1 }
0x1465   :  { %11319 = vmatpush3.bf16.msra.mxu1 %v14239_v37  ;;  %11326 = vmatprep.mubr.msk.bf16.mxu1 %vm13523_vm0, %v13522_v1 }
0x1466   :  { %11320 = vmatprep.subr.bf16.mxu1 %v13522_v1 }
0x1467   :  { %11333 = vmatpush3.bf16.msra.mxu0 %v14070_v2 }
0x1468   :  { %11338 = vmatprep.subr.bf16.mxu0 %v13522_v1 }
0x1469   :  { %11321 = vmatpush3.bf16.msra.mxu1 %v14248_v38 }
0x146a   :  { %11322 = vmatprep.subr.bf16.mxu1 %v13522_v1 }
0x146d   :  { %11323 = vmatpush3.bf16.msra.mxu1 %v14255_v39 }
0x146e   :  { %11324 = vmatprep.subr.bf16.mxu1 %v13522_v1 }
0x1471   :  { %11325 = vmatpush3.bf16.msra.mxu1 %v14262_v20 }
0x1472   :  { %11350 = vmatprep.subr.bf16.mxu1 %v13522_v1 }
0x1474   :  { %11327 = vmatmul.mubr.msk.bf16.vlgmr.msra.gmra.mrb[52].mxu1 %vm199_vm2, %v1486_v26 }
0x1475   :  { %11351 = vmatpush3.bf16.msra.mxu1 %v14061_v0  ;;  %11354 = vmatprep.mubr.msk.bf16.mxu1 %vm13523_vm0, %v13522_v1 }
0x1476   :  { %11352 = vmatprep.subr.bf16.mxu1 %v13522_v1 }
0x1479   :  { %11353 = vmatpush3.bf16.msra.mxu1 %v14070_v2 }
0x147a   :  { %11370 = vmatprep.subr.bf16.mxu1 %v13522_v1 }
0x1535   :  { %v1862_v57 = vpop.f32.mrb[72].mxu0 }
0x1536   :  { %v1863_v59 = vadd.f32 %v14174_v21, %v1862_v57  ;;  %v11304_v6 = vpop.f32.mrb[73].mxu0 }
0x1537   :  { %v1865_v42 = vpop.f32.mrb[74].mxu0 }
0x1538   :  { %v1924_v60 = vadd.f32 %v1922_v18, %v1863_v59  ;;  %v1866_v24 = vadd.f32 %v14174_v21, %v1865_v42  ;;  %v11305_v25 = vpop.f32.mrb[75].mxu0 }
0x153a   :  { %v1926_v26 = vmul.f32 %v1924_v60, %v13869_v44  ;;  %v1925_v43 = vadd.f32 %v1923_v32, %v1866_v24 }
0x153c   :  { %v1927_v7 = vmul.f32 %v1925_v43, %v13869_v44  ;;  %v14346_v9 = vadd.f32 %v1926_v26, %v14079_v54  ;;  %v1931_v54 = vmul.f32 2.0, %v14230_v19  ;;  %v1992_v43 = vstv %s1991_s18  ;;  %s3812_s18 = sadd.f32 %s15052_s17, %s13687_s21 }
0x153e   :  { %v14349_v61 = vadd.f32 %v1927_v7, %v14082_v55  ;;  %v1976_v55 = vmul.f32 2.0, %v14287_v58  ;;  %v1993_v7 = vmul.f32 %v14135_v17, %v1992_v43 }
0x1540   :  { %v1999_v30 = vpack.c.bf16 %v14349_v61, %v14346_v9 }
0x1542   :  { %11335 = vmatmul.mubr.msk.bf16.vlgmr.msra.gmra.mrb[76].mxu0 %vm127_vm1, %v1999_v30  ;;  %v1994_v30 = vadd.f32 %v14141_v35, %v1993_v7 }
0x1543   :  { %11339 = vmatpush3.bf16.msra.mxu0 %v14154_v10  ;;  %11346 = vmatprep.mubr.msk.bf16.mxu0 %vm13523_vm0, %v13522_v1 }
0x1544   :  { %11340 = vmatprep.subr.bf16.mxu0 %v13522_v1 }
0x1547   :  { %v1969_v5 = vpop.f32.mrb[52].mxu1  ;;  %11341 = vmatpush3.bf16.msra.mxu0 %v14163_v13 }
0x1548   :  { %v1970_v15 = vadd.f32 %v1969_v5, %v1930_v4  ;;  %v11328_v12 = vpop.f32.mrb[53].mxu1  ;;  %11342 = vmatprep.subr.bf16.mxu0 %v13522_v1 }
0x1549   :  { %v1972_v34 = vpop.f32.mrb[54].mxu1 }
0x154a   :  { %v1978_v18 = vadd.f32 %v1976_v55, %v1970_v15  ;;  %v1973_v23 = vadd.f32 %v1972_v34, %v1931_v54  ;;  %v11329_v31 = vpop.f32.mrb[55].mxu1 }
0x154b   :  { %11343 = vmatpush3.bf16.msra.mxu0 %v14110_v63 }
0x154c   :  { %v1982_v51 = vmul.f32 %v1978_v18, %v13869_v44  ;;  %v1979_v32 = vadd.f32 %v1977_v28, %v1973_v23  ;;  %11344 = vmatprep.subr.bf16.mxu0 %v13522_v1 }
0x154e   :  { %v1983_v19 = vmul.f32 %v1979_v32, %v13869_v44  ;;  %v14369_v58 = vadd.f32 %v1982_v51, %v14115_v11 }
0x154f   :  { %11345 = vmatpush3.bf16.msra.mxu0 %v14121_v14 }
0x1550   :  { %11358 = vmatprep.subr.bf16.mxu0 %v13522_v1  ;;  %v14374_v62 = vadd.f32 %v1983_v19, %v14124_v16 }
0x1615   :  { %v2037_v36 = vpop.f32.mrb[76].mxu0 }
0x1616   :  { %v2038_v47 = vadd.f32 %v2037_v36, %v1990_v49  ;;  %v11336_v11 = vpop.f32.mrb[77].mxu0 }
0x1617   :  { %v2040_v48 = vpop.f32.mrb[78].mxu0 }
0x1618   :  { %13186 = vtanh.f32 %v2038_v47  ;;  %v2041_v45 = vadd.f32 %v2040_v48, %v1990_v49  ;;  %v11337_v53 = vpop.f32.mrb[79].mxu0 }
0x161a   :  { %13188 = vtanh.f32 %v2041_v45 }
0x1622   :  { %v13187_v3 = vpop.eup %13186 }
0x1623   :  { %v14383_v56 = vmul.f32 %v13187_v3, %v13187_v3 }
0x1624   :  { %v13189_v16 = vpop.eup %13188 }
0x1625   :  { %v2046_v27 = vpack.c.bf16 %v13189_v16, %v13187_v3  ;;  %v14385_v50 = vmul.f32 %v13189_v16, %v13189_v16 }
0x1627   :  { %11347 = vmatmul.mubr.msk.bf16.vlgmr.msra.gmra.mrb[80].mxu0 %vm199_vm2, %v2046_v27  ;;  %v2093_v52 = vpack.c.bf16 %v14385_v50, %v14383_v56 }
0x1628   :  { %11359 = vmatpush3.bf16.msra.mxu0 %v14154_v10  ;;  %11366 = vmatprep.mubr.msk.bf16.mxu0 %vm13523_vm0, %v13522_v1 }
0x1629   :  { %11360 = vmatprep.subr.bf16.mxu0 %v13522_v1 }
0x162c   :  { %11361 = vmatpush3.bf16.msra.mxu0 %v14163_v13 }
0x162d   :  { %11362 = vmatprep.subr.bf16.mxu0 %v13522_v1 }
0x1630   :  { %11363 = vmatpush3.bf16.msra.mxu0 %v14110_v63 }
0x1631   :  { %11364 = vmatprep.subr.bf16.mxu0 %v13522_v1 }
0x1634   :  { %11365 = vmatpush3.bf16.msra.mxu0 %v14121_v14 }
0x1635   :  { %11382 = vmatprep.subr.bf16.mxu0 %v13522_v1 }
0x16fa   :  { %v2084_v40 = vpop.f32.mrb[80].mxu0 }
0x16fb   :  { %v14401_v8 = vadd.f32 %v14174_v21, %v2084_v40  ;;  %v11348_v41 = vpop.f32.mrb[81].mxu0 }
0x16fc   :  { %v2087_v57 = vpop.f32.mrb[82].mxu0 }
0x16fd   :  { %v2094_v59 = vmul.f32 %v14401_v8, %v13695_v29  ;;  %v14406_v6 = vadd.f32 %v14174_v21, %v2087_v57  ;;  %v11349_v42 = vpop.f32.mrb[83].mxu0 }
0x16ff   :  { %v2095_v60 = vmul.f32 %v14406_v6, %v13695_v29  ;;  %v2096_v24 = vadd.f32 %v2094_v59, %v14346_v9 }
0x1701   :  { %v2097_v25 = vadd.f32 %v2095_v60, %v14349_v61 }
0x1703   :  { %v2098_v26 = vpack.c.bf16 %v2097_v25, %v2096_v24 }
0x1705   :  { %11355 = vmatmul.mubr.msk.bf16.vlgmr.msra.gmra.mrb[56].mxu1 %vm127_vm1, %v2098_v26 }
0x1706   :  { %11371 = vmatpush3.bf16.msra.mxu1 %v14239_v37  ;;  %11378 = vmatprep.mubr.msk.bf16.mxu1 %vm13523_vm0, %v13522_v1 }
0x1707   :  { %11372 = vmatprep.subr.bf16.mxu1 %v13522_v1 }
0x170a   :  { %11373 = vmatpush3.bf16.msra.mxu1 %v14248_v38 }
0x170b   :  { %11374 = vmatprep.subr.bf16.mxu1 %v13522_v1 }
0x170e   :  { %11375 = vmatpush3.bf16.msra.mxu1 %v14255_v39 }
0x170f   :  { %11376 = vmatprep.subr.bf16.mxu1 %v13522_v1 }
0x1712   :  { %11377 = vmatpush3.bf16.msra.mxu1 %v14262_v20 }
0x1713   :  { %11390 = vmatprep.subr.bf16.mxu1 %v13522_v1 }
0x17d8   :  { %v2136_v4 = vpop.f32.mrb[56].mxu1 }
0x17d9   :  { %v2137_v5 = vadd.f32 %v2136_v4, %v1994_v30  ;;  %v11356_v54 = vpop.f32.mrb[57].mxu1 }
0x17da   :  { %v2139_v55 = vpop.f32.mrb[58].mxu1 }
0x17db   :  { %13190 = vtanh.f32 %v2137_v5  ;;  %v2140_v15 = vadd.f32 %v2139_v55, %v1994_v30  ;;  %v11357_v12 = vpop.f32.mrb[59].mxu1 }
0x17dd   :  { %13192 = vtanh.f32 %v2140_v15 }
0x17e5   :  { %v13191_v34 = vpop.eup %13190 }
0x17e6   :  { %v2190_v23 = vmul.f32 %v13191_v34, %v13191_v34 }
0x17e7   :  { %v13193_v28 = vpop.eup %13192 }
0x17e8   :  { %v2145_v18 = vpack.c.bf16 %v13193_v28, %v13191_v34  ;;  %v2191_v31 = vmul.f32 %v13193_v28, %v13193_v28 }
0x17ea   :  { %11367 = vmatmul.mubr.msk.bf16.vlgmr.msra.gmra.mrb[84].mxu0 %vm199_vm2, %v2145_v18  ;;  %v2192_v51 = vpack.c.bf16 %v2191_v31, %v2190_v23 }
0x17eb   :  { %11383 = vmatpush3.bf16.msra.mxu0 %v14061_v0  ;;  %11386 = vmatprep.mubr.msk.bf16.mxu0 %vm13523_vm0, %v13522_v1 }
0x17ec   :  { %11379 = vmatmul.mubr.msk.bf16.vlgmr.msra.gmra.mrb[60].mxu1 %vm199_vm2, %v2192_v51  ;;  %11384 = vmatprep.subr.bf16.mxu0 %v13522_v1 }
0x17ed   :  { %11391 = vmatpush3.bf16.msra.mxu1 %v14154_v10  ;;  %11398 = vmatprep.mubr.msk.bf16.mxu1 %vm13523_vm0, %v13522_v1 }
0x17ee   :  { %11392 = vmatprep.subr.bf16.mxu1 %v13522_v1 }
0x17ef   :  { %11385 = vmatpush3.bf16.msra.mxu0 %v14070_v2 }
0x17f0   :  { %11402 = vmatprep.subr.bf16.mxu0 %v13522_v1 }
0x17f1   :  { %11393 = vmatpush3.bf16.msra.mxu1 %v14163_v13 }
0x17f2   :  { %11394 = vmatprep.subr.bf16.mxu1 %v13522_v1 }
0x17f5   :  { %11395 = vmatpush3.bf16.msra.mxu1 %v14110_v63 }
0x17f6   :  { %11396 = vmatprep.subr.bf16.mxu1 %v13522_v1 }
0x17f9   :  { %11397 = vmatpush3.bf16.msra.mxu1 %v14121_v14 }
0x17fa   :  { %11414 = vmatprep.subr.bf16.mxu1 %v13522_v1 }
0x18bd   :  { %v2183_v32 = vpop.f32.mrb[84].mxu0 }
0x18be   :  { %v2184_v19 = vadd.f32 %v14174_v21, %v2183_v32  ;;  %v11368_v33 = vpop.f32.mrb[85].mxu0 }
0x18bf   :  { %v2186_v22 = vpop.f32.mrb[86].mxu0  ;;  %v14446_v49 = vpop.f32.mrb[60].mxu1 }
0x18c0   :  { %v2237_v36 = vmul.f32 %v2184_v19, %v13695_v29  ;;  %v2187_v47 = vadd.f32 %v14174_v21, %v2186_v22  ;;  %v11369_v11 = vpop.f32.mrb[87].mxu0  ;;  %v11380_v48 = vpop.f32.mrb[61].mxu1 }
0x18c1   :  { %v14450_v45 = vpop.f32.mrb[62].mxu1 }
0x18c2   :  { %v2238_v53 = vmul.f32 %v2187_v47, %v13695_v29  ;;  %v11381_v3 = vpop.f32.mrb[63].mxu1  ;;  %v2239_v16 = vadd.f32 %v2237_v36, %v14346_v9  ;;  %v2524_v55 = vmul.f32 2.0, %v2187_v47 }
0x18c4   :  { %v2240_v27 = vadd.f32 %v2238_v53, %v14349_v61  ;;  %v2526_v47 = vadd.f32 %v2524_v55, %v14406_v6  ;;  %v1996_v6 = vstv %s1995_s19 }
0x18c6   :  { %v2241_v40 = vpack.c.bf16 %v2240_v27, %v2239_v16  ;;  %v1997_v27 = vmul.f32 %v14135_v17, %v1996_v6 }
0x18c8   :  { %11387 = vmatmul.mubr.msk.bf16.vlgmr.msra.gmra.mrb[88].mxu0 %vm127_vm1, %v2241_v40  ;;  %v1998_v40 = vadd.f32 %v14141_v35, %v1997_v27 }
0x18c9   :  { %11403 = vmatpush3.bf16.msra.mxu0 %v14239_v37  ;;  %11410 = vmatprep.mubr.msk.bf16.mxu0 %vm13523_vm0, %v13522_v1 }
0x18ca   :  { %11404 = vmatprep.subr.bf16.mxu0 %v13522_v1 }
0x18cd   :  { %11405 = vmatpush3.bf16.msra.mxu0 %v14248_v38 }
0x18ce   :  { %11406 = vmatprep.subr.bf16.mxu0 %v13522_v1 }
0x18d1   :  { %11407 = vmatpush3.bf16.msra.mxu0 %v14255_v39 }
0x18d2   :  { %11408 = vmatprep.subr.bf16.mxu0 %v13522_v1 }
0x18d5   :  { %11409 = vmatpush3.bf16.msra.mxu0 %v14262_v20 }
0x18d6   :  { %11422 = vmatprep.subr.bf16.mxu0 %v13522_v1 }
0x199b   :  { %v2279_v41 = vpop.f32.mrb[88].mxu0 }
0x199c   :  { %v2280_v57 = vadd.f32 %v2279_v41, %v1994_v30  ;;  %v11388_v59 = vpop.f32.mrb[89].mxu0 }
0x199d   :  { %v2282_v42 = vpop.f32.mrb[90].mxu0 }
0x199e   :  { %13194 = vtanh.f32 %v2280_v57  ;;  %v2283_v60 = vadd.f32 %v2282_v42, %v1994_v30  ;;  %v11389_v24 = vpop.f32.mrb[91].mxu0  ;;  %v2523_v30 = vmul.f32 2.0, %v2184_v19 }
0x19a0   :  { %13196 = vtanh.f32 %v2283_v60  ;;  %v2525_v23 = vadd.f32 %v2523_v30, %v14401_v8 }
0x19a8   :  { %v13195_v25 = vpop.eup %13194 }
0x19a9   :  { %v2333_v7 = vmul.f32 %v13195_v25, %v13195_v25 }
0x19aa   :  { %v13197_v26 = vpop.eup %13196 }
0x19ab   :  { %v2288_v43 = vpack.c.bf16 %v13197_v26, %v13195_v25  ;;  %v2334_v4 = vmul.f32 %v13197_v26, %v13197_v26 }
0x19ad   :  { %11399 = vmatmul.mubr.msk.bf16.vlgmr.msra.gmra.mrb[64].mxu1 %vm199_vm2, %v2288_v43  ;;  %v2335_v5 = vpack.c.bf16 %v2334_v4, %v2333_v7 }
0x19ae   :  { %11415 = vmatpush3.bf16.msra.mxu1 %v14061_v0  ;;  %11418 = vmatprep.mubr.msk.bf16.mxu1 %vm13523_vm0, %v13522_v1 }
0x19af   :  { %11411 = vmatmul.mubr.msk.bf16.vlgmr.msra.gmra.mrb[92].mxu0 %vm199_vm2, %v2335_v5  ;;  %11416 = vmatprep.subr.bf16.mxu1 %v13522_v1 }
0x19b0   :  { %11423 = vmatpush3.bf16.msra.mxu0 %v14154_v10  ;;  %11430 = vmatprep.mubr.msk.bf16.mxu0 %vm13523_vm0, %v13522_v1 }
0x19b1   :  { %11424 = vmatprep.subr.bf16.mxu0 %v13522_v1 }
0x19b2   :  { %11417 = vmatpush3.bf16.msra.mxu1 %v14070_v2 }
0x19b3   :  { %11434 = vmatprep.subr.bf16.mxu1 %v13522_v1 }
0x19b4   :  { %11425 = vmatpush3.bf16.msra.mxu0 %v14163_v13 }
0x19b5   :  { %11426 = vmatprep.subr.bf16.mxu0 %v13522_v1 }
0x19b8   :  { %11427 = vmatpush3.bf16.msra.mxu0 %v14110_v63 }
0x19b9   :  { %11428 = vmatprep.subr.bf16.mxu0 %v13522_v1 }
0x19bc   :  { %11429 = vmatpush3.bf16.msra.mxu0 %v14121_v14 }
0x19bd   :  { %11458 = vmatprep.subr.bf16.mxu0 %v13522_v1 }
0x1a80   :  { %v2326_v54 = vpop.f32.mrb[64].mxu1 }
0x1a81   :  { %v2327_v15 = vadd.f32 %v14174_v21, %v2326_v54  ;;  %v11400_v12 = vpop.f32.mrb[65].mxu1 }
0x1a82   :  { %v2329_v34 = vpop.f32.mrb[66].mxu1  ;;  %v14485_v28 = vpop.f32.mrb[92].mxu0 }
0x1a83   :  { %v2380_v18 = vmul.f32 %v2327_v15, %v13810_v46  ;;  %v2527_v31 = vmul.f32 2.0, %v2327_v15  ;;  %v2330_v51 = vadd.f32 %v14174_v21, %v2329_v34  ;;  %v11401_v32 = vpop.f32.mrb[67].mxu1  ;;  %v11412_v33 = vpop.f32.mrb[93].mxu0 }
0x1a84   :  { %v14490_v22 = vpop.f32.mrb[94].mxu0 }
0x1a85   :  { %v14492_v19 = vadd.f32 %v2527_v31, %v2525_v23  ;;  %v2381_v36 = vmul.f32 %v2330_v51, %v13810_v46  ;;  %v2528_v11 = vmul.f32 2.0, %v2330_v51  ;;  %v11413_v48 = vpop.f32.mrb[95].mxu0  ;;  %v2382_v53 = vadd.f32 %v2380_v18, %v14346_v9 }
0x1a86   :  { %v2537_v31 = vmul.f32 2.0, %v14446_v49 }
0x1a87   :  { %v2383_v8 = vadd.f32 %v2381_v36, %v14349_v61  ;;  %v2530_v3 = vadd.f32 %v2528_v11, %v2526_v47  ;;  %v2584_v36 = vmul.f32 2.0, %v14490_v22 }
0x1a89   :  { %v2384_v16 = vpack.c.bf16 %v2383_v8, %v2382_v53 }
0x1a8b   :  { %11419 = vmatmul.mubr.msk.bf16.vlgmr.msra.gmra.mrb[68].mxu1 %vm127_vm1, %v2384_v16 }
0x1a8c   :  { %11435 = vmatpush3.bf16.msra.mxu1 %v14239_v37  ;;  %11442 = vmatprep.mubr.msk.bf16.mxu1 %vm13523_vm0, %v13522_v1 }
0x1a8d   :  { %11436 = vmatprep.subr.bf16.mxu1 %v13522_v1 }
0x1a90   :  { %11437 = vmatpush3.bf16.msra.mxu1 %v14248_v38 }
0x1a91   :  { %11438 = vmatprep.subr.bf16.mxu1 %v13522_v1 }
0x1a94   :  { %11439 = vmatpush3.bf16.msra.mxu1 %v14255_v39 }
0x1a95   :  { %11440 = vmatprep.subr.bf16.mxu1 %v13522_v1 }
0x1a98   :  { %11441 = vmatpush3.bf16.msra.mxu1 %v14262_v20 }
0x1a99   :  { %11446 = vmatprep.subr.bf16.mxu1 %v13522_v1 }
0x1b5e   :  { %v2422_v41 = vpop.f32.mrb[68].mxu1 }
0x1b5f   :  { %v2423_v57 = vadd.f32 %v2422_v41, %v1998_v40  ;;  %v11420_v59 = vpop.f32.mrb[69].mxu1 }
0x1b60   :  { %v2425_v42 = vpop.f32.mrb[70].mxu1 }
0x1b61   :  { %13198 = vtanh.f32 %v2423_v57  ;;  %v2426_v60 = vadd.f32 %v2425_v42, %v1998_v40  ;;  %v11421_v24 = vpop.f32.mrb[71].mxu1 }
0x1b63   :  { %13200 = vtanh.f32 %v2426_v60 }
0x1b6b   :  { %v13199_v25 = vpop.eup %13198 }
0x1b6c   :  { %v2476_v43 = vmul.f32 %v13199_v25, %v13199_v25 }
0x1b6d   :  { %v13201_v26 = vpop.eup %13200 }
0x1b6e   :  { %v2477_v7 = vmul.f32 %v13201_v26, %v13201_v26  ;;  %v2431_v4 = vpack.c.bf16 %v13201_v26, %v13199_v25 }
0x1b70   :  { %11431 = vmatmul.mubr.msk.bf16.vlgmr.msra.gmra.mrb[96].mxu0 %vm199_vm2, %v2431_v4  ;;  %v2478_v5 = vpack.c.bf16 %v2477_v7, %v2476_v43 }
0x1b71   :  { %11459 = vmatpush3.bf16.msra.mxu0 %v14061_v0  ;;  %11462 = vmatprep.mubr.msk.bf16.mxu0 %vm13523_vm0, %v13522_v1 }
0x1b72   :  { %11443 = vmatmul.mubr.msk.bf16.vlgmr.msra.gmra.mrb[72].mxu1 %vm199_vm2, %v2478_v5  ;;  %11460 = vmatprep.subr.bf16.mxu0 %v13522_v1 }
0x1b73   :  { %11447 = vmatpush3.bf16.msra.mxu1 %v14239_v37  ;;  %11454 = vmatprep.mubr.msk.bf16.mxu1 %vm13523_vm0, %v13522_v1 }
0x1b74   :  { %11448 = vmatprep.subr.bf16.mxu1 %v13522_v1 }
0x1b75   :  { %11461 = vmatpush3.bf16.msra.mxu0 %v14070_v2 }
0x1b76   :  { %11466 = vmatprep.subr.bf16.mxu0 %v13522_v1 }
0x1b77   :  { %11449 = vmatpush3.bf16.msra.mxu1 %v14248_v38 }
0x1b78   :  { %11450 = vmatprep.subr.bf16.mxu1 %v13522_v1 }
0x1b7b   :  { %11451 = vmatpush3.bf16.msra.mxu1 %v14255_v39 }
0x1b7c   :  { %11452 = vmatprep.subr.bf16.mxu1 %v13522_v1 }
0x1b7f   :  { %11453 = vmatpush3.bf16.msra.mxu1 %v14262_v20 }
0x1b80   :  { %11478 = vmatprep.subr.bf16.mxu1 %v13522_v1 }
0x1b82   :  { %11455 = vmatmul.mubr.msk.bf16.vlgmr.msra.gmra.mrb[72].mxu1 %vm199_vm2, %v2093_v52 }
0x1b83   :  { %11479 = vmatpush3.bf16.msra.mxu1 %v14061_v0  ;;  %11482 = vmatprep.mubr.msk.bf16.mxu1 %vm13523_vm0, %v13522_v1 }
0x1b84   :  { %11480 = vmatprep.subr.bf16.mxu1 %v13522_v1 }
0x1b87   :  { %11481 = vmatpush3.bf16.msra.mxu1 %v14070_v2 }
0x1b88   :  { %11498 = vmatprep.subr.bf16.mxu1 %v13522_v1 }
0x1c43   :  { %v2469_v30 = vpop.f32.mrb[96].mxu0 }
0x1c44   :  { %v2470_v54 = vadd.f32 %v14174_v21, %v2469_v30  ;;  %v11432_v55 = vpop.f32.mrb[97].mxu0 }
0x1c45   :  { %v2472_v15 = vpop.f32.mrb[98].mxu0  ;;  %v14639_v55 = vld [vmem:[%s17348_s7] ss:$0 sm:$0xff] }
0x1c46   :  { %v2531_v56 = vadd.f32 %v14492_v19, %v2470_v54  ;;  %v2473_v50 = vadd.f32 %v14174_v21, %v2472_v15  ;;  %v11433_v52 = vpop.f32.mrb[99].mxu0 }
0x1c48   :  { %v2533_v0 = vmul.f32 %v2531_v56, %v13869_v44  ;;  %v2532_v12 = vadd.f32 %v2530_v3, %v2473_v50  ;;  %v14645_v56 = vld [vmem:[%s17347_s6] ss:$0 sm:$0xff] }
0x1c4a   :  { %v2534_v34 = vmul.f32 %v2532_v12, %v13869_v44  ;;  %v14547_v18 = vadd.f32 %v2533_v0, %v14346_v9  ;;  %v2538_v9 = vmul.f32 2.0, %v14450_v45 }
0x1c4c   :  { %v14550_v2 = vadd.f32 %v2534_v34, %v14349_v61  ;;  %v2583_v61 = vmul.f32 2.0, %v14485_v28 }
0x1c4e   :  { %v2606_v23 = vpack.c.bf16 %v14550_v2, %v14547_v18 }
0x1c50   :  { %11463 = vmatmul.mubr.msk.bf16.vlgmr.msra.gmra.mrb[100].mxu0 %vm127_vm1, %v2606_v23 }
0x1c51   :  { %11467 = vmatpush3.bf16.msra.mxu0 %v14154_v10  ;;  %11474 = vmatprep.mubr.msk.bf16.mxu0 %vm13523_vm0, %v13522_v1 }
0x1c52   :  { %11468 = vmatprep.subr.bf16.mxu0 %v13522_v1 }
0x1c55   :  { %v2576_v51 = vpop.f32.mrb[72].mxu1  ;;  %11469 = vmatpush3.bf16.msra.mxu0 %v14163_v13 }
0x1c56   :  { %v2577_v32 = vadd.f32 %v2576_v51, %v2537_v31  ;;  %v11456_v33 = vpop.f32.mrb[73].mxu1  ;;  %11470 = vmatprep.subr.bf16.mxu0 %v13522_v1 }
0x1c57   :  { %v2579_v19 = vpop.f32.mrb[74].mxu1 }
0x1c58   :  { %v2585_v47 = vadd.f32 %v2583_v61, %v2577_v32  ;;  %v2580_v11 = vadd.f32 %v2579_v19, %v2538_v9  ;;  %v11457_v48 = vpop.f32.mrb[75].mxu1 }
0x1c59   :  { %11471 = vmatpush3.bf16.msra.mxu0 %v14110_v63  ;;  %v2595_v63 = vstv %s14579_s20  ;;  %v14682_v48 = vld [vmem:[%s17345_s4 + $0x8] sm:$0xff]   ;;  %s3200_s20 = smul.f32 5.0, %s13658_s15 }
0x1c5a   :  { %v2589_v49 = vmul.f32 %v2585_v47, %v13869_v44  ;;  %v2586_v53 = vadd.f32 %v2584_v36, %v2580_v11  ;;  %11472 = vmatprep.subr.bf16.mxu0 %v13522_v1  ;;  %v2596_v22 = vmul.f32 %v14135_v17, %v2595_v63  ;;  %v14656_v36 = vld [vmem:[%s17344_s3] sm:$0xff]   ;;  %v14675_v11 = vld [vmem:[%s17344_s3 + $0x8] sm:$0xff]  }
0x1c5b   :  { %v14666_v47 = vld [vmem:[%s17345_s4] sm:$0xff]   ;;  %s14854_s30 = sadd.f32 %s3200_s20, %s13652_s12  ;;  %s5021_s20 = smul.f32 8.0, %s13658_s15 }
0x1c5c   :  { %v14569_v45 = vadd.f32 %v2589_v49, %v14369_v58  ;;  %v2590_v28 = vmul.f32 %v2586_v53, %v13869_v44  ;;  %v2597_v3 = vadd.f32 %v14141_v35, %v2596_v22  ;;  %v14600_v35 = vld [vmem:[%s17345_s4 + $0x10] sm:$0xff]   ;;  %v14693_v53 = vld [vmem:[%s17349_s8] ss:$0 sm:$0xff] }
0x1c5d   :  { %11473 = vmatpush3.bf16.msra.mxu0 %v14121_v14  ;;  %s3205_s13 = sadd.f32 %s14854_s30, %s13687_s21 }
0x1c5e   :  { %v14574_v8 = vadd.f32 %v2590_v28, %v14374_v62  ;;  %11486 = vmatprep.subr.bf16.mxu0 %v13522_v1  ;;  %s3209_s16 = sadd.f32 %s14854_s30, %s13658_s15 }
0x1d23   :  { %v2644_v58 = vpop.f32.mrb[100].mxu0 }
0x1d24   :  { %v2645_v16 = vadd.f32 %v2644_v58, %v2597_v3  ;;  %v11464_v6 = vpop.f32.mrb[101].mxu0 }
0x1d25   :  { %v2647_v27 = vpop.f32.mrb[102].mxu0 }
0x1d26   :  { %13202 = vtanh.f32 %v2645_v16  ;;  %v2648_v14 = vadd.f32 %v2647_v27, %v2597_v3  ;;  %v11465_v40 = vpop.f32.mrb[103].mxu0 }
0x1d28   :  { %13204 = vtanh.f32 %v2648_v14 }
0x1d30   :  { %v13203_v62 = vpop.eup %13202 }
0x1d31   :  { %v14584_v59 = vmul.f32 %v13203_v62, %v13203_v62 }
0x1d32   :  { %v13205_v41 = vpop.eup %13204 }
0x1d33   :  { %v2653_v57 = vpack.c.bf16 %v13205_v41, %v13203_v62  ;;  %v14586_v42 = vmul.f32 %v13205_v41, %v13205_v41 }
0x1d35   :  { %11475 = vmatmul.mubr.msk.bf16.vlgmr.msra.gmra.mrb[104].mxu0 %vm199_vm2, %v2653_v57  ;;  %v2700_v17 = vpack.c.bf16 %v14586_v42, %v14584_v59 }
0x1d36   :  { %11487 = vmatpush3.bf16.msra.mxu0 %v14154_v10  ;;  %11494 = vmatprep.mubr.msk.bf16.mxu0 %vm13523_vm0, %v13522_v1  ;;  %v14607_v10 = vld [vmem:[%s17345_s4 + $0x18] sm:$0xff]  }
0x1d37   :  { %11488 = vmatprep.subr.bf16.mxu0 %v13522_v1 }
0x1d3a   :  { %11489 = vmatpush3.bf16.msra.mxu0 %v14163_v13 }
0x1d3b   :  { %11490 = vmatprep.subr.bf16.mxu0 %v13522_v1 }
0x1d3e   :  { %11491 = vmatpush3.bf16.msra.mxu0 %v14600_v35 }
0x1d3f   :  { %11492 = vmatprep.subr.bf16.mxu0 %v13522_v1 }
0x1d42   :  { %11493 = vmatpush3.bf16.msra.mxu0 %v14607_v10 }
0x1d43   :  { %11510 = vmatprep.subr.bf16.mxu0 %v13522_v1 }
0x1e08   :  { %v2691_v13 = vpop.f32.mrb[104].mxu0 }
0x1e09   :  { %v14612_v60 = vadd.f32 %v14174_v21, %v2691_v13  ;;  %v11476_v24 = vpop.f32.mrb[105].mxu0 }
0x1e0a   :  { %v2694_v25 = vpop.f32.mrb[106].mxu0 }
0x1e0b   :  { %v2701_v26 = vmul.f32 %v14612_v60, %v13695_v29  ;;  %v14617_v43 = vadd.f32 %v14174_v21, %v2694_v25  ;;  %v11477_v7 = vpop.f32.mrb[107].mxu0  ;;  %v2599_v21 = vstv %s2598_s25 }
0x1e0c   :  { %v2600_v15 = vmul.f32 %v14639_v55, %v2599_v21 }
0x1e0d   :  { %v2702_v4 = vmul.f32 %v14617_v43, %v13695_v29  ;;  %v2703_v5 = vadd.f32 %v2701_v26, %v14547_v18 }
0x1e0e   :  { %v14648_v50 = vadd.f32 %v14645_v56, %v2600_v15 }
0x1e0f   :  { %v2704_v30 = vadd.f32 %v2702_v4, %v14550_v2 }
0x1e11   :  { %v2705_v54 = vpack.c.bf16 %v2704_v30, %v2703_v5 }
0x1e13   :  { %11483 = vmatmul.mubr.msk.bf16.vlgmr.msra.gmra.mrb[76].mxu1 %vm127_vm1, %v2705_v54 }
0x1e14   :  { %11499 = vmatpush3.bf16.msra.mxu1 %v14239_v37  ;;  %11506 = vmatprep.mubr.msk.bf16.mxu1 %vm13523_vm0, %v13522_v1 }
0x1e15   :  { %11500 = vmatprep.subr.bf16.mxu1 %v13522_v1 }
0x1e18   :  { %11501 = vmatpush3.bf16.msra.mxu1 %v14248_v38 }
0x1e19   :  { %11502 = vmatprep.subr.bf16.mxu1 %v13522_v1 }
0x1e1c   :  { %11503 = vmatpush3.bf16.msra.mxu1 %v14255_v39 }
0x1e1d   :  { %11504 = vmatprep.subr.bf16.mxu1 %v13522_v1 }
0x1e20   :  { %11505 = vmatpush3.bf16.msra.mxu1 %v14262_v20 }
0x1e21   :  { %11518 = vmatprep.subr.bf16.mxu1 %v13522_v1 }
0x1ee6   :  { %v2743_v52 = vpop.f32.mrb[76].mxu1 }
0x1ee7   :  { %v2744_v0 = vadd.f32 %v2743_v52, %v14648_v50  ;;  %v11484_v12 = vpop.f32.mrb[77].mxu1 }
0x1ee8   :  { %v2746_v34 = vpop.f32.mrb[78].mxu1 }
0x1ee9   :  { %13206 = vtanh.f32 %v2744_v0  ;;  %v2747_v23 = vadd.f32 %v2746_v34, %v14648_v50  ;;  %v11485_v31 = vpop.f32.mrb[79].mxu1 }
0x1eeb   :  { %13208 = vtanh.f32 %v2747_v23 }
0x1ef3   :  { %v13207_v51 = vpop.eup %13206 }
0x1ef4   :  { %v2797_v61 = vmul.f32 %v13207_v51, %v13207_v51 }
0x1ef5   :  { %v13209_v9 = vpop.eup %13208 }
0x1ef6   :  { %v2798_v32 = vmul.f32 %v13209_v9, %v13209_v9  ;;  %v2752_v33 = vpack.c.bf16 %v13209_v9, %v13207_v51 }
0x1ef8   :  { %11495 = vmatmul.mubr.msk.bf16.vlgmr.msra.gmra.mrb[108].mxu0 %vm199_vm2, %v2752_v33  ;;  %v2799_v19 = vpack.c.bf16 %v2798_v32, %v2797_v61 }
0x1ef9   :  { %11511 = vmatpush3.bf16.msra.mxu0 %v14656_v36  ;;  %11514 = vmatprep.mubr.msk.bf16.mxu0 %vm13523_vm0, %v13522_v1 }
0x1efa   :  { %11507 = vmatmul.mubr.msk.bf16.vlgmr.msra.gmra.mrb[80].mxu1 %vm199_vm2, %v2799_v19  ;;  %11512 = vmatprep.subr.bf16.mxu0 %v13522_v1 }
0x1efb   :  { %11519 = vmatpush3.bf16.msra.mxu1 %v14666_v47  ;;  %11526 = vmatprep.mubr.msk.bf16.mxu1 %vm13523_vm0, %v13522_v1 }
0x1efc   :  { %11520 = vmatprep.subr.bf16.mxu1 %v13522_v1 }
0x1efd   :  { %11513 = vmatpush3.bf16.msra.mxu0 %v14675_v11 }
0x1efe   :  { %11530 = vmatprep.subr.bf16.mxu0 %v13522_v1 }
0x1eff   :  { %11521 = vmatpush3.bf16.msra.mxu1 %v14682_v48 }
0x1f00   :  { %11522 = vmatprep.subr.bf16.mxu1 %v13522_v1 }
0x1f03   :  { %11523 = vmatpush3.bf16.msra.mxu1 %v14600_v35 }
0x1f04   :  { %11524 = vmatprep.subr.bf16.mxu1 %v13522_v1 }
0x1f07   :  { %11525 = vmatpush3.bf16.msra.mxu1 %v14607_v10 }
0x1f08   :  { %11542 = vmatprep.subr.bf16.mxu1 %v13522_v1 }
0x1fcb   :  { %v2790_v49 = vpop.f32.mrb[108].mxu0 }
0x1fcc   :  { %v2791_v28 = vadd.f32 %v14693_v53, %v2790_v49  ;;  %v11496_v63 = vpop.f32.mrb[109].mxu0 }
0x1fcd   :  { %v2793_v22 = vpop.f32.mrb[110].mxu0  ;;  %v14696_v3 = vpop.f32.mrb[80].mxu1 }
0x1fce   :  { %v2844_v58 = vmul.f32 %v2791_v28, %v13695_v29  ;;  %v2794_v16 = vadd.f32 %v14693_v53, %v2793_v22  ;;  %v11497_v6 = vpop.f32.mrb[111].mxu0  ;;  %v11508_v27 = vpop.f32.mrb[81].mxu1  ;;  %v3130_v21 = vmul.f32 2.0, %v2791_v28 }
0x1fcf   :  { %v14700_v14 = vpop.f32.mrb[82].mxu1  ;;  %v14756_v27 = vld [vmem:[%s17346_s5] sm:$0xff]  }
0x1fd0   :  { %v2845_v40 = vmul.f32 %v2794_v16, %v13695_v29  ;;  %v11509_v62 = vpop.f32.mrb[83].mxu1  ;;  %v2846_v41 = vadd.f32 %v2844_v58, %v14547_v18  ;;  %v3132_v31 = vadd.f32 %v3130_v21, %v14612_v60 }
0x1fd1   :  { %v14779_v62 = vld [vmem:[%s17346_s5 + $0x18] sm:$0xff]  }
0x1fd2   :  { %v2847_v57 = vadd.f32 %v2845_v40, %v14550_v2  ;;  %v14772_v40 = vld [vmem:[%s17346_s5 + $0x10] sm:$0xff]  }
0x1fd4   :  { %v2848_v13 = vpack.c.bf16 %v2847_v57, %v2846_v41  ;;  %v2603_v41 = vstv %s2602_s2  ;;  %s4423_s2 = sadd.f32 %s15327_s28, %s13658_s15 }
0x1fd5   :  { %v2604_v57 = vmul.f32 %v14639_v55, %v2603_v41 }
0x1fd6   :  { %11515 = vmatmul.mubr.msk.bf16.vlgmr.msra.gmra.mrb[112].mxu0 %vm127_vm1, %v2848_v13 }
0x1fd7   :  { %11531 = vmatpush3.bf16.msra.mxu0 %v14239_v37  ;;  %11538 = vmatprep.mubr.msk.bf16.mxu0 %vm13523_vm0, %v13522_v1  ;;  %v2605_v13 = vadd.f32 %v14645_v56, %v2604_v57 }
0x1fd8   :  { %11532 = vmatprep.subr.bf16.mxu0 %v13522_v1 }
0x1fdb   :  { %11533 = vmatpush3.bf16.msra.mxu0 %v14248_v38 }
0x1fdc   :  { %11534 = vmatprep.subr.bf16.mxu0 %v13522_v1 }
0x1fdf   :  { %11535 = vmatpush3.bf16.msra.mxu0 %v14255_v39 }
0x1fe0   :  { %11536 = vmatprep.subr.bf16.mxu0 %v13522_v1 }
0x1fe3   :  { %11537 = vmatpush3.bf16.msra.mxu0 %v14262_v20 }
0x1fe4   :  { %11550 = vmatprep.subr.bf16.mxu0 %v13522_v1 }
0x20a9   :  { %v2886_v24 = vpop.f32.mrb[112].mxu0 }
0x20aa   :  { %v2887_v37 = vadd.f32 %v2886_v24, %v14648_v50  ;;  %v11516_v25 = vpop.f32.mrb[113].mxu0 }
0x20ab   :  { %v2889_v26 = vpop.f32.mrb[114].mxu0 }
0x20ac   :  { %13210 = vtanh.f32 %v2887_v37  ;;  %v2890_v7 = vadd.f32 %v2889_v26, %v14648_v50  ;;  %v11517_v4 = vpop.f32.mrb[115].mxu0  ;;  %v3131_v50 = vmul.f32 2.0, %v2794_v16 }
0x20ae   :  { %13212 = vtanh.f32 %v2890_v7  ;;  %v3133_v28 = vadd.f32 %v3131_v50, %v14617_v43  ;;  %v14765_v43 = vld [vmem:[%s17346_s5 + $0x8] sm:$0xff]  }
0x20b6   :  { %v13211_v38 = vpop.eup %13210 }
0x20b7   :  { %v2940_v39 = vmul.f32 %v13211_v38, %v13211_v38 }
0x20b8   :  { %v13213_v5 = vpop.eup %13212 }
0x20b9   :  { %v2895_v30 = vpack.c.bf16 %v13213_v5, %v13211_v38  ;;  %v2941_v54 = vmul.f32 %v13213_v5, %v13213_v5 }
0x20bb   :  { %11527 = vmatmul.mubr.msk.bf16.vlgmr.msra.gmra.mrb[84].mxu1 %vm199_vm2, %v2895_v30  ;;  %v2942_v20 = vpack.c.bf16 %v2941_v54, %v2940_v39 }
0x20bc   :  { %11543 = vmatpush3.bf16.msra.mxu1 %v14656_v36  ;;  %11546 = vmatprep.mubr.msk.bf16.mxu1 %vm13523_vm0, %v13522_v1 }
0x20bd   :  { %11539 = vmatmul.mubr.msk.bf16.vlgmr.msra.gmra.mrb[116].mxu0 %vm199_vm2, %v2942_v20  ;;  %11544 = vmatprep.subr.bf16.mxu1 %v13522_v1 }
0x20be   :  { %11551 = vmatpush3.bf16.msra.mxu0 %v14666_v47  ;;  %11558 = vmatprep.mubr.msk.bf16.mxu0 %vm13523_vm0, %v13522_v1 }
0x20bf   :  { %11552 = vmatprep.subr.bf16.mxu0 %v13522_v1 }
0x20c0   :  { %11545 = vmatpush3.bf16.msra.mxu1 %v14675_v11 }
0x20c1   :  { %11562 = vmatprep.subr.bf16.mxu1 %v13522_v1 }
0x20c2   :  { %11553 = vmatpush3.bf16.msra.mxu0 %v14682_v48 }
0x20c3   :  { %11554 = vmatprep.subr.bf16.mxu0 %v13522_v1 }
0x20c6   :  { %11555 = vmatpush3.bf16.msra.mxu0 %v14600_v35 }
0x20c7   :  { %11556 = vmatprep.subr.bf16.mxu0 %v13522_v1 }
0x20ca   :  { %11557 = vmatpush3.bf16.msra.mxu0 %v14607_v10 }
0x20cb   :  { %11586 = vmatprep.subr.bf16.mxu0 %v13522_v1 }
0x218e   :  { %v2933_v15 = vpop.f32.mrb[84].mxu1 }
0x218f   :  { %v2934_v52 = vadd.f32 %v14693_v53, %v2933_v15  ;;  %v11528_v0 = vpop.f32.mrb[85].mxu1 }
0x2190   :  { %v2936_v12 = vpop.f32.mrb[86].mxu1  ;;  %v14737_v34 = vpop.f32.mrb[116].mxu0 }
0x2191   :  { %v2987_v23 = vmul.f32 %v2934_v52, %v13810_v46  ;;  %v3134_v51 = vmul.f32 2.0, %v2934_v52  ;;  %v2937_v9 = vadd.f32 %v14693_v53, %v2936_v12  ;;  %v11529_v61 = vpop.f32.mrb[87].mxu1  ;;  %v11540_v32 = vpop.f32.mrb[117].mxu0 }
0x2192   :  { %v14742_v33 = vpop.f32.mrb[118].mxu0  ;;  %v3144_v61 = vmul.f32 2.0, %v14696_v3 }
0x2193   :  { %v14744_v19 = vadd.f32 %v3134_v51, %v3132_v31  ;;  %v2988_v49 = vmul.f32 %v2937_v9, %v13810_v46  ;;  %v3135_v63 = vmul.f32 2.0, %v2937_v9  ;;  %v11541_v22 = vpop.f32.mrb[119].mxu0  ;;  %v2989_v58 = vadd.f32 %v2987_v23, %v14547_v18 }
0x2195   :  { %v2990_v16 = vadd.f32 %v2988_v49, %v14550_v2  ;;  %v14750_v60 = vadd.f32 %v3135_v63, %v3133_v28  ;;  %v3191_v63 = vmul.f32 2.0, %v14742_v33  ;;  %v3202_v33 = vstv %s14854_s30  ;;  %s15525_s30 = sadd.f32 %s5021_s20, %s13652_s12 }
0x2196   :  { %v3203_v41 = vmul.f32 %v14639_v55, %v3202_v33 }
0x2197   :  { %v2991_v6 = vpack.c.bf16 %v2990_v16, %v2989_v58 }
0x2198   :  { %v3204_v57 = vadd.f32 %v14645_v56, %v3203_v41 }
0x2199   :  { %11547 = vmatmul.mubr.msk.bf16.vlgmr.msra.gmra.mrb[88].mxu1 %vm127_vm1, %v2991_v6 }
0x219a   :  { %11563 = vmatpush3.bf16.msra.mxu1 %v14756_v27  ;;  %11570 = vmatprep.mubr.msk.bf16.mxu1 %vm13523_vm0, %v13522_v1 }
0x219b   :  { %11564 = vmatprep.subr.bf16.mxu1 %v13522_v1 }
0x219e   :  { %11565 = vmatpush3.bf16.msra.mxu1 %v14765_v43 }
0x219f   :  { %11566 = vmatprep.subr.bf16.mxu1 %v13522_v1 }
0x21a2   :  { %11567 = vmatpush3.bf16.msra.mxu1 %v14772_v40 }
0x21a3   :  { %11568 = vmatprep.subr.bf16.mxu1 %v13522_v1 }
0x21a6   :  { %11569 = vmatpush3.bf16.msra.mxu1 %v14779_v62 }
0x21a7   :  { %11574 = vmatprep.subr.bf16.mxu1 %v13522_v1 }
0x226c   :  { %v3029_v24 = vpop.f32.mrb[88].mxu1 }
0x226d   :  { %v3030_v37 = vadd.f32 %v3029_v24, %v2605_v13  ;;  %v11548_v25 = vpop.f32.mrb[89].mxu1 }
0x226e   :  { %v3032_v26 = vpop.f32.mrb[90].mxu1 }
0x226f   :  { %13214 = vtanh.f32 %v3030_v37  ;;  %v3033_v7 = vadd.f32 %v3032_v26, %v2605_v13  ;;  %v11549_v4 = vpop.f32.mrb[91].mxu1 }
0x2271   :  { %13216 = vtanh.f32 %v3033_v7 }
0x2279   :  { %v13215_v38 = vpop.eup %13214 }
0x227a   :  { %v3083_v30 = vmul.f32 %v13215_v38, %v13215_v38 }
0x227b   :  { %v13217_v5 = vpop.eup %13216 }
0x227c   :  { %v3084_v39 = vmul.f32 %v13217_v5, %v13217_v5  ;;  %v3038_v54 = vpack.c.bf16 %v13217_v5, %v13215_v38 }
0x227e   :  { %11559 = vmatmul.mubr.msk.bf16.vlgmr.msra.gmra.mrb[120].mxu0 %vm199_vm2, %v3038_v54  ;;  %v3085_v20 = vpack.c.bf16 %v3084_v39, %v3083_v30 }
0x227f   :  { %11587 = vmatpush3.bf16.msra.mxu0 %v14656_v36  ;;  %11590 = vmatprep.mubr.msk.bf16.mxu0 %vm13523_vm0, %v13522_v1 }
0x2280   :  { %11571 = vmatmul.mubr.msk.bf16.vlgmr.msra.gmra.mrb[92].mxu1 %vm199_vm2, %v3085_v20  ;;  %11588 = vmatprep.subr.bf16.mxu0 %v13522_v1 }
0x2281   :  { %11575 = vmatpush3.bf16.msra.mxu1 %v14756_v27  ;;  %11582 = vmatprep.mubr.msk.bf16.mxu1 %vm13523_vm0, %v13522_v1 }
0x2282   :  { %11576 = vmatprep.subr.bf16.mxu1 %v13522_v1 }
0x2283   :  { %11589 = vmatpush3.bf16.msra.mxu0 %v14675_v11 }
0x2284   :  { %11594 = vmatprep.subr.bf16.mxu0 %v13522_v1 }
0x2285   :  { %11577 = vmatpush3.bf16.msra.mxu1 %v14765_v43 }
0x2286   :  { %11578 = vmatprep.subr.bf16.mxu1 %v13522_v1 }
0x2289   :  { %11579 = vmatpush3.bf16.msra.mxu1 %v14772_v40 }
0x228a   :  { %11580 = vmatprep.subr.bf16.mxu1 %v13522_v1 }
0x228d   :  { %11581 = vmatpush3.bf16.msra.mxu1 %v14779_v62 }
0x228e   :  { %11606 = vmatprep.subr.bf16.mxu1 %v13522_v1 }
0x2290   :  { %11583 = vmatmul.mubr.msk.bf16.vlgmr.msra.gmra.mrb[92].mxu1 %vm199_vm2, %v2700_v17 }
0x2291   :  { %11607 = vmatpush3.bf16.msra.mxu1 %v14656_v36  ;;  %11610 = vmatprep.mubr.msk.bf16.mxu1 %vm13523_vm0, %v13522_v1 }
0x2292   :  { %11608 = vmatprep.subr.bf16.mxu1 %v13522_v1 }
0x2295   :  { %11609 = vmatpush3.bf16.msra.mxu1 %v14675_v11 }
0x2296   :  { %11626 = vmatprep.subr.bf16.mxu1 %v13522_v1 }
0x2351   :  { %v3076_v21 = vpop.f32.mrb[120].mxu0 }
0x2352   :  { %v3077_v15 = vadd.f32 %v14693_v53, %v3076_v21  ;;  %v11560_v50 = vpop.f32.mrb[121].mxu0 }
0x2353   :  { %v3079_v52 = vpop.f32.mrb[122].mxu0 }
0x2354   :  { %v3138_v59 = vadd.f32 %v14744_v19, %v3077_v15  ;;  %v3080_v42 = vadd.f32 %v14693_v53, %v3079_v52  ;;  %v11561_v17 = vpop.f32.mrb[123].mxu0 }
0x2356   :  { %v3140_v0 = vmul.f32 %v3138_v59, %v13869_v44  ;;  %v3139_v12 = vadd.f32 %v14750_v60, %v3080_v42 }
0x2358   :  { %v3141_v23 = vmul.f32 %v3139_v12, %v13869_v44  ;;  %v14822_v31 = vadd.f32 %v3140_v0, %v14547_v18  ;;  %v3145_v18 = vmul.f32 2.0, %v14700_v14  ;;  %v3206_v12 = vstv %s3205_s13  ;;  %s3816_s13 = sadd.f32 %s15052_s17, %s13658_s15 }
0x235a   :  { %v14825_v51 = vadd.f32 %v3141_v23, %v14550_v2  ;;  %v3190_v2 = vmul.f32 2.0, %v14737_v34  ;;  %v3207_v23 = vmul.f32 %v14639_v55, %v3206_v12 }
0x235c   :  { %v3213_v9 = vpack.c.bf16 %v14825_v51, %v14822_v31 }
0x235e   :  { %11591 = vmatmul.mubr.msk.bf16.vlgmr.msra.gmra.mrb[124].mxu0 %vm127_vm1, %v3213_v9  ;;  %v3208_v9 = vadd.f32 %v14645_v56, %v3207_v23 }
0x235f   :  { %11595 = vmatpush3.bf16.msra.mxu0 %v14666_v47  ;;  %11602 = vmatprep.mubr.msk.bf16.mxu0 %vm13523_vm0, %v13522_v1 }
0x2360   :  { %11596 = vmatprep.subr.bf16.mxu0 %v13522_v1 }
0x2363   :  { %v3183_v32 = vpop.f32.mrb[92].mxu1  ;;  %11597 = vmatpush3.bf16.msra.mxu0 %v14682_v48 }
0x2364   :  { %v3184_v19 = vadd.f32 %v3183_v32, %v3144_v61  ;;  %v11584_v49 = vpop.f32.mrb[93].mxu1  ;;  %11598 = vmatprep.subr.bf16.mxu0 %v13522_v1 }
0x2365   :  { %v3186_v28 = vpop.f32.mrb[94].mxu1 }
0x2366   :  { %v3192_v22 = vadd.f32 %v3190_v2, %v3184_v19  ;;  %v3187_v58 = vadd.f32 %v3186_v28, %v3145_v18  ;;  %v11585_v16 = vpop.f32.mrb[95].mxu1 }
0x2367   :  { %11599 = vmatpush3.bf16.msra.mxu0 %v14600_v35 }
0x2368   :  { %v3196_v3 = vmul.f32 %v3192_v22, %v13869_v44  ;;  %v3193_v60 = vadd.f32 %v3191_v63, %v3187_v58  ;;  %11600 = vmatprep.subr.bf16.mxu0 %v13522_v1 }
0x236a   :  { %v14844_v14 = vadd.f32 %v3196_v3, %v14569_v45  ;;  %v3197_v34 = vmul.f32 %v3193_v60, %v13869_v44 }
0x236b   :  { %11601 = vmatpush3.bf16.msra.mxu0 %v14607_v10 }
0x236c   :  { %v14849_v6 = vadd.f32 %v3197_v34, %v14574_v8  ;;  %11614 = vmatprep.subr.bf16.mxu0 %v13522_v1 }
0x2431   :  { %v3251_v45 = vpop.f32.mrb[124].mxu0 }
0x2432   :  { %v3252_v13 = vadd.f32 %v3251_v45, %v3204_v57  ;;  %v11592_v24 = vpop.f32.mrb[125].mxu0 }
0x2433   :  { %v3254_v37 = vpop.f32.mrb[126].mxu0 }
0x2434   :  { %13218 = vtanh.f32 %v3252_v13  ;;  %v3255_v25 = vadd.f32 %v3254_v37, %v3204_v57  ;;  %v11593_v26 = vpop.f32.mrb[127].mxu0 }
0x2436   :  { %13220 = vtanh.f32 %v3255_v25 }
0x243e   :  { %v13219_v8 = vpop.eup %13218 }
0x243f   :  { %v14859_v38 = vmul.f32 %v13219_v8, %v13219_v8 }
0x2440   :  { %v13221_v7 = vpop.eup %13220 }
0x2441   :  { %v3260_v4 = vpack.c.bf16 %v13221_v7, %v13219_v8  ;;  %v14861_v5 = vmul.f32 %v13221_v7, %v13221_v7 }
0x2443   :  { %11603 = vmatmul.mubr.msk.bf16.vlgmr.msra.gmra.mrb[128].mxu0 %vm199_vm2, %v3260_v4  ;;  %v3307_v30 = vpack.c.bf16 %v14861_v5, %v14859_v38 }
0x2444   :  { %11615 = vmatpush3.bf16.msra.mxu0 %v14666_v47  ;;  %11622 = vmatprep.mubr.msk.bf16.mxu0 %vm13523_vm0, %v13522_v1 }
0x2445   :  { %11616 = vmatprep.subr.bf16.mxu0 %v13522_v1 }
0x2448   :  { %11617 = vmatpush3.bf16.msra.mxu0 %v14682_v48 }
0x2449   :  { %11618 = vmatprep.subr.bf16.mxu0 %v13522_v1 }
0x244c   :  { %11619 = vmatpush3.bf16.msra.mxu0 %v14600_v35 }
0x244d   :  { %11620 = vmatprep.subr.bf16.mxu0 %v13522_v1 }
0x2450   :  { %11621 = vmatpush3.bf16.msra.mxu0 %v14607_v10 }
0x2451   :  { %11638 = vmatprep.subr.bf16.mxu0 %v13522_v1 }
0x2516   :  { %v3298_v39 = vpop.f32.mrb[128].mxu0 }
0x2517   :  { %v14877_v54 = vadd.f32 %v14693_v53, %v3298_v39  ;;  %v11604_v20 = vpop.f32.mrb[129].mxu0 }
0x2518   :  { %v3301_v21 = vpop.f32.mrb[130].mxu0 }
0x2519   :  { %v3308_v15 = vmul.f32 %v14877_v54, %v13695_v29  ;;  %v14882_v50 = vadd.f32 %v14693_v53, %v3301_v21  ;;  %v11605_v52 = vpop.f32.mrb[131].mxu0 }
0x251b   :  { %v3309_v59 = vmul.f32 %v14882_v50, %v13695_v29  ;;  %v3310_v42 = vadd.f32 %v3308_v15, %v14822_v31 }
0x251d   :  { %v3311_v17 = vadd.f32 %v3309_v59, %v14825_v51 }
0x251f   :  { %v3312_v0 = vpack.c.bf16 %v3311_v17, %v3310_v42 }
0x2521   :  { %11611 = vmatmul.mubr.msk.bf16.vlgmr.msra.gmra.mrb[96].mxu1 %vm127_vm1, %v3312_v0 }
0x2522   :  { %11627 = vmatpush3.bf16.msra.mxu1 %v14756_v27  ;;  %11634 = vmatprep.mubr.msk.bf16.mxu1 %vm13523_vm0, %v13522_v1 }
0x2523   :  { %11628 = vmatprep.subr.bf16.mxu1 %v13522_v1 }
0x2526   :  { %11629 = vmatpush3.bf16.msra.mxu1 %v14765_v43 }
0x2527   :  { %11630 = vmatprep.subr.bf16.mxu1 %v13522_v1 }
0x252a   :  { %11631 = vmatpush3.bf16.msra.mxu1 %v14772_v40 }
0x252b   :  { %11632 = vmatprep.subr.bf16.mxu1 %v13522_v1 }
0x252e   :  { %11633 = vmatpush3.bf16.msra.mxu1 %v14779_v62 }
0x252f   :  { %11646 = vmatprep.subr.bf16.mxu1 %v13522_v1 }
0x25f4   :  { %v3350_v61 = vpop.f32.mrb[96].mxu1 }
0x25f5   :  { %v3351_v32 = vadd.f32 %v3350_v61, %v3208_v9  ;;  %v11612_v18 = vpop.f32.mrb[97].mxu1 }
0x25f6   :  { %v3353_v2 = vpop.f32.mrb[98].mxu1 }
0x25f7   :  { %13222 = vtanh.f32 %v3351_v32  ;;  %v3354_v19 = vadd.f32 %v3353_v2, %v3208_v9  ;;  %v11613_v49 = vpop.f32.mrb[99].mxu1 }
0x25f9   :  { %13224 = vtanh.f32 %v3354_v19 }
0x2601   :  { %v13223_v28 = vpop.eup %13222 }
0x2602   :  { %v3404_v22 = vmul.f32 %v13223_v28, %v13223_v28 }
0x2603   :  { %v13225_v63 = vpop.eup %13224 }
0x2604   :  { %v3405_v58 = vmul.f32 %v13225_v63, %v13225_v63  ;;  %v3359_v16 = vpack.c.bf16 %v13225_v63, %v13223_v28 }
0x2606   :  { %11623 = vmatmul.mubr.msk.bf16.vlgmr.msra.gmra.mrb[132].mxu0 %vm199_vm2, %v3359_v16  ;;  %v3406_v3 = vpack.c.bf16 %v3405_v58, %v3404_v22 }
0x2607   :  { %11639 = vmatpush3.bf16.msra.mxu0 %v14656_v36  ;;  %11642 = vmatprep.mubr.msk.bf16.mxu0 %vm13523_vm0, %v13522_v1 }
0x2608   :  { %11635 = vmatmul.mubr.msk.bf16.vlgmr.msra.gmra.mrb[100].mxu1 %vm199_vm2, %v3406_v3  ;;  %11640 = vmatprep.subr.bf16.mxu0 %v13522_v1 }
0x2609   :  { %11647 = vmatpush3.bf16.msra.mxu1 %v14666_v47  ;;  %11654 = vmatprep.mubr.msk.bf16.mxu1 %vm13523_vm0, %v13522_v1 }
0x260a   :  { %11648 = vmatprep.subr.bf16.mxu1 %v13522_v1 }
0x260b   :  { %11641 = vmatpush3.bf16.msra.mxu0 %v14675_v11 }
0x260c   :  { %11658 = vmatprep.subr.bf16.mxu0 %v13522_v1 }
0x260d   :  { %11649 = vmatpush3.bf16.msra.mxu1 %v14682_v48 }
0x260e   :  { %11650 = vmatprep.subr.bf16.mxu1 %v13522_v1 }
0x2611   :  { %11651 = vmatpush3.bf16.msra.mxu1 %v14600_v35 }
0x2612   :  { %11652 = vmatprep.subr.bf16.mxu1 %v13522_v1 }
0x2615   :  { %11653 = vmatpush3.bf16.msra.mxu1 %v14607_v10 }
0x2616   :  { %11670 = vmatprep.subr.bf16.mxu1 %v13522_v1 }
0x26d9   :  { %v3397_v60 = vpop.f32.mrb[132].mxu0 }
0x26da   :  { %v3398_v34 = vadd.f32 %v14693_v53, %v3397_v60  ;;  %v11624_v33 = vpop.f32.mrb[133].mxu0 }
0x26db   :  { %v3400_v41 = vpop.f32.mrb[134].mxu0  ;;  %v14922_v57 = vpop.f32.mrb[100].mxu1 }
0x26dc   :  { %v3451_v45 = vmul.f32 %v3398_v34, %v13695_v29  ;;  %v3401_v13 = vadd.f32 %v14693_v53, %v3400_v41  ;;  %v11625_v24 = vpop.f32.mrb[135].mxu0  ;;  %v11636_v37 = vpop.f32.mrb[101].mxu1 }
0x26dd   :  { %v14926_v25 = vpop.f32.mrb[102].mxu1 }
0x26de   :  { %v3452_v26 = vmul.f32 %v3401_v13, %v13695_v29  ;;  %v11637_v8 = vpop.f32.mrb[103].mxu1  ;;  %v3453_v7 = vadd.f32 %v3451_v45, %v14822_v31  ;;  %v3738_v2 = vmul.f32 2.0, %v3401_v13 }
0x26e0   :  { %v3454_v4 = vadd.f32 %v3452_v26, %v14825_v51 }
0x26e2   :  { %v3455_v39 = vpack.c.bf16 %v3454_v4, %v3453_v7 }
0x26e4   :  { %11643 = vmatmul.mubr.msk.bf16.vlgmr.msra.gmra.mrb[136].mxu0 %vm127_vm1, %v3455_v39 }
0x26e5   :  { %11659 = vmatpush3.bf16.msra.mxu0 %v14756_v27  ;;  %11666 = vmatprep.mubr.msk.bf16.mxu0 %vm13523_vm0, %v13522_v1 }
0x26e6   :  { %11660 = vmatprep.subr.bf16.mxu0 %v13522_v1 }
0x26e9   :  { %11661 = vmatpush3.bf16.msra.mxu0 %v14765_v43 }
0x26ea   :  { %11662 = vmatprep.subr.bf16.mxu0 %v13522_v1 }
0x26ed   :  { %11663 = vmatpush3.bf16.msra.mxu0 %v14772_v40 }
0x26ee   :  { %11664 = vmatprep.subr.bf16.mxu0 %v13522_v1 }
0x26f1   :  { %11665 = vmatpush3.bf16.msra.mxu0 %v14779_v62 }
0x26f2   :  { %11678 = vmatprep.subr.bf16.mxu0 %v13522_v1 }
0x27b7   :  { %v3493_v20 = vpop.f32.mrb[136].mxu0 }
0x27b8   :  { %v3494_v21 = vadd.f32 %v3493_v20, %v3208_v9  ;;  %v11644_v15 = vpop.f32.mrb[137].mxu0 }
0x27b9   :  { %v3496_v52 = vpop.f32.mrb[138].mxu0 }
0x27ba   :  { %13226 = vtanh.f32 %v3494_v21  ;;  %v3497_v59 = vadd.f32 %v3496_v52, %v3208_v9  ;;  %v11645_v42 = vpop.f32.mrb[139].mxu0  ;;  %v3737_v9 = vmul.f32 2.0, %v3398_v34  ;;  %v3740_v34 = vadd.f32 %v3738_v2, %v14882_v50 }
0x27bc   :  { %13228 = vtanh.f32 %v3497_v59  ;;  %v3739_v33 = vadd.f32 %v3737_v9, %v14877_v54  ;;  %v3210_v54 = vstv %s3209_s16 }
0x27bd   :  { %v3211_v50 = vmul.f32 %v14639_v55, %v3210_v54 }
0x27bf   :  { %v3212_v39 = vadd.f32 %v14645_v56, %v3211_v50 }
0x27c4   :  { %v13227_v17 = vpop.eup %13226 }
0x27c5   :  { %v3547_v12 = vmul.f32 %v13227_v17, %v13227_v17 }
0x27c6   :  { %v13229_v0 = vpop.eup %13228 }
0x27c7   :  { %v3548_v23 = vmul.f32 %v13229_v0, %v13229_v0  ;;  %v3502_v61 = vpack.c.bf16 %v13229_v0, %v13227_v17 }
0x27c9   :  { %11655 = vmatmul.mubr.msk.bf16.vlgmr.msra.gmra.mrb[104].mxu1 %vm199_vm2, %v3502_v61  ;;  %v3549_v32 = vpack.c.bf16 %v3548_v23, %v3547_v12 }
0x27ca   :  { %11671 = vmatpush3.bf16.msra.mxu1 %v14656_v36  ;;  %11674 = vmatprep.mubr.msk.bf16.mxu1 %vm13523_vm0, %v13522_v1 }
0x27cb   :  { %11667 = vmatmul.mubr.msk.bf16.vlgmr.msra.gmra.mrb[140].mxu0 %vm199_vm2, %v3549_v32  ;;  %11672 = vmatprep.subr.bf16.mxu1 %v13522_v1 }
0x27cc   :  { %11679 = vmatpush3.bf16.msra.mxu0 %v14666_v47  ;;  %11686 = vmatprep.mubr.msk.bf16.mxu0 %vm13523_vm0, %v13522_v1 }
0x27cd   :  { %11680 = vmatprep.subr.bf16.mxu0 %v13522_v1 }
0x27ce   :  { %11673 = vmatpush3.bf16.msra.mxu1 %v14675_v11 }
0x27cf   :  { %11690 = vmatprep.subr.bf16.mxu1 %v13522_v1 }
0x27d0   :  { %11681 = vmatpush3.bf16.msra.mxu0 %v14682_v48 }
0x27d1   :  { %11682 = vmatprep.subr.bf16.mxu0 %v13522_v1 }
0x27d4   :  { %11683 = vmatpush3.bf16.msra.mxu0 %v14600_v35 }
0x27d5   :  { %11684 = vmatprep.subr.bf16.mxu0 %v13522_v1 }
0x27d8   :  { %11685 = vmatpush3.bf16.msra.mxu0 %v14607_v10 }
0x27d9   :  { %11714 = vmatprep.subr.bf16.mxu0 %v13522_v1 }
0x289c   :  { %v3540_v18 = vpop.f32.mrb[104].mxu1 }
0x289d   :  { %v3541_v19 = vadd.f32 %v14693_v53, %v3540_v18  ;;  %v11656_v49 = vpop.f32.mrb[105].mxu1 }
0x289e   :  { %v3543_v28 = vpop.f32.mrb[106].mxu1  ;;  %v14961_v63 = vpop.f32.mrb[140].mxu0 }
0x289f   :  { %v3594_v22 = vmul.f32 %v3541_v19, %v13810_v46  ;;  %v3741_v58 = vmul.f32 2.0, %v3541_v19  ;;  %v3544_v16 = vadd.f32 %v14693_v53, %v3543_v28  ;;  %v11657_v3 = vpop.f32.mrb[107].mxu1  ;;  %v11668_v60 = vpop.f32.mrb[141].mxu0 }
0x28a0   :  { %v14966_v41 = vpop.f32.mrb[142].mxu0  ;;  %v3751_v60 = vmul.f32 2.0, %v14922_v57 }
0x28a1   :  { %v3595_v45 = vmul.f32 %v3544_v16, %v13810_v46  ;;  %v3742_v13 = vmul.f32 2.0, %v3544_v16  ;;  %v11669_v24 = vpop.f32.mrb[143].mxu0  ;;  %v3743_v37 = vadd.f32 %v3741_v58, %v3739_v33  ;;  %v3596_v26 = vadd.f32 %v3594_v22, %v14822_v31 }
0x28a2   :  { %v3798_v24 = vmul.f32 2.0, %v14966_v41  ;;  %v3809_v41 = vstv %s15052_s17  ;;  %s5030_s17 = sadd.f32 %s15525_s30, %s13658_s15 }
0x28a3   :  { %v3597_v8 = vadd.f32 %v3595_v45, %v14825_v51  ;;  %v3744_v7 = vadd.f32 %v3742_v13, %v3740_v34  ;;  %v3810_v54 = vmul.f32 %v14639_v55, %v3809_v41 }
0x28a5   :  { %v3598_v4 = vpack.c.bf16 %v3597_v8, %v3596_v26  ;;  %v3811_v50 = vadd.f32 %v14645_v56, %v3810_v54 }
0x28a7   :  { %11675 = vmatmul.mubr.msk.bf16.vlgmr.msra.gmra.mrb[108].mxu1 %vm127_vm1, %v3598_v4 }
0x28a8   :  { %11691 = vmatpush3.bf16.msra.mxu1 %v14756_v27  ;;  %11698 = vmatprep.mubr.msk.bf16.mxu1 %vm13523_vm0, %v13522_v1 }
0x28a9   :  { %11692 = vmatprep.subr.bf16.mxu1 %v13522_v1 }
0x28ac   :  { %11693 = vmatpush3.bf16.msra.mxu1 %v14765_v43 }
0x28ad   :  { %11694 = vmatprep.subr.bf16.mxu1 %v13522_v1 }
0x28b0   :  { %11695 = vmatpush3.bf16.msra.mxu1 %v14772_v40 }
0x28b1   :  { %11696 = vmatprep.subr.bf16.mxu1 %v13522_v1 }
0x28b4   :  { %11697 = vmatpush3.bf16.msra.mxu1 %v14779_v62 }
0x28b5   :  { %11702 = vmatprep.subr.bf16.mxu1 %v13522_v1 }
0x297a   :  { %v3636_v20 = vpop.f32.mrb[108].mxu1 }
0x297b   :  { %v3637_v21 = vadd.f32 %v3636_v20, %v3212_v39  ;;  %v11676_v15 = vpop.f32.mrb[109].mxu1 }
0x297c   :  { %v3639_v52 = vpop.f32.mrb[110].mxu1 }
0x297d   :  { %13230 = vtanh.f32 %v3637_v21  ;;  %v3640_v59 = vadd.f32 %v3639_v52, %v3212_v39  ;;  %v11677_v42 = vpop.f32.mrb[111].mxu1 }
0x297f   :  { %13232 = vtanh.f32 %v3640_v59 }
0x2987   :  { %v13231_v17 = vpop.eup %13230 }
0x2988   :  { %v3690_v12 = vmul.f32 %v13231_v17, %v13231_v17 }
0x2989   :  { %v13233_v0 = vpop.eup %13232 }
0x298a   :  { %v3691_v23 = vmul.f32 %v13233_v0, %v13233_v0  ;;  %v3645_v61 = vpack.c.bf16 %v13233_v0, %v13231_v17 }
0x298c   :  { %11687 = vmatmul.mubr.msk.bf16.vlgmr.msra.gmra.mrb[144].mxu0 %vm199_vm2, %v3645_v61  ;;  %v3692_v32 = vpack.c.bf16 %v3691_v23, %v3690_v12 }
0x298d   :  { %11715 = vmatpush3.bf16.msra.mxu0 %v14656_v36  ;;  %11718 = vmatprep.mubr.msk.bf16.mxu0 %vm13523_vm0, %v13522_v1 }
0x298e   :  { %11699 = vmatmul.mubr.msk.bf16.vlgmr.msra.gmra.mrb[112].mxu1 %vm199_vm2, %v3692_v32  ;;  %11716 = vmatprep.subr.bf16.mxu0 %v13522_v1 }
0x298f   :  { %11703 = vmatpush3.bf16.msra.mxu1 %v14756_v27  ;;  %11710 = vmatprep.mubr.msk.bf16.mxu1 %vm13523_vm0, %v13522_v1 }
0x2990   :  { %11704 = vmatprep.subr.bf16.mxu1 %v13522_v1 }
0x2991   :  { %11717 = vmatpush3.bf16.msra.mxu0 %v14675_v11 }
0x2992   :  { %11722 = vmatprep.subr.bf16.mxu0 %v13522_v1 }
0x2993   :  { %11705 = vmatpush3.bf16.msra.mxu1 %v14765_v43 }
0x2994   :  { %11706 = vmatprep.subr.bf16.mxu1 %v13522_v1 }
0x2997   :  { %11707 = vmatpush3.bf16.msra.mxu1 %v14772_v40 }
0x2998   :  { %11708 = vmatprep.subr.bf16.mxu1 %v13522_v1 }
0x299b   :  { %11709 = vmatpush3.bf16.msra.mxu1 %v14779_v62 }
0x299c   :  { %11734 = vmatprep.subr.bf16.mxu1 %v13522_v1 }
0x299e   :  { %11711 = vmatmul.mubr.msk.bf16.vlgmr.msra.gmra.mrb[112].mxu1 %vm199_vm2, %v3307_v30 }
0x299f   :  { %11735 = vmatpush3.bf16.msra.mxu1 %v14656_v36  ;;  %11738 = vmatprep.mubr.msk.bf16.mxu1 %vm13523_vm0, %v13522_v1 }
0x29a0   :  { %11736 = vmatprep.subr.bf16.mxu1 %v13522_v1 }
0x29a3   :  { %11737 = vmatpush3.bf16.msra.mxu1 %v14675_v11 }
0x29a4   :  { %11754 = vmatprep.subr.bf16.mxu1 %v13522_v1 }
0x2a5f   :  { %v3683_v9 = vpop.f32.mrb[144].mxu0 }
0x2a60   :  { %v3684_v18 = vadd.f32 %v14693_v53, %v3683_v9  ;;  %v11688_v2 = vpop.f32.mrb[145].mxu0 }
0x2a61   :  { %v3686_v19 = vpop.f32.mrb[146].mxu0 }
0x2a62   :  { %v3745_v49 = vadd.f32 %v3743_v37, %v3684_v18  ;;  %v3687_v38 = vadd.f32 %v14693_v53, %v3686_v19  ;;  %v11689_v5 = vpop.f32.mrb[147].mxu0 }
0x2a63   :  { %v3813_v5 = vstv %s3812_s18 }
0x2a64   :  { %v3747_v30 = vmul.f32 %v3745_v49, %v13869_v44  ;;  %v3746_v28 = vadd.f32 %v3744_v7, %v3687_v38 }
0x2a66   :  { %v3748_v22 = vmul.f32 %v3746_v28, %v13869_v44  ;;  %v15020_v58 = vadd.f32 %v3747_v30, %v14822_v31  ;;  %v3752_v31 = vmul.f32 2.0, %v14926_v25  ;;  %v3814_v30 = vmul.f32 %v14639_v55, %v3813_v5  ;;  %v15186_v5 = vld [vmem:[%s17345_s4 + $0x8] sm:$0xff]  }
0x2a68   :  { %v15023_v16 = vadd.f32 %v3748_v22, %v14825_v51  ;;  %v3797_v51 = vmul.f32 2.0, %v14961_v63  ;;  %v15101_v28 = vadd.f32 %v14645_v56, %v3814_v30  ;;  %v15122_v56 = vld [vmem:[%s17345_s4 + $0x10] sm:$0xff]  }
0x2a6a   :  { %v3820_v3 = vpack.c.bf16 %v15023_v16, %v15020_v58 }
0x2a6c   :  { %11719 = vmatmul.mubr.msk.bf16.vlgmr.msra.gmra.mrb[148].mxu0 %vm127_vm1, %v3820_v3 }
0x2a6d   :  { %11723 = vmatpush3.bf16.msra.mxu0 %v14666_v47  ;;  %11730 = vmatprep.mubr.msk.bf16.mxu0 %vm13523_vm0, %v13522_v1 }
0x2a6e   :  { %11724 = vmatprep.subr.bf16.mxu0 %v13522_v1 }
0x2a71   :  { %v3790_v33 = vpop.f32.mrb[112].mxu1  ;;  %11725 = vmatpush3.bf16.msra.mxu0 %v14682_v48 }
0x2a72   :  { %v3791_v34 = vadd.f32 %v3790_v33, %v3751_v60  ;;  %v11712_v45 = vpop.f32.mrb[113].mxu1  ;;  %11726 = vmatprep.subr.bf16.mxu0 %v13522_v1 }
0x2a73   :  { %v3793_v13 = vpop.f32.mrb[114].mxu1 }
0x2a74   :  { %v3799_v37 = vadd.f32 %v3797_v51, %v3791_v34  ;;  %v3794_v26 = vadd.f32 %v3793_v13, %v3752_v31  ;;  %v11713_v8 = vpop.f32.mrb[115].mxu1 }
0x2a75   :  { %11727 = vmatpush3.bf16.msra.mxu0 %v14600_v35 }
0x2a76   :  { %v3803_v57 = vmul.f32 %v3799_v37, %v13869_v44  ;;  %v3800_v7 = vadd.f32 %v3798_v24, %v3794_v26  ;;  %11728 = vmatprep.subr.bf16.mxu0 %v13522_v1 }
0x2a78   :  { %v15042_v25 = vadd.f32 %v3803_v57, %v14844_v14  ;;  %v3804_v63 = vmul.f32 %v3800_v7, %v13869_v44 }
0x2a79   :  { %11729 = vmatpush3.bf16.msra.mxu0 %v14607_v10 }
0x2a7a   :  { %v15047_v4 = vadd.f32 %v3804_v63, %v14849_v6  ;;  %11742 = vmatprep.subr.bf16.mxu0 %v13522_v1 }
0x2b3f   :  { %v3858_v14 = vpop.f32.mrb[148].mxu0 }
0x2b40   :  { %v3859_v39 = vadd.f32 %v3858_v14, %v3811_v50  ;;  %v11720_v20 = vpop.f32.mrb[149].mxu0 }
0x2b41   :  { %v3861_v21 = vpop.f32.mrb[150].mxu0 }
0x2b42   :  { %13234 = vtanh.f32 %v3859_v39  ;;  %v3862_v15 = vadd.f32 %v3861_v21, %v3811_v50  ;;  %v11721_v52 = vpop.f32.mrb[151].mxu0 }
0x2b44   :  { %13236 = vtanh.f32 %v3862_v15 }
0x2b4c   :  { %v13235_v6 = vpop.eup %13234 }
0x2b4d   :  { %v15057_v42 = vmul.f32 %v13235_v6, %v13235_v6 }
0x2b4e   :  { %v13237_v59 = vpop.eup %13236 }
0x2b4f   :  { %v15059_v17 = vmul.f32 %v13237_v59, %v13237_v59  ;;  %v3867_v0 = vpack.c.bf16 %v13237_v59, %v13235_v6 }
0x2b51   :  { %11731 = vmatmul.mubr.msk.bf16.vlgmr.msra.gmra.mrb[152].mxu0 %vm199_vm2, %v3867_v0  ;;  %v3914_v12 = vpack.c.bf16 %v15059_v17, %v15057_v42 }
0x2b52   :  { %11743 = vmatpush3.bf16.msra.mxu0 %v14666_v47  ;;  %11750 = vmatprep.mubr.msk.bf16.mxu0 %vm13523_vm0, %v13522_v1 }
0x2b53   :  { %11744 = vmatprep.subr.bf16.mxu0 %v13522_v1 }
0x2b56   :  { %11745 = vmatpush3.bf16.msra.mxu0 %v14682_v48 }
0x2b57   :  { %11746 = vmatprep.subr.bf16.mxu0 %v13522_v1 }
0x2b5a   :  { %11747 = vmatpush3.bf16.msra.mxu0 %v14600_v35 }
0x2b5b   :  { %11748 = vmatprep.subr.bf16.mxu0 %v13522_v1 }
0x2b5e   :  { %11749 = vmatpush3.bf16.msra.mxu0 %v14607_v10 }
0x2b5f   :  { %11766 = vmatprep.subr.bf16.mxu0 %v13522_v1 }
0x2c24   :  { %v3905_v23 = vpop.f32.mrb[152].mxu0 }
0x2c25   :  { %v15075_v61 = vadd.f32 %v14693_v53, %v3905_v23  ;;  %v11732_v32 = vpop.f32.mrb[153].mxu0 }
0x2c26   :  { %v3908_v9 = vpop.f32.mrb[154].mxu0 }
0x2c27   :  { %v3915_v18 = vmul.f32 %v15075_v61, %v13695_v29  ;;  %v15080_v2 = vadd.f32 %v14693_v53, %v3908_v9  ;;  %v11733_v35 = vpop.f32.mrb[155].mxu0 }
0x2c29   :  { %v3916_v10 = vmul.f32 %v15080_v2, %v13695_v29  ;;  %v3917_v19 = vadd.f32 %v3915_v18, %v15020_v58 }
0x2c2b   :  { %v3918_v49 = vadd.f32 %v3916_v10, %v15023_v16 }
0x2c2d   :  { %v3919_v38 = vpack.c.bf16 %v3918_v49, %v3917_v19  ;;  %v15160_v19 = vld [vmem:[%s17344_s3] sm:$0xff]  }
0x2c2e   :  { %v15170_v49 = vld [vmem:[%s17345_s4] sm:$0xff]  }
0x2c2f   :  { %11739 = vmatmul.mubr.msk.bf16.vlgmr.msra.gmra.mrb[116].mxu1 %vm127_vm1, %v3919_v38  ;;  %v15179_v38 = vld [vmem:[%s17344_s3 + $0x8] sm:$0xff]  }
0x2c30   :  { %11755 = vmatpush3.bf16.msra.mxu1 %v14756_v27  ;;  %11762 = vmatprep.mubr.msk.bf16.mxu1 %vm13523_vm0, %v13522_v1 }
0x2c31   :  { %11756 = vmatprep.subr.bf16.mxu1 %v13522_v1 }
0x2c34   :  { %11757 = vmatpush3.bf16.msra.mxu1 %v14765_v43 }
0x2c35   :  { %11758 = vmatprep.subr.bf16.mxu1 %v13522_v1 }
0x2c38   :  { %11759 = vmatpush3.bf16.msra.mxu1 %v14772_v40 }
0x2c39   :  { %11760 = vmatprep.subr.bf16.mxu1 %v13522_v1 }
0x2c3c   :  { %11761 = vmatpush3.bf16.msra.mxu1 %v14779_v62 }
0x2c3d   :  { %11774 = vmatprep.subr.bf16.mxu1 %v13522_v1 }
0x2d02   :  { %v3957_v22 = vpop.f32.mrb[116].mxu1 }
0x2d03   :  { %v3958_v3 = vadd.f32 %v3957_v22, %v15101_v28  ;;  %v11740_v60 = vpop.f32.mrb[117].mxu1 }
0x2d04   :  { %v3960_v33 = vpop.f32.mrb[118].mxu1 }
0x2d05   :  { %13238 = vtanh.f32 %v3958_v3  ;;  %v3961_v31 = vadd.f32 %v3960_v33, %v15101_v28  ;;  %v11741_v51 = vpop.f32.mrb[119].mxu1  ;;  %v15197_v3 = vld [vmem:[%s17349_s8] ss:$0 sm:$0xff] }
0x2d07   :  { %13240 = vtanh.f32 %v3961_v31 }
0x2d0f   :  { %v13239_v34 = vpop.eup %13238 }
0x2d10   :  { %v4011_v13 = vmul.f32 %v13239_v34, %v13239_v34 }
0x2d11   :  { %v13241_v45 = vpop.eup %13240 }
0x2d12   :  { %v4012_v24 = vmul.f32 %v13241_v45, %v13241_v45  ;;  %v3966_v37 = vpack.c.bf16 %v13241_v45, %v13239_v34 }
0x2d14   :  { %11751 = vmatmul.mubr.msk.bf16.vlgmr.msra.gmra.mrb[156].mxu0 %vm199_vm2, %v3966_v37  ;;  %v4013_v55 = vpack.c.bf16 %v4012_v24, %v4011_v13 }
0x2d15   :  { %11767 = vmatpush3.bf16.msra.mxu0 %v14656_v36  ;;  %11770 = vmatprep.mubr.msk.bf16.mxu0 %vm13523_vm0, %v13522_v1  ;;  %v15129_v36 = vld [vmem:[%s17345_s4 + $0x18] sm:$0xff]  }
0x2d16   :  { %11763 = vmatmul.mubr.msk.bf16.vlgmr.msra.gmra.mrb[120].mxu1 %vm199_vm2, %v4013_v55  ;;  %11768 = vmatprep.subr.bf16.mxu0 %v13522_v1 }
0x2d17   :  { %11775 = vmatpush3.bf16.msra.mxu1 %v14666_v47  ;;  %11782 = vmatprep.mubr.msk.bf16.mxu1 %vm13523_vm0, %v13522_v1 }
0x2d18   :  { %11776 = vmatprep.subr.bf16.mxu1 %v13522_v1 }
0x2d19   :  { %11769 = vmatpush3.bf16.msra.mxu0 %v14675_v11 }
0x2d1a   :  { %11786 = vmatprep.subr.bf16.mxu0 %v13522_v1 }
0x2d1b   :  { %11777 = vmatpush3.bf16.msra.mxu1 %v14682_v48 }
0x2d1c   :  { %11778 = vmatprep.subr.bf16.mxu1 %v13522_v1 }
0x2d1f   :  { %11779 = vmatpush3.bf16.msra.mxu1 %v15122_v56 }
0x2d20   :  { %11780 = vmatprep.subr.bf16.mxu1 %v13522_v1 }
0x2d23   :  { %11781 = vmatpush3.bf16.msra.mxu1 %v15129_v36 }
0x2d24   :  { %11798 = vmatprep.subr.bf16.mxu1 %v13522_v1 }
0x2de7   :  { %v4004_v47 = vpop.f32.mrb[156].mxu0 }
0x2de8   :  { %v4005_v11 = vadd.f32 %v14693_v53, %v4004_v47  ;;  %v11752_v48 = vpop.f32.mrb[157].mxu0 }
0x2de9   :  { %v4007_v26 = vpop.f32.mrb[158].mxu0  ;;  %v15134_v8 = vpop.f32.mrb[120].mxu1 }
0x2dea   :  { %v4058_v57 = vmul.f32 %v4005_v11, %v13695_v29  ;;  %v4008_v7 = vadd.f32 %v14693_v53, %v4007_v26  ;;  %v11753_v63 = vpop.f32.mrb[159].mxu0  ;;  %v11764_v41 = vpop.f32.mrb[121].mxu1  ;;  %v4344_v30 = vmul.f32 2.0, %v4005_v11 }
0x2deb   :  { %v15138_v54 = vpop.f32.mrb[122].mxu1 }
0x2dec   :  { %v4059_v50 = vmul.f32 %v4008_v7, %v13695_v29  ;;  %v11765_v14 = vpop.f32.mrb[123].mxu1  ;;  %v4060_v39 = vadd.f32 %v4058_v57, %v15020_v58  ;;  %v4345_v22 = vmul.f32 2.0, %v4008_v7  ;;  %v4346_v55 = vadd.f32 %v4344_v30, %v15075_v61 }
0x2ded   :  { %v3817_v61 = vstv %s3816_s13  ;;  %s5026_s13 = sadd.f32 %s15525_s30, %s13687_s21 }
0x2dee   :  { %v4061_v20 = vadd.f32 %v4059_v50, %v15023_v16  ;;  %v4347_v11 = vadd.f32 %v4345_v22, %v15080_v2 }
0x2df0   :  { %v4062_v21 = vpack.c.bf16 %v4061_v20, %v4060_v39 }
0x2df2   :  { %11771 = vmatmul.mubr.msk.bf16.vlgmr.msra.gmra.mrb[160].mxu0 %vm127_vm1, %v4062_v21 }
0x2df3   :  { %11787 = vmatpush3.bf16.msra.mxu0 %v14756_v27  ;;  %11794 = vmatprep.mubr.msk.bf16.mxu0 %vm13523_vm0, %v13522_v1 }
0x2df4   :  { %11788 = vmatprep.subr.bf16.mxu0 %v13522_v1 }
0x2df7   :  { %11789 = vmatpush3.bf16.msra.mxu0 %v14765_v43 }
0x2df8   :  { %11790 = vmatprep.subr.bf16.mxu0 %v13522_v1 }
0x2dfb   :  { %11791 = vmatpush3.bf16.msra.mxu0 %v14772_v40 }
0x2dfc   :  { %11792 = vmatprep.subr.bf16.mxu0 %v13522_v1 }
0x2dff   :  { %11793 = vmatpush3.bf16.msra.mxu0 %v14779_v62 }
0x2e00   :  { %11806 = vmatprep.subr.bf16.mxu0 %v13522_v1 }
0x2ec5   :  { %v4100_v53 = vpop.f32.mrb[160].mxu0 }
0x2ec6   :  { %v4101_v15 = vadd.f32 %v4100_v53, %v15101_v28  ;;  %v11772_v52 = vpop.f32.mrb[161].mxu0 }
0x2ec7   :  { %v4103_v6 = vpop.f32.mrb[162].mxu0 }
0x2ec8   :  { %13242 = vtanh.f32 %v4101_v15  ;;  %v4104_v59 = vadd.f32 %v4103_v6, %v15101_v28  ;;  %v11773_v0 = vpop.f32.mrb[163].mxu0 }
0x2eca   :  { %13244 = vtanh.f32 %v4104_v59 }
0x2ed2   :  { %v13243_v23 = vpop.eup %13242 }
0x2ed3   :  { %v4154_v9 = vmul.f32 %v13243_v23, %v13243_v23 }
0x2ed4   :  { %v13245_v32 = vpop.eup %13244 }
0x2ed5   :  { %v4155_v18 = vmul.f32 %v13245_v32, %v13245_v32  ;;  %v4109_v35 = vpack.c.bf16 %v13245_v32, %v13243_v23 }
0x2ed7   :  { %11783 = vmatmul.mubr.msk.bf16.vlgmr.msra.gmra.mrb[124].mxu1 %vm199_vm2, %v4109_v35  ;;  %v4156_v10 = vpack.c.bf16 %v4155_v18, %v4154_v9  ;;  %v15249_v9 = vld [vmem:[%s17346_s5] sm:$0xff]   ;;  %v15260_v18 = vld [vmem:[%s17346_s5 + $0x8] sm:$0xff]   ;;  %v15267_v35 = vld [vmem:[%s17346_s5 + $0x10] sm:$0xff]  }
0x2ed8   :  { %11799 = vmatpush3.bf16.msra.mxu1 %v15160_v19  ;;  %11802 = vmatprep.mubr.msk.bf16.mxu1 %vm13523_vm0, %v13522_v1 }
0x2ed9   :  { %11795 = vmatmul.mubr.msk.bf16.vlgmr.msra.gmra.mrb[164].mxu0 %vm199_vm2, %v4156_v10  ;;  %11800 = vmatprep.subr.bf16.mxu1 %v13522_v1  ;;  %v15274_v10 = vld [vmem:[%s17346_s5 + $0x18] sm:$0xff]  }
0x2eda   :  { %11807 = vmatpush3.bf16.msra.mxu0 %v15170_v49  ;;  %11814 = vmatprep.mubr.msk.bf16.mxu0 %vm13523_vm0, %v13522_v1 }
0x2edb   :  { %11808 = vmatprep.subr.bf16.mxu0 %v13522_v1 }
0x2edc   :  { %11801 = vmatpush3.bf16.msra.mxu1 %v15179_v38 }
0x2edd   :  { %11818 = vmatprep.subr.bf16.mxu1 %v13522_v1 }
0x2ede   :  { %11809 = vmatpush3.bf16.msra.mxu0 %v15186_v5 }
0x2edf   :  { %11810 = vmatprep.subr.bf16.mxu0 %v13522_v1 }
0x2ee2   :  { %11811 = vmatpush3.bf16.msra.mxu0 %v15122_v56 }
0x2ee3   :  { %11812 = vmatprep.subr.bf16.mxu0 %v13522_v1 }
0x2ee6   :  { %11813 = vmatpush3.bf16.msra.mxu0 %v15129_v36 }
0x2ee7   :  { %11842 = vmatprep.subr.bf16.mxu0 %v13522_v1 }
0x2faa   :  { %v4147_v28 = vpop.f32.mrb[124].mxu1 }
0x2fab   :  { %v4148_v60 = vadd.f32 %v15197_v3, %v4147_v28  ;;  %v11784_v33 = vpop.f32.mrb[125].mxu1 }
0x2fac   :  { %v4150_v31 = vpop.f32.mrb[126].mxu1  ;;  %v15200_v51 = vpop.f32.mrb[164].mxu0 }
0x2fad   :  { %v4201_v34 = vmul.f32 %v4148_v60, %v13810_v46  ;;  %v4348_v45 = vmul.f32 2.0, %v4148_v60  ;;  %v4151_v13 = vadd.f32 %v15197_v3, %v4150_v31  ;;  %v11785_v24 = vpop.f32.mrb[127].mxu1  ;;  %v11796_v37 = vpop.f32.mrb[165].mxu0 }
0x2fae   :  { %v15205_v47 = vpop.f32.mrb[166].mxu0  ;;  %v4358_v37 = vmul.f32 2.0, %v15134_v8 }
0x2faf   :  { %v4202_v48 = vmul.f32 %v4151_v13, %v13810_v46  ;;  %v4349_v26 = vmul.f32 2.0, %v4151_v13  ;;  %v11797_v57 = vpop.f32.mrb[167].mxu0  ;;  %v15209_v7 = vadd.f32 %v4348_v45, %v4346_v55  ;;  %v4203_v63 = vadd.f32 %v4201_v34, %v15020_v58 }
0x2fb0   :  { %v4405_v57 = vmul.f32 2.0, %v15205_v47  ;;  %v4416_v47 = vstv %s15327_s28  ;;  %s15989_s28 = sadd.f32 %s6235_s27, %s13652_s12  ;;  %s8056_s27 = smul.f32 13.0, %s13658_s15 }
0x2fb1   :  { %v4204_v41 = vadd.f32 %v4202_v48, %v15023_v16  ;;  %v15213_v50 = vadd.f32 %v4349_v26, %v4347_v11 }
0x2fb3   :  { %v4205_v14 = vpack.c.bf16 %v4204_v41, %v4203_v63 }
0x2fb5   :  { %11803 = vmatmul.mubr.msk.bf16.vlgmr.msra.gmra.mrb[128].mxu1 %vm127_vm1, %v4205_v14 }
0x2fb6   :  { %11819 = vmatpush3.bf16.msra.mxu1 %v14756_v27  ;;  %11826 = vmatprep.mubr.msk.bf16.mxu1 %vm13523_vm0, %v13522_v1  ;;  %v15231_v27 = vld [vmem:[%s17348_s7] ss:$0 sm:$0xff] }
0x2fb7   :  { %11820 = vmatprep.subr.bf16.mxu1 %v13522_v1  ;;  %v3818_v2 = vmul.f32 %v15231_v27, %v3817_v61  ;;  %v4417_v61 = vmul.f32 %v15231_v27, %v4416_v47 }
0x2fba   :  { %11821 = vmatpush3.bf16.msra.mxu1 %v14765_v43  ;;  %v15237_v43 = vld [vmem:[%s17347_s6] ss:$0 sm:$0xff] }
0x2fbb   :  { %11822 = vmatprep.subr.bf16.mxu1 %v13522_v1 }
0x2fbe   :  { %11823 = vmatpush3.bf16.msra.mxu1 %v14772_v40  ;;  %v3819_v40 = vadd.f32 %v15237_v43, %v3818_v2  ;;  %v4418_v2 = vadd.f32 %v15237_v43, %v4417_v61 }
0x2fbf   :  { %11824 = vmatprep.subr.bf16.mxu1 %v13522_v1 }
0x2fc2   :  { %11825 = vmatpush3.bf16.msra.mxu1 %v14779_v62 }
0x2fc3   :  { %11830 = vmatprep.subr.bf16.mxu1 %v13522_v1 }
0x3088   :  { %v4243_v39 = vpop.f32.mrb[128].mxu1 }
0x3089   :  { %v4244_v62 = vadd.f32 %v4243_v39, %v3819_v40  ;;  %v11804_v20 = vpop.f32.mrb[129].mxu1 }
0x308a   :  { %v4246_v21 = vpop.f32.mrb[130].mxu1 }
0x308b   :  { %13246 = vtanh.f32 %v4244_v62  ;;  %v4247_v53 = vadd.f32 %v4246_v21, %v3819_v40  ;;  %v11805_v15 = vpop.f32.mrb[131].mxu1 }
0x308d   :  { %13248 = vtanh.f32 %v4247_v53 }
0x3095   :  { %v13247_v52 = vpop.eup %13246 }
0x3096   :  { %v4297_v59 = vmul.f32 %v13247_v52, %v13247_v52 }
0x3097   :  { %v13249_v6 = vpop.eup %13248 }
0x3098   :  { %v4298_v0 = vmul.f32 %v13249_v6, %v13249_v6  ;;  %v4252_v23 = vpack.c.bf16 %v13249_v6, %v13247_v52 }
0x309a   :  { %11815 = vmatmul.mubr.msk.bf16.vlgmr.msra.gmra.mrb[168].mxu0 %vm199_vm2, %v4252_v23  ;;  %v4299_v32 = vpack.c.bf16 %v4298_v0, %v4297_v59 }
0x309b   :  { %11843 = vmatpush3.bf16.msra.mxu0 %v15160_v19  ;;  %11846 = vmatprep.mubr.msk.bf16.mxu0 %vm13523_vm0, %v13522_v1 }
0x309c   :  { %11827 = vmatmul.mubr.msk.bf16.vlgmr.msra.gmra.mrb[132].mxu1 %vm199_vm2, %v4299_v32  ;;  %11844 = vmatprep.subr.bf16.mxu0 %v13522_v1 }
0x309d   :  { %11831 = vmatpush3.bf16.msra.mxu1 %v15249_v9  ;;  %11838 = vmatprep.mubr.msk.bf16.mxu1 %vm13523_vm0, %v13522_v1 }
0x309e   :  { %11832 = vmatprep.subr.bf16.mxu1 %v13522_v1 }
0x309f   :  { %11845 = vmatpush3.bf16.msra.mxu0 %v15179_v38 }
0x30a0   :  { %11850 = vmatprep.subr.bf16.mxu0 %v13522_v1 }
0x30a1   :  { %11833 = vmatpush3.bf16.msra.mxu1 %v15260_v18 }
0x30a2   :  { %11834 = vmatprep.subr.bf16.mxu1 %v13522_v1 }
0x30a5   :  { %11835 = vmatpush3.bf16.msra.mxu1 %v15267_v35 }
0x30a6   :  { %11836 = vmatprep.subr.bf16.mxu1 %v13522_v1 }
0x30a9   :  { %11837 = vmatpush3.bf16.msra.mxu1 %v15274_v10 }
0x30aa   :  { %11862 = vmatprep.subr.bf16.mxu1 %v13522_v1 }
0x30ac   :  { %11839 = vmatmul.mubr.msk.bf16.vlgmr.msra.gmra.mrb[132].mxu1 %vm199_vm2, %v3914_v12 }
0x30ad   :  { %11863 = vmatpush3.bf16.msra.mxu1 %v15160_v19  ;;  %11866 = vmatprep.mubr.msk.bf16.mxu1 %vm13523_vm0, %v13522_v1 }
0x30ae   :  { %11864 = vmatprep.subr.bf16.mxu1 %v13522_v1 }
0x30b1   :  { %11865 = vmatpush3.bf16.msra.mxu1 %v15179_v38 }
0x30b2   :  { %11882 = vmatprep.subr.bf16.mxu1 %v13522_v1 }
0x316d   :  { %v4290_v30 = vpop.f32.mrb[168].mxu0 }
0x316e   :  { %v4291_v28 = vadd.f32 %v15197_v3, %v4290_v30  ;;  %v11816_v22 = vpop.f32.mrb[169].mxu0 }
0x316f   :  { %v4293_v60 = vpop.f32.mrb[170].mxu0 }
0x3170   :  { %v4352_v42 = vadd.f32 %v15209_v7, %v4291_v28  ;;  %v4294_v17 = vadd.f32 %v15197_v3, %v4293_v60  ;;  %v11817_v12 = vpop.f32.mrb[171].mxu0 }
0x3172   :  { %v4354_v33 = vmul.f32 %v4352_v42, %v13869_v44  ;;  %v4353_v31 = vadd.f32 %v15213_v50, %v4294_v17 }
0x3174   :  { %v4355_v34 = vmul.f32 %v4353_v31, %v13869_v44  ;;  %v15295_v45 = vadd.f32 %v4354_v33, %v15020_v58  ;;  %v4359_v58 = vmul.f32 2.0, %v15138_v54  ;;  %v4420_v31 = vstv %s4419_s29  ;;  %s6240_s29 = sadd.f32 %s15989_s28, %s13687_s21 }
0x3176   :  { %v15298_v13 = vadd.f32 %v4355_v34, %v15023_v16  ;;  %v4404_v16 = vmul.f32 2.0, %v15200_v51  ;;  %v4421_v34 = vmul.f32 %v15231_v27, %v4420_v31 }
0x3178   :  { %v4427_v24 = vpack.c.bf16 %v15298_v13, %v15295_v45 }
0x317a   :  { %11847 = vmatmul.mubr.msk.bf16.vlgmr.msra.gmra.mrb[172].mxu0 %vm127_vm1, %v4427_v24  ;;  %v4422_v24 = vadd.f32 %v15237_v43, %v4421_v34 }
0x317b   :  { %11851 = vmatpush3.bf16.msra.mxu0 %v15170_v49  ;;  %11858 = vmatprep.mubr.msk.bf16.mxu0 %vm13523_vm0, %v13522_v1 }
0x317c   :  { %11852 = vmatprep.subr.bf16.mxu0 %v13522_v1 }
0x317f   :  { %v4397_v55 = vpop.f32.mrb[132].mxu1  ;;  %11853 = vmatpush3.bf16.msra.mxu0 %v15186_v5 }
0x3180   :  { %v4398_v11 = vadd.f32 %v4397_v55, %v4358_v37  ;;  %v11840_v48 = vpop.f32.mrb[133].mxu1  ;;  %11854 = vmatprep.subr.bf16.mxu0 %v13522_v1 }
0x3181   :  { %v4400_v26 = vpop.f32.mrb[134].mxu1 }
0x3182   :  { %v4406_v7 = vadd.f32 %v4404_v16, %v4398_v11  ;;  %v4401_v63 = vadd.f32 %v4400_v26, %v4359_v58  ;;  %v11841_v41 = vpop.f32.mrb[135].mxu1 }
0x3183   :  { %11855 = vmatpush3.bf16.msra.mxu0 %v15122_v56 }
0x3184   :  { %v4410_v8 = vmul.f32 %v4406_v7, %v13869_v44  ;;  %v4407_v50 = vadd.f32 %v4405_v57, %v4401_v63  ;;  %11856 = vmatprep.subr.bf16.mxu0 %v13522_v1 }
0x3186   :  { %v15317_v54 = vadd.f32 %v4410_v8, %v15042_v25  ;;  %v4411_v51 = vmul.f32 %v4407_v50, %v13869_v44 }
0x3187   :  { %11857 = vmatpush3.bf16.msra.mxu0 %v15129_v36 }
0x3188   :  { %v15322_v14 = vadd.f32 %v4411_v51, %v15047_v4  ;;  %11870 = vmatprep.subr.bf16.mxu0 %v13522_v1 }
0x324d   :  { %v4465_v25 = vpop.f32.mrb[172].mxu0 }
0x324e   :  { %v4466_v40 = vadd.f32 %v4465_v25, %v4418_v2  ;;  %v11848_v39 = vpop.f32.mrb[173].mxu0 }
0x324f   :  { %v4468_v62 = vpop.f32.mrb[174].mxu0 }
0x3250   :  { %13250 = vtanh.f32 %v4466_v40  ;;  %v4469_v20 = vadd.f32 %v4468_v62, %v4418_v2  ;;  %v11849_v21 = vpop.f32.mrb[175].mxu0 }
0x3252   :  { %13252 = vtanh.f32 %v4469_v20 }
0x325a   :  { %v13251_v4 = vpop.eup %13250 }
0x325b   :  { %v15332_v15 = vmul.f32 %v13251_v4, %v13251_v4 }
0x325c   :  { %v13253_v53 = vpop.eup %13252 }
0x325d   :  { %v15334_v52 = vmul.f32 %v13253_v53, %v13253_v53  ;;  %v4474_v6 = vpack.c.bf16 %v13253_v53, %v13251_v4 }
0x325f   :  { %11859 = vmatmul.mubr.msk.bf16.vlgmr.msra.gmra.mrb[176].mxu0 %vm199_vm2, %v4474_v6  ;;  %v4521_v59 = vpack.c.bf16 %v15334_v52, %v15332_v15 }
0x3260   :  { %11871 = vmatpush3.bf16.msra.mxu0 %v15170_v49  ;;  %11878 = vmatprep.mubr.msk.bf16.mxu0 %vm13523_vm0, %v13522_v1 }
0x3261   :  { %11872 = vmatprep.subr.bf16.mxu0 %v13522_v1 }
0x3264   :  { %11873 = vmatpush3.bf16.msra.mxu0 %v15186_v5 }
0x3265   :  { %11874 = vmatprep.subr.bf16.mxu0 %v13522_v1 }
0x3268   :  { %11875 = vmatpush3.bf16.msra.mxu0 %v15122_v56 }
0x3269   :  { %11876 = vmatprep.subr.bf16.mxu0 %v13522_v1 }
0x326c   :  { %11877 = vmatpush3.bf16.msra.mxu0 %v15129_v36 }
0x326d   :  { %11894 = vmatprep.subr.bf16.mxu0 %v13522_v1 }
0x3332   :  { %v4512_v0 = vpop.f32.mrb[176].mxu0 }
0x3333   :  { %v15350_v23 = vadd.f32 %v15197_v3, %v4512_v0  ;;  %v11860_v32 = vpop.f32.mrb[177].mxu0 }
0x3334   :  { %v4515_v30 = vpop.f32.mrb[178].mxu0 }
0x3335   :  { %v4522_v28 = vmul.f32 %v15350_v23, %v13695_v29  ;;  %v15355_v22 = vadd.f32 %v15197_v3, %v4515_v30  ;;  %v11861_v60 = vpop.f32.mrb[179].mxu0 }
0x3337   :  { %v4523_v42 = vmul.f32 %v15355_v22, %v13695_v29  ;;  %v4524_v17 = vadd.f32 %v4522_v28, %v15295_v45 }
0x3339   :  { %v4525_v12 = vadd.f32 %v4523_v42, %v15298_v13 }
0x333b   :  { %v4526_v33 = vpack.c.bf16 %v4525_v12, %v4524_v17 }
0x333d   :  { %11867 = vmatmul.mubr.msk.bf16.vlgmr.msra.gmra.mrb[136].mxu1 %vm127_vm1, %v4526_v33 }
0x333e   :  { %11883 = vmatpush3.bf16.msra.mxu1 %v15249_v9  ;;  %11890 = vmatprep.mubr.msk.bf16.mxu1 %vm13523_vm0, %v13522_v1 }
0x333f   :  { %11884 = vmatprep.subr.bf16.mxu1 %v13522_v1 }
0x3342   :  { %11885 = vmatpush3.bf16.msra.mxu1 %v15260_v18 }
0x3343   :  { %11886 = vmatprep.subr.bf16.mxu1 %v13522_v1 }
0x3346   :  { %11887 = vmatpush3.bf16.msra.mxu1 %v15267_v35 }
0x3347   :  { %11888 = vmatprep.subr.bf16.mxu1 %v13522_v1 }
0x334a   :  { %11889 = vmatpush3.bf16.msra.mxu1 %v15274_v10 }
0x334b   :  { %11902 = vmatprep.subr.bf16.mxu1 %v13522_v1 }
0x3410   :  { %v4564_v37 = vpop.f32.mrb[136].mxu1 }
0x3411   :  { %v4565_v55 = vadd.f32 %v4564_v37, %v4422_v24  ;;  %v11868_v58 = vpop.f32.mrb[137].mxu1 }
0x3412   :  { %v4567_v16 = vpop.f32.mrb[138].mxu1 }
0x3413   :  { %13254 = vtanh.f32 %v4565_v55  ;;  %v4568_v11 = vadd.f32 %v4567_v16, %v4422_v24  ;;  %v11869_v48 = vpop.f32.mrb[139].mxu1 }
0x3415   :  { %13256 = vtanh.f32 %v4568_v11 }
0x341d   :  { %v13255_v26 = vpop.eup %13254 }
0x341e   :  { %v4618_v7 = vmul.f32 %v13255_v26, %v13255_v26 }
0x341f   :  { %v13257_v57 = vpop.eup %13256 }
0x3420   :  { %v4619_v63 = vmul.f32 %v13257_v57, %v13257_v57  ;;  %v4573_v41 = vpack.c.bf16 %v13257_v57, %v13255_v26 }
0x3422   :  { %11879 = vmatmul.mubr.msk.bf16.vlgmr.msra.gmra.mrb[180].mxu0 %vm199_vm2, %v4573_v41  ;;  %v4620_v8 = vpack.c.bf16 %v4619_v63, %v4618_v7 }
0x3423   :  { %11895 = vmatpush3.bf16.msra.mxu0 %v15160_v19  ;;  %11898 = vmatprep.mubr.msk.bf16.mxu0 %vm13523_vm0, %v13522_v1 }
0x3424   :  { %11891 = vmatmul.mubr.msk.bf16.vlgmr.msra.gmra.mrb[140].mxu1 %vm199_vm2, %v4620_v8  ;;  %11896 = vmatprep.subr.bf16.mxu0 %v13522_v1 }
0x3425   :  { %11903 = vmatpush3.bf16.msra.mxu1 %v15170_v49  ;;  %11910 = vmatprep.mubr.msk.bf16.mxu1 %vm13523_vm0, %v13522_v1 }
0x3426   :  { %11904 = vmatprep.subr.bf16.mxu1 %v13522_v1 }
0x3427   :  { %11897 = vmatpush3.bf16.msra.mxu0 %v15179_v38 }
0x3428   :  { %11914 = vmatprep.subr.bf16.mxu0 %v13522_v1 }
0x3429   :  { %11905 = vmatpush3.bf16.msra.mxu1 %v15186_v5 }
0x342a   :  { %11906 = vmatprep.subr.bf16.mxu1 %v13522_v1 }
0x342d   :  { %11907 = vmatpush3.bf16.msra.mxu1 %v15122_v56 }
0x342e   :  { %11908 = vmatprep.subr.bf16.mxu1 %v13522_v1 }
0x3431   :  { %11909 = vmatpush3.bf16.msra.mxu1 %v15129_v36 }
0x3432   :  { %11926 = vmatprep.subr.bf16.mxu1 %v13522_v1 }
0x34f5   :  { %v4611_v50 = vpop.f32.mrb[180].mxu0 }
0x34f6   :  { %v4612_v51 = vadd.f32 %v15197_v3, %v4611_v50  ;;  %v11880_v47 = vpop.f32.mrb[181].mxu0 }
0x34f7   :  { %v4614_v61 = vpop.f32.mrb[182].mxu0  ;;  %v15395_v2 = vpop.f32.mrb[140].mxu1 }
0x34f8   :  { %v4665_v25 = vmul.f32 %v4612_v51, %v13695_v29  ;;  %v4615_v40 = vadd.f32 %v15197_v3, %v4614_v61  ;;  %v11881_v39 = vpop.f32.mrb[183].mxu0  ;;  %v11892_v62 = vpop.f32.mrb[141].mxu1 }
0x34f9   :  { %v15399_v20 = vpop.f32.mrb[142].mxu1 }
0x34fa   :  { %v4666_v21 = vmul.f32 %v4615_v40, %v13695_v29  ;;  %v11893_v4 = vpop.f32.mrb[143].mxu1  ;;  %v4667_v53 = vadd.f32 %v4665_v25, %v15295_v45  ;;  %v4952_v16 = vmul.f32 2.0, %v4615_v40 }
0x34fc   :  { %v4668_v6 = vadd.f32 %v4666_v21, %v15298_v13 }
0x34fe   :  { %v4669_v0 = vpack.c.bf16 %v4668_v6, %v4667_v53 }
0x3500   :  { %11899 = vmatmul.mubr.msk.bf16.vlgmr.msra.gmra.mrb[184].mxu0 %vm127_vm1, %v4669_v0 }
0x3501   :  { %11915 = vmatpush3.bf16.msra.mxu0 %v15249_v9  ;;  %11922 = vmatprep.mubr.msk.bf16.mxu0 %vm13523_vm0, %v13522_v1 }
0x3502   :  { %11916 = vmatprep.subr.bf16.mxu0 %v13522_v1 }
0x3505   :  { %11917 = vmatpush3.bf16.msra.mxu0 %v15260_v18 }
0x3506   :  { %11918 = vmatprep.subr.bf16.mxu0 %v13522_v1 }
0x3509   :  { %11919 = vmatpush3.bf16.msra.mxu0 %v15267_v35 }
0x350a   :  { %11920 = vmatprep.subr.bf16.mxu0 %v13522_v1 }
0x350d   :  { %11921 = vmatpush3.bf16.msra.mxu0 %v15274_v10 }
0x350e   :  { %11934 = vmatprep.subr.bf16.mxu0 %v13522_v1 }
0x35d3   :  { %v4707_v32 = vpop.f32.mrb[184].mxu0 }
0x35d4   :  { %v4708_v30 = vadd.f32 %v4707_v32, %v4422_v24  ;;  %v11900_v28 = vpop.f32.mrb[185].mxu0 }
0x35d5   :  { %v4710_v60 = vpop.f32.mrb[186].mxu0 }
0x35d6   :  { %13258 = vtanh.f32 %v4708_v30  ;;  %v4711_v42 = vadd.f32 %v4710_v60, %v4422_v24  ;;  %v11901_v17 = vpop.f32.mrb[187].mxu0  ;;  %v4951_v24 = vmul.f32 2.0, %v4612_v51  ;;  %v4954_v51 = vadd.f32 %v4952_v16, %v15355_v22 }
0x35d8   :  { %13260 = vtanh.f32 %v4711_v42  ;;  %v4953_v47 = vadd.f32 %v4951_v24, %v15350_v23  ;;  %v4424_v23 = vstv %s4423_s2  ;;  %s5628_s2 = smul.f32 9.0, %s13658_s15 }
0x35d9   :  { %v4425_v22 = vmul.f32 %v15231_v27, %v4424_v23 }
0x35da   :  { %s15761_s20 = sadd.f32 %s5628_s2, %s13652_s12 }
0x35db   :  { %v4426_v0 = vadd.f32 %v15237_v43, %v4425_v22  ;;  %s6244_s2 = sadd.f32 %s15989_s28, %s13658_s15 }
0x35dc   :  { %s5633_s25 = sadd.f32 %s15761_s20, %s13687_s21 }
0x35dd   :  { %s5637_s26 = sadd.f32 %s15761_s20, %s13658_s15 }
0x35e0   :  { %v13259_v12 = vpop.eup %13258 }
0x35e1   :  { %v4761_v31 = vmul.f32 %v13259_v12, %v13259_v12 }
0x35e2   :  { %v13261_v33 = vpop.eup %13260 }
0x35e3   :  { %v4762_v34 = vmul.f32 %v13261_v33, %v13261_v33  ;;  %v4716_v37 = vpack.c.bf16 %v13261_v33, %v13259_v12 }
0x35e5   :  { %11911 = vmatmul.mubr.msk.bf16.vlgmr.msra.gmra.mrb[144].mxu1 %vm199_vm2, %v4716_v37  ;;  %v4763_v55 = vpack.c.bf16 %v4762_v34, %v4761_v31 }
0x35e6   :  { %11927 = vmatpush3.bf16.msra.mxu1 %v15160_v19  ;;  %11930 = vmatprep.mubr.msk.bf16.mxu1 %vm13523_vm0, %v13522_v1 }
0x35e7   :  { %11923 = vmatmul.mubr.msk.bf16.vlgmr.msra.gmra.mrb[188].mxu0 %vm199_vm2, %v4763_v55  ;;  %11928 = vmatprep.subr.bf16.mxu1 %v13522_v1 }
0x35e8   :  { %11935 = vmatpush3.bf16.msra.mxu0 %v15170_v49  ;;  %11942 = vmatprep.mubr.msk.bf16.mxu0 %vm13523_vm0, %v13522_v1 }
0x35e9   :  { %11936 = vmatprep.subr.bf16.mxu0 %v13522_v1 }
0x35ea   :  { %11929 = vmatpush3.bf16.msra.mxu1 %v15179_v38 }
0x35eb   :  { %11946 = vmatprep.subr.bf16.mxu1 %v13522_v1 }
0x35ec   :  { %11937 = vmatpush3.bf16.msra.mxu0 %v15186_v5 }
0x35ed   :  { %11938 = vmatprep.subr.bf16.mxu0 %v13522_v1 }
0x35f0   :  { %11939 = vmatpush3.bf16.msra.mxu0 %v15122_v56 }
0x35f1   :  { %11940 = vmatprep.subr.bf16.mxu0 %v13522_v1 }
0x35f4   :  { %11941 = vmatpush3.bf16.msra.mxu0 %v15129_v36 }
0x35f5   :  { %11970 = vmatprep.subr.bf16.mxu0 %v13522_v1 }
0x36b8   :  { %v4754_v58 = vpop.f32.mrb[144].mxu1 }
0x36b9   :  { %v4755_v11 = vadd.f32 %v15197_v3, %v4754_v58  ;;  %v11912_v48 = vpop.f32.mrb[145].mxu1 }
0x36ba   :  { %v4757_v26 = vpop.f32.mrb[146].mxu1  ;;  %v15434_v57 = vpop.f32.mrb[188].mxu0 }
0x36bb   :  { %v4808_v7 = vmul.f32 %v4755_v11, %v13810_v46  ;;  %v4955_v63 = vmul.f32 2.0, %v4755_v11  ;;  %v4758_v41 = vadd.f32 %v15197_v3, %v4757_v26  ;;  %v11913_v8 = vpop.f32.mrb[147].mxu1  ;;  %v11924_v50 = vpop.f32.mrb[189].mxu0 }
0x36bc   :  { %v15439_v61 = vpop.f32.mrb[190].mxu0  ;;  %v4965_v50 = vmul.f32 2.0, %v15395_v2 }
0x36bd   :  { %v4809_v25 = vmul.f32 %v4758_v41, %v13810_v46  ;;  %v4956_v40 = vmul.f32 2.0, %v4758_v41  ;;  %v11925_v39 = vpop.f32.mrb[191].mxu0  ;;  %v4957_v62 = vadd.f32 %v4955_v63, %v4953_v47  ;;  %v4810_v21 = vadd.f32 %v4808_v7, %v15295_v45 }
0x36be   :  { %v5012_v39 = vmul.f32 2.0, %v15439_v61  ;;  %v5023_v61 = vstv %s15525_s30 }
0x36bf   :  { %v4811_v4 = vadd.f32 %v4809_v25, %v15298_v13  ;;  %v4958_v53 = vadd.f32 %v4956_v40, %v4954_v51  ;;  %v5024_v23 = vmul.f32 %v15231_v27, %v5023_v61 }
0x36c1   :  { %v4812_v6 = vpack.c.bf16 %v4811_v4, %v4810_v21  ;;  %v5025_v22 = vadd.f32 %v15237_v43, %v5024_v23 }
0x36c3   :  { %11931 = vmatmul.mubr.msk.bf16.vlgmr.msra.gmra.mrb[148].mxu1 %vm127_vm1, %v4812_v6 }
0x36c4   :  { %11947 = vmatpush3.bf16.msra.mxu1 %v15249_v9  ;;  %11954 = vmatprep.mubr.msk.bf16.mxu1 %vm13523_vm0, %v13522_v1 }
0x36c5   :  { %11948 = vmatprep.subr.bf16.mxu1 %v13522_v1 }
0x36c8   :  { %11949 = vmatpush3.bf16.msra.mxu1 %v15260_v18 }
0x36c9   :  { %11950 = vmatprep.subr.bf16.mxu1 %v13522_v1 }
0x36cc   :  { %11951 = vmatpush3.bf16.msra.mxu1 %v15267_v35 }
0x36cd   :  { %11952 = vmatprep.subr.bf16.mxu1 %v13522_v1 }
0x36d0   :  { %11953 = vmatpush3.bf16.msra.mxu1 %v15274_v10 }
0x36d1   :  { %11958 = vmatprep.subr.bf16.mxu1 %v13522_v1 }
0x3796   :  { %v4850_v32 = vpop.f32.mrb[148].mxu1 }
0x3797   :  { %v4851_v30 = vadd.f32 %v4850_v32, %v4426_v0  ;;  %v11932_v28 = vpop.f32.mrb[149].mxu1 }
0x3798   :  { %v4853_v60 = vpop.f32.mrb[150].mxu1 }
0x3799   :  { %13262 = vtanh.f32 %v4851_v30  ;;  %v4854_v42 = vadd.f32 %v4853_v60, %v4426_v0  ;;  %v11933_v17 = vpop.f32.mrb[151].mxu1 }
0x379b   :  { %13264 = vtanh.f32 %v4854_v42 }
0x37a3   :  { %v13263_v12 = vpop.eup %13262 }
0x37a4   :  { %v4904_v31 = vmul.f32 %v13263_v12, %v13263_v12 }
0x37a5   :  { %v13265_v33 = vpop.eup %13264 }
0x37a6   :  { %v4905_v34 = vmul.f32 %v13265_v33, %v13265_v33  ;;  %v4859_v37 = vpack.c.bf16 %v13265_v33, %v13263_v12 }
0x37a8   :  { %11943 = vmatmul.mubr.msk.bf16.vlgmr.msra.gmra.mrb[192].mxu0 %vm199_vm2, %v4859_v37  ;;  %v4906_v55 = vpack.c.bf16 %v4905_v34, %v4904_v31 }
0x37a9   :  { %11971 = vmatpush3.bf16.msra.mxu0 %v15160_v19  ;;  %11974 = vmatprep.mubr.msk.bf16.mxu0 %vm13523_vm0, %v13522_v1 }
0x37aa   :  { %11955 = vmatmul.mubr.msk.bf16.vlgmr.msra.gmra.mrb[152].mxu1 %vm199_vm2, %v4906_v55  ;;  %11972 = vmatprep.subr.bf16.mxu0 %v13522_v1 }
0x37ab   :  { %11959 = vmatpush3.bf16.msra.mxu1 %v15249_v9  ;;  %11966 = vmatprep.mubr.msk.bf16.mxu1 %vm13523_vm0, %v13522_v1 }
0x37ac   :  { %11960 = vmatprep.subr.bf16.mxu1 %v13522_v1 }
0x37ad   :  { %11973 = vmatpush3.bf16.msra.mxu0 %v15179_v38 }
0x37ae   :  { %11978 = vmatprep.subr.bf16.mxu0 %v13522_v1 }
0x37af   :  { %11961 = vmatpush3.bf16.msra.mxu1 %v15260_v18 }
0x37b0   :  { %11962 = vmatprep.subr.bf16.mxu1 %v13522_v1 }
0x37b3   :  { %11963 = vmatpush3.bf16.msra.mxu1 %v15267_v35 }
0x37b4   :  { %11964 = vmatprep.subr.bf16.mxu1 %v13522_v1 }
0x37b7   :  { %11965 = vmatpush3.bf16.msra.mxu1 %v15274_v10 }
0x37b8   :  { %11990 = vmatprep.subr.bf16.mxu1 %v13522_v1 }
0x37ba   :  { %11967 = vmatmul.mubr.msk.bf16.vlgmr.msra.gmra.mrb[152].mxu1 %vm199_vm2, %v4521_v59 }
0x37bb   :  { %11991 = vmatpush3.bf16.msra.mxu1 %v15160_v19  ;;  %11994 = vmatprep.mubr.msk.bf16.mxu1 %vm13523_vm0, %v13522_v1 }
0x37bc   :  { %11992 = vmatprep.subr.bf16.mxu1 %v13522_v1 }
0x37bf   :  { %11993 = vmatpush3.bf16.msra.mxu1 %v15179_v38 }
0x37c0   :  { %12010 = vmatprep.subr.bf16.mxu1 %v13522_v1 }
0x387b   :  { %v4897_v24 = vpop.f32.mrb[192].mxu0 }
0x387c   :  { %v4898_v58 = vadd.f32 %v15197_v3, %v4897_v24  ;;  %v11944_v16 = vpop.f32.mrb[193].mxu0 }
0x387d   :  { %v4900_v11 = vpop.f32.mrb[194].mxu0 }
0x387e   :  { %v4959_v48 = vadd.f32 %v4957_v62, %v4898_v58  ;;  %v4901_v15 = vadd.f32 %v15197_v3, %v4900_v11  ;;  %v11945_v52 = vpop.f32.mrb[195].mxu0 }
0x3880   :  { %v4961_v59 = vmul.f32 %v4959_v48, %v13869_v44  ;;  %v4960_v26 = vadd.f32 %v4958_v53, %v4901_v15 }
0x3882   :  { %v4962_v7 = vmul.f32 %v4960_v26, %v13869_v44  ;;  %v15493_v63 = vadd.f32 %v4961_v59, %v15295_v45  ;;  %v4966_v45 = vmul.f32 2.0, %v15399_v20  ;;  %v5027_v26 = vstv %s5026_s13 }
0x3884   :  { %v15496_v41 = vadd.f32 %v4962_v7, %v15298_v13  ;;  %v5011_v13 = vmul.f32 2.0, %v15434_v57  ;;  %v5028_v7 = vmul.f32 %v15231_v27, %v5027_v26 }
0x3886   :  { %v5034_v8 = vpack.c.bf16 %v15496_v41, %v15493_v63 }
0x3888   :  { %11975 = vmatmul.mubr.msk.bf16.vlgmr.msra.gmra.mrb[196].mxu0 %vm127_vm1, %v5034_v8  ;;  %v5029_v8 = vadd.f32 %v15237_v43, %v5028_v7 }
0x3889   :  { %11979 = vmatpush3.bf16.msra.mxu0 %v15170_v49  ;;  %11986 = vmatprep.mubr.msk.bf16.mxu0 %vm13523_vm0, %v13522_v1 }
0x388a   :  { %11980 = vmatprep.subr.bf16.mxu0 %v13522_v1 }
0x388d   :  { %v5004_v47 = vpop.f32.mrb[152].mxu1  ;;  %11981 = vmatpush3.bf16.msra.mxu0 %v15186_v5 }
0x388e   :  { %v5005_v51 = vadd.f32 %v5004_v47, %v4965_v50  ;;  %v11968_v25 = vpop.f32.mrb[153].mxu1  ;;  %11982 = vmatprep.subr.bf16.mxu0 %v13522_v1 }
0x388f   :  { %v5007_v40 = vpop.f32.mrb[154].mxu1 }
0x3890   :  { %v5013_v62 = vadd.f32 %v5011_v13, %v5005_v51  ;;  %v5008_v21 = vadd.f32 %v5007_v40, %v4966_v45  ;;  %v11969_v4 = vpop.f32.mrb[155].mxu1 }
0x3891   :  { %11983 = vmatpush3.bf16.msra.mxu0 %v15122_v56 }
0x3892   :  { %v5017_v2 = vmul.f32 %v5013_v62, %v13869_v44  ;;  %v5014_v53 = vadd.f32 %v5012_v39, %v5008_v21  ;;  %11984 = vmatprep.subr.bf16.mxu0 %v13522_v1 }
0x3894   :  { %v15515_v20 = vadd.f32 %v5017_v2, %v15317_v54  ;;  %v5018_v57 = vmul.f32 %v5014_v53, %v13869_v44 }
0x3895   :  { %11985 = vmatpush3.bf16.msra.mxu0 %v15129_v36 }
0x3896   :  { %v15520_v6 = vadd.f32 %v5018_v57, %v15322_v14  ;;  %11998 = vmatprep.subr.bf16.mxu0 %v13522_v1 }
0x395b   :  { %v5072_v54 = vpop.f32.mrb[196].mxu0 }
0x395c   :  { %v5073_v0 = vadd.f32 %v5072_v54, %v5025_v22  ;;  %v11976_v32 = vpop.f32.mrb[197].mxu0 }
0x395d   :  { %v5075_v30 = vpop.f32.mrb[198].mxu0 }
0x395e   :  { %13266 = vtanh.f32 %v5073_v0  ;;  %v5076_v28 = vadd.f32 %v5075_v30, %v5025_v22  ;;  %v11977_v60 = vpop.f32.mrb[199].mxu0 }
0x3960   :  { %13268 = vtanh.f32 %v5076_v28 }
0x3968   :  { %v13267_v14 = vpop.eup %13266 }
0x3969   :  { %v15530_v17 = vmul.f32 %v13267_v14, %v13267_v14 }
0x396a   :  { %v13269_v42 = vpop.eup %13268 }
0x396b   :  { %v15532_v12 = vmul.f32 %v13269_v42, %v13269_v42  ;;  %v5081_v33 = vpack.c.bf16 %v13269_v42, %v13267_v14 }
0x396d   :  { %11987 = vmatmul.mubr.msk.bf16.vlgmr.msra.gmra.mrb[200].mxu0 %vm199_vm2, %v5081_v33  ;;  %v5128_v31 = vpack.c.bf16 %v15532_v12, %v15530_v17 }
0x396e   :  { %11999 = vmatpush3.bf16.msra.mxu0 %v15170_v49  ;;  %12006 = vmatprep.mubr.msk.bf16.mxu0 %vm13523_vm0, %v13522_v1 }
0x396f   :  { %12000 = vmatprep.subr.bf16.mxu0 %v13522_v1 }
0x3972   :  { %12001 = vmatpush3.bf16.msra.mxu0 %v15186_v5 }
0x3973   :  { %12002 = vmatprep.subr.bf16.mxu0 %v13522_v1 }
0x3976   :  { %12003 = vmatpush3.bf16.msra.mxu0 %v15122_v56 }
0x3977   :  { %12004 = vmatprep.subr.bf16.mxu0 %v13522_v1 }
0x397a   :  { %12005 = vmatpush3.bf16.msra.mxu0 %v15129_v36 }
0x397b   :  { %12022 = vmatprep.subr.bf16.mxu0 %v13522_v1 }
0x3a40   :  { %v5119_v34 = vpop.f32.mrb[200].mxu0 }
0x3a41   :  { %v15548_v37 = vadd.f32 %v15197_v3, %v5119_v34  ;;  %v11988_v55 = vpop.f32.mrb[201].mxu0 }
0x3a42   :  { %v5122_v24 = vpop.f32.mrb[202].mxu0 }
0x3a43   :  { %v5129_v58 = vmul.f32 %v15548_v37, %v13695_v29  ;;  %v15553_v16 = vadd.f32 %v15197_v3, %v5122_v24  ;;  %v11989_v11 = vpop.f32.mrb[203].mxu0 }
0x3a45   :  { %v5130_v48 = vmul.f32 %v15553_v16, %v13695_v29  ;;  %v5131_v15 = vadd.f32 %v5129_v58, %v15493_v63 }
0x3a47   :  { %v5132_v52 = vadd.f32 %v5130_v48, %v15496_v41 }
0x3a49   :  { %v5133_v59 = vpack.c.bf16 %v5132_v52, %v5131_v15 }
0x3a4b   :  { %11995 = vmatmul.mubr.msk.bf16.vlgmr.msra.gmra.mrb[156].mxu1 %vm127_vm1, %v5133_v59 }
0x3a4c   :  { %12011 = vmatpush3.bf16.msra.mxu1 %v15249_v9  ;;  %12018 = vmatprep.mubr.msk.bf16.mxu1 %vm13523_vm0, %v13522_v1 }
0x3a4d   :  { %12012 = vmatprep.subr.bf16.mxu1 %v13522_v1 }
0x3a50   :  { %12013 = vmatpush3.bf16.msra.mxu1 %v15260_v18 }
0x3a51   :  { %12014 = vmatprep.subr.bf16.mxu1 %v13522_v1 }
0x3a54   :  { %12015 = vmatpush3.bf16.msra.mxu1 %v15267_v35 }
0x3a55   :  { %12016 = vmatprep.subr.bf16.mxu1 %v13522_v1 }
0x3a58   :  { %12017 = vmatpush3.bf16.msra.mxu1 %v15274_v10 }
0x3a59   :  { %12030 = vmatprep.subr.bf16.mxu1 %v13522_v1 }
0x3b1e   :  { %v5171_v50 = vpop.f32.mrb[156].mxu1 }
0x3b1f   :  { %v5172_v47 = vadd.f32 %v5171_v50, %v5029_v8  ;;  %v11996_v45 = vpop.f32.mrb[157].mxu1 }
0x3b20   :  { %v5174_v13 = vpop.f32.mrb[158].mxu1 }
0x3b21   :  { %13270 = vtanh.f32 %v5172_v47  ;;  %v5175_v51 = vadd.f32 %v5174_v13, %v5029_v8  ;;  %v11997_v25 = vpop.f32.mrb[159].mxu1 }
0x3b23   :  { %13272 = vtanh.f32 %v5175_v51 }
0x3b2b   :  { %v13271_v40 = vpop.eup %13270 }
0x3b2c   :  { %v5225_v62 = vmul.f32 %v13271_v40, %v13271_v40 }
0x3b2d   :  { %v13273_v39 = vpop.eup %13272 }
0x3b2e   :  { %v5226_v21 = vmul.f32 %v13273_v39, %v13273_v39  ;;  %v5180_v4 = vpack.c.bf16 %v13273_v39, %v13271_v40 }
0x3b30   :  { %12007 = vmatmul.mubr.msk.bf16.vlgmr.msra.gmra.mrb[204].mxu0 %vm199_vm2, %v5180_v4  ;;  %v5227_v2 = vpack.c.bf16 %v5226_v21, %v5225_v62 }
0x3b31   :  { %12023 = vmatpush3.bf16.msra.mxu0 %v15160_v19  ;;  %12026 = vmatprep.mubr.msk.bf16.mxu0 %vm13523_vm0, %v13522_v1 }
0x3b32   :  { %12019 = vmatmul.mubr.msk.bf16.vlgmr.msra.gmra.mrb[160].mxu1 %vm199_vm2, %v5227_v2  ;;  %12024 = vmatprep.subr.bf16.mxu0 %v13522_v1 }
0x3b33   :  { %12031 = vmatpush3.bf16.msra.mxu1 %v15170_v49  ;;  %12038 = vmatprep.mubr.msk.bf16.mxu1 %vm13523_vm0, %v13522_v1 }
0x3b34   :  { %12032 = vmatprep.subr.bf16.mxu1 %v13522_v1 }
0x3b35   :  { %12025 = vmatpush3.bf16.msra.mxu0 %v15179_v38 }
0x3b36   :  { %12042 = vmatprep.subr.bf16.mxu0 %v13522_v1 }
0x3b37   :  { %12033 = vmatpush3.bf16.msra.mxu1 %v15186_v5 }
0x3b38   :  { %12034 = vmatprep.subr.bf16.mxu1 %v13522_v1 }
0x3b3b   :  { %12035 = vmatpush3.bf16.msra.mxu1 %v15122_v56 }
0x3b3c   :  { %12036 = vmatprep.subr.bf16.mxu1 %v13522_v1 }
0x3b3f   :  { %12037 = vmatpush3.bf16.msra.mxu1 %v15129_v36 }
0x3b40   :  { %12054 = vmatprep.subr.bf16.mxu1 %v13522_v1 }
0x3c03   :  { %v5218_v53 = vpop.f32.mrb[204].mxu0 }
0x3c04   :  { %v5219_v57 = vadd.f32 %v15197_v3, %v5218_v53  ;;  %v12008_v61 = vpop.f32.mrb[205].mxu0 }
0x3c05   :  { %v5221_v23 = vpop.f32.mrb[206].mxu0  ;;  %v15593_v22 = vpop.f32.mrb[160].mxu1 }
0x3c06   :  { %v5272_v54 = vmul.f32 %v5219_v57, %v13695_v29  ;;  %v5222_v0 = vadd.f32 %v15197_v3, %v5221_v23  ;;  %v12009_v32 = vpop.f32.mrb[207].mxu0  ;;  %v12020_v30 = vpop.f32.mrb[161].mxu1 }
0x3c07   :  { %v15597_v56 = vpop.f32.mrb[162].mxu1 }
0x3c08   :  { %v5273_v28 = vmul.f32 %v5222_v0, %v13695_v29  ;;  %v12021_v36 = vpop.f32.mrb[163].mxu1  ;;  %v5274_v60 = vadd.f32 %v5272_v54, %v15493_v63 }
0x3c0a   :  { %v5275_v14 = vadd.f32 %v5273_v28, %v15496_v41 }
0x3c0c   :  { %v5276_v42 = vpack.c.bf16 %v5275_v14, %v5274_v60 }
0x3c0e   :  { %12027 = vmatmul.mubr.msk.bf16.vlgmr.msra.gmra.mrb[208].mxu0 %vm127_vm1, %v5276_v42 }
0x3c0f   :  { %12043 = vmatpush3.bf16.msra.mxu0 %v15249_v9  ;;  %12050 = vmatprep.mubr.msk.bf16.mxu0 %vm13523_vm0, %v13522_v1 }
0x3c10   :  { %12044 = vmatprep.subr.bf16.mxu0 %v13522_v1 }
0x3c13   :  { %12045 = vmatpush3.bf16.msra.mxu0 %v15260_v18 }
0x3c14   :  { %12046 = vmatprep.subr.bf16.mxu0 %v13522_v1 }
0x3c17   :  { %12047 = vmatpush3.bf16.msra.mxu0 %v15267_v35 }
0x3c18   :  { %12048 = vmatprep.subr.bf16.mxu0 %v13522_v1 }
0x3c1b   :  { %12049 = vmatpush3.bf16.msra.mxu0 %v15274_v10 }
0x3c1c   :  { %12062 = vmatprep.subr.bf16.mxu0 %v13522_v1 }
0x3ce1   :  { %v5314_v33 = vpop.f32.mrb[208].mxu0 }
0x3ce2   :  { %v5315_v34 = vadd.f32 %v5314_v33, %v5029_v8  ;;  %v12028_v55 = vpop.f32.mrb[209].mxu0 }
0x3ce3   :  { %v5317_v24 = vpop.f32.mrb[210].mxu0 }
0x3ce4   :  { %13274 = vtanh.f32 %v5315_v34  ;;  %v5318_v58 = vadd.f32 %v5317_v24, %v5029_v8  ;;  %v12029_v11 = vpop.f32.mrb[211].mxu0  ;;  %v5559_v8 = vmul.f32 2.0, %v5222_v0 }
0x3ce6   :  { %13276 = vtanh.f32 %v5318_v58  ;;  %v5561_v2 = vadd.f32 %v5559_v8, %v15553_v16  ;;  %v15730_v8 = vld [vmem:[%s17345_s4] sm:$0xff]  }
0x3cee   :  { %v13275_v48 = vpop.eup %13274 }
0x3cef   :  { %v5368_v52 = vmul.f32 %v13275_v48, %v13275_v48 }
0x3cf0   :  { %v13277_v15 = vpop.eup %13276 }
0x3cf1   :  { %v5369_v59 = vmul.f32 %v13277_v15, %v13277_v15  ;;  %v5323_v26 = vpack.c.bf16 %v13277_v15, %v13275_v48 }
0x3cf3   :  { %12039 = vmatmul.mubr.msk.bf16.vlgmr.msra.gmra.mrb[164].mxu1 %vm199_vm2, %v5323_v26  ;;  %v5370_v7 = vpack.c.bf16 %v5369_v59, %v5368_v52 }
0x3cf4   :  { %12055 = vmatpush3.bf16.msra.mxu1 %v15160_v19  ;;  %12058 = vmatprep.mubr.msk.bf16.mxu1 %vm13523_vm0, %v13522_v1  ;;  %v15630_v19 = vld [vmem:[%s17345_s4 + $0x10] sm:$0xff]  }
0x3cf5   :  { %12051 = vmatmul.mubr.msk.bf16.vlgmr.msra.gmra.mrb[212].mxu0 %vm199_vm2, %v5370_v7  ;;  %12056 = vmatprep.subr.bf16.mxu1 %v13522_v1 }
0x3cf6   :  { %12063 = vmatpush3.bf16.msra.mxu0 %v15170_v49  ;;  %12070 = vmatprep.mubr.msk.bf16.mxu0 %vm13523_vm0, %v13522_v1  ;;  %v15637_v49 = vld [vmem:[%s17345_s4 + $0x18] sm:$0xff]  }
0x3cf7   :  { %12064 = vmatprep.subr.bf16.mxu0 %v13522_v1 }
0x3cf8   :  { %12057 = vmatpush3.bf16.msra.mxu1 %v15179_v38  ;;  %v5558_v38 = vmul.f32 2.0, %v5219_v57 }
0x3cf9   :  { %12074 = vmatprep.subr.bf16.mxu1 %v13522_v1 }
0x3cfa   :  { %12065 = vmatpush3.bf16.msra.mxu0 %v15186_v5  ;;  %v5560_v21 = vadd.f32 %v5558_v38, %v15548_v37  ;;  %v5031_v37 = vstv %s5030_s17 }
0x3cfb   :  { %12066 = vmatprep.subr.bf16.mxu0 %v13522_v1  ;;  %v5032_v16 = vmul.f32 %v15231_v27, %v5031_v37  ;;  %v15674_v27 = vld [vmem:[%s17344_s3] sm:$0xff]  }
0x3cfd   :  { %v5033_v30 = vadd.f32 %v15237_v43, %v5032_v16  ;;  %v15688_v43 = vld [vmem:[%s17344_s3 + $0x8] sm:$0xff]  }
0x3cfe   :  { %12067 = vmatpush3.bf16.msra.mxu0 %v15630_v19 }
0x3cff   :  { %12068 = vmatprep.subr.bf16.mxu0 %v13522_v1 }
0x3d02   :  { %12069 = vmatpush3.bf16.msra.mxu0 %v15637_v49 }
0x3d03   :  { %12098 = vmatprep.subr.bf16.mxu0 %v13522_v1 }
0x3dc6   :  { %v5361_v5 = vpop.f32.mrb[164].mxu1 }
0x3dc7   :  { %v5362_v50 = vadd.f32 %v15197_v3, %v5361_v5  ;;  %v12040_v47 = vpop.f32.mrb[165].mxu1 }
0x3dc8   :  { %v5364_v45 = vpop.f32.mrb[166].mxu1  ;;  %v15642_v13 = vpop.f32.mrb[212].mxu0  ;;  %v5573_v47 = vmul.f32 2.0, %v15597_v56 }
0x3dc9   :  { %v5415_v51 = vmul.f32 %v5362_v50, %v13810_v46  ;;  %v5562_v25 = vmul.f32 2.0, %v5362_v50  ;;  %v5365_v40 = vadd.f32 %v15197_v3, %v5364_v45  ;;  %v12041_v39 = vpop.f32.mrb[167].mxu1  ;;  %v12052_v62 = vpop.f32.mrb[213].mxu0  ;;  %v15740_v50 = vld [vmem:[%s17345_s4 + $0x8] sm:$0xff]   ;;  %v5618_v45 = vmul.f32 2.0, %v15642_v13 }
0x3dca   :  { %v15647_v4 = vpop.f32.mrb[214].mxu0 }
0x3dcb   :  { %v5416_v53 = vmul.f32 %v5365_v40, %v13810_v46  ;;  %v5563_v57 = vmul.f32 2.0, %v5365_v40  ;;  %v12053_v61 = vpop.f32.mrb[215].mxu0  ;;  %v5564_v23 = vadd.f32 %v5562_v25, %v5560_v21  ;;  %v5417_v54 = vadd.f32 %v5415_v51, %v15493_v63 }
0x3dcc   :  { %v15767_v61 = vld [vmem:[%s17348_s7] ss:$0 sm:$0xff] }
0x3dcd   :  { %v5418_v0 = vadd.f32 %v5416_v53, %v15496_v41  ;;  %v15653_v3 = vadd.f32 %v5563_v57, %v5561_v2 }
0x3dcf   :  { %v5419_v32 = vpack.c.bf16 %v5418_v0, %v5417_v54 }
0x3dd1   :  { %12059 = vmatmul.mubr.msk.bf16.vlgmr.msra.gmra.mrb[168].mxu1 %vm127_vm1, %v5419_v32 }
0x3dd2   :  { %12075 = vmatpush3.bf16.msra.mxu1 %v15249_v9  ;;  %12082 = vmatprep.mubr.msk.bf16.mxu1 %vm13523_vm0, %v13522_v1 }
0x3dd3   :  { %12076 = vmatprep.subr.bf16.mxu1 %v13522_v1 }
0x3dd6   :  { %12077 = vmatpush3.bf16.msra.mxu1 %v15260_v18 }
0x3dd7   :  { %12078 = vmatprep.subr.bf16.mxu1 %v13522_v1 }
0x3dda   :  { %12079 = vmatpush3.bf16.msra.mxu1 %v15267_v35 }
0x3ddb   :  { %12080 = vmatprep.subr.bf16.mxu1 %v13522_v1 }
0x3dde   :  { %12081 = vmatpush3.bf16.msra.mxu1 %v15274_v10 }
0x3ddf   :  { %12086 = vmatprep.subr.bf16.mxu1 %v13522_v1 }
0x3ea4   :  { %v5457_v28 = vpop.f32.mrb[168].mxu1 }
0x3ea5   :  { %v5458_v36 = vadd.f32 %v5457_v28, %v5033_v30  ;;  %v12060_v60 = vpop.f32.mrb[169].mxu1 }
0x3ea6   :  { %v5460_v14 = vpop.f32.mrb[170].mxu1 }
0x3ea7   :  { %13278 = vtanh.f32 %v5458_v36  ;;  %v5461_v42 = vadd.f32 %v5460_v14, %v5033_v30  ;;  %v12061_v33 = vpop.f32.mrb[171].mxu1 }
0x3ea9   :  { %13280 = vtanh.f32 %v5461_v42 }
0x3eb1   :  { %v13279_v34 = vpop.eup %13278 }
0x3eb2   :  { %v5511_v24 = vmul.f32 %v13279_v34, %v13279_v34 }
0x3eb3   :  { %v13281_v55 = vpop.eup %13280 }
0x3eb4   :  { %v5512_v58 = vmul.f32 %v13281_v55, %v13281_v55  ;;  %v5466_v11 = vpack.c.bf16 %v13281_v55, %v13279_v34 }
0x3eb6   :  { %12071 = vmatmul.mubr.msk.bf16.vlgmr.msra.gmra.mrb[216].mxu0 %vm199_vm2, %v5466_v11  ;;  %v5513_v48 = vpack.c.bf16 %v5512_v58, %v5511_v24 }
0x3eb7   :  { %12099 = vmatpush3.bf16.msra.mxu0 %v15674_v27  ;;  %12102 = vmatprep.mubr.msk.bf16.mxu0 %vm13523_vm0, %v13522_v1 }
0x3eb8   :  { %12083 = vmatmul.mubr.msk.bf16.vlgmr.msra.gmra.mrb[172].mxu1 %vm199_vm2, %v5513_v48  ;;  %12100 = vmatprep.subr.bf16.mxu0 %v13522_v1 }
0x3eb9   :  { %12087 = vmatpush3.bf16.msra.mxu1 %v15249_v9  ;;  %12094 = vmatprep.mubr.msk.bf16.mxu1 %vm13523_vm0, %v13522_v1 }
0x3eba   :  { %12088 = vmatprep.subr.bf16.mxu1 %v13522_v1 }
0x3ebb   :  { %12101 = vmatpush3.bf16.msra.mxu0 %v15688_v43 }
0x3ebc   :  { %12106 = vmatprep.subr.bf16.mxu0 %v13522_v1 }
0x3ebd   :  { %12089 = vmatpush3.bf16.msra.mxu1 %v15260_v18  ;;  %v15711_v18 = vld [vmem:[%s17349_s8] ss:$0 sm:$0xff] }
0x3ebe   :  { %12090 = vmatprep.subr.bf16.mxu1 %v13522_v1 }
0x3ec1   :  { %12091 = vmatpush3.bf16.msra.mxu1 %v15267_v35 }
0x3ec2   :  { %12092 = vmatprep.subr.bf16.mxu1 %v13522_v1 }
0x3ec5   :  { %12093 = vmatpush3.bf16.msra.mxu1 %v15274_v10 }
0x3ec6   :  { %12118 = vmatprep.subr.bf16.mxu1 %v13522_v1 }
0x3ec8   :  { %12095 = vmatmul.mubr.msk.bf16.vlgmr.msra.gmra.mrb[172].mxu1 %vm199_vm2, %v5128_v31 }
0x3ec9   :  { %12119 = vmatpush3.bf16.msra.mxu1 %v15674_v27  ;;  %12122 = vmatprep.mubr.msk.bf16.mxu1 %vm13523_vm0, %v13522_v1 }
0x3eca   :  { %12120 = vmatprep.subr.bf16.mxu1 %v13522_v1 }
0x3ecd   :  { %12121 = vmatpush3.bf16.msra.mxu1 %v15688_v43 }
0x3ece   :  { %12138 = vmatprep.subr.bf16.mxu1 %v13522_v1 }
0x3f89   :  { %v5504_v9 = vpop.f32.mrb[216].mxu0 }
0x3f8a   :  { %v5505_v35 = vadd.f32 %v15711_v18, %v5504_v9  ;;  %v12072_v10 = vpop.f32.mrb[217].mxu0 }
0x3f8b   :  { %v5507_v17 = vpop.f32.mrb[218].mxu0 }
0x3f8c   :  { %v5566_v12 = vadd.f32 %v5564_v23, %v5505_v35  ;;  %v5508_v31 = vadd.f32 %v15711_v18, %v5507_v17  ;;  %v12073_v15 = vpop.f32.mrb[219].mxu0  ;;  %v15773_v23 = vld [vmem:[%s17347_s6] ss:$0 sm:$0xff] }
0x3f8d   :  { %v15825_v15 = vld [vmem:[%s17346_s5 + $0x10] sm:$0xff]  }
0x3f8e   :  { %v5568_v52 = vmul.f32 %v5566_v12, %v13869_v44  ;;  %v5567_v59 = vadd.f32 %v15653_v3, %v5508_v31  ;;  %v15809_v12 = vld [vmem:[%s17346_s5] sm:$0xff]   ;;  %v15818_v31 = vld [vmem:[%s17346_s5 + $0x8] sm:$0xff]  }
0x3f90   :  { %v5569_v26 = vmul.f32 %v5567_v59, %v13869_v44  ;;  %v15719_v7 = vadd.f32 %v5568_v52, %v15493_v63  ;;  %v5572_v63 = vmul.f32 2.0, %v15593_v22  ;;  %v5619_v22 = vmul.f32 2.0, %v15647_v4  ;;  %v15832_v52 = vld [vmem:[%s17346_s5 + $0x18] sm:$0xff]  }
0x3f91   :  { %v5630_v4 = vstv %s15761_s20  ;;  %v5634_v59 = vstv %s5633_s25 }
0x3f92   :  { %v15722_v38 = vadd.f32 %v5569_v26, %v15496_v41  ;;  %v5635_v26 = vmul.f32 %v15767_v61, %v5634_v59 }
0x3f94   :  { %v5641_v5 = vpack.c.bf16 %v15722_v38, %v15719_v7 }
0x3f96   :  { %12103 = vmatmul.mubr.msk.bf16.vlgmr.msra.gmra.mrb[220].mxu0 %vm127_vm1, %v5641_v5  ;;  %v5636_v5 = vadd.f32 %v15773_v23, %v5635_v26 }
0x3f97   :  { %12107 = vmatpush3.bf16.msra.mxu0 %v15730_v8  ;;  %12114 = vmatprep.mubr.msk.bf16.mxu0 %vm13523_vm0, %v13522_v1 }
0x3f98   :  { %12108 = vmatprep.subr.bf16.mxu0 %v13522_v1 }
0x3f9b   :  { %v5611_v41 = vpop.f32.mrb[172].mxu1  ;;  %12109 = vmatpush3.bf16.msra.mxu0 %v15740_v50 }
0x3f9c   :  { %v5612_v51 = vadd.f32 %v5611_v41, %v5572_v63  ;;  %v12096_v25 = vpop.f32.mrb[173].mxu1  ;;  %12110 = vmatprep.subr.bf16.mxu0 %v13522_v1 }
0x3f9d   :  { %v5614_v40 = vpop.f32.mrb[174].mxu1 }
0x3f9e   :  { %v5620_v39 = vadd.f32 %v5618_v45, %v5612_v51  ;;  %v5615_v62 = vadd.f32 %v5614_v40, %v5573_v47  ;;  %v12097_v21 = vpop.f32.mrb[175].mxu1 }
0x3f9f   :  { %12111 = vmatpush3.bf16.msra.mxu0 %v15630_v19 }
0x3fa0   :  { %v5624_v2 = vmul.f32 %v5620_v39, %v13869_v44  ;;  %v5621_v53 = vadd.f32 %v5619_v22, %v5615_v62  ;;  %12112 = vmatprep.subr.bf16.mxu0 %v13522_v1 }
0x3fa2   :  { %v15751_v56 = vadd.f32 %v5624_v2, %v15515_v20  ;;  %v5625_v13 = vmul.f32 %v5621_v53, %v13869_v44  ;;  %v5631_v20 = vmul.f32 %v15767_v61, %v5630_v4 }
0x3fa3   :  { %12113 = vmatpush3.bf16.msra.mxu0 %v15637_v49 }
0x3fa4   :  { %v15756_v57 = vadd.f32 %v5625_v13, %v15520_v6  ;;  %12126 = vmatprep.subr.bf16.mxu0 %v13522_v1  ;;  %v5632_v6 = vadd.f32 %v15773_v23, %v5631_v20 }
0x4069   :  { %v5679_v54 = vpop.f32.mrb[220].mxu0 }
0x406a   :  { %v5680_v0 = vadd.f32 %v5679_v54, %v5632_v6  ;;  %v12104_v3 = vpop.f32.mrb[221].mxu0 }
0x406b   :  { %v5682_v32 = vpop.f32.mrb[222].mxu0 }
0x406c   :  { %13282 = vtanh.f32 %v5680_v0  ;;  %v5683_v37 = vadd.f32 %v5682_v32, %v5632_v6  ;;  %v12105_v16 = vpop.f32.mrb[223].mxu0 }
0x406e   :  { %13284 = vtanh.f32 %v5683_v37 }
0x4076   :  { %v13283_v30 = vpop.eup %13282 }
0x4077   :  { %v15776_v36 = vmul.f32 %v13283_v30, %v13283_v30 }
0x4078   :  { %v13285_v28 = vpop.eup %13284 }
0x4079   :  { %v15778_v60 = vmul.f32 %v13285_v28, %v13285_v28  ;;  %v5688_v14 = vpack.c.bf16 %v13285_v28, %v13283_v30 }
0x407b   :  { %12115 = vmatmul.mubr.msk.bf16.vlgmr.msra.gmra.mrb[224].mxu0 %vm199_vm2, %v5688_v14  ;;  %v5735_v42 = vpack.c.bf16 %v15778_v60, %v15776_v36 }
0x407c   :  { %12127 = vmatpush3.bf16.msra.mxu0 %v15730_v8  ;;  %12134 = vmatprep.mubr.msk.bf16.mxu0 %vm13523_vm0, %v13522_v1 }
0x407d   :  { %12128 = vmatprep.subr.bf16.mxu0 %v13522_v1 }
0x4080   :  { %12129 = vmatpush3.bf16.msra.mxu0 %v15740_v50 }
0x4081   :  { %12130 = vmatprep.subr.bf16.mxu0 %v13522_v1 }
0x4084   :  { %12131 = vmatpush3.bf16.msra.mxu0 %v15630_v19 }
0x4085   :  { %12132 = vmatprep.subr.bf16.mxu0 %v13522_v1 }
0x4088   :  { %12133 = vmatpush3.bf16.msra.mxu0 %v15637_v49 }
0x4089   :  { %12150 = vmatprep.subr.bf16.mxu0 %v13522_v1 }
0x414e   :  { %v5726_v33 = vpop.f32.mrb[224].mxu0 }
0x414f   :  { %v15794_v34 = vadd.f32 %v15711_v18, %v5726_v33  ;;  %v12116_v55 = vpop.f32.mrb[225].mxu0 }
0x4150   :  { %v5729_v24 = vpop.f32.mrb[226].mxu0 }
0x4151   :  { %v5736_v58 = vmul.f32 %v15794_v34, %v13695_v29  ;;  %v15799_v11 = vadd.f32 %v15711_v18, %v5729_v24  ;;  %v12117_v48 = vpop.f32.mrb[227].mxu0 }
0x4153   :  { %v5737_v9 = vmul.f32 %v15799_v11, %v13695_v29  ;;  %v5738_v35 = vadd.f32 %v5736_v58, %v15719_v7 }
0x4155   :  { %v5739_v10 = vadd.f32 %v5737_v9, %v15722_v38 }
0x4157   :  { %v5740_v17 = vpack.c.bf16 %v5739_v10, %v5738_v35 }
0x4159   :  { %12123 = vmatmul.mubr.msk.bf16.vlgmr.msra.gmra.mrb[176].mxu1 %vm127_vm1, %v5740_v17 }
0x415a   :  { %12139 = vmatpush3.bf16.msra.mxu1 %v15809_v12  ;;  %12146 = vmatprep.mubr.msk.bf16.mxu1 %vm13523_vm0, %v13522_v1 }
0x415b   :  { %12140 = vmatprep.subr.bf16.mxu1 %v13522_v1 }
0x415e   :  { %12141 = vmatpush3.bf16.msra.mxu1 %v15818_v31 }
0x415f   :  { %12142 = vmatprep.subr.bf16.mxu1 %v13522_v1 }
0x4162   :  { %12143 = vmatpush3.bf16.msra.mxu1 %v15825_v15 }
0x4163   :  { %12144 = vmatprep.subr.bf16.mxu1 %v13522_v1 }
0x4166   :  { %12145 = vmatpush3.bf16.msra.mxu1 %v15832_v52 }
0x4167   :  { %12158 = vmatprep.subr.bf16.mxu1 %v13522_v1 }
0x422c   :  { %v5778_v63 = vpop.f32.mrb[176].mxu1 }
0x422d   :  { %v5779_v41 = vadd.f32 %v5778_v63, %v5636_v5  ;;  %v12124_v47 = vpop.f32.mrb[177].mxu1 }
0x422e   :  { %v5781_v45 = vpop.f32.mrb[178].mxu1 }
0x422f   :  { %13286 = vtanh.f32 %v5779_v41  ;;  %v5782_v51 = vadd.f32 %v5781_v45, %v5636_v5  ;;  %v12125_v25 = vpop.f32.mrb[179].mxu1 }
0x4231   :  { %13288 = vtanh.f32 %v5782_v51 }
0x4239   :  { %v13287_v40 = vpop.eup %13286 }
0x423a   :  { %v5832_v39 = vmul.f32 %v13287_v40, %v13287_v40 }
0x423b   :  { %v13289_v22 = vpop.eup %13288 }
0x423c   :  { %v5833_v62 = vmul.f32 %v13289_v22, %v13289_v22  ;;  %v5787_v21 = vpack.c.bf16 %v13289_v22, %v13287_v40 }
0x423e   :  { %12135 = vmatmul.mubr.msk.bf16.vlgmr.msra.gmra.mrb[228].mxu0 %vm199_vm2, %v5787_v21  ;;  %v5834_v2 = vpack.c.bf16 %v5833_v62, %v5832_v39 }
0x423f   :  { %12151 = vmatpush3.bf16.msra.mxu0 %v15674_v27  ;;  %12154 = vmatprep.mubr.msk.bf16.mxu0 %vm13523_vm0, %v13522_v1 }
0x4240   :  { %12147 = vmatmul.mubr.msk.bf16.vlgmr.msra.gmra.mrb[180].mxu1 %vm199_vm2, %v5834_v2  ;;  %12152 = vmatprep.subr.bf16.mxu0 %v13522_v1 }
0x4241   :  { %12159 = vmatpush3.bf16.msra.mxu1 %v15730_v8  ;;  %12166 = vmatprep.mubr.msk.bf16.mxu1 %vm13523_vm0, %v13522_v1 }
0x4242   :  { %12160 = vmatprep.subr.bf16.mxu1 %v13522_v1 }
0x4243   :  { %12153 = vmatpush3.bf16.msra.mxu0 %v15688_v43 }
0x4244   :  { %12170 = vmatprep.subr.bf16.mxu0 %v13522_v1 }
0x4245   :  { %12161 = vmatpush3.bf16.msra.mxu1 %v15740_v50 }
0x4246   :  { %12162 = vmatprep.subr.bf16.mxu1 %v13522_v1 }
0x4249   :  { %12163 = vmatpush3.bf16.msra.mxu1 %v15630_v19 }
0x424a   :  { %12164 = vmatprep.subr.bf16.mxu1 %v13522_v1 }
0x424d   :  { %12165 = vmatpush3.bf16.msra.mxu1 %v15637_v49 }
0x424e   :  { %12182 = vmatprep.subr.bf16.mxu1 %v13522_v1 }
0x4311   :  { %v5825_v53 = vpop.f32.mrb[228].mxu0 }
0x4312   :  { %v5826_v13 = vadd.f32 %v15711_v18, %v5825_v53  ;;  %v12136_v4 = vpop.f32.mrb[229].mxu0 }
0x4313   :  { %v5828_v20 = vpop.f32.mrb[230].mxu0  ;;  %v15859_v6 = vpop.f32.mrb[180].mxu1 }
0x4314   :  { %v5879_v54 = vmul.f32 %v5826_v13, %v13695_v29  ;;  %v5829_v0 = vadd.f32 %v15711_v18, %v5828_v20  ;;  %v12137_v3 = vpop.f32.mrb[231].mxu0  ;;  %v12148_v32 = vpop.f32.mrb[181].mxu1 }
0x4315   :  { %v15863_v37 = vpop.f32.mrb[182].mxu1 }
0x4316   :  { %v5880_v16 = vmul.f32 %v5829_v0, %v13695_v29  ;;  %v12149_v30 = vpop.f32.mrb[183].mxu1  ;;  %v5881_v28 = vadd.f32 %v5879_v54, %v15719_v7  ;;  %v6166_v45 = vmul.f32 2.0, %v5829_v0 }
0x4318   :  { %v5882_v14 = vadd.f32 %v5880_v16, %v15722_v38 }
0x431a   :  { %v5883_v33 = vpack.c.bf16 %v5882_v14, %v5881_v28 }
0x431c   :  { %12155 = vmatmul.mubr.msk.bf16.vlgmr.msra.gmra.mrb[232].mxu0 %vm127_vm1, %v5883_v33 }
0x431d   :  { %12171 = vmatpush3.bf16.msra.mxu0 %v15809_v12  ;;  %12178 = vmatprep.mubr.msk.bf16.mxu0 %vm13523_vm0, %v13522_v1 }
0x431e   :  { %12172 = vmatprep.subr.bf16.mxu0 %v13522_v1 }
0x4321   :  { %12173 = vmatpush3.bf16.msra.mxu0 %v15818_v31 }
0x4322   :  { %12174 = vmatprep.subr.bf16.mxu0 %v13522_v1 }
0x4325   :  { %12175 = vmatpush3.bf16.msra.mxu0 %v15825_v15 }
0x4326   :  { %12176 = vmatprep.subr.bf16.mxu0 %v13522_v1 }
0x4329   :  { %12177 = vmatpush3.bf16.msra.mxu0 %v15832_v52 }
0x432a   :  { %12190 = vmatprep.subr.bf16.mxu0 %v13522_v1 }
0x43ef   :  { %v5921_v55 = vpop.f32.mrb[232].mxu0 }
0x43f0   :  { %v5922_v24 = vadd.f32 %v5921_v55, %v5636_v5  ;;  %v12156_v58 = vpop.f32.mrb[233].mxu0 }
0x43f1   :  { %v5924_v48 = vpop.f32.mrb[234].mxu0 }
0x43f2   :  { %13290 = vtanh.f32 %v5922_v24  ;;  %v5925_v9 = vadd.f32 %v5924_v48, %v5636_v5  ;;  %v12157_v35 = vpop.f32.mrb[235].mxu0  ;;  %v6165_v5 = vmul.f32 2.0, %v5826_v13  ;;  %v6168_v13 = vadd.f32 %v6166_v45, %v15799_v11 }
0x43f4   :  { %13292 = vtanh.f32 %v5925_v9  ;;  %v6167_v4 = vadd.f32 %v6165_v5, %v15794_v34  ;;  %v5638_v34 = vstv %s5637_s26 }
0x43f5   :  { %v5639_v11 = vmul.f32 %v15767_v61, %v5638_v34 }
0x43f7   :  { %v5640_v33 = vadd.f32 %v15773_v23, %v5639_v11 }
0x43fc   :  { %v13291_v10 = vpop.eup %13290 }
0x43fd   :  { %v5975_v59 = vmul.f32 %v13291_v10, %v13291_v10 }
0x43fe   :  { %v13293_v17 = vpop.eup %13292 }
0x43ff   :  { %v5976_v26 = vmul.f32 %v13293_v17, %v13293_v17  ;;  %v5930_v63 = vpack.c.bf16 %v13293_v17, %v13291_v10 }
0x4401   :  { %12167 = vmatmul.mubr.msk.bf16.vlgmr.msra.gmra.mrb[184].mxu1 %vm199_vm2, %v5930_v63  ;;  %v5977_v41 = vpack.c.bf16 %v5976_v26, %v5975_v59 }
0x4402   :  { %12183 = vmatpush3.bf16.msra.mxu1 %v15674_v27  ;;  %12186 = vmatprep.mubr.msk.bf16.mxu1 %vm13523_vm0, %v13522_v1 }
0x4403   :  { %12179 = vmatmul.mubr.msk.bf16.vlgmr.msra.gmra.mrb[236].mxu0 %vm199_vm2, %v5977_v41  ;;  %12184 = vmatprep.subr.bf16.mxu1 %v13522_v1 }
0x4404   :  { %12191 = vmatpush3.bf16.msra.mxu0 %v15730_v8  ;;  %12198 = vmatprep.mubr.msk.bf16.mxu0 %vm13523_vm0, %v13522_v1 }
0x4405   :  { %12192 = vmatprep.subr.bf16.mxu0 %v13522_v1 }
0x4406   :  { %12185 = vmatpush3.bf16.msra.mxu1 %v15688_v43 }
0x4407   :  { %12202 = vmatprep.subr.bf16.mxu1 %v13522_v1 }
0x4408   :  { %12193 = vmatpush3.bf16.msra.mxu0 %v15740_v50 }
0x4409   :  { %12194 = vmatprep.subr.bf16.mxu0 %v13522_v1 }
0x440c   :  { %12195 = vmatpush3.bf16.msra.mxu0 %v15630_v19 }
0x440d   :  { %12196 = vmatprep.subr.bf16.mxu0 %v13522_v1 }
0x4410   :  { %12197 = vmatpush3.bf16.msra.mxu0 %v15637_v49 }
0x4411   :  { %12226 = vmatprep.subr.bf16.mxu0 %v13522_v1 }
0x44d4   :  { %v5968_v47 = vpop.f32.mrb[184].mxu1 }
0x44d5   :  { %v5969_v51 = vadd.f32 %v15711_v18, %v5968_v47  ;;  %v12168_v25 = vpop.f32.mrb[185].mxu1 }
0x44d6   :  { %v5971_v40 = vpop.f32.mrb[186].mxu1  ;;  %v15898_v22 = vpop.f32.mrb[236].mxu0 }
0x44d7   :  { %v6022_v39 = vmul.f32 %v5969_v51, %v13810_v46  ;;  %v6169_v62 = vmul.f32 2.0, %v5969_v51  ;;  %v5972_v21 = vadd.f32 %v15711_v18, %v5971_v40  ;;  %v12169_v2 = vpop.f32.mrb[187].mxu1  ;;  %v12180_v53 = vpop.f32.mrb[237].mxu0 }
0x44d8   :  { %v15903_v20 = vpop.f32.mrb[238].mxu0  ;;  %v6179_v53 = vmul.f32 2.0, %v15859_v6 }
0x44d9   :  { %v6023_v54 = vmul.f32 %v5972_v21, %v13810_v46  ;;  %v6170_v0 = vmul.f32 2.0, %v5972_v21  ;;  %v12181_v3 = vpop.f32.mrb[239].mxu0  ;;  %v6171_v32 = vadd.f32 %v6169_v62, %v6167_v4  ;;  %v6024_v16 = vadd.f32 %v6022_v39, %v15719_v7 }
0x44da   :  { %v6226_v3 = vmul.f32 2.0, %v15903_v20  ;;  %v6237_v20 = vstv %s15989_s28  ;;  %s6847_s28 = sadd.f32 %s16207_s22, %s13687_s21 }
0x44db   :  { %v6025_v30 = vadd.f32 %v6023_v54, %v15722_v38  ;;  %v6172_v28 = vadd.f32 %v6170_v0, %v6168_v13  ;;  %v6238_v34 = vmul.f32 %v15767_v61, %v6237_v20 }
0x44dd   :  { %v6026_v14 = vpack.c.bf16 %v6025_v30, %v6024_v16  ;;  %v6239_v11 = vadd.f32 %v15773_v23, %v6238_v34 }
0x44df   :  { %12187 = vmatmul.mubr.msk.bf16.vlgmr.msra.gmra.mrb[188].mxu1 %vm127_vm1, %v6026_v14 }
0x44e0   :  { %12203 = vmatpush3.bf16.msra.mxu1 %v15809_v12  ;;  %12210 = vmatprep.mubr.msk.bf16.mxu1 %vm13523_vm0, %v13522_v1 }
0x44e1   :  { %12204 = vmatprep.subr.bf16.mxu1 %v13522_v1 }
0x44e4   :  { %12205 = vmatpush3.bf16.msra.mxu1 %v15818_v31 }
0x44e5   :  { %12206 = vmatprep.subr.bf16.mxu1 %v13522_v1 }
0x44e8   :  { %12207 = vmatpush3.bf16.msra.mxu1 %v15825_v15 }
0x44e9   :  { %12208 = vmatprep.subr.bf16.mxu1 %v13522_v1 }
0x44ec   :  { %12209 = vmatpush3.bf16.msra.mxu1 %v15832_v52 }
0x44ed   :  { %12214 = vmatprep.subr.bf16.mxu1 %v13522_v1 }
0x45b2   :  { %v6064_v55 = vpop.f32.mrb[188].mxu1 }
0x45b3   :  { %v6065_v24 = vadd.f32 %v6064_v55, %v5640_v33  ;;  %v12188_v58 = vpop.f32.mrb[189].mxu1 }
0x45b4   :  { %v6067_v48 = vpop.f32.mrb[190].mxu1 }
0x45b5   :  { %13294 = vtanh.f32 %v6065_v24  ;;  %v6068_v9 = vadd.f32 %v6067_v48, %v5640_v33  ;;  %v12189_v35 = vpop.f32.mrb[191].mxu1 }
0x45b7   :  { %13296 = vtanh.f32 %v6068_v9 }
0x45bf   :  { %v13295_v10 = vpop.eup %13294 }
0x45c0   :  { %v6118_v59 = vmul.f32 %v13295_v10, %v13295_v10 }
0x45c1   :  { %v13297_v17 = vpop.eup %13296 }
0x45c2   :  { %v6119_v26 = vmul.f32 %v13297_v17, %v13297_v17  ;;  %v6073_v63 = vpack.c.bf16 %v13297_v17, %v13295_v10 }
0x45c4   :  { %12199 = vmatmul.mubr.msk.bf16.vlgmr.msra.gmra.mrb[240].mxu0 %vm199_vm2, %v6073_v63  ;;  %v6120_v41 = vpack.c.bf16 %v6119_v26, %v6118_v59 }
0x45c5   :  { %12227 = vmatpush3.bf16.msra.mxu0 %v15674_v27  ;;  %12230 = vmatprep.mubr.msk.bf16.mxu0 %vm13523_vm0, %v13522_v1 }
0x45c6   :  { %12211 = vmatmul.mubr.msk.bf16.vlgmr.msra.gmra.mrb[192].mxu1 %vm199_vm2, %v6120_v41  ;;  %12228 = vmatprep.subr.bf16.mxu0 %v13522_v1 }
0x45c7   :  { %12215 = vmatpush3.bf16.msra.mxu1 %v15809_v12  ;;  %12222 = vmatprep.mubr.msk.bf16.mxu1 %vm13523_vm0, %v13522_v1 }
0x45c8   :  { %12216 = vmatprep.subr.bf16.mxu1 %v13522_v1 }
0x45c9   :  { %12229 = vmatpush3.bf16.msra.mxu0 %v15688_v43 }
0x45ca   :  { %12234 = vmatprep.subr.bf16.mxu0 %v13522_v1 }
0x45cb   :  { %12217 = vmatpush3.bf16.msra.mxu1 %v15818_v31 }
0x45cc   :  { %12218 = vmatprep.subr.bf16.mxu1 %v13522_v1 }
0x45cf   :  { %12219 = vmatpush3.bf16.msra.mxu1 %v15825_v15 }
0x45d0   :  { %12220 = vmatprep.subr.bf16.mxu1 %v13522_v1 }
0x45d3   :  { %12221 = vmatpush3.bf16.msra.mxu1 %v15832_v52 }
0x45d4   :  { %12246 = vmatprep.subr.bf16.mxu1 %v13522_v1 }
0x45d6   :  { %12223 = vmatmul.mubr.msk.bf16.vlgmr.msra.gmra.mrb[192].mxu1 %vm199_vm2, %v5735_v42 }
0x45d7   :  { %12247 = vmatpush3.bf16.msra.mxu1 %v15674_v27  ;;  %12250 = vmatprep.mubr.msk.bf16.mxu1 %vm13523_vm0, %v13522_v1 }
0x45d8   :  { %12248 = vmatprep.subr.bf16.mxu1 %v13522_v1 }
0x45db   :  { %12249 = vmatpush3.bf16.msra.mxu1 %v15688_v43 }
0x45dc   :  { %12266 = vmatprep.subr.bf16.mxu1 %v13522_v1 }
0x4697   :  { %v6111_v5 = vpop.f32.mrb[240].mxu0 }
0x4698   :  { %v6112_v47 = vadd.f32 %v15711_v18, %v6111_v5  ;;  %v12200_v45 = vpop.f32.mrb[241].mxu0 }
0x4699   :  { %v6114_v51 = vpop.f32.mrb[242].mxu0 }
0x469a   :  { %v6173_v25 = vadd.f32 %v6171_v32, %v6112_v47  ;;  %v6115_v36 = vadd.f32 %v15711_v18, %v6114_v51  ;;  %v12201_v60 = vpop.f32.mrb[243].mxu0 }
0x469c   :  { %v6175_v42 = vmul.f32 %v6173_v25, %v13869_v44  ;;  %v6174_v40 = vadd.f32 %v6172_v28, %v6115_v36 }
0x469e   :  { %v6176_v39 = vmul.f32 %v6174_v40, %v13869_v44  ;;  %v15957_v62 = vadd.f32 %v6175_v42, %v15719_v7  ;;  %v6180_v7 = vmul.f32 2.0, %v15863_v37  ;;  %v6241_v40 = vstv %s6240_s29 }
0x46a0   :  { %v15960_v21 = vadd.f32 %v6176_v39, %v15722_v38  ;;  %v6225_v38 = vmul.f32 2.0, %v15898_v22  ;;  %v6242_v39 = vmul.f32 %v15767_v61, %v6241_v40 }
0x46a2   :  { %v6248_v2 = vpack.c.bf16 %v15960_v21, %v15957_v62 }
0x46a4   :  { %12231 = vmatmul.mubr.msk.bf16.vlgmr.msra.gmra.mrb[244].mxu0 %vm127_vm1, %v6248_v2  ;;  %v6243_v2 = vadd.f32 %v15773_v23, %v6242_v39 }
0x46a5   :  { %12235 = vmatpush3.bf16.msra.mxu0 %v15730_v8  ;;  %12242 = vmatprep.mubr.msk.bf16.mxu0 %vm13523_vm0, %v13522_v1 }
0x46a6   :  { %12236 = vmatprep.subr.bf16.mxu0 %v13522_v1 }
0x46a9   :  { %v6218_v4 = vpop.f32.mrb[192].mxu1  ;;  %12237 = vmatpush3.bf16.msra.mxu0 %v15740_v50 }
0x46aa   :  { %v6219_v13 = vadd.f32 %v6218_v4, %v6179_v53  ;;  %v12224_v54 = vpop.f32.mrb[193].mxu1  ;;  %12238 = vmatprep.subr.bf16.mxu0 %v13522_v1 }
0x46ab   :  { %v6221_v0 = vpop.f32.mrb[194].mxu1 }
0x46ac   :  { %v6227_v32 = vadd.f32 %v6225_v38, %v6219_v13  ;;  %v6222_v16 = vadd.f32 %v6221_v0, %v6180_v7  ;;  %v12225_v30 = vpop.f32.mrb[195].mxu1 }
0x46ad   :  { %12239 = vmatpush3.bf16.msra.mxu0 %v15630_v19 }
0x46ae   :  { %v6231_v6 = vmul.f32 %v6227_v32, %v13869_v44  ;;  %v6228_v28 = vadd.f32 %v6226_v3, %v6222_v16  ;;  %12240 = vmatprep.subr.bf16.mxu0 %v13522_v1 }
0x46b0   :  { %v15979_v37 = vadd.f32 %v6231_v6, %v15751_v56  ;;  %v6232_v22 = vmul.f32 %v6228_v28, %v13869_v44 }
0x46b1   :  { %12241 = vmatpush3.bf16.msra.mxu0 %v15637_v49 }
0x46b2   :  { %v15984_v14 = vadd.f32 %v6232_v22, %v15756_v57  ;;  %12254 = vmatprep.subr.bf16.mxu0 %v13522_v1 }
0x4777   :  { %v6286_v56 = vpop.f32.mrb[244].mxu0 }
0x4778   :  { %v6287_v33 = vadd.f32 %v6286_v56, %v6239_v11  ;;  %v12232_v55 = vpop.f32.mrb[245].mxu0 }
0x4779   :  { %v6289_v24 = vpop.f32.mrb[246].mxu0 }
0x477a   :  { %13298 = vtanh.f32 %v6287_v33  ;;  %v6290_v58 = vadd.f32 %v6289_v24, %v6239_v11  ;;  %v12233_v48 = vpop.f32.mrb[247].mxu0 }
0x477c   :  { %13300 = vtanh.f32 %v6290_v58 }
0x4784   :  { %v13299_v57 = vpop.eup %13298 }
0x4785   :  { %v15994_v35 = vmul.f32 %v13299_v57, %v13299_v57 }
0x4786   :  { %v13301_v9 = vpop.eup %13300 }
0x4787   :  { %v15996_v10 = vmul.f32 %v13301_v9, %v13301_v9  ;;  %v6295_v17 = vpack.c.bf16 %v13301_v9, %v13299_v57 }
0x4789   :  { %12243 = vmatmul.mubr.msk.bf16.vlgmr.msra.gmra.mrb[248].mxu0 %vm199_vm2, %v6295_v17  ;;  %v6342_v59 = vpack.c.bf16 %v15996_v10, %v15994_v35 }
0x478a   :  { %12255 = vmatpush3.bf16.msra.mxu0 %v15730_v8  ;;  %12262 = vmatprep.mubr.msk.bf16.mxu0 %vm13523_vm0, %v13522_v1 }
0x478b   :  { %12256 = vmatprep.subr.bf16.mxu0 %v13522_v1 }
0x478e   :  { %12257 = vmatpush3.bf16.msra.mxu0 %v15740_v50 }
0x478f   :  { %12258 = vmatprep.subr.bf16.mxu0 %v13522_v1 }
0x4792   :  { %12259 = vmatpush3.bf16.msra.mxu0 %v15630_v19 }
0x4793   :  { %12260 = vmatprep.subr.bf16.mxu0 %v13522_v1 }
0x4796   :  { %12261 = vmatpush3.bf16.msra.mxu0 %v15637_v49 }
0x4797   :  { %12278 = vmatprep.subr.bf16.mxu0 %v13522_v1 }
0x485c   :  { %v6333_v26 = vpop.f32.mrb[248].mxu0 }
0x485d   :  { %v16012_v63 = vadd.f32 %v15711_v18, %v6333_v26  ;;  %v12244_v41 = vpop.f32.mrb[249].mxu0 }
0x485e   :  { %v6336_v5 = vpop.f32.mrb[250].mxu0 }
0x485f   :  { %v6343_v47 = vmul.f32 %v16012_v63, %v13695_v29  ;;  %v16017_v45 = vadd.f32 %v15711_v18, %v6336_v5  ;;  %v12245_v51 = vpop.f32.mrb[251].mxu0 }
0x4861   :  { %v6344_v25 = vmul.f32 %v16017_v45, %v13695_v29  ;;  %v6345_v36 = vadd.f32 %v6343_v47, %v15957_v62 }
0x4863   :  { %v6346_v60 = vadd.f32 %v6344_v25, %v15960_v21 }
0x4865   :  { %v6347_v42 = vpack.c.bf16 %v6346_v60, %v6345_v36 }
0x4867   :  { %12251 = vmatmul.mubr.msk.bf16.vlgmr.msra.gmra.mrb[196].mxu1 %vm127_vm1, %v6347_v42 }
0x4868   :  { %12267 = vmatpush3.bf16.msra.mxu1 %v15809_v12  ;;  %12274 = vmatprep.mubr.msk.bf16.mxu1 %vm13523_vm0, %v13522_v1 }
0x4869   :  { %12268 = vmatprep.subr.bf16.mxu1 %v13522_v1 }
0x486c   :  { %12269 = vmatpush3.bf16.msra.mxu1 %v15818_v31 }
0x486d   :  { %12270 = vmatprep.subr.bf16.mxu1 %v13522_v1 }
0x4870   :  { %12271 = vmatpush3.bf16.msra.mxu1 %v15825_v15 }
0x4871   :  { %12272 = vmatprep.subr.bf16.mxu1 %v13522_v1 }
0x4874   :  { %12273 = vmatpush3.bf16.msra.mxu1 %v15832_v52 }
0x4875   :  { %12286 = vmatprep.subr.bf16.mxu1 %v13522_v1 }
0x493a   :  { %v6385_v53 = vpop.f32.mrb[196].mxu1 }
0x493b   :  { %v6386_v4 = vadd.f32 %v6385_v53, %v6243_v2  ;;  %v12252_v7 = vpop.f32.mrb[197].mxu1 }
0x493c   :  { %v6388_v38 = vpop.f32.mrb[198].mxu1 }
0x493d   :  { %13302 = vtanh.f32 %v6386_v4  ;;  %v6389_v13 = vadd.f32 %v6388_v38, %v6243_v2  ;;  %v12253_v54 = vpop.f32.mrb[199].mxu1 }
0x493f   :  { %13304 = vtanh.f32 %v6389_v13 }
0x4947   :  { %v13303_v0 = vpop.eup %13302 }
0x4948   :  { %v6439_v32 = vmul.f32 %v13303_v0, %v13303_v0 }
0x4949   :  { %v13305_v3 = vpop.eup %13304 }
0x494a   :  { %v6440_v16 = vmul.f32 %v13305_v3, %v13305_v3  ;;  %v6394_v30 = vpack.c.bf16 %v13305_v3, %v13303_v0 }
0x494c   :  { %12263 = vmatmul.mubr.msk.bf16.vlgmr.msra.gmra.mrb[252].mxu0 %vm199_vm2, %v6394_v30  ;;  %v6441_v6 = vpack.c.bf16 %v6440_v16, %v6439_v32 }
0x494d   :  { %12279 = vmatpush3.bf16.msra.mxu0 %v15674_v27  ;;  %12282 = vmatprep.mubr.msk.bf16.mxu0 %vm13523_vm0, %v13522_v1 }
0x494e   :  { %12275 = vmatmul.mubr.msk.bf16.vlgmr.msra.gmra.mrb[200].mxu1 %vm199_vm2, %v6441_v6  ;;  %12280 = vmatprep.subr.bf16.mxu0 %v13522_v1 }
0x494f   :  { %12287 = vmatpush3.bf16.msra.mxu1 %v15730_v8  ;;  %12294 = vmatprep.mubr.msk.bf16.mxu1 %vm13523_vm0, %v13522_v1 }
0x4950   :  { %12288 = vmatprep.subr.bf16.mxu1 %v13522_v1 }
0x4951   :  { %12281 = vmatpush3.bf16.msra.mxu0 %v15688_v43 }
0x4952   :  { %12298 = vmatprep.subr.bf16.mxu0 %v13522_v1 }
0x4953   :  { %12289 = vmatpush3.bf16.msra.mxu1 %v15740_v50 }
0x4954   :  { %12290 = vmatprep.subr.bf16.mxu1 %v13522_v1 }
0x4957   :  { %12291 = vmatpush3.bf16.msra.mxu1 %v15630_v19 }
0x4958   :  { %12292 = vmatprep.subr.bf16.mxu1 %v13522_v1 }
0x495b   :  { %12293 = vmatpush3.bf16.msra.mxu1 %v15637_v49 }
0x495c   :  { %12310 = vmatprep.subr.bf16.mxu1 %v13522_v1 }
0x4a1f   :  { %v6432_v28 = vpop.f32.mrb[252].mxu0 }
0x4a20   :  { %v6433_v22 = vadd.f32 %v15711_v18, %v6432_v28  ;;  %v12264_v20 = vpop.f32.mrb[253].mxu0 }
0x4a21   :  { %v6435_v34 = vpop.f32.mrb[254].mxu0  ;;  %v16057_v11 = vpop.f32.mrb[200].mxu1 }
0x4a22   :  { %v6486_v56 = vmul.f32 %v6433_v22, %v13695_v29  ;;  %v6436_v33 = vadd.f32 %v15711_v18, %v6435_v34  ;;  %v12265_v55 = vpop.f32.mrb[255].mxu0  ;;  %v12276_v24 = vpop.f32.mrb[201].mxu1 }
0x4a23   :  { %v16061_v58 = vpop.f32.mrb[202].mxu1 }
0x4a24   :  { %v6487_v48 = vmul.f32 %v6436_v33, %v13695_v29  ;;  %v12277_v57 = vpop.f32.mrb[203].mxu1  ;;  %v6488_v9 = vadd.f32 %v6486_v56, %v15957_v62  ;;  %v6773_v38 = vmul.f32 2.0, %v6436_v33 }
0x4a26   :  { %v6489_v17 = vadd.f32 %v6487_v48, %v15960_v21 }
0x4a28   :  { %v6490_v26 = vpack.c.bf16 %v6489_v17, %v6488_v9 }
0x4a2a   :  { %12283 = vmatmul.mubr.msk.bf16.vlgmr.msra.gmra.mrb[0].mxu0 %vm127_vm1, %v6490_v26 }
0x4a2b   :  { %12299 = vmatpush3.bf16.msra.mxu0 %v15809_v12  ;;  %12306 = vmatprep.mubr.msk.bf16.mxu0 %vm13523_vm0, %v13522_v1 }
0x4a2c   :  { %12300 = vmatprep.subr.bf16.mxu0 %v13522_v1 }
0x4a2f   :  { %12301 = vmatpush3.bf16.msra.mxu0 %v15818_v31 }
0x4a30   :  { %12302 = vmatprep.subr.bf16.mxu0 %v13522_v1 }
0x4a33   :  { %12303 = vmatpush3.bf16.msra.mxu0 %v15825_v15 }
0x4a34   :  { %12304 = vmatprep.subr.bf16.mxu0 %v13522_v1 }
0x4a37   :  { %12305 = vmatpush3.bf16.msra.mxu0 %v15832_v52 }
0x4a38   :  { %12318 = vmatprep.subr.bf16.mxu0 %v13522_v1 }
0x4afd   :  { %v6528_v41 = vpop.f32.mrb[0].mxu0 }
0x4afe   :  { %v6529_v5 = vadd.f32 %v6528_v41, %v6243_v2  ;;  %v12284_v47 = vpop.f32.mrb[1].mxu0 }
0x4aff   :  { %v6531_v51 = vpop.f32.mrb[2].mxu0 }
0x4b00   :  { %13306 = vtanh.f32 %v6529_v5  ;;  %v6532_v25 = vadd.f32 %v6531_v51, %v6243_v2  ;;  %v12285_v36 = vpop.f32.mrb[3].mxu0  ;;  %v6772_v2 = vmul.f32 2.0, %v6433_v22  ;;  %v6775_v22 = vadd.f32 %v6773_v38, %v16017_v45 }
0x4b02   :  { %13308 = vtanh.f32 %v6532_v25 }
0x4b0a   :  { %v13307_v60 = vpop.eup %13306 }
0x4b0b   :  { %v6582_v40 = vmul.f32 %v13307_v60, %v13307_v60 }
0x4b0c   :  { %v13309_v42 = vpop.eup %13308 }
0x4b0d   :  { %v6583_v39 = vmul.f32 %v13309_v42, %v13309_v42  ;;  %v6537_v53 = vpack.c.bf16 %v13309_v42, %v13307_v60 }
0x4b0f   :  { %v6584_v4 = vpack.c.bf16 %v6583_v39, %v6582_v40  ;;  %12295 = vmatmul.mubr.msk.bf16.vlgmr.msra.gmra.mrb[204].mxu1 %vm199_vm2, %v6537_v53 }
0x4b10   :  { %12311 = vmatpush3.bf16.msra.mxu1 %v15674_v27  ;;  %12314 = vmatprep.mubr.msk.bf16.mxu1 %vm13523_vm0, %v13522_v1 }
0x4b11   :  { %12307 = vmatmul.mubr.msk.bf16.vlgmr.msra.gmra.mrb[4].mxu0 %vm199_vm2, %v6584_v4  ;;  %12312 = vmatprep.subr.bf16.mxu1 %v13522_v1 }
0x4b12   :  { %12319 = vmatpush3.bf16.msra.mxu0 %v15730_v8  ;;  %12326 = vmatprep.mubr.msk.bf16.mxu0 %vm13523_vm0, %v13522_v1 }
0x4b13   :  { %12320 = vmatprep.subr.bf16.mxu0 %v13522_v1 }
0x4b14   :  { %12313 = vmatpush3.bf16.msra.mxu1 %v15688_v43 }
0x4b15   :  { %12330 = vmatprep.subr.bf16.mxu1 %v13522_v1 }
0x4b16   :  { %12321 = vmatpush3.bf16.msra.mxu0 %v15740_v50 }
0x4b17   :  { %12322 = vmatprep.subr.bf16.mxu0 %v13522_v1 }
0x4b1a   :  { %12323 = vmatpush3.bf16.msra.mxu0 %v15630_v19 }
0x4b1b   :  { %12324 = vmatprep.subr.bf16.mxu0 %v13522_v1 }
0x4b1e   :  { %12325 = vmatpush3.bf16.msra.mxu0 %v15637_v49  ;;  %v6774_v49 = vadd.f32 %v6772_v2, %v16012_v63  ;;  %v6245_v63 = vstv %s6244_s2 }
0x4b1f   :  { %12354 = vmatprep.subr.bf16.mxu0 %v13522_v1  ;;  %v6246_v45 = vmul.f32 %v15767_v61, %v6245_v63 }
0x4b21   :  { %v6247_v9 = vadd.f32 %v15773_v23, %v6246_v45 }
0x4be2   :  { %v6575_v7 = vpop.f32.mrb[204].mxu1 }
0x4be3   :  { %v6576_v13 = vadd.f32 %v15711_v18, %v6575_v7  ;;  %v12296_v54 = vpop.f32.mrb[205].mxu1 }
0x4be4   :  { %v6578_v0 = vpop.f32.mrb[206].mxu1  ;;  %v16096_v3 = vpop.f32.mrb[4].mxu0 }
0x4be5   :  { %v6629_v32 = vmul.f32 %v6576_v13, %v13810_v46  ;;  %v6776_v16 = vmul.f32 2.0, %v6576_v13  ;;  %v6579_v19 = vadd.f32 %v15711_v18, %v6578_v0  ;;  %v12297_v30 = vpop.f32.mrb[207].mxu1  ;;  %v12308_v6 = vpop.f32.mrb[5].mxu0 }
0x4be6   :  { %v16101_v28 = vpop.f32.mrb[6].mxu0 }
0x4be7   :  { %v6630_v20 = vmul.f32 %v6579_v19, %v13810_v46  ;;  %v6777_v34 = vmul.f32 2.0, %v6579_v19  ;;  %v12309_v56 = vpop.f32.mrb[7].mxu0  ;;  %v6778_v33 = vadd.f32 %v6776_v16, %v6774_v49  ;;  %v6631_v55 = vadd.f32 %v6629_v32, %v15957_v62 }
0x4be8   :  { %v16198_v56 = vld [vmem:[%s17345_s4 + $0x18] sm:$0xff]  }
0x4be9   :  { %v6632_v24 = vadd.f32 %v6630_v20, %v15960_v21  ;;  %v6779_v48 = vadd.f32 %v6777_v34, %v6775_v22 }
0x4beb   :  { %v6633_v57 = vpack.c.bf16 %v6632_v24, %v6631_v55 }
0x4bed   :  { %12315 = vmatmul.mubr.msk.bf16.vlgmr.msra.gmra.mrb[208].mxu1 %vm127_vm1, %v6633_v57 }
0x4bee   :  { %12331 = vmatpush3.bf16.msra.mxu1 %v15809_v12  ;;  %12338 = vmatprep.mubr.msk.bf16.mxu1 %vm13523_vm0, %v13522_v1 }
0x4bef   :  { %12332 = vmatprep.subr.bf16.mxu1 %v13522_v1 }
0x4bf2   :  { %12333 = vmatpush3.bf16.msra.mxu1 %v15818_v31 }
0x4bf3   :  { %12334 = vmatprep.subr.bf16.mxu1 %v13522_v1 }
0x4bf6   :  { %12335 = vmatpush3.bf16.msra.mxu1 %v15825_v15 }
0x4bf7   :  { %12336 = vmatprep.subr.bf16.mxu1 %v13522_v1 }
0x4bfa   :  { %12337 = vmatpush3.bf16.msra.mxu1 %v15832_v52 }
0x4bfb   :  { %12342 = vmatprep.subr.bf16.mxu1 %v13522_v1 }
0x4cc0   :  { %v6671_v17 = vpop.f32.mrb[208].mxu1 }
0x4cc1   :  { %v6672_v26 = vadd.f32 %v6671_v17, %v6247_v9  ;;  %v12316_v41 = vpop.f32.mrb[209].mxu1 }
0x4cc2   :  { %v6674_v5 = vpop.f32.mrb[210].mxu1 }
0x4cc3   :  { %13310 = vtanh.f32 %v6672_v26  ;;  %v6675_v47 = vadd.f32 %v6674_v5, %v6247_v9  ;;  %v12317_v51 = vpop.f32.mrb[211].mxu1 }
0x4cc4   :  { %v16231_v51 = vld [vmem:[%s17345_s4 + $0x8] sm:$0xff]  }
0x4cc5   :  { %13312 = vtanh.f32 %v6675_v47 }
0x4ccd   :  { %v13311_v25 = vpop.eup %13310 }
0x4cce   :  { %v6725_v60 = vmul.f32 %v13311_v25, %v13311_v25 }
0x4ccf   :  { %v13313_v36 = vpop.eup %13312 }
0x4cd0   :  { %v6680_v42 = vpack.c.bf16 %v13313_v36, %v13311_v25  ;;  %v6726_v40 = vmul.f32 %v13313_v36, %v13313_v36  ;;  %v16242_v36 = vld [vmem:[%s17349_s8] ss:$0 sm:$0xff] }
0x4cd2   :  { %12327 = vmatmul.mubr.msk.bf16.vlgmr.msra.gmra.mrb[8].mxu0 %vm199_vm2, %v6680_v42  ;;  %v6727_v39 = vpack.c.bf16 %v6726_v40, %v6725_v60 }
0x4cd3   :  { %12355 = vmatpush3.bf16.msra.mxu0 %v15674_v27  ;;  %12358 = vmatprep.mubr.msk.bf16.mxu0 %vm13523_vm0, %v13522_v1  ;;  %v16147_v27 = vld [vmem:[%s17344_s3] sm:$0xff]  }
0x4cd4   :  { %12339 = vmatmul.mubr.msk.bf16.vlgmr.msra.gmra.mrb[212].mxu1 %vm199_vm2, %v6727_v39  ;;  %12356 = vmatprep.subr.bf16.mxu0 %v13522_v1 }
0x4cd5   :  { %12343 = vmatpush3.bf16.msra.mxu1 %v15809_v12  ;;  %12350 = vmatprep.mubr.msk.bf16.mxu1 %vm13523_vm0, %v13522_v1 }
0x4cd6   :  { %12344 = vmatprep.subr.bf16.mxu1 %v13522_v1 }
0x4cd7   :  { %12357 = vmatpush3.bf16.msra.mxu0 %v15688_v43  ;;  %v16156_v43 = vld [vmem:[%s17344_s3 + $0x8] sm:$0xff]  }
0x4cd8   :  { %12362 = vmatprep.subr.bf16.mxu0 %v13522_v1 }
0x4cd9   :  { %12345 = vmatpush3.bf16.msra.mxu1 %v15818_v31 }
0x4cda   :  { %12346 = vmatprep.subr.bf16.mxu1 %v13522_v1 }
0x4cdd   :  { %12347 = vmatpush3.bf16.msra.mxu1 %v15825_v15 }
0x4cde   :  { %12348 = vmatprep.subr.bf16.mxu1 %v13522_v1 }
0x4ce1   :  { %12349 = vmatpush3.bf16.msra.mxu1 %v15832_v52 }
0x4ce2   :  { %12374 = vmatprep.subr.bf16.mxu1 %v13522_v1 }
0x4ce4   :  { %12351 = vmatmul.mubr.msk.bf16.vlgmr.msra.gmra.mrb[212].mxu1 %vm199_vm2, %v6342_v59 }
0x4ce5   :  { %12375 = vmatpush3.bf16.msra.mxu1 %v16147_v27  ;;  %12378 = vmatprep.mubr.msk.bf16.mxu1 %vm13523_vm0, %v13522_v1 }
0x4ce6   :  { %12376 = vmatprep.subr.bf16.mxu1 %v13522_v1 }
0x4ce9   :  { %12377 = vmatpush3.bf16.msra.mxu1 %v16156_v43 }
0x4cea   :  { %12394 = vmatprep.subr.bf16.mxu1 %v13522_v1 }
0x4da5   :  { %v6718_v35 = vpop.f32.mrb[8].mxu0 }
0x4da6   :  { %v6719_v10 = vadd.f32 %v15711_v18, %v6718_v35  ;;  %v12328_v59 = vpop.f32.mrb[9].mxu0 }
0x4da7   :  { %v6721_v53 = vpop.f32.mrb[10].mxu0 }
0x4da8   :  { %v6780_v4 = vadd.f32 %v6778_v33, %v6719_v10  ;;  %v6722_v2 = vadd.f32 %v15711_v18, %v6721_v53  ;;  %v12329_v7 = vpop.f32.mrb[11].mxu0  ;;  %v6786_v18 = vmul.f32 2.0, %v16057_v11 }
0x4da9   :  { %v6848_v7 = vstv %s6847_s28  ;;  %s16654_s28 = sadd.f32 %s8056_s27, %s13652_s12 }
0x4daa   :  { %v6782_v38 = vmul.f32 %v6780_v4, %v13869_v44  ;;  %v6781_v13 = vadd.f32 %v6779_v48, %v6722_v2 }
0x4dab   :  { %s8061_s13 = sadd.f32 %s16654_s28, %s13687_s21 }
0x4dac   :  { %v6783_v54 = vmul.f32 %v6781_v13, %v13869_v44  ;;  %v16165_v0 = vadd.f32 %v6782_v38, %v15957_v62  ;;  %v6787_v62 = vmul.f32 2.0, %v16061_v58  ;;  %s8065_s16 = sadd.f32 %s16654_s28, %s13658_s15 }
0x4dae   :  { %v16168_v32 = vadd.f32 %v6783_v54, %v15960_v21  ;;  %v6832_v21 = vmul.f32 2.0, %v16096_v3 }
0x4db0   :  { %v6855_v16 = vpack.c.bf16 %v16168_v32, %v16165_v0 }
0x4db2   :  { %12359 = vmatmul.mubr.msk.bf16.vlgmr.msra.gmra.mrb[12].mxu0 %vm127_vm1, %v6855_v16 }
0x4db3   :  { %12363 = vmatpush3.bf16.msra.mxu0 %v15730_v8  ;;  %12370 = vmatprep.mubr.msk.bf16.mxu0 %vm13523_vm0, %v13522_v1  ;;  %v6833_v8 = vmul.f32 2.0, %v16101_v28 }
0x4db4   :  { %12364 = vmatprep.subr.bf16.mxu0 %v13522_v1 }
0x4db7   :  { %v6825_v19 = vpop.f32.mrb[212].mxu1  ;;  %12365 = vmatpush3.bf16.msra.mxu0 %v15740_v50  ;;  %v16186_v50 = vld [vmem:[%s17345_s4 + $0x10] sm:$0xff]  }
0x4db8   :  { %v6826_v30 = vadd.f32 %v6825_v19, %v6786_v18  ;;  %v12352_v6 = vpop.f32.mrb[213].mxu1  ;;  %12366 = vmatprep.subr.bf16.mxu0 %v13522_v1 }
0x4db9   :  { %v6828_v49 = vpop.f32.mrb[214].mxu1 }
0x4dba   :  { %v6834_v22 = vadd.f32 %v6832_v21, %v6826_v30  ;;  %v6829_v20 = vadd.f32 %v6828_v49, %v6787_v62  ;;  %v12353_v34 = vpop.f32.mrb[215].mxu1 }
0x4dbb   :  { %12367 = vmatpush3.bf16.msra.mxu0 %v16186_v50 }
0x4dbc   :  { %v6838_v11 = vmul.f32 %v6834_v22, %v13869_v44  ;;  %v6835_v58 = vadd.f32 %v6833_v8, %v6829_v20  ;;  %12368 = vmatprep.subr.bf16.mxu0 %v13522_v1 }
0x4dbe   :  { %v16192_v3 = vadd.f32 %v6838_v11, %v15979_v37  ;;  %v6839_v28 = vmul.f32 %v6835_v58, %v13869_v44  ;;  %v6844_v37 = vstv %s16207_s22  ;;  %s7449_s22 = smul.f32 12.0, %s13658_s15 }
0x4dbf   :  { %12369 = vmatpush3.bf16.msra.mxu0 %v16198_v56  ;;  %v6845_v55 = vmul.f32 %v15767_v61, %v6844_v37 }
0x4dc0   :  { %v16202_v33 = vadd.f32 %v6839_v28, %v15984_v14  ;;  %12382 = vmatprep.subr.bf16.mxu0 %v13522_v1  ;;  %s16456_s1 = sadd.f32 %s7449_s22, %s13652_s12 }
0x4dc1   :  { %v6846_v24 = vadd.f32 %v15773_v23, %v6845_v55  ;;  %v16222_v23 = vld [vmem:[%s17345_s4] sm:$0xff]  }
0x4dc2   :  { %s7454_s25 = sadd.f32 %s16456_s1, %s13687_s21 }
0x4dc3   :  { %s7458_s26 = sadd.f32 %s16456_s1, %s13658_s15 }
0x4e85   :  { %v6893_v48 = vpop.f32.mrb[12].mxu0 }
0x4e86   :  { %v6894_v57 = vadd.f32 %v6893_v48, %v6846_v24  ;;  %v12360_v63 = vpop.f32.mrb[13].mxu0 }
0x4e87   :  { %v6896_v45 = vpop.f32.mrb[14].mxu0 }
0x4e88   :  { %13314 = vtanh.f32 %v6894_v57  ;;  %v6897_v9 = vadd.f32 %v6896_v45, %v6846_v24  ;;  %v12361_v17 = vpop.f32.mrb[15].mxu0 }
0x4e8a   :  { %13316 = vtanh.f32 %v6897_v9 }
0x4e92   :  { %v13315_v14 = vpop.eup %13314 }
0x4e93   :  { %v16212_v41 = vmul.f32 %v13315_v14, %v13315_v14 }
0x4e94   :  { %v13317_v26 = vpop.eup %13316 }
0x4e95   :  { %v6902_v5 = vpack.c.bf16 %v13317_v26, %v13315_v14  ;;  %v16214_v47 = vmul.f32 %v13317_v26, %v13317_v26  ;;  %v16317_v14 = vld [vmem:[%s17346_s5] sm:$0xff]   ;;  %v16326_v26 = vld [vmem:[%s17346_s5 + $0x8] sm:$0xff]  }
0x4e97   :  { %12371 = vmatmul.mubr.msk.bf16.vlgmr.msra.gmra.mrb[16].mxu0 %vm199_vm2, %v6902_v5  ;;  %v6949_v61 = vpack.c.bf16 %v16214_v47, %v16212_v41  ;;  %v16333_v5 = vld [vmem:[%s17346_s5 + $0x10] sm:$0xff]  }
0x4e98   :  { %12383 = vmatpush3.bf16.msra.mxu0 %v16222_v23  ;;  %12390 = vmatprep.mubr.msk.bf16.mxu0 %vm13523_vm0, %v13522_v1 }
0x4e99   :  { %12384 = vmatprep.subr.bf16.mxu0 %v13522_v1 }
0x4e9c   :  { %12385 = vmatpush3.bf16.msra.mxu0 %v16231_v51 }
0x4e9d   :  { %12386 = vmatprep.subr.bf16.mxu0 %v13522_v1 }
0x4ea0   :  { %12387 = vmatpush3.bf16.msra.mxu0 %v16186_v50 }
0x4ea1   :  { %12388 = vmatprep.subr.bf16.mxu0 %v13522_v1 }
0x4ea4   :  { %12389 = vmatpush3.bf16.msra.mxu0 %v16198_v56 }
0x4ea5   :  { %12406 = vmatprep.subr.bf16.mxu0 %v13522_v1 }
0x4f6a   :  { %v6940_v25 = vpop.f32.mrb[16].mxu0 }
0x4f6b   :  { %v16245_v60 = vadd.f32 %v16242_v36, %v6940_v25  ;;  %v12372_v42 = vpop.f32.mrb[17].mxu0  ;;  %v16340_v25 = vld [vmem:[%s17346_s5 + $0x18] sm:$0xff]  }
0x4f6c   :  { %v6943_v40 = vpop.f32.mrb[18].mxu0 }
0x4f6d   :  { %v6950_v39 = vmul.f32 %v16245_v60, %v13695_v29  ;;  %v16250_v35 = vadd.f32 %v16242_v36, %v6943_v40  ;;  %v12373_v10 = vpop.f32.mrb[19].mxu0 }
0x4f6f   :  { %v6951_v59 = vmul.f32 %v16250_v35, %v13695_v29  ;;  %v6952_v53 = vadd.f32 %v6950_v39, %v16165_v0 }
0x4f71   :  { %v6953_v4 = vadd.f32 %v6951_v59, %v16168_v32 }
0x4f73   :  { %v6954_v2 = vpack.c.bf16 %v6953_v4, %v6952_v53 }
0x4f75   :  { %12379 = vmatmul.mubr.msk.bf16.vlgmr.msra.gmra.mrb[216].mxu1 %vm127_vm1, %v6954_v2 }
0x4f76   :  { %12395 = vmatpush3.bf16.msra.mxu1 %v15809_v12  ;;  %12402 = vmatprep.mubr.msk.bf16.mxu1 %vm13523_vm0, %v13522_v1  ;;  %v16272_v12 = vld [vmem:[%s17348_s7] ss:$0 sm:$0xff] }
0x4f77   :  { %12396 = vmatprep.subr.bf16.mxu1 %v13522_v1  ;;  %v6849_v38 = vmul.f32 %v16272_v12, %v6848_v7 }
0x4f7a   :  { %12397 = vmatpush3.bf16.msra.mxu1 %v15818_v31  ;;  %v16278_v31 = vld [vmem:[%s17347_s6] ss:$0 sm:$0xff] }
0x4f7b   :  { %12398 = vmatprep.subr.bf16.mxu1 %v13522_v1 }
0x4f7e   :  { %12399 = vmatpush3.bf16.msra.mxu1 %v15825_v15  ;;  %v16281_v15 = vadd.f32 %v16278_v31, %v6849_v38 }
0x4f7f   :  { %12400 = vmatprep.subr.bf16.mxu1 %v13522_v1 }
0x4f82   :  { %12401 = vmatpush3.bf16.msra.mxu1 %v15832_v52 }
0x4f83   :  { %12414 = vmatprep.subr.bf16.mxu1 %v13522_v1 }
0x5048   :  { %v6992_v52 = vpop.f32.mrb[216].mxu1 }
0x5049   :  { %v6993_v13 = vadd.f32 %v6992_v52, %v16281_v15  ;;  %v12380_v54 = vpop.f32.mrb[217].mxu1 }
0x504a   :  { %v6995_v16 = vpop.f32.mrb[218].mxu1 }
0x504b   :  { %13318 = vtanh.f32 %v6993_v13  ;;  %v6996_v18 = vadd.f32 %v6995_v16, %v16281_v15  ;;  %v12381_v19 = vpop.f32.mrb[219].mxu1 }
0x504d   :  { %13320 = vtanh.f32 %v6996_v18 }
0x5055   :  { %v13319_v62 = vpop.eup %13318 }
0x5056   :  { %v7046_v30 = vmul.f32 %v13319_v62, %v13319_v62 }
0x5057   :  { %v13321_v21 = vpop.eup %13320 }
0x5058   :  { %v7001_v6 = vpack.c.bf16 %v13321_v21, %v13319_v62  ;;  %v7047_v49 = vmul.f32 %v13321_v21, %v13321_v21 }
0x505a   :  { %12391 = vmatmul.mubr.msk.bf16.vlgmr.msra.gmra.mrb[20].mxu0 %vm199_vm2, %v7001_v6  ;;  %v7048_v8 = vpack.c.bf16 %v7047_v49, %v7046_v30 }
0x505b   :  { %12407 = vmatpush3.bf16.msra.mxu0 %v16147_v27  ;;  %12410 = vmatprep.mubr.msk.bf16.mxu0 %vm13523_vm0, %v13522_v1 }
0x505c   :  { %12403 = vmatmul.mubr.msk.bf16.vlgmr.msra.gmra.mrb[220].mxu1 %vm199_vm2, %v7048_v8  ;;  %12408 = vmatprep.subr.bf16.mxu0 %v13522_v1 }
0x505d   :  { %12415 = vmatpush3.bf16.msra.mxu1 %v16222_v23  ;;  %12422 = vmatprep.mubr.msk.bf16.mxu1 %vm13523_vm0, %v13522_v1 }
0x505e   :  { %12416 = vmatprep.subr.bf16.mxu1 %v13522_v1 }
0x505f   :  { %12409 = vmatpush3.bf16.msra.mxu0 %v16156_v43 }
0x5060   :  { %12426 = vmatprep.subr.bf16.mxu0 %v13522_v1 }
0x5061   :  { %12417 = vmatpush3.bf16.msra.mxu1 %v16231_v51 }
0x5062   :  { %12418 = vmatprep.subr.bf16.mxu1 %v13522_v1 }
0x5065   :  { %12419 = vmatpush3.bf16.msra.mxu1 %v16186_v50 }
0x5066   :  { %12420 = vmatprep.subr.bf16.mxu1 %v13522_v1 }
0x5069   :  { %12421 = vmatpush3.bf16.msra.mxu1 %v16198_v56 }
0x506a   :  { %12438 = vmatprep.subr.bf16.mxu1 %v13522_v1 }
0x512d   :  { %v7039_v22 = vpop.f32.mrb[20].mxu0 }
0x512e   :  { %v7040_v20 = vadd.f32 %v16242_v36, %v7039_v22  ;;  %v12392_v34 = vpop.f32.mrb[21].mxu0 }
0x512f   :  { %v7042_v11 = vpop.f32.mrb[22].mxu0  ;;  %v16304_v58 = vpop.f32.mrb[220].mxu1 }
0x5130   :  { %v7093_v28 = vmul.f32 %v7040_v20, %v13695_v29  ;;  %v7043_v37 = vadd.f32 %v16242_v36, %v7042_v11  ;;  %v12393_v55 = vpop.f32.mrb[23].mxu0  ;;  %v12404_v24 = vpop.f32.mrb[221].mxu1 }
0x5131   :  { %v16308_v48 = vpop.f32.mrb[222].mxu1 }
0x5132   :  { %v7094_v57 = vmul.f32 %v7043_v37, %v13695_v29  ;;  %v12405_v63 = vpop.f32.mrb[223].mxu1  ;;  %v7095_v45 = vadd.f32 %v7093_v28, %v16165_v0  ;;  %v7380_v16 = vmul.f32 2.0, %v7043_v37 }
0x5134   :  { %v7096_v9 = vadd.f32 %v7094_v57, %v16168_v32 }
0x5136   :  { %v7097_v17 = vpack.c.bf16 %v7096_v9, %v7095_v45 }
0x5138   :  { %12411 = vmatmul.mubr.msk.bf16.vlgmr.msra.gmra.mrb[24].mxu0 %vm127_vm1, %v7097_v17 }
0x5139   :  { %12427 = vmatpush3.bf16.msra.mxu0 %v16317_v14  ;;  %12434 = vmatprep.mubr.msk.bf16.mxu0 %vm13523_vm0, %v13522_v1 }
0x513a   :  { %12428 = vmatprep.subr.bf16.mxu0 %v13522_v1 }
0x513d   :  { %12429 = vmatpush3.bf16.msra.mxu0 %v16326_v26 }
0x513e   :  { %12430 = vmatprep.subr.bf16.mxu0 %v13522_v1 }
0x5141   :  { %12431 = vmatpush3.bf16.msra.mxu0 %v16333_v5 }
0x5142   :  { %12432 = vmatprep.subr.bf16.mxu0 %v13522_v1 }
0x5145   :  { %12433 = vmatpush3.bf16.msra.mxu0 %v16340_v25 }
0x5146   :  { %12446 = vmatprep.subr.bf16.mxu0 %v13522_v1 }
0x520b   :  { %v7135_v42 = vpop.f32.mrb[24].mxu0 }
0x520c   :  { %v7136_v40 = vadd.f32 %v7135_v42, %v16281_v15  ;;  %v12412_v39 = vpop.f32.mrb[25].mxu0 }
0x520d   :  { %v7138_v10 = vpop.f32.mrb[26].mxu0 }
0x520e   :  { %13322 = vtanh.f32 %v7136_v40  ;;  %v7139_v59 = vadd.f32 %v7138_v10, %v16281_v15  ;;  %v12413_v53 = vpop.f32.mrb[27].mxu0  ;;  %v7379_v15 = vmul.f32 2.0, %v7040_v20  ;;  %v7382_v20 = vadd.f32 %v7380_v16, %v16250_v35 }
0x5210   :  { %13324 = vtanh.f32 %v7139_v59  ;;  %v7381_v34 = vadd.f32 %v7379_v15, %v16245_v60  ;;  %v6852_v60 = vstv %s6851_s24  ;;  %s17127_s24 = sadd.f32 %s9270_s23, %s13652_s12  ;;  %s17311_s23 = sld [smem:[#allocation2 + $0x2]] }
0x5211   :  { %v6853_v35 = vmul.f32 %v16272_v12, %v6852_v60 }
0x5213   :  { %v6854_v17 = vadd.f32 %v16278_v31, %v6853_v35 }
0x5218   :  { %v13323_v4 = vpop.eup %13322 }
0x5219   :  { %v7189_v7 = vmul.f32 %v13323_v4, %v13323_v4 }
0x521a   :  { %v13325_v2 = vpop.eup %13324 }
0x521b   :  { %v7190_v38 = vmul.f32 %v13325_v2, %v13325_v2  ;;  %v7144_v52 = vpack.c.bf16 %v13325_v2, %v13323_v4 }
0x521d   :  { %v7191_v13 = vpack.c.bf16 %v7190_v38, %v7189_v7  ;;  %12423 = vmatmul.mubr.msk.bf16.vlgmr.msra.gmra.mrb[224].mxu1 %vm199_vm2, %v7144_v52 }
0x521e   :  { %12439 = vmatpush3.bf16.msra.mxu1 %v16147_v27  ;;  %12442 = vmatprep.mubr.msk.bf16.mxu1 %vm13523_vm0, %v13522_v1 }
0x521f   :  { %12435 = vmatmul.mubr.msk.bf16.vlgmr.msra.gmra.mrb[28].mxu0 %vm199_vm2, %v7191_v13  ;;  %12440 = vmatprep.subr.bf16.mxu1 %v13522_v1 }
0x5220   :  { %12447 = vmatpush3.bf16.msra.mxu0 %v16222_v23  ;;  %12454 = vmatprep.mubr.msk.bf16.mxu0 %vm13523_vm0, %v13522_v1 }
0x5221   :  { %12448 = vmatprep.subr.bf16.mxu0 %v13522_v1 }
0x5222   :  { %12441 = vmatpush3.bf16.msra.mxu1 %v16156_v43 }
0x5223   :  { %12458 = vmatprep.subr.bf16.mxu1 %v13522_v1 }
0x5224   :  { %12449 = vmatpush3.bf16.msra.mxu0 %v16231_v51 }
0x5225   :  { %12450 = vmatprep.subr.bf16.mxu0 %v13522_v1 }
0x5228   :  { %12451 = vmatpush3.bf16.msra.mxu0 %v16186_v50 }
0x5229   :  { %12452 = vmatprep.subr.bf16.mxu0 %v13522_v1 }
0x522c   :  { %12453 = vmatpush3.bf16.msra.mxu0 %v16198_v56 }
0x522d   :  { %12482 = vmatprep.subr.bf16.mxu0 %v13522_v1 }
0x52f0   :  { %v7182_v54 = vpop.f32.mrb[224].mxu1 }
0x52f1   :  { %v7183_v18 = vadd.f32 %v16242_v36, %v7182_v54  ;;  %v12424_v19 = vpop.f32.mrb[225].mxu1 }
0x52f2   :  { %v7185_v62 = vpop.f32.mrb[226].mxu1  ;;  %v16365_v21 = vpop.f32.mrb[28].mxu0 }
0x52f3   :  { %v7236_v30 = vmul.f32 %v7183_v18, %v13810_v46  ;;  %v7383_v6 = vmul.f32 2.0, %v7183_v18  ;;  %v7186_v49 = vadd.f32 %v16242_v36, %v7185_v62  ;;  %v12425_v8 = vpop.f32.mrb[227].mxu1  ;;  %v12436_v22 = vpop.f32.mrb[29].mxu0 }
0x52f4   :  { %v16370_v11 = vpop.f32.mrb[30].mxu0  ;;  %v7393_v22 = vmul.f32 2.0, %v16304_v58 }
0x52f5   :  { %v7237_v28 = vmul.f32 %v7186_v49, %v13810_v46  ;;  %v7384_v37 = vmul.f32 2.0, %v7186_v49  ;;  %v12437_v55 = vpop.f32.mrb[31].mxu0  ;;  %v7385_v24 = vadd.f32 %v7383_v6, %v7381_v34  ;;  %v7238_v57 = vadd.f32 %v7236_v30, %v16165_v0 }
0x52f6   :  { %v7440_v55 = vmul.f32 2.0, %v16370_v11  ;;  %v7451_v11 = vstv %s16456_s1 }
0x52f7   :  { %v7239_v63 = vadd.f32 %v7237_v28, %v16168_v32  ;;  %v7386_v45 = vadd.f32 %v7384_v37, %v7382_v20  ;;  %v7452_v60 = vmul.f32 %v16272_v12, %v7451_v11 }
0x52f9   :  { %v7240_v9 = vpack.c.bf16 %v7239_v63, %v7238_v57  ;;  %v7453_v35 = vadd.f32 %v16278_v31, %v7452_v60 }
0x52fb   :  { %12443 = vmatmul.mubr.msk.bf16.vlgmr.msra.gmra.mrb[228].mxu1 %vm127_vm1, %v7240_v9 }
0x52fc   :  { %12459 = vmatpush3.bf16.msra.mxu1 %v16317_v14  ;;  %12466 = vmatprep.mubr.msk.bf16.mxu1 %vm13523_vm0, %v13522_v1 }
0x52fd   :  { %12460 = vmatprep.subr.bf16.mxu1 %v13522_v1 }
0x5300   :  { %12461 = vmatpush3.bf16.msra.mxu1 %v16326_v26 }
0x5301   :  { %12462 = vmatprep.subr.bf16.mxu1 %v13522_v1 }
0x5304   :  { %12463 = vmatpush3.bf16.msra.mxu1 %v16333_v5 }
0x5305   :  { %12464 = vmatprep.subr.bf16.mxu1 %v13522_v1 }
0x5308   :  { %12465 = vmatpush3.bf16.msra.mxu1 %v16340_v25 }
0x5309   :  { %12470 = vmatprep.subr.bf16.mxu1 %v13522_v1 }
0x53ce   :  { %v7278_v42 = vpop.f32.mrb[228].mxu1 }
0x53cf   :  { %v7279_v40 = vadd.f32 %v7278_v42, %v6854_v17  ;;  %v12444_v39 = vpop.f32.mrb[229].mxu1 }
0x53d0   :  { %v7281_v10 = vpop.f32.mrb[230].mxu1 }
0x53d1   :  { %13326 = vtanh.f32 %v7279_v40  ;;  %v7282_v59 = vadd.f32 %v7281_v10, %v6854_v17  ;;  %v12445_v53 = vpop.f32.mrb[231].mxu1 }
0x53d3   :  { %13328 = vtanh.f32 %v7282_v59 }
0x53db   :  { %v13327_v4 = vpop.eup %13326 }
0x53dc   :  { %v7332_v7 = vmul.f32 %v13327_v4, %v13327_v4 }
0x53dd   :  { %v13329_v2 = vpop.eup %13328 }
0x53de   :  { %v7287_v38 = vpack.c.bf16 %v13329_v2, %v13327_v4  ;;  %v7333_v52 = vmul.f32 %v13329_v2, %v13329_v2 }
0x53e0   :  { %12455 = vmatmul.mubr.msk.bf16.vlgmr.msra.gmra.mrb[32].mxu0 %vm199_vm2, %v7287_v38  ;;  %v7334_v13 = vpack.c.bf16 %v7333_v52, %v7332_v7 }
0x53e1   :  { %12483 = vmatpush3.bf16.msra.mxu0 %v16147_v27  ;;  %12486 = vmatprep.mubr.msk.bf16.mxu0 %vm13523_vm0, %v13522_v1 }
0x53e2   :  { %12467 = vmatmul.mubr.msk.bf16.vlgmr.msra.gmra.mrb[232].mxu1 %vm199_vm2, %v7334_v13  ;;  %12484 = vmatprep.subr.bf16.mxu0 %v13522_v1 }
0x53e3   :  { %12471 = vmatpush3.bf16.msra.mxu1 %v16317_v14  ;;  %12478 = vmatprep.mubr.msk.bf16.mxu1 %vm13523_vm0, %v13522_v1 }
0x53e4   :  { %12472 = vmatprep.subr.bf16.mxu1 %v13522_v1 }
0x53e5   :  { %12485 = vmatpush3.bf16.msra.mxu0 %v16156_v43 }
0x53e6   :  { %12490 = vmatprep.subr.bf16.mxu0 %v13522_v1 }
0x53e7   :  { %12473 = vmatpush3.bf16.msra.mxu1 %v16326_v26 }
0x53e8   :  { %12474 = vmatprep.subr.bf16.mxu1 %v13522_v1 }
0x53eb   :  { %12475 = vmatpush3.bf16.msra.mxu1 %v16333_v5 }
0x53ec   :  { %12476 = vmatprep.subr.bf16.mxu1 %v13522_v1 }
0x53ef   :  { %12477 = vmatpush3.bf16.msra.mxu1 %v16340_v25 }
0x53f0   :  { %12502 = vmatprep.subr.bf16.mxu1 %v13522_v1 }
0x53f2   :  { %12479 = vmatmul.mubr.msk.bf16.vlgmr.msra.gmra.mrb[232].mxu1 %vm199_vm2, %v6949_v61 }
0x53f3   :  { %12503 = vmatpush3.bf16.msra.mxu1 %v16147_v27  ;;  %12506 = vmatprep.mubr.msk.bf16.mxu1 %vm13523_vm0, %v13522_v1 }
0x53f4   :  { %12504 = vmatprep.subr.bf16.mxu1 %v13522_v1 }
0x53f7   :  { %12505 = vmatpush3.bf16.msra.mxu1 %v16156_v43 }
0x53f8   :  { %12522 = vmatprep.subr.bf16.mxu1 %v13522_v1 }
0x54b3   :  { %v7325_v15 = vpop.f32.mrb[32].mxu0 }
0x54b4   :  { %v7326_v54 = vadd.f32 %v16242_v36, %v7325_v15  ;;  %v12456_v16 = vpop.f32.mrb[33].mxu0 }
0x54b5   :  { %v7328_v18 = vpop.f32.mrb[34].mxu0 }
0x54b6   :  { %v7387_v19 = vadd.f32 %v7385_v24, %v7326_v54  ;;  %v7329_v41 = vadd.f32 %v16242_v36, %v7328_v18  ;;  %v12457_v47 = vpop.f32.mrb[35].mxu0 }
0x54b8   :  { %v7389_v61 = vmul.f32 %v7387_v19, %v13869_v44  ;;  %v7388_v62 = vadd.f32 %v7386_v45, %v7329_v41 }
0x54ba   :  { %v7390_v30 = vmul.f32 %v7388_v62, %v13869_v44  ;;  %v16424_v6 = vadd.f32 %v7389_v61, %v16165_v0  ;;  %v7394_v0 = vmul.f32 2.0, %v16308_v48  ;;  %v7455_v62 = vstv %s7454_s25 }
0x54bc   :  { %v16427_v49 = vadd.f32 %v7390_v30, %v16168_v32  ;;  %v7439_v32 = vmul.f32 2.0, %v16365_v21  ;;  %v7456_v30 = vmul.f32 %v16272_v12, %v7455_v62 }
0x54be   :  { %v7462_v8 = vpack.c.bf16 %v16427_v49, %v16424_v6 }
0x54c0   :  { %12487 = vmatmul.mubr.msk.bf16.vlgmr.msra.gmra.mrb[36].mxu0 %vm127_vm1, %v7462_v8  ;;  %v7457_v8 = vadd.f32 %v16278_v31, %v7456_v30 }
0x54c1   :  { %12491 = vmatpush3.bf16.msra.mxu0 %v16222_v23  ;;  %12498 = vmatprep.mubr.msk.bf16.mxu0 %vm13523_vm0, %v13522_v1 }
0x54c2   :  { %12492 = vmatprep.subr.bf16.mxu0 %v13522_v1 }
0x54c5   :  { %v7432_v34 = vpop.f32.mrb[232].mxu1  ;;  %12493 = vmatpush3.bf16.msra.mxu0 %v16231_v51 }
0x54c6   :  { %v7433_v20 = vadd.f32 %v7432_v34, %v7393_v22  ;;  %v12480_v28 = vpop.f32.mrb[233].mxu1  ;;  %12494 = vmatprep.subr.bf16.mxu0 %v13522_v1 }
0x54c7   :  { %v7435_v37 = vpop.f32.mrb[234].mxu1 }
0x54c8   :  { %v7441_v24 = vadd.f32 %v7439_v32, %v7433_v20  ;;  %v7436_v57 = vadd.f32 %v7435_v37, %v7394_v0  ;;  %v12481_v63 = vpop.f32.mrb[235].mxu1 }
0x54c9   :  { %12495 = vmatpush3.bf16.msra.mxu0 %v16186_v50 }
0x54ca   :  { %v7445_v58 = vmul.f32 %v7441_v24, %v13869_v44  ;;  %v7442_v45 = vadd.f32 %v7440_v55, %v7436_v57  ;;  %12496 = vmatprep.subr.bf16.mxu0 %v13522_v1 }
0x54cc   :  { %v16446_v48 = vadd.f32 %v7445_v58, %v16192_v3  ;;  %v7446_v21 = vmul.f32 %v7442_v45, %v13869_v44 }
0x54cd   :  { %12497 = vmatpush3.bf16.msra.mxu0 %v16198_v56 }
0x54ce   :  { %v16451_v9 = vadd.f32 %v7446_v21, %v16202_v33  ;;  %12510 = vmatprep.subr.bf16.mxu0 %v13522_v1 }
0x5593   :  { %v7500_v3 = vpop.f32.mrb[36].mxu0 }
0x5594   :  { %v7501_v17 = vadd.f32 %v7500_v3, %v7453_v35  ;;  %v12488_v42 = vpop.f32.mrb[37].mxu0 }
0x5595   :  { %v7503_v40 = vpop.f32.mrb[38].mxu0 }
0x5596   :  { %13330 = vtanh.f32 %v7501_v17  ;;  %v7504_v39 = vadd.f32 %v7503_v40, %v7453_v35  ;;  %v12489_v10 = vpop.f32.mrb[39].mxu0 }
0x5598   :  { %13332 = vtanh.f32 %v7504_v39 }
0x55a0   :  { %v13331_v33 = vpop.eup %13330 }
0x55a1   :  { %v16461_v53 = vmul.f32 %v13331_v33, %v13331_v33 }
0x55a2   :  { %v13333_v59 = vpop.eup %13332 }
0x55a3   :  { %v7509_v4 = vpack.c.bf16 %v13333_v59, %v13331_v33  ;;  %v16463_v2 = vmul.f32 %v13333_v59, %v13333_v59 }
0x55a5   :  { %12499 = vmatmul.mubr.msk.bf16.vlgmr.msra.gmra.mrb[40].mxu0 %vm199_vm2, %v7509_v4  ;;  %v7556_v7 = vpack.c.bf16 %v16463_v2, %v16461_v53 }
0x55a6   :  { %12511 = vmatpush3.bf16.msra.mxu0 %v16222_v23  ;;  %12518 = vmatprep.mubr.msk.bf16.mxu0 %vm13523_vm0, %v13522_v1 }
0x55a7   :  { %12512 = vmatprep.subr.bf16.mxu0 %v13522_v1 }
0x55aa   :  { %12513 = vmatpush3.bf16.msra.mxu0 %v16231_v51 }
0x55ab   :  { %12514 = vmatprep.subr.bf16.mxu0 %v13522_v1 }
0x55ae   :  { %12515 = vmatpush3.bf16.msra.mxu0 %v16186_v50 }
0x55af   :  { %12516 = vmatprep.subr.bf16.mxu0 %v13522_v1 }
0x55b2   :  { %12517 = vmatpush3.bf16.msra.mxu0 %v16198_v56 }
0x55b3   :  { %12534 = vmatprep.subr.bf16.mxu0 %v13522_v1 }
0x5678   :  { %v7547_v38 = vpop.f32.mrb[40].mxu0 }
0x5679   :  { %v16479_v52 = vadd.f32 %v16242_v36, %v7547_v38  ;;  %v12500_v13 = vpop.f32.mrb[41].mxu0 }
0x567a   :  { %v7550_v15 = vpop.f32.mrb[42].mxu0 }
0x567b   :  { %v7557_v54 = vmul.f32 %v16479_v52, %v13695_v29  ;;  %v16484_v16 = vadd.f32 %v16242_v36, %v7550_v15  ;;  %v12501_v18 = vpop.f32.mrb[43].mxu0 }
0x567d   :  { %v7558_v19 = vmul.f32 %v16484_v16, %v13695_v29  ;;  %v7559_v41 = vadd.f32 %v7557_v54, %v16424_v6 }
0x567f   :  { %v7560_v47 = vadd.f32 %v7558_v19, %v16427_v49 }
0x5681   :  { %v7561_v61 = vpack.c.bf16 %v7560_v47, %v7559_v41 }
0x5683   :  { %12507 = vmatmul.mubr.msk.bf16.vlgmr.msra.gmra.mrb[236].mxu1 %vm127_vm1, %v7561_v61 }
0x5684   :  { %12523 = vmatpush3.bf16.msra.mxu1 %v16317_v14  ;;  %12530 = vmatprep.mubr.msk.bf16.mxu1 %vm13523_vm0, %v13522_v1 }
0x5685   :  { %12524 = vmatprep.subr.bf16.mxu1 %v13522_v1 }
0x5688   :  { %12525 = vmatpush3.bf16.msra.mxu1 %v16326_v26 }
0x5689   :  { %12526 = vmatprep.subr.bf16.mxu1 %v13522_v1 }
0x568c   :  { %12527 = vmatpush3.bf16.msra.mxu1 %v16333_v5 }
0x568d   :  { %12528 = vmatprep.subr.bf16.mxu1 %v13522_v1 }
0x5690   :  { %12529 = vmatpush3.bf16.msra.mxu1 %v16340_v25 }
0x5691   :  { %12542 = vmatprep.subr.bf16.mxu1 %v13522_v1 }
0x5756   :  { %v7599_v22 = vpop.f32.mrb[236].mxu1 }
0x5757   :  { %v7600_v34 = vadd.f32 %v7599_v22, %v7457_v8  ;;  %v12508_v0 = vpop.f32.mrb[237].mxu1 }
0x5758   :  { %v7602_v32 = vpop.f32.mrb[238].mxu1 }
0x5759   :  { %13334 = vtanh.f32 %v7600_v34  ;;  %v7603_v20 = vadd.f32 %v7602_v32, %v7457_v8  ;;  %v12509_v28 = vpop.f32.mrb[239].mxu1 }
0x575b   :  { %13336 = vtanh.f32 %v7603_v20 }
0x5763   :  { %v13335_v37 = vpop.eup %13334 }
0x5764   :  { %v7653_v24 = vmul.f32 %v13335_v37, %v13335_v37 }
0x5765   :  { %v13337_v55 = vpop.eup %13336 }
0x5766   :  { %v7608_v57 = vpack.c.bf16 %v13337_v55, %v13335_v37  ;;  %v7654_v63 = vmul.f32 %v13337_v55, %v13337_v55 }
0x5768   :  { %12519 = vmatmul.mubr.msk.bf16.vlgmr.msra.gmra.mrb[44].mxu0 %vm199_vm2, %v7608_v57  ;;  %v7655_v58 = vpack.c.bf16 %v7654_v63, %v7653_v24 }
0x5769   :  { %12535 = vmatpush3.bf16.msra.mxu0 %v16147_v27  ;;  %12538 = vmatprep.mubr.msk.bf16.mxu0 %vm13523_vm0, %v13522_v1 }
0x576a   :  { %12531 = vmatmul.mubr.msk.bf16.vlgmr.msra.gmra.mrb[240].mxu1 %vm199_vm2, %v7655_v58  ;;  %12536 = vmatprep.subr.bf16.mxu0 %v13522_v1 }
0x576b   :  { %12543 = vmatpush3.bf16.msra.mxu1 %v16222_v23  ;;  %12550 = vmatprep.mubr.msk.bf16.mxu1 %vm13523_vm0, %v13522_v1 }
0x576c   :  { %12544 = vmatprep.subr.bf16.mxu1 %v13522_v1 }
0x576d   :  { %12537 = vmatpush3.bf16.msra.mxu0 %v16156_v43 }
0x576e   :  { %12554 = vmatprep.subr.bf16.mxu0 %v13522_v1 }
0x576f   :  { %12545 = vmatpush3.bf16.msra.mxu1 %v16231_v51 }
0x5770   :  { %12546 = vmatprep.subr.bf16.mxu1 %v13522_v1 }
0x5773   :  { %12547 = vmatpush3.bf16.msra.mxu1 %v16186_v50 }
0x5774   :  { %12548 = vmatprep.subr.bf16.mxu1 %v13522_v1 }
0x5777   :  { %12549 = vmatpush3.bf16.msra.mxu1 %v16198_v56 }
0x5778   :  { %12566 = vmatprep.subr.bf16.mxu1 %v13522_v1 }
0x583b   :  { %v7646_v45 = vpop.f32.mrb[44].mxu0 }
0x583c   :  { %v7647_v21 = vadd.f32 %v16242_v36, %v7646_v45  ;;  %v12520_v11 = vpop.f32.mrb[45].mxu0 }
0x583d   :  { %v7649_v60 = vpop.f32.mrb[46].mxu0  ;;  %v16524_v35 = vpop.f32.mrb[240].mxu1 }
0x583e   :  { %v7700_v3 = vmul.f32 %v7647_v21, %v13695_v29  ;;  %v7650_v17 = vadd.f32 %v16242_v36, %v7649_v60  ;;  %v12521_v42 = vpop.f32.mrb[47].mxu0  ;;  %v12532_v40 = vpop.f32.mrb[241].mxu1 }
0x583f   :  { %v16528_v39 = vpop.f32.mrb[242].mxu1 }
0x5840   :  { %v7701_v10 = vmul.f32 %v7650_v17, %v13695_v29  ;;  %v12533_v33 = vpop.f32.mrb[243].mxu1  ;;  %v7702_v59 = vadd.f32 %v7700_v3, %v16424_v6  ;;  %v7987_v32 = vmul.f32 2.0, %v7650_v17 }
0x5842   :  { %v7703_v4 = vadd.f32 %v7701_v10, %v16427_v49 }
0x5844   :  { %v7704_v38 = vpack.c.bf16 %v7703_v4, %v7702_v59 }
0x5846   :  { %12539 = vmatmul.mubr.msk.bf16.vlgmr.msra.gmra.mrb[48].mxu0 %vm127_vm1, %v7704_v38 }
0x5847   :  { %12555 = vmatpush3.bf16.msra.mxu0 %v16317_v14  ;;  %12562 = vmatprep.mubr.msk.bf16.mxu0 %vm13523_vm0, %v13522_v1 }
0x5848   :  { %12556 = vmatprep.subr.bf16.mxu0 %v13522_v1 }
0x584b   :  { %12557 = vmatpush3.bf16.msra.mxu0 %v16326_v26 }
0x584c   :  { %12558 = vmatprep.subr.bf16.mxu0 %v13522_v1 }
0x584f   :  { %12559 = vmatpush3.bf16.msra.mxu0 %v16333_v5 }
0x5850   :  { %12560 = vmatprep.subr.bf16.mxu0 %v13522_v1 }
0x5853   :  { %12561 = vmatpush3.bf16.msra.mxu0 %v16340_v25 }
0x5854   :  { %12574 = vmatprep.subr.bf16.mxu0 %v13522_v1 }
0x5919   :  { %v7742_v13 = vpop.f32.mrb[48].mxu0 }
0x591a   :  { %v7743_v15 = vadd.f32 %v7742_v13, %v7457_v8  ;;  %v12540_v54 = vpop.f32.mrb[49].mxu0 }
0x591b   :  { %v7745_v18 = vpop.f32.mrb[50].mxu0 }
0x591c   :  { %13338 = vtanh.f32 %v7743_v15  ;;  %v7746_v19 = vadd.f32 %v7745_v18, %v7457_v8  ;;  %v12541_v41 = vpop.f32.mrb[51].mxu0  ;;  %v7986_v8 = vmul.f32 2.0, %v7647_v21  ;;  %v7989_v21 = vadd.f32 %v7987_v32, %v16484_v16 }
0x591e   :  { %13340 = vtanh.f32 %v7746_v19  ;;  %v7988_v11 = vadd.f32 %v7986_v8, %v16479_v52  ;;  %v7459_v52 = vstv %s7458_s26 }
0x591f   :  { %v7460_v16 = vmul.f32 %v16272_v12, %v7459_v52 }
0x5921   :  { %v7461_v38 = vadd.f32 %v16278_v31, %v7460_v16 }
0x5926   :  { %v13339_v47 = vpop.eup %13338 }
0x5927   :  { %v7796_v62 = vmul.f32 %v13339_v47, %v13339_v47 }
0x5928   :  { %v13341_v61 = vpop.eup %13340 }
0x5929   :  { %v7797_v30 = vmul.f32 %v13341_v61, %v13341_v61  ;;  %v7751_v22 = vpack.c.bf16 %v13341_v61, %v13339_v47 }
0x592b   :  { %v7798_v34 = vpack.c.bf16 %v7797_v30, %v7796_v62  ;;  %12551 = vmatmul.mubr.msk.bf16.vlgmr.msra.gmra.mrb[244].mxu1 %vm199_vm2, %v7751_v22 }
0x592c   :  { %12567 = vmatpush3.bf16.msra.mxu1 %v16147_v27  ;;  %12570 = vmatprep.mubr.msk.bf16.mxu1 %vm13523_vm0, %v13522_v1 }
0x592d   :  { %12563 = vmatmul.mubr.msk.bf16.vlgmr.msra.gmra.mrb[52].mxu0 %vm199_vm2, %v7798_v34  ;;  %12568 = vmatprep.subr.bf16.mxu1 %v13522_v1 }
0x592e   :  { %12575 = vmatpush3.bf16.msra.mxu0 %v16222_v23  ;;  %12582 = vmatprep.mubr.msk.bf16.mxu0 %vm13523_vm0, %v13522_v1 }
0x592f   :  { %12576 = vmatprep.subr.bf16.mxu0 %v13522_v1 }
0x5930   :  { %12569 = vmatpush3.bf16.msra.mxu1 %v16156_v43 }
0x5931   :  { %12586 = vmatprep.subr.bf16.mxu1 %v13522_v1 }
0x5932   :  { %12577 = vmatpush3.bf16.msra.mxu0 %v16231_v51 }
0x5933   :  { %12578 = vmatprep.subr.bf16.mxu0 %v13522_v1 }
0x5936   :  { %12579 = vmatpush3.bf16.msra.mxu0 %v16186_v50 }
0x5937   :  { %12580 = vmatprep.subr.bf16.mxu0 %v13522_v1 }
0x593a   :  { %12581 = vmatpush3.bf16.msra.mxu0 %v16198_v56 }
0x593b   :  { %12610 = vmatprep.subr.bf16.mxu0 %v13522_v1 }
0x59fe   :  { %v7789_v0 = vpop.f32.mrb[244].mxu1 }
0x59ff   :  { %v7790_v20 = vadd.f32 %v16242_v36, %v7789_v0  ;;  %v12552_v28 = vpop.f32.mrb[245].mxu1 }
0x5a00   :  { %v7792_v37 = vpop.f32.mrb[246].mxu1  ;;  %v16563_v55 = vpop.f32.mrb[52].mxu0 }
0x5a01   :  { %v7843_v24 = vmul.f32 %v7790_v20, %v13810_v46  ;;  %v7990_v57 = vmul.f32 2.0, %v7790_v20  ;;  %v7793_v63 = vadd.f32 %v16242_v36, %v7792_v37  ;;  %v12553_v58 = vpop.f32.mrb[247].mxu1  ;;  %v12564_v45 = vpop.f32.mrb[53].mxu0 }
0x5a02   :  { %v16568_v60 = vpop.f32.mrb[54].mxu0 }
0x5a03   :  { %v7844_v3 = vmul.f32 %v7793_v63, %v13810_v46  ;;  %v7991_v17 = vmul.f32 2.0, %v7793_v63  ;;  %v12565_v42 = vpop.f32.mrb[55].mxu0  ;;  %v7992_v40 = vadd.f32 %v7990_v57, %v7988_v11  ;;  %v7845_v10 = vadd.f32 %v7843_v24, %v16424_v6 }
0x5a04   :  { %v8000_v63 = vmul.f32 2.0, %v16524_v35 }
0x5a05   :  { %v7846_v33 = vadd.f32 %v7844_v3, %v16427_v49  ;;  %v7993_v59 = vadd.f32 %v7991_v17, %v7989_v21  ;;  %v8047_v3 = vmul.f32 2.0, %v16568_v60 }
0x5a07   :  { %v7847_v4 = vpack.c.bf16 %v7846_v33, %v7845_v10 }
0x5a09   :  { %12571 = vmatmul.mubr.msk.bf16.vlgmr.msra.gmra.mrb[248].mxu1 %vm127_vm1, %v7847_v4 }
0x5a0a   :  { %12587 = vmatpush3.bf16.msra.mxu1 %v16317_v14  ;;  %12594 = vmatprep.mubr.msk.bf16.mxu1 %vm13523_vm0, %v13522_v1 }
0x5a0b   :  { %12588 = vmatprep.subr.bf16.mxu1 %v13522_v1 }
0x5a0e   :  { %12589 = vmatpush3.bf16.msra.mxu1 %v16326_v26 }
0x5a0f   :  { %12590 = vmatprep.subr.bf16.mxu1 %v13522_v1 }
0x5a12   :  { %12591 = vmatpush3.bf16.msra.mxu1 %v16333_v5 }
0x5a13   :  { %12592 = vmatprep.subr.bf16.mxu1 %v13522_v1 }
0x5a16   :  { %12593 = vmatpush3.bf16.msra.mxu1 %v16340_v25 }
0x5a17   :  { %12598 = vmatprep.subr.bf16.mxu1 %v13522_v1 }
0x5adc   :  { %v7885_v13 = vpop.f32.mrb[248].mxu1 }
0x5add   :  { %v7886_v15 = vadd.f32 %v7885_v13, %v7461_v38  ;;  %v12572_v54 = vpop.f32.mrb[249].mxu1 }
0x5ade   :  { %v7888_v18 = vpop.f32.mrb[250].mxu1 }
0x5adf   :  { %13342 = vtanh.f32 %v7886_v15  ;;  %v7889_v19 = vadd.f32 %v7888_v18, %v7461_v38  ;;  %v12573_v41 = vpop.f32.mrb[251].mxu1 }
0x5ae0   :  { %v16675_v41 = vld [vmem:[%s17345_s4 + $0x10] sm:$0xff]  }
0x5ae1   :  { %13344 = vtanh.f32 %v7889_v19 }
0x5ae9   :  { %v13343_v47 = vpop.eup %13342 }
0x5aea   :  { %v7939_v62 = vmul.f32 %v13343_v47, %v13343_v47 }
0x5aeb   :  { %v13345_v61 = vpop.eup %13344 }
0x5aec   :  { %v7894_v30 = vpack.c.bf16 %v13345_v61, %v13343_v47  ;;  %v7940_v22 = vmul.f32 %v13345_v61, %v13345_v61 }
0x5aee   :  { %12583 = vmatmul.mubr.msk.bf16.vlgmr.msra.gmra.mrb[56].mxu0 %vm199_vm2, %v7894_v30  ;;  %v7941_v34 = vpack.c.bf16 %v7940_v22, %v7939_v62 }
0x5aef   :  { %12611 = vmatpush3.bf16.msra.mxu0 %v16147_v27  ;;  %12614 = vmatprep.mubr.msk.bf16.mxu0 %vm13523_vm0, %v13522_v1 }
0x5af0   :  { %12595 = vmatmul.mubr.msk.bf16.vlgmr.msra.gmra.mrb[252].mxu1 %vm199_vm2, %v7941_v34  ;;  %12612 = vmatprep.subr.bf16.mxu0 %v13522_v1 }
0x5af1   :  { %12599 = vmatpush3.bf16.msra.mxu1 %v16317_v14  ;;  %12606 = vmatprep.mubr.msk.bf16.mxu1 %vm13523_vm0, %v13522_v1 }
0x5af2   :  { %12600 = vmatprep.subr.bf16.mxu1 %v13522_v1 }
0x5af3   :  { %12613 = vmatpush3.bf16.msra.mxu0 %v16156_v43 }
0x5af4   :  { %12618 = vmatprep.subr.bf16.mxu0 %v13522_v1 }
0x5af5   :  { %12601 = vmatpush3.bf16.msra.mxu1 %v16326_v26 }
0x5af6   :  { %12602 = vmatprep.subr.bf16.mxu1 %v13522_v1 }
0x5af9   :  { %12603 = vmatpush3.bf16.msra.mxu1 %v16333_v5 }
0x5afa   :  { %12604 = vmatprep.subr.bf16.mxu1 %v13522_v1 }
0x5afd   :  { %12605 = vmatpush3.bf16.msra.mxu1 %v16340_v25 }
0x5afe   :  { %12630 = vmatprep.subr.bf16.mxu1 %v13522_v1 }
0x5b00   :  { %12607 = vmatmul.mubr.msk.bf16.vlgmr.msra.gmra.mrb[252].mxu1 %vm199_vm2, %v7556_v7 }
0x5b01   :  { %12631 = vmatpush3.bf16.msra.mxu1 %v16147_v27  ;;  %12634 = vmatprep.mubr.msk.bf16.mxu1 %vm13523_vm0, %v13522_v1 }
0x5b02   :  { %12632 = vmatprep.subr.bf16.mxu1 %v13522_v1 }
0x5b05   :  { %12633 = vmatpush3.bf16.msra.mxu1 %v16156_v43 }
0x5b06   :  { %12650 = vmatprep.subr.bf16.mxu1 %v13522_v1 }
0x5bc1   :  { %v7932_v8 = vpop.f32.mrb[56].mxu0 }
0x5bc2   :  { %v7933_v0 = vadd.f32 %v16242_v36, %v7932_v8  ;;  %v12584_v32 = vpop.f32.mrb[57].mxu0 }
0x5bc3   :  { %v7935_v20 = vpop.f32.mrb[58].mxu0 }
0x5bc4   :  { %v7994_v28 = vadd.f32 %v7992_v40, %v7933_v0  ;;  %v7936_v53 = vadd.f32 %v16242_v36, %v7935_v20  ;;  %v12585_v2 = vpop.f32.mrb[59].mxu0 }
0x5bc6   :  { %v7996_v27 = vmul.f32 %v7994_v28, %v13869_v44  ;;  %v7995_v7 = vadd.f32 %v7993_v59, %v7936_v53 }
0x5bc8   :  { %v7997_v37 = vmul.f32 %v7995_v7, %v13869_v44  ;;  %v16622_v24 = vadd.f32 %v7996_v27, %v16424_v6  ;;  %v8001_v6 = vmul.f32 2.0, %v16528_v39 }
0x5bca   :  { %v16625_v43 = vadd.f32 %v7997_v37, %v16427_v49  ;;  %v8046_v49 = vmul.f32 2.0, %v16563_v55 }
0x5bcc   :  { %v8069_v57 = vpack.c.bf16 %v16625_v43, %v16622_v24 }
0x5bce   :  { %12615 = vmatmul.mubr.msk.bf16.vlgmr.msra.gmra.mrb[60].mxu0 %vm127_vm1, %v8069_v57 }
0x5bcf   :  { %12619 = vmatpush3.bf16.msra.mxu0 %v16222_v23  ;;  %12626 = vmatprep.mubr.msk.bf16.mxu0 %vm13523_vm0, %v13522_v1 }
0x5bd0   :  { %12620 = vmatprep.subr.bf16.mxu0 %v13522_v1 }
0x5bd3   :  { %v8039_v58 = vpop.f32.mrb[252].mxu1  ;;  %12621 = vmatpush3.bf16.msra.mxu0 %v16231_v51 }
0x5bd4   :  { %v8040_v45 = vadd.f32 %v8039_v58, %v8000_v63  ;;  %v12608_v11 = vpop.f32.mrb[253].mxu1  ;;  %12622 = vmatprep.subr.bf16.mxu0 %v13522_v1 }
0x5bd5   :  { %v8042_v21 = vpop.f32.mrb[254].mxu1 }
0x5bd6   :  { %v8048_v17 = vadd.f32 %v8046_v49, %v8040_v45  ;;  %v8043_v42 = vadd.f32 %v8042_v21, %v8001_v6  ;;  %v12609_v40 = vpop.f32.mrb[255].mxu1 }
0x5bd7   :  { %12623 = vmatpush3.bf16.msra.mxu0 %v16186_v50  ;;  %v8058_v50 = vstv %s16654_s28  ;;  %v16758_v40 = vld [vmem:[%s17349_s8] ss:$0 sm:$0xff] }
0x5bd8   :  { %v8052_v35 = vmul.f32 %v8048_v17, %v13869_v44  ;;  %v8049_v10 = vadd.f32 %v8047_v3, %v8043_v42  ;;  %12624 = vmatprep.subr.bf16.mxu0 %v13522_v1  ;;  %v8059_v60 = vmul.f32 %v16272_v12, %v8058_v50  ;;  %v16740_v3 = vld [vmem:[%s17344_s3 + $0x8] sm:$0xff]  }
0x5bd9   :  { %v16747_v17 = vld [vmem:[%s17345_s4 + $0x8] sm:$0xff]  }
0x5bda   :  { %v16644_v39 = vadd.f32 %v8052_v35, %v16446_v48  ;;  %v8053_v55 = vmul.f32 %v8049_v10, %v13869_v44  ;;  %v8060_v59 = vadd.f32 %v16278_v31, %v8059_v60 }
0x5bdb   :  { %12625 = vmatpush3.bf16.msra.mxu0 %v16198_v56 }
0x5bdc   :  { %v16649_v33 = vadd.f32 %v8053_v55, %v16451_v9  ;;  %12638 = vmatprep.subr.bf16.mxu0 %v13522_v1 }
0x5ca1   :  { %v8107_v48 = vpop.f32.mrb[60].mxu0 }
0x5ca2   :  { %v8108_v4 = vadd.f32 %v8107_v48, %v8060_v59  ;;  %v12616_v52 = vpop.f32.mrb[61].mxu0 }
0x5ca3   :  { %v8110_v16 = vpop.f32.mrb[62].mxu0 }
0x5ca4   :  { %13346 = vtanh.f32 %v8108_v4  ;;  %v8111_v56 = vadd.f32 %v8110_v16, %v8060_v59  ;;  %v12617_v38 = vpop.f32.mrb[63].mxu0 }
0x5ca6   :  { %13348 = vtanh.f32 %v8111_v56 }
0x5cae   :  { %v13347_v9 = vpop.eup %13346 }
0x5caf   :  { %v16659_v15 = vmul.f32 %v13347_v9, %v13347_v9 }
0x5cb0   :  { %v13349_v13 = vpop.eup %13348 }
0x5cb1   :  { %v8116_v54 = vpack.c.bf16 %v13349_v13, %v13347_v9  ;;  %v16661_v18 = vmul.f32 %v13349_v13, %v13349_v13 }
0x5cb3   :  { %v8163_v19 = vpack.c.bf16 %v16661_v18, %v16659_v15  ;;  %12627 = vmatmul.mubr.msk.bf16.vlgmr.msra.gmra.mrb[64].mxu0 %vm199_vm2, %v8116_v54 }
0x5cb4   :  { %12639 = vmatpush3.bf16.msra.mxu0 %v16222_v23  ;;  %12646 = vmatprep.mubr.msk.bf16.mxu0 %vm13523_vm0, %v13522_v1  ;;  %v16682_v23 = vld [vmem:[%s17345_s4 + $0x18] sm:$0xff]  }
0x5cb5   :  { %12640 = vmatprep.subr.bf16.mxu0 %v13522_v1 }
0x5cb8   :  { %12641 = vmatpush3.bf16.msra.mxu0 %v16231_v51 }
0x5cb9   :  { %12642 = vmatprep.subr.bf16.mxu0 %v13522_v1 }
0x5cbc   :  { %12643 = vmatpush3.bf16.msra.mxu0 %v16675_v41 }
0x5cbd   :  { %12644 = vmatprep.subr.bf16.mxu0 %v13522_v1 }
0x5cc0   :  { %12645 = vmatpush3.bf16.msra.mxu0 %v16682_v23 }
0x5cc1   :  { %12662 = vmatprep.subr.bf16.mxu0 %v13522_v1 }
0x5d86   :  { %v8154_v51 = vpop.f32.mrb[64].mxu0 }
0x5d87   :  { %v16687_v47 = vadd.f32 %v16242_v36, %v8154_v51  ;;  %v12628_v61 = vpop.f32.mrb[65].mxu0 }
0x5d88   :  { %v8157_v62 = vpop.f32.mrb[66].mxu0 }
0x5d89   :  { %v8164_v30 = vmul.f32 %v16687_v47, %v13695_v29  ;;  %v16692_v22 = vadd.f32 %v16242_v36, %v8157_v62  ;;  %v12629_v34 = vpop.f32.mrb[67].mxu0  ;;  %v8062_v36 = vstv %s8061_s13 }
0x5d8a   :  { %v8063_v28 = vmul.f32 %v16272_v12, %v8062_v36  ;;  %v16721_v12 = vld [vmem:[%s17344_s3] sm:$0xff]  }
0x5d8b   :  { %v8165_v8 = vmul.f32 %v16692_v22, %v13695_v29  ;;  %v8166_v0 = vadd.f32 %v8164_v30, %v16622_v24 }
0x5d8c   :  { %v16713_v53 = vadd.f32 %v16278_v31, %v8063_v28  ;;  %v16731_v31 = vld [vmem:[%s17345_s4] sm:$0xff]  }
0x5d8d   :  { %v8167_v32 = vadd.f32 %v8165_v8, %v16625_v43 }
0x5d8f   :  { %v8168_v20 = vpack.c.bf16 %v8167_v32, %v8166_v0 }
0x5d91   :  { %12635 = vmatmul.mubr.msk.bf16.vlgmr.msra.gmra.mrb[0].mxu1 %vm127_vm1, %v8168_v20 }
0x5d92   :  { %12651 = vmatpush3.bf16.msra.mxu1 %v16317_v14  ;;  %12658 = vmatprep.mubr.msk.bf16.mxu1 %vm13523_vm0, %v13522_v1 }
0x5d93   :  { %12652 = vmatprep.subr.bf16.mxu1 %v13522_v1 }
0x5d96   :  { %12653 = vmatpush3.bf16.msra.mxu1 %v16326_v26 }
0x5d97   :  { %12654 = vmatprep.subr.bf16.mxu1 %v13522_v1 }
0x5d9a   :  { %12655 = vmatpush3.bf16.msra.mxu1 %v16333_v5 }
0x5d9b   :  { %12656 = vmatprep.subr.bf16.mxu1 %v13522_v1 }
0x5d9e   :  { %12657 = vmatpush3.bf16.msra.mxu1 %v16340_v25 }
0x5d9f   :  { %12670 = vmatprep.subr.bf16.mxu1 %v13522_v1 }
0x5e64   :  { %v8206_v2 = vpop.f32.mrb[0].mxu1 }
0x5e65   :  { %v8207_v27 = vadd.f32 %v8206_v2, %v16713_v53  ;;  %v12636_v7 = vpop.f32.mrb[1].mxu1 }
0x5e66   :  { %v8209_v37 = vpop.f32.mrb[2].mxu1 }
0x5e67   :  { %13350 = vtanh.f32 %v8207_v27  ;;  %v8210_v57 = vadd.f32 %v8209_v37, %v16713_v53  ;;  %v12637_v63 = vpop.f32.mrb[3].mxu1 }
0x5e69   :  { %13352 = vtanh.f32 %v8210_v57 }
0x5e71   :  { %v13351_v58 = vpop.eup %13350 }
0x5e72   :  { %v8260_v49 = vmul.f32 %v13351_v58, %v13351_v58 }
0x5e73   :  { %v13353_v6 = vpop.eup %13352 }
0x5e74   :  { %v8215_v45 = vpack.c.bf16 %v13353_v6, %v13351_v58  ;;  %v8261_v11 = vmul.f32 %v13353_v6, %v13353_v6 }
0x5e76   :  { %v8262_v21 = vpack.c.bf16 %v8261_v11, %v8260_v49  ;;  %12647 = vmatmul.mubr.msk.bf16.vlgmr.msra.gmra.mrb[68].mxu0 %vm199_vm2, %v8215_v45 }
0x5e77   :  { %12663 = vmatpush3.bf16.msra.mxu0 %v16721_v12  ;;  %12666 = vmatprep.mubr.msk.bf16.mxu0 %vm13523_vm0, %v13522_v1 }
0x5e78   :  { %12659 = vmatmul.mubr.msk.bf16.vlgmr.msra.gmra.mrb[4].mxu1 %vm199_vm2, %v8262_v21  ;;  %12664 = vmatprep.subr.bf16.mxu0 %v13522_v1 }
0x5e79   :  { %12671 = vmatpush3.bf16.msra.mxu1 %v16731_v31  ;;  %12678 = vmatprep.mubr.msk.bf16.mxu1 %vm13523_vm0, %v13522_v1 }
0x5e7a   :  { %12672 = vmatprep.subr.bf16.mxu1 %v13522_v1 }
0x5e7b   :  { %12665 = vmatpush3.bf16.msra.mxu0 %v16740_v3 }
0x5e7c   :  { %12682 = vmatprep.subr.bf16.mxu0 %v13522_v1 }
0x5e7d   :  { %12673 = vmatpush3.bf16.msra.mxu1 %v16747_v17 }
0x5e7e   :  { %12674 = vmatprep.subr.bf16.mxu1 %v13522_v1 }
0x5e81   :  { %12675 = vmatpush3.bf16.msra.mxu1 %v16675_v41 }
0x5e82   :  { %12676 = vmatprep.subr.bf16.mxu1 %v13522_v1 }
0x5e85   :  { %12677 = vmatpush3.bf16.msra.mxu1 %v16682_v23 }
0x5e86   :  { %12694 = vmatprep.subr.bf16.mxu1 %v13522_v1 }
0x5f49   :  { %v8253_v42 = vpop.f32.mrb[68].mxu0 }
0x5f4a   :  { %v8254_v35 = vadd.f32 %v16758_v40, %v8253_v42  ;;  %v12648_v10 = vpop.f32.mrb[69].mxu0 }
0x5f4b   :  { %v8256_v55 = vpop.f32.mrb[70].mxu0  ;;  %v16761_v50 = vpop.f32.mrb[4].mxu1 }
0x5f4c   :  { %v8307_v60 = vmul.f32 %v8254_v35, %v13695_v29  ;;  %v8257_v59 = vadd.f32 %v16758_v40, %v8256_v55  ;;  %v12649_v48 = vpop.f32.mrb[71].mxu0  ;;  %v12660_v4 = vpop.f32.mrb[5].mxu1 }
0x5f4d   :  { %v16765_v52 = vpop.f32.mrb[6].mxu1  ;;  %v16837_v48 = vld [vmem:[%s17346_s5 + $0x10] sm:$0xff]   ;;  %v16844_v4 = vld [vmem:[%s17346_s5 + $0x18] sm:$0xff]  }
0x5f4e   :  { %v8308_v16 = vmul.f32 %v8257_v59, %v13695_v29  ;;  %v12661_v56 = vpop.f32.mrb[7].mxu1  ;;  %v8309_v38 = vadd.f32 %v8307_v60, %v16622_v24  ;;  %v8594_v36 = vmul.f32 2.0, %v8257_v59 }
0x5f4f   :  { %v16853_v56 = vld [vmem:[%s17348_s7] ss:$0 sm:$0xff] }
0x5f50   :  { %v8310_v9 = vadd.f32 %v8308_v16, %v16625_v43  ;;  %v8596_v45 = vadd.f32 %v8594_v36, %v16692_v22  ;;  %v16830_v22 = vld [vmem:[%s17346_s5 + $0x8] sm:$0xff]   ;;  %v8066_v16 = vstv %s8065_s16 }
0x5f52   :  { %v8311_v13 = vpack.c.bf16 %v8310_v9, %v8309_v38  ;;  %v8067_v38 = vmul.f32 %v16853_v56, %v8066_v16  ;;  %v16859_v9 = vld [vmem:[%s17347_s6] ss:$0 sm:$0xff]  ;;  %s8663_s6 = smul.f32 14.0, %s13658_s15 }
0x5f54   :  { %12667 = vmatmul.mubr.msk.bf16.vlgmr.msra.gmra.mrb[72].mxu0 %vm127_vm1, %v8311_v13  ;;  %v8068_v13 = vadd.f32 %v16859_v9, %v8067_v38  ;;  %s16929_s7 = sadd.f32 %s8663_s6, %s13652_s12 }
0x5f55   :  { %12683 = vmatpush3.bf16.msra.mxu0 %v16317_v14  ;;  %12690 = vmatprep.mubr.msk.bf16.mxu0 %vm13523_vm0, %v13522_v1  ;;  %s9275_s12 = sadd.f32 %s17127_s24, %s13687_s21 }
0x5f56   :  { %12684 = vmatprep.subr.bf16.mxu0 %v13522_v1  ;;  %s8668_s28 = sadd.f32 %s16929_s7, %s13687_s21 }
0x5f57   :  { %s8672_s0 = sadd.f32 %s16929_s7, %s13658_s15 }
0x5f59   :  { %12685 = vmatpush3.bf16.msra.mxu0 %v16326_v26 }
0x5f5a   :  { %12686 = vmatprep.subr.bf16.mxu0 %v13522_v1 }
0x5f5d   :  { %12687 = vmatpush3.bf16.msra.mxu0 %v16333_v5 }
0x5f5e   :  { %12688 = vmatprep.subr.bf16.mxu0 %v13522_v1 }
0x5f61   :  { %12689 = vmatpush3.bf16.msra.mxu0 %v16340_v25  ;;  %v8593_v25 = vmul.f32 2.0, %v8254_v35 }
0x5f62   :  { %12702 = vmatprep.subr.bf16.mxu0 %v13522_v1 }
0x5f63   :  { %v8595_v6 = vadd.f32 %v8593_v25, %v16687_v47  ;;  %v16821_v47 = vld [vmem:[%s17346_s5] sm:$0xff]  }
0x6027   :  { %v8349_v54 = vpop.f32.mrb[72].mxu0 }
0x6028   :  { %v8350_v14 = vadd.f32 %v8349_v54, %v16713_v53  ;;  %v12668_v51 = vpop.f32.mrb[73].mxu0 }
0x6029   :  { %v8352_v61 = vpop.f32.mrb[74].mxu0 }
0x602a   :  { %13354 = vtanh.f32 %v8350_v14  ;;  %v8353_v62 = vadd.f32 %v8352_v61, %v16713_v53  ;;  %v12669_v30 = vpop.f32.mrb[75].mxu0 }
0x602c   :  { %13356 = vtanh.f32 %v8353_v62 }
0x6034   :  { %v13355_v26 = vpop.eup %13354 }
0x6035   :  { %v8403_v8 = vmul.f32 %v13355_v26, %v13355_v26 }
0x6036   :  { %v13357_v34 = vpop.eup %13356 }
0x6037   :  { %v8358_v5 = vpack.c.bf16 %v13357_v34, %v13355_v26  ;;  %v8404_v0 = vmul.f32 %v13357_v34, %v13357_v34 }
0x6039   :  { %v8405_v32 = vpack.c.bf16 %v8404_v0, %v8403_v8  ;;  %12679 = vmatmul.mubr.msk.bf16.vlgmr.msra.gmra.mrb[8].mxu1 %vm199_vm2, %v8358_v5 }
0x603a   :  { %12695 = vmatpush3.bf16.msra.mxu1 %v16721_v12  ;;  %12698 = vmatprep.mubr.msk.bf16.mxu1 %vm13523_vm0, %v13522_v1 }
0x603b   :  { %12691 = vmatmul.mubr.msk.bf16.vlgmr.msra.gmra.mrb[76].mxu0 %vm199_vm2, %v8405_v32  ;;  %12696 = vmatprep.subr.bf16.mxu1 %v13522_v1 }
0x603c   :  { %12703 = vmatpush3.bf16.msra.mxu0 %v16731_v31  ;;  %12710 = vmatprep.mubr.msk.bf16.mxu0 %vm13523_vm0, %v13522_v1 }
0x603d   :  { %12704 = vmatprep.subr.bf16.mxu0 %v13522_v1 }
0x603e   :  { %12697 = vmatpush3.bf16.msra.mxu1 %v16740_v3 }
0x603f   :  { %12714 = vmatprep.subr.bf16.mxu1 %v13522_v1 }
0x6040   :  { %12705 = vmatpush3.bf16.msra.mxu0 %v16747_v17 }
0x6041   :  { %12706 = vmatprep.subr.bf16.mxu0 %v13522_v1 }
0x6044   :  { %12707 = vmatpush3.bf16.msra.mxu0 %v16675_v41 }
0x6045   :  { %12708 = vmatprep.subr.bf16.mxu0 %v13522_v1 }
0x6048   :  { %12709 = vmatpush3.bf16.msra.mxu0 %v16682_v23 }
0x6049   :  { %12738 = vmatprep.subr.bf16.mxu0 %v13522_v1 }
0x610c   :  { %v8396_v20 = vpop.f32.mrb[8].mxu1 }
0x610d   :  { %v8397_v28 = vadd.f32 %v16758_v40, %v8396_v20  ;;  %v12680_v53 = vpop.f32.mrb[9].mxu1 }
0x610e   :  { %v8399_v2 = vpop.f32.mrb[10].mxu1  ;;  %v16802_v27 = vpop.f32.mrb[76].mxu0 }
0x610f   :  { %v8450_v7 = vmul.f32 %v8397_v28, %v13810_v46  ;;  %v8597_v37 = vmul.f32 2.0, %v8397_v28  ;;  %v8400_v57 = vadd.f32 %v16758_v40, %v8399_v2  ;;  %v12681_v63 = vpop.f32.mrb[11].mxu1  ;;  %v12692_v58 = vpop.f32.mrb[77].mxu0 }
0x6110   :  { %v16807_v49 = vpop.f32.mrb[78].mxu0  ;;  %v8607_v58 = vmul.f32 2.0, %v16761_v50 }
0x6111   :  { %v8451_v11 = vmul.f32 %v8400_v57, %v13810_v46  ;;  %v8598_v21 = vmul.f32 2.0, %v8400_v57  ;;  %v12693_v42 = vpop.f32.mrb[79].mxu0  ;;  %v16811_v35 = vadd.f32 %v8597_v37, %v8595_v6  ;;  %v8452_v10 = vadd.f32 %v8450_v7, %v16622_v24 }
0x6112   :  { %v8654_v42 = vmul.f32 2.0, %v16807_v49  ;;  %v8665_v49 = vstv %s16929_s7 }
0x6113   :  { %v8453_v55 = vadd.f32 %v8451_v11, %v16625_v43  ;;  %v16815_v60 = vadd.f32 %v8598_v21, %v8596_v45  ;;  %v8666_v16 = vmul.f32 %v16853_v56, %v8665_v49 }
0x6115   :  { %v8454_v59 = vpack.c.bf16 %v8453_v55, %v8452_v10  ;;  %v8667_v38 = vadd.f32 %v16859_v9, %v8666_v16 }
0x6117   :  { %12699 = vmatmul.mubr.msk.bf16.vlgmr.msra.gmra.mrb[12].mxu1 %vm127_vm1, %v8454_v59 }
0x6118   :  { %12715 = vmatpush3.bf16.msra.mxu1 %v16821_v47  ;;  %12722 = vmatprep.mubr.msk.bf16.mxu1 %vm13523_vm0, %v13522_v1 }
0x6119   :  { %12716 = vmatprep.subr.bf16.mxu1 %v13522_v1 }
0x611c   :  { %12717 = vmatpush3.bf16.msra.mxu1 %v16830_v22 }
0x611d   :  { %12718 = vmatprep.subr.bf16.mxu1 %v13522_v1 }
0x6120   :  { %12719 = vmatpush3.bf16.msra.mxu1 %v16837_v48 }
0x6121   :  { %12720 = vmatprep.subr.bf16.mxu1 %v13522_v1 }
0x6124   :  { %12721 = vmatpush3.bf16.msra.mxu1 %v16844_v4 }
0x6125   :  { %12726 = vmatprep.subr.bf16.mxu1 %v13522_v1 }
0x61ea   :  { %v8492_v54 = vpop.f32.mrb[12].mxu1 }
0x61eb   :  { %v8493_v14 = vadd.f32 %v8492_v54, %v8068_v13  ;;  %v12700_v51 = vpop.f32.mrb[13].mxu1 }
0x61ec   :  { %v8495_v61 = vpop.f32.mrb[14].mxu1 }
0x61ed   :  { %13358 = vtanh.f32 %v8493_v14  ;;  %v8496_v62 = vadd.f32 %v8495_v61, %v8068_v13  ;;  %v12701_v30 = vpop.f32.mrb[15].mxu1 }
0x61ef   :  { %13360 = vtanh.f32 %v8496_v62 }
0x61f7   :  { %v13359_v26 = vpop.eup %13358 }
0x61f8   :  { %v8546_v8 = vmul.f32 %v13359_v26, %v13359_v26 }
0x61f9   :  { %v13361_v34 = vpop.eup %13360 }
0x61fa   :  { %v8501_v5 = vpack.c.bf16 %v13361_v34, %v13359_v26  ;;  %v8547_v0 = vmul.f32 %v13361_v34, %v13361_v34 }
0x61fc   :  { %v8548_v32 = vpack.c.bf16 %v8547_v0, %v8546_v8  ;;  %12711 = vmatmul.mubr.msk.bf16.vlgmr.msra.gmra.mrb[80].mxu0 %vm199_vm2, %v8501_v5 }
0x61fd   :  { %12739 = vmatpush3.bf16.msra.mxu0 %v16721_v12  ;;  %12742 = vmatprep.mubr.msk.bf16.mxu0 %vm13523_vm0, %v13522_v1 }
0x61fe   :  { %12723 = vmatmul.mubr.msk.bf16.vlgmr.msra.gmra.mrb[16].mxu1 %vm199_vm2, %v8548_v32  ;;  %12740 = vmatprep.subr.bf16.mxu0 %v13522_v1 }
0x61ff   :  { %12727 = vmatpush3.bf16.msra.mxu1 %v16821_v47  ;;  %12734 = vmatprep.mubr.msk.bf16.mxu1 %vm13523_vm0, %v13522_v1 }
0x6200   :  { %12728 = vmatprep.subr.bf16.mxu1 %v13522_v1 }
0x6201   :  { %12741 = vmatpush3.bf16.msra.mxu0 %v16740_v3 }
0x6202   :  { %12746 = vmatprep.subr.bf16.mxu0 %v13522_v1 }
0x6203   :  { %12729 = vmatpush3.bf16.msra.mxu1 %v16830_v22 }
0x6204   :  { %12730 = vmatprep.subr.bf16.mxu1 %v13522_v1 }
0x6207   :  { %12731 = vmatpush3.bf16.msra.mxu1 %v16837_v48 }
0x6208   :  { %12732 = vmatprep.subr.bf16.mxu1 %v13522_v1 }
0x620b   :  { %12733 = vmatpush3.bf16.msra.mxu1 %v16844_v4 }
0x620c   :  { %12758 = vmatprep.subr.bf16.mxu1 %v13522_v1 }
0x620e   :  { %12735 = vmatmul.mubr.msk.bf16.vlgmr.msra.gmra.mrb[16].mxu1 %vm199_vm2, %v8163_v19 }
0x620f   :  { %12759 = vmatpush3.bf16.msra.mxu1 %v16721_v12  ;;  %12762 = vmatprep.mubr.msk.bf16.mxu1 %vm13523_vm0, %v13522_v1 }
0x6210   :  { %12760 = vmatprep.subr.bf16.mxu1 %v13522_v1 }
0x6213   :  { %12761 = vmatpush3.bf16.msra.mxu1 %v16740_v3 }
0x6214   :  { %12778 = vmatprep.subr.bf16.mxu1 %v13522_v1 }
0x62cf   :  { %v8539_v25 = vpop.f32.mrb[80].mxu0 }
0x62d0   :  { %v8540_v20 = vadd.f32 %v16758_v40, %v8539_v25  ;;  %v12712_v36 = vpop.f32.mrb[81].mxu0 }
0x62d1   :  { %v8542_v28 = vpop.f32.mrb[82].mxu0 }
0x62d2   :  { %v8601_v15 = vadd.f32 %v16811_v35, %v8540_v20  ;;  %v8543_v18 = vadd.f32 %v16758_v40, %v8542_v28  ;;  %v12713_v19 = vpop.f32.mrb[83].mxu0 }
0x62d4   :  { %v8603_v53 = vmul.f32 %v8601_v15, %v13869_v44  ;;  %v8602_v2 = vadd.f32 %v16815_v60, %v8543_v18 }
0x62d6   :  { %v8604_v7 = vmul.f32 %v8602_v2, %v13869_v44  ;;  %v16897_v37 = vadd.f32 %v8603_v53, %v16622_v24  ;;  %v8608_v24 = vmul.f32 2.0, %v16765_v52  ;;  %v8669_v2 = vstv %s8668_s28 }
0x62d8   :  { %v16900_v57 = vadd.f32 %v8604_v7, %v16625_v43  ;;  %v8653_v43 = vmul.f32 2.0, %v16802_v27  ;;  %v8670_v7 = vmul.f32 %v16853_v56, %v8669_v2 }
0x62da   :  { %v8676_v63 = vpack.c.bf16 %v16900_v57, %v16897_v37 }
0x62dc   :  { %12743 = vmatmul.mubr.msk.bf16.vlgmr.msra.gmra.mrb[84].mxu0 %vm127_vm1, %v8676_v63  ;;  %v8671_v63 = vadd.f32 %v16859_v9, %v8670_v7 }
0x62dd   :  { %12747 = vmatpush3.bf16.msra.mxu0 %v16731_v31  ;;  %12754 = vmatprep.mubr.msk.bf16.mxu0 %vm13523_vm0, %v13522_v1 }
0x62de   :  { %12748 = vmatprep.subr.bf16.mxu0 %v13522_v1 }
0x62e1   :  { %v8646_v6 = vpop.f32.mrb[16].mxu1  ;;  %12749 = vmatpush3.bf16.msra.mxu0 %v16747_v17 }
0x62e2   :  { %v8647_v45 = vadd.f32 %v8646_v6, %v8607_v58  ;;  %v12736_v11 = vpop.f32.mrb[17].mxu1  ;;  %12750 = vmatprep.subr.bf16.mxu0 %v13522_v1 }
0x62e3   :  { %v8649_v21 = vpop.f32.mrb[18].mxu1 }
0x62e4   :  { %v8655_v35 = vadd.f32 %v8653_v43, %v8647_v45  ;;  %v8650_v10 = vadd.f32 %v8649_v21, %v8608_v24  ;;  %v12737_v55 = vpop.f32.mrb[19].mxu1 }
0x62e5   :  { %12751 = vmatpush3.bf16.msra.mxu0 %v16675_v41 }
0x62e6   :  { %v8659_v50 = vmul.f32 %v8655_v35, %v13869_v44  ;;  %v8656_v60 = vadd.f32 %v8654_v42, %v8650_v10  ;;  %12752 = vmatprep.subr.bf16.mxu0 %v13522_v1 }
0x62e8   :  { %v16919_v52 = vadd.f32 %v8659_v50, %v16644_v39  ;;  %v8660_v27 = vmul.f32 %v8656_v60, %v13869_v44 }
0x62e9   :  { %12753 = vmatpush3.bf16.msra.mxu0 %v16682_v23 }
0x62ea   :  { %v16924_v59 = vadd.f32 %v8660_v27, %v16649_v33  ;;  %12766 = vmatprep.subr.bf16.mxu0 %v13522_v1 }
0x63af   :  { %v8714_v39 = vpop.f32.mrb[84].mxu0 }
0x63b0   :  { %v8715_v13 = vadd.f32 %v8714_v39, %v8667_v38  ;;  %v12744_v54 = vpop.f32.mrb[85].mxu0 }
0x63b1   :  { %v8717_v14 = vpop.f32.mrb[86].mxu0 }
0x63b2   :  { %13362 = vtanh.f32 %v8715_v13  ;;  %v8718_v51 = vadd.f32 %v8717_v14, %v8667_v38  ;;  %v12745_v61 = vpop.f32.mrb[87].mxu0 }
0x63b4   :  { %13364 = vtanh.f32 %v8718_v51 }
0x63bc   :  { %v13363_v33 = vpop.eup %13362 }
0x63bd   :  { %v16934_v30 = vmul.f32 %v13363_v33, %v13363_v33 }
0x63be   :  { %v13365_v62 = vpop.eup %13364 }
0x63bf   :  { %v8723_v26 = vpack.c.bf16 %v13365_v62, %v13363_v33  ;;  %v16936_v34 = vmul.f32 %v13365_v62, %v13365_v62 }
0x63c1   :  { %v8770_v8 = vpack.c.bf16 %v16936_v34, %v16934_v30  ;;  %12755 = vmatmul.mubr.msk.bf16.vlgmr.msra.gmra.mrb[88].mxu0 %vm199_vm2, %v8723_v26 }
0x63c2   :  { %12767 = vmatpush3.bf16.msra.mxu0 %v16731_v31  ;;  %12774 = vmatprep.mubr.msk.bf16.mxu0 %vm13523_vm0, %v13522_v1 }
0x63c3   :  { %12768 = vmatprep.subr.bf16.mxu0 %v13522_v1 }
0x63c6   :  { %12769 = vmatpush3.bf16.msra.mxu0 %v16747_v17 }
0x63c7   :  { %12770 = vmatprep.subr.bf16.mxu0 %v13522_v1 }
0x63ca   :  { %12771 = vmatpush3.bf16.msra.mxu0 %v16675_v41 }
0x63cb   :  { %12772 = vmatprep.subr.bf16.mxu0 %v13522_v1 }
0x63ce   :  { %12773 = vmatpush3.bf16.msra.mxu0 %v16682_v23 }
0x63cf   :  { %12790 = vmatprep.subr.bf16.mxu0 %v13522_v1 }
0x6494   :  { %v8761_v5 = vpop.f32.mrb[88].mxu0 }
0x6495   :  { %v16952_v0 = vadd.f32 %v16758_v40, %v8761_v5  ;;  %v12756_v32 = vpop.f32.mrb[89].mxu0 }
0x6496   :  { %v8764_v25 = vpop.f32.mrb[90].mxu0 }
0x6497   :  { %v8771_v20 = vmul.f32 %v16952_v0, %v13695_v29  ;;  %v16957_v36 = vadd.f32 %v16758_v40, %v8764_v25  ;;  %v12757_v28 = vpop.f32.mrb[91].mxu0 }
0x6499   :  { %v8772_v15 = vmul.f32 %v16957_v36, %v13695_v29  ;;  %v8773_v18 = vadd.f32 %v8771_v20, %v16897_v37 }
0x649b   :  { %v8774_v19 = vadd.f32 %v8772_v15, %v16900_v57 }
0x649d   :  { %v8775_v53 = vpack.c.bf16 %v8774_v19, %v8773_v18 }
0x649f   :  { %12763 = vmatmul.mubr.msk.bf16.vlgmr.msra.gmra.mrb[20].mxu1 %vm127_vm1, %v8775_v53 }
0x64a0   :  { %12779 = vmatpush3.bf16.msra.mxu1 %v16821_v47  ;;  %12786 = vmatprep.mubr.msk.bf16.mxu1 %vm13523_vm0, %v13522_v1 }
0x64a1   :  { %12780 = vmatprep.subr.bf16.mxu1 %v13522_v1 }
0x64a4   :  { %12781 = vmatpush3.bf16.msra.mxu1 %v16830_v22 }
0x64a5   :  { %12782 = vmatprep.subr.bf16.mxu1 %v13522_v1 }
0x64a8   :  { %12783 = vmatpush3.bf16.msra.mxu1 %v16837_v48 }
0x64a9   :  { %12784 = vmatprep.subr.bf16.mxu1 %v13522_v1 }
0x64ac   :  { %12785 = vmatpush3.bf16.msra.mxu1 %v16844_v4 }
0x64ad   :  { %12798 = vmatprep.subr.bf16.mxu1 %v13522_v1 }
0x6572   :  { %v8813_v58 = vpop.f32.mrb[20].mxu1 }
0x6573   :  { %v8814_v6 = vadd.f32 %v8813_v58, %v8671_v63  ;;  %v12764_v24 = vpop.f32.mrb[21].mxu1 }
0x6574   :  { %v8816_v43 = vpop.f32.mrb[22].mxu1 }
0x6575   :  { %13366 = vtanh.f32 %v8814_v6  ;;  %v8817_v45 = vadd.f32 %v8816_v43, %v8671_v63  ;;  %v12765_v11 = vpop.f32.mrb[23].mxu1 }
0x6577   :  { %13368 = vtanh.f32 %v8817_v45 }
0x657f   :  { %v13367_v21 = vpop.eup %13366 }
0x6580   :  { %v8867_v35 = vmul.f32 %v13367_v21, %v13367_v21 }
0x6581   :  { %v13369_v42 = vpop.eup %13368 }
0x6582   :  { %v8822_v10 = vpack.c.bf16 %v13369_v42, %v13367_v21  ;;  %v8868_v55 = vmul.f32 %v13369_v42, %v13369_v42 }
0x6584   :  { %v8869_v50 = vpack.c.bf16 %v8868_v55, %v8867_v35  ;;  %12775 = vmatmul.mubr.msk.bf16.vlgmr.msra.gmra.mrb[92].mxu0 %vm199_vm2, %v8822_v10 }
0x6585   :  { %12791 = vmatpush3.bf16.msra.mxu0 %v16721_v12  ;;  %12794 = vmatprep.mubr.msk.bf16.mxu0 %vm13523_vm0, %v13522_v1 }
0x6586   :  { %12787 = vmatmul.mubr.msk.bf16.vlgmr.msra.gmra.mrb[24].mxu1 %vm199_vm2, %v8869_v50  ;;  %12792 = vmatprep.subr.bf16.mxu0 %v13522_v1 }
0x6587   :  { %12799 = vmatpush3.bf16.msra.mxu1 %v16731_v31  ;;  %12806 = vmatprep.mubr.msk.bf16.mxu1 %vm13523_vm0, %v13522_v1 }
0x6588   :  { %12800 = vmatprep.subr.bf16.mxu1 %v13522_v1 }
0x6589   :  { %12793 = vmatpush3.bf16.msra.mxu0 %v16740_v3 }
0x658a   :  { %12810 = vmatprep.subr.bf16.mxu0 %v13522_v1 }
0x658b   :  { %12801 = vmatpush3.bf16.msra.mxu1 %v16747_v17 }
0x658c   :  { %12802 = vmatprep.subr.bf16.mxu1 %v13522_v1 }
0x658f   :  { %12803 = vmatpush3.bf16.msra.mxu1 %v16675_v41 }
0x6590   :  { %12804 = vmatprep.subr.bf16.mxu1 %v13522_v1 }
0x6593   :  { %12805 = vmatpush3.bf16.msra.mxu1 %v16682_v23 }
0x6594   :  { %12822 = vmatprep.subr.bf16.mxu1 %v13522_v1 }
0x6657   :  { %v8860_v60 = vpop.f32.mrb[92].mxu0 }
0x6658   :  { %v8861_v27 = vadd.f32 %v16758_v40, %v8860_v60  ;;  %v12776_v49 = vpop.f32.mrb[93].mxu0 }
0x6659   :  { %v8863_v16 = vpop.f32.mrb[94].mxu0  ;;  %v16997_v38 = vpop.f32.mrb[24].mxu1 }
0x665a   :  { %v8914_v39 = vmul.f32 %v8861_v27, %v13695_v29  ;;  %v8864_v13 = vadd.f32 %v16758_v40, %v8863_v16  ;;  %v12777_v54 = vpop.f32.mrb[95].mxu0  ;;  %v12788_v14 = vpop.f32.mrb[25].mxu1 }
0x665b   :  { %v17001_v51 = vpop.f32.mrb[26].mxu1 }
0x665c   :  { %v8915_v61 = vmul.f32 %v8864_v13, %v13695_v29  ;;  %v12789_v33 = vpop.f32.mrb[27].mxu1  ;;  %v8916_v62 = vadd.f32 %v8914_v39, %v16897_v37  ;;  %v9201_v43 = vmul.f32 2.0, %v8864_v13 }
0x665e   :  { %v8917_v26 = vadd.f32 %v8915_v61, %v16900_v57 }
0x6660   :  { %v8918_v5 = vpack.c.bf16 %v8917_v26, %v8916_v62 }
0x6662   :  { %12795 = vmatmul.mubr.msk.bf16.vlgmr.msra.gmra.mrb[96].mxu0 %vm127_vm1, %v8918_v5 }
0x6663   :  { %12811 = vmatpush3.bf16.msra.mxu0 %v16821_v47  ;;  %12818 = vmatprep.mubr.msk.bf16.mxu0 %vm13523_vm0, %v13522_v1 }
0x6664   :  { %12812 = vmatprep.subr.bf16.mxu0 %v13522_v1 }
0x6667   :  { %12813 = vmatpush3.bf16.msra.mxu0 %v16830_v22 }
0x6668   :  { %12814 = vmatprep.subr.bf16.mxu0 %v13522_v1 }
0x666b   :  { %12815 = vmatpush3.bf16.msra.mxu0 %v16837_v48 }
0x666c   :  { %12816 = vmatprep.subr.bf16.mxu0 %v13522_v1 }
0x666f   :  { %12817 = vmatpush3.bf16.msra.mxu0 %v16844_v4 }
0x6670   :  { %12830 = vmatprep.subr.bf16.mxu0 %v13522_v1 }
0x6735   :  { %v8956_v32 = vpop.f32.mrb[96].mxu0 }
0x6736   :  { %v8957_v25 = vadd.f32 %v8956_v32, %v8671_v63  ;;  %v12796_v20 = vpop.f32.mrb[97].mxu0 }
0x6737   :  { %v8959_v28 = vpop.f32.mrb[98].mxu0 }
0x6738   :  { %13370 = vtanh.f32 %v8957_v25  ;;  %v8960_v15 = vadd.f32 %v8959_v28, %v8671_v63  ;;  %v12797_v18 = vpop.f32.mrb[99].mxu0  ;;  %v9200_v63 = vmul.f32 2.0, %v8861_v27  ;;  %v9203_v27 = vadd.f32 %v9201_v43, %v16957_v36 }
0x673a   :  { %13372 = vtanh.f32 %v8960_v15  ;;  %v9202_v49 = vadd.f32 %v9200_v63, %v16952_v0  ;;  %v8673_v0 = vstv %s8672_s0  ;;  %s13524_s0 = smov [#allocation5]  }
0x673b   :  { %v8674_v36 = vmul.f32 %v16853_v56, %v8673_v0 }
0x673d   :  { %v8675_v5 = vadd.f32 %v16859_v9, %v8674_v36 }
0x6742   :  { %v13371_v19 = vpop.eup %13370 }
0x6743   :  { %v9010_v2 = vmul.f32 %v13371_v19, %v13371_v19 }
0x6744   :  { %v13373_v53 = vpop.eup %13372 }
0x6745   :  { %v8965_v7 = vpack.c.bf16 %v13373_v53, %v13371_v19  ;;  %v9011_v58 = vmul.f32 %v13373_v53, %v13373_v53 }
0x6747   :  { %v9012_v6 = vpack.c.bf16 %v9011_v58, %v9010_v2  ;;  %12807 = vmatmul.mubr.msk.bf16.vlgmr.msra.gmra.mrb[28].mxu1 %vm199_vm2, %v8965_v7 }
0x6748   :  { %12823 = vmatpush3.bf16.msra.mxu1 %v16721_v12  ;;  %12826 = vmatprep.mubr.msk.bf16.mxu1 %vm13523_vm0, %v13522_v1 }
0x6749   :  { %12819 = vmatmul.mubr.msk.bf16.vlgmr.msra.gmra.mrb[100].mxu0 %vm199_vm2, %v9012_v6  ;;  %12824 = vmatprep.subr.bf16.mxu1 %v13522_v1 }
0x674a   :  { %12831 = vmatpush3.bf16.msra.mxu0 %v16731_v31  ;;  %12838 = vmatprep.mubr.msk.bf16.mxu0 %vm13523_vm0, %v13522_v1 }
0x674b   :  { %12832 = vmatprep.subr.bf16.mxu0 %v13522_v1 }
0x674c   :  { %12825 = vmatpush3.bf16.msra.mxu1 %v16740_v3 }
0x674d   :  { %12842 = vmatprep.subr.bf16.mxu1 %v13522_v1 }
0x674e   :  { %12833 = vmatpush3.bf16.msra.mxu0 %v16747_v17 }
0x674f   :  { %12834 = vmatprep.subr.bf16.mxu0 %v13522_v1 }
0x6752   :  { %12835 = vmatpush3.bf16.msra.mxu0 %v16675_v41 }
0x6753   :  { %12836 = vmatprep.subr.bf16.mxu0 %v13522_v1 }
0x6756   :  { %12837 = vmatpush3.bf16.msra.mxu0 %v16682_v23 }
0x6757   :  { %12866 = vmatprep.subr.bf16.mxu0 %v13522_v1 }
0x681a   :  { %v9003_v24 = vpop.f32.mrb[28].mxu1 }
0x681b   :  { %v9004_v45 = vadd.f32 %v16758_v40, %v9003_v24  ;;  %v12808_v11 = vpop.f32.mrb[29].mxu1 }
0x681c   :  { %v9006_v21 = vpop.f32.mrb[30].mxu1  ;;  %v17036_v42 = vpop.f32.mrb[100].mxu0 }
0x681d   :  { %v9057_v35 = vmul.f32 %v9004_v45, %v13810_v46  ;;  %v9204_v10 = vmul.f32 2.0, %v9004_v45  ;;  %v9007_v55 = vadd.f32 %v16758_v40, %v9006_v21  ;;  %v12809_v50 = vpop.f32.mrb[31].mxu1  ;;  %v12820_v60 = vpop.f32.mrb[101].mxu0 }
0x681e   :  { %v17041_v16 = vpop.f32.mrb[102].mxu0  ;;  %v9214_v60 = vmul.f32 2.0, %v16997_v38 }
0x681f   :  { %v9058_v39 = vmul.f32 %v9007_v55, %v13810_v46  ;;  %v9205_v13 = vmul.f32 2.0, %v9007_v55  ;;  %v12821_v54 = vpop.f32.mrb[103].mxu0  ;;  %v9206_v14 = vadd.f32 %v9204_v10, %v9202_v49  ;;  %v9059_v61 = vadd.f32 %v9057_v35, %v16897_v37 }
0x6820   :  { %v9261_v54 = vmul.f32 2.0, %v17041_v16  ;;  %v9272_v16 = vstv %s17127_s24 }
0x6821   :  { %v9060_v33 = vadd.f32 %v9058_v39, %v16900_v57  ;;  %v9207_v62 = vadd.f32 %v9205_v13, %v9203_v27  ;;  %v9273_v0 = vmul.f32 %v16853_v56, %v9272_v16 }
0x6823   :  { %v9061_v26 = vpack.c.bf16 %v9060_v33, %v9059_v61  ;;  %v9274_v36 = vadd.f32 %v16859_v9, %v9273_v0 }
0x6825   :  { %12827 = vmatmul.mubr.msk.bf16.vlgmr.msra.gmra.mrb[32].mxu1 %vm127_vm1, %v9061_v26 }
0x6826   :  { %12843 = vmatpush3.bf16.msra.mxu1 %v16821_v47  ;;  %12850 = vmatprep.mubr.msk.bf16.mxu1 %vm13523_vm0, %v13522_v1 }
0x6827   :  { %12844 = vmatprep.subr.bf16.mxu1 %v13522_v1 }
0x682a   :  { %12845 = vmatpush3.bf16.msra.mxu1 %v16830_v22 }
0x682b   :  { %12846 = vmatprep.subr.bf16.mxu1 %v13522_v1 }
0x682e   :  { %12847 = vmatpush3.bf16.msra.mxu1 %v16837_v48 }
0x682f   :  { %12848 = vmatprep.subr.bf16.mxu1 %v13522_v1 }
0x6832   :  { %12849 = vmatpush3.bf16.msra.mxu1 %v16844_v4 }
0x6833   :  { %12854 = vmatprep.subr.bf16.mxu1 %v13522_v1 }
0x68f8   :  { %v9099_v32 = vpop.f32.mrb[32].mxu1 }
0x68f9   :  { %v9100_v25 = vadd.f32 %v9099_v32, %v8675_v5  ;;  %v12828_v20 = vpop.f32.mrb[33].mxu1 }
0x68fa   :  { %v9102_v28 = vpop.f32.mrb[34].mxu1 }
0x68fb   :  { %13374 = vtanh.f32 %v9100_v25  ;;  %v9103_v15 = vadd.f32 %v9102_v28, %v8675_v5  ;;  %v12829_v18 = vpop.f32.mrb[35].mxu1 }
0x68fd   :  { %13376 = vtanh.f32 %v9103_v15 }
0x6905   :  { %v13375_v19 = vpop.eup %13374 }
0x6906   :  { %v9153_v2 = vmul.f32 %v13375_v19, %v13375_v19 }
0x6907   :  { %v13377_v53 = vpop.eup %13376 }
0x6908   :  { %v9108_v7 = vpack.c.bf16 %v13377_v53, %v13375_v19  ;;  %v9154_v58 = vmul.f32 %v13377_v53, %v13377_v53 }
0x690a   :  { %v9155_v6 = vpack.c.bf16 %v9154_v58, %v9153_v2  ;;  %12839 = vmatmul.mubr.msk.bf16.vlgmr.msra.gmra.mrb[104].mxu0 %vm199_vm2, %v9108_v7 }
0x690b   :  { %12867 = vmatpush3.bf16.msra.mxu0 %v16721_v12  ;;  %12870 = vmatprep.mubr.msk.bf16.mxu0 %vm13523_vm0, %v13522_v1 }
0x690c   :  { %12851 = vmatmul.mubr.msk.bf16.vlgmr.msra.gmra.mrb[36].mxu1 %vm199_vm2, %v9155_v6  ;;  %12868 = vmatprep.subr.bf16.mxu0 %v13522_v1 }
0x690d   :  { %12855 = vmatpush3.bf16.msra.mxu1 %v16821_v47  ;;  %12862 = vmatprep.mubr.msk.bf16.mxu1 %vm13523_vm0, %v13522_v1 }
0x690e   :  { %12856 = vmatprep.subr.bf16.mxu1 %v13522_v1 }
0x690f   :  { %12869 = vmatpush3.bf16.msra.mxu0 %v16740_v3 }
0x6910   :  { %12874 = vmatprep.subr.bf16.mxu0 %v13522_v1 }
0x6911   :  { %12857 = vmatpush3.bf16.msra.mxu1 %v16830_v22 }
0x6912   :  { %12858 = vmatprep.subr.bf16.mxu1 %v13522_v1 }
0x6915   :  { %12859 = vmatpush3.bf16.msra.mxu1 %v16837_v48 }
0x6916   :  { %12860 = vmatprep.subr.bf16.mxu1 %v13522_v1 }
0x6919   :  { %12861 = vmatpush3.bf16.msra.mxu1 %v16844_v4 }
0x691a   :  { %12886 = vmatprep.subr.bf16.mxu1 %v13522_v1 }
0x691c   :  { %12863 = vmatmul.mubr.msk.bf16.vlgmr.msra.gmra.mrb[36].mxu1 %vm199_vm2, %v8770_v8 }
0x691d   :  { %12887 = vmatpush3.bf16.msra.mxu1 %v16721_v12  ;;  %12890 = vmatprep.mubr.msk.bf16.mxu1 %vm13523_vm0, %v13522_v1 }
0x691e   :  { %12888 = vmatprep.subr.bf16.mxu1 %v13522_v1 }
0x6921   :  { %12889 = vmatpush3.bf16.msra.mxu1 %v16740_v3 }
0x6922   :  { %12906 = vmatprep.subr.bf16.mxu1 %v13522_v1 }
0x69dd   :  { %v9146_v63 = vpop.f32.mrb[104].mxu0 }
0x69de   :  { %v9147_v24 = vadd.f32 %v16758_v40, %v9146_v63  ;;  %v12840_v43 = vpop.f32.mrb[105].mxu0 }
0x69df   :  { %v9149_v45 = vpop.f32.mrb[106].mxu0 }
0x69e0   :  { %v9208_v11 = vadd.f32 %v9206_v14, %v9147_v24  ;;  %v9150_v30 = vadd.f32 %v16758_v40, %v9149_v45  ;;  %v12841_v34 = vpop.f32.mrb[107].mxu0 }
0x69e1   :  { %v9276_v34 = vstv %s9275_s12 }
0x69e2   :  { %v9210_v8 = vmul.f32 %v9208_v11, %v13869_v44  ;;  %v9209_v21 = vadd.f32 %v9207_v62, %v9150_v30 }
0x69e4   :  { %v9211_v35 = vmul.f32 %v9209_v21, %v13869_v44  ;;  %v17095_v10 = vadd.f32 %v9210_v8, %v16897_v37  ;;  %v9215_v37 = vmul.f32 2.0, %v17001_v51  ;;  %v9277_v8 = vmul.f32 %v16853_v56, %v9276_v34  ;;  %v13476_v34 = vld [vmem:[%s17344_s3 + $0x8] sm:$0xff]  }
0x69e6   :  { %v17098_v55 = vadd.f32 %v9211_v35, %v16900_v57  ;;  %v9260_v57 = vmul.f32 2.0, %v17036_v42  ;;  %v17176_v21 = vadd.f32 %v16859_v9, %v9277_v8  ;;  %v13477_v8 = vld [vmem:[%s17345_s4 + $0x8] sm:$0xff]  }
0x69e8   :  { %v9283_v50 = vpack.c.bf16 %v17098_v55, %v17095_v10 }
0x69ea   :  { %12871 = vmatmul.mubr.msk.bf16.vlgmr.msra.gmra.mrb[108].mxu0 %vm127_vm1, %v9283_v50 }
0x69eb   :  { %12875 = vmatpush3.bf16.msra.mxu0 %v16731_v31  ;;  %12882 = vmatprep.mubr.msk.bf16.mxu0 %vm13523_vm0, %v13522_v1 }
0x69ec   :  { %12876 = vmatprep.subr.bf16.mxu0 %v13522_v1 }
0x69ef   :  { %v9253_v49 = vpop.f32.mrb[36].mxu1  ;;  %12877 = vmatpush3.bf16.msra.mxu0 %v16747_v17 }
0x69f0   :  { %v9254_v27 = vadd.f32 %v9253_v49, %v9214_v60  ;;  %v12864_v39 = vpop.f32.mrb[37].mxu1  ;;  %12878 = vmatprep.subr.bf16.mxu0 %v13522_v1 }
0x69f1   :  { %v9256_v13 = vpop.f32.mrb[38].mxu1 }
0x69f2   :  { %v9262_v14 = vadd.f32 %v9260_v57, %v9254_v27  ;;  %v9257_v61 = vadd.f32 %v9256_v13, %v9215_v37  ;;  %v12865_v33 = vpop.f32.mrb[39].mxu1 }
0x69f3   :  { %12879 = vmatpush3.bf16.msra.mxu0 %v16675_v41 }
0x69f4   :  { %v9266_v38 = vmul.f32 %v9262_v14, %v13869_v44  ;;  %v9263_v62 = vadd.f32 %v9261_v54, %v9257_v61  ;;  %12880 = vmatprep.subr.bf16.mxu0 %v13522_v1 }
0x69f6   :  { %v17117_v51 = vadd.f32 %v9266_v38, %v16919_v52  ;;  %v9267_v42 = vmul.f32 %v9263_v62, %v13869_v44 }
0x69f7   :  { %12881 = vmatpush3.bf16.msra.mxu0 %v16682_v23 }
0x69f8   :  { %v17122_v26 = vadd.f32 %v9267_v42, %v16924_v59  ;;  %12894 = vmatprep.subr.bf16.mxu0 %v13522_v1 }
0x6abd   :  { %v9321_v52 = vpop.f32.mrb[108].mxu0 }
0x6abe   :  { %v9322_v5 = vadd.f32 %v9321_v52, %v9274_v36  ;;  %v12872_v32 = vpop.f32.mrb[109].mxu0 }
0x6abf   :  { %v9324_v25 = vpop.f32.mrb[110].mxu0 }
0x6ac0   :  { %13378 = vtanh.f32 %v9322_v5  ;;  %v9325_v20 = vadd.f32 %v9324_v25, %v9274_v36  ;;  %v12873_v28 = vpop.f32.mrb[111].mxu0 }
0x6ac2   :  { %13380 = vtanh.f32 %v9325_v20 }
0x6aca   :  { %v13379_v59 = vpop.eup %13378 }
0x6acb   :  { %v17132_v18 = vmul.f32 %v13379_v59, %v13379_v59 }
0x6acc   :  { %v13381_v15 = vpop.eup %13380 }
0x6acd   :  { %v9330_v19 = vpack.c.bf16 %v13381_v15, %v13379_v59  ;;  %v17134_v53 = vmul.f32 %v13381_v15, %v13381_v15 }
0x6acf   :  { %v9377_v2 = vpack.c.bf16 %v17134_v53, %v17132_v18  ;;  %12883 = vmatmul.mubr.msk.bf16.vlgmr.msra.gmra.mrb[112].mxu0 %vm199_vm2, %v9330_v19 }
0x6ad0   :  { %12895 = vmatpush3.bf16.msra.mxu0 %v16731_v31  ;;  %12902 = vmatprep.mubr.msk.bf16.mxu0 %vm13523_vm0, %v13522_v1 }
0x6ad1   :  { %12896 = vmatprep.subr.bf16.mxu0 %v13522_v1 }
0x6ad4   :  { %12897 = vmatpush3.bf16.msra.mxu0 %v16747_v17 }
0x6ad5   :  { %12898 = vmatprep.subr.bf16.mxu0 %v13522_v1 }
0x6ad8   :  { %12899 = vmatpush3.bf16.msra.mxu0 %v16675_v41 }
0x6ad9   :  { %12900 = vmatprep.subr.bf16.mxu0 %v13522_v1 }
0x6adc   :  { %12901 = vmatpush3.bf16.msra.mxu0 %v16682_v23 }
0x6add   :  { %12918 = vmatprep.subr.bf16.mxu0 %v13522_v1 }
0x6ba2   :  { %v9368_v7 = vpop.f32.mrb[112].mxu0 }
0x6ba3   :  { %v17150_v58 = vadd.f32 %v16758_v40, %v9368_v7  ;;  %v12884_v6 = vpop.f32.mrb[113].mxu0 }
0x6ba4   :  { %v9371_v63 = vpop.f32.mrb[114].mxu0 }
0x6ba5   :  { %v9378_v24 = vmul.f32 %v17150_v58, %v13695_v29  ;;  %v17155_v43 = vadd.f32 %v16758_v40, %v9371_v63  ;;  %v12885_v41 = vpop.f32.mrb[115].mxu0 }
0x6ba7   :  { %v9379_v23 = vmul.f32 %v17155_v43, %v13695_v29  ;;  %v9380_v45 = vadd.f32 %v9378_v24, %v17095_v10 }
0x6ba9   :  { %v9381_v11 = vadd.f32 %v9379_v23, %v17098_v55 }
0x6bab   :  { %v9382_v30 = vpack.c.bf16 %v9381_v11, %v9380_v45  ;;  %v13474_v11 = vld [vmem:[%s17344_s3] sm:$0xff]   ;;  %s9279_s3 = sadd.f32 %s17127_s24, %s13658_s15 }
0x6bad   :  { %12891 = vmatmul.mubr.msk.bf16.vlgmr.msra.gmra.mrb[40].mxu1 %vm127_vm1, %v9382_v30  ;;  %v13475_v30 = vld [vmem:[%s17345_s4] sm:$0xff]  }
0x6bae   :  { %12907 = vmatpush3.bf16.msra.mxu1 %v16821_v47  ;;  %12914 = vmatprep.mubr.msk.bf16.mxu1 %vm13523_vm0, %v13522_v1 }
0x6baf   :  { %12908 = vmatprep.subr.bf16.mxu1 %v13522_v1 }
0x6bb2   :  { %12909 = vmatpush3.bf16.msra.mxu1 %v16830_v22 }
0x6bb3   :  { %12910 = vmatprep.subr.bf16.mxu1 %v13522_v1 }
0x6bb6   :  { %12911 = vmatpush3.bf16.msra.mxu1 %v16837_v48 }
0x6bb7   :  { %12912 = vmatprep.subr.bf16.mxu1 %v13522_v1 }
0x6bba   :  { %12913 = vmatpush3.bf16.msra.mxu1 %v16844_v4 }
0x6bbb   :  { %12926 = vmatprep.subr.bf16.mxu1 %v13522_v1 }
0x6c80   :  { %v9420_v35 = vpop.f32.mrb[40].mxu1 }
0x6c81   :  { %v9421_v50 = vadd.f32 %v9420_v35, %v17176_v21  ;;  %v12892_v60 = vpop.f32.mrb[41].mxu1 }
0x6c82   :  { %v9423_v49 = vpop.f32.mrb[42].mxu1  ;;  %v17251_v60 = vld [vmem:[%s17349_s8] ss:$0 sm:$0xff] }
0x6c83   :  { %13382 = vtanh.f32 %v9421_v50  ;;  %v9424_v37 = vadd.f32 %v9423_v49, %v17176_v21  ;;  %v12893_v57 = vpop.f32.mrb[43].mxu1 }
0x6c85   :  { %13384 = vtanh.f32 %v9424_v37 }
0x6c8d   :  { %v13383_v27 = vpop.eup %13382 }
0x6c8e   :  { %v9474_v13 = vmul.f32 %v13383_v27, %v13383_v27 }
0x6c8f   :  { %v13385_v39 = vpop.eup %13384 }
0x6c90   :  { %v9429_v54 = vpack.c.bf16 %v13385_v39, %v13383_v27  ;;  %v9475_v14 = vmul.f32 %v13385_v39, %v13385_v39 }
0x6c92   :  { %v9476_v61 = vpack.c.bf16 %v9475_v14, %v9474_v13  ;;  %12903 = vmatmul.mubr.msk.bf16.vlgmr.msra.gmra.mrb[116].mxu0 %vm199_vm2, %v9429_v54 }
0x6c93   :  { %12919 = vmatpush3.bf16.msra.mxu0 %v16721_v12  ;;  %12922 = vmatprep.mubr.msk.bf16.mxu0 %vm13523_vm0, %v13522_v1  ;;  %v13472_v12 = vld [vmem:[%s17345_s4 + $0x10] sm:$0xff]  }
0x6c94   :  { %12915 = vmatmul.mubr.msk.bf16.vlgmr.msra.gmra.mrb[44].mxu1 %vm199_vm2, %v9476_v61  ;;  %12920 = vmatprep.subr.bf16.mxu0 %v13522_v1 }
0x6c95   :  { %12927 = vmatpush3.bf16.msra.mxu1 %v16731_v31  ;;  %12934 = vmatprep.mubr.msk.bf16.mxu1 %vm13523_vm0, %v13522_v1  ;;  %v13473_v31 = vld [vmem:[%s17345_s4 + $0x18] sm:$0xff]  }
0x6c96   :  { %12928 = vmatprep.subr.bf16.mxu1 %v13522_v1 }
0x6c97   :  { %12921 = vmatpush3.bf16.msra.mxu0 %v16740_v3 }
0x6c98   :  { %12938 = vmatprep.subr.bf16.mxu0 %v13522_v1 }
0x6c99   :  { %12929 = vmatpush3.bf16.msra.mxu1 %v16747_v17 }
0x6c9a   :  { %12930 = vmatprep.subr.bf16.mxu1 %v13522_v1 }
0x6c9d   :  { %12931 = vmatpush3.bf16.msra.mxu1 %v13472_v12 }
0x6c9e   :  { %12932 = vmatprep.subr.bf16.mxu1 %v13522_v1 }
0x6ca1   :  { %12933 = vmatpush3.bf16.msra.mxu1 %v13473_v31 }
0x6ca2   :  { %12950 = vmatprep.subr.bf16.mxu1 %v13522_v1 }
0x6d65   :  { %v9467_v3 = vpop.f32.mrb[116].mxu0 }
0x6d66   :  { %v9468_v33 = vadd.f32 %v16758_v40, %v9467_v3  ;;  %v12904_v17 = vpop.f32.mrb[117].mxu0 }
0x6d67   :  { %v9470_v38 = vpop.f32.mrb[118].mxu0  ;;  %v17203_v62 = vpop.f32.mrb[44].mxu1 }
0x6d68   :  { %v9521_v42 = vmul.f32 %v9468_v33, %v13695_v29  ;;  %v9471_v16 = vadd.f32 %v16758_v40, %v9470_v38  ;;  %v12905_v0 = vpop.f32.mrb[119].mxu0  ;;  %v12916_v36 = vpop.f32.mrb[45].mxu1 }
0x6d69   :  { %v17207_v52 = vpop.f32.mrb[46].mxu1 }
0x6d6a   :  { %v9522_v5 = vmul.f32 %v9471_v16, %v13695_v29  ;;  %v12917_v32 = vpop.f32.mrb[47].mxu1  ;;  %v9523_v25 = vadd.f32 %v9521_v42, %v17095_v10  ;;  %v9808_v50 = vmul.f32 2.0, %v9471_v16 }
0x6d6c   :  { %v9524_v20 = vadd.f32 %v9522_v5, %v17098_v55  ;;  %v9810_v3 = vadd.f32 %v9808_v50, %v17155_v43 }
0x6d6e   :  { %v9525_v28 = vpack.c.bf16 %v9524_v20, %v9523_v25 }
0x6d70   :  { %12923 = vmatmul.mubr.msk.bf16.vlgmr.msra.gmra.mrb[120].mxu0 %vm127_vm1, %v9525_v28 }
0x6d71   :  { %12939 = vmatpush3.bf16.msra.mxu0 %v16821_v47  ;;  %12946 = vmatprep.mubr.msk.bf16.mxu0 %vm13523_vm0, %v13522_v1 }
0x6d72   :  { %12940 = vmatprep.subr.bf16.mxu0 %v13522_v1 }
0x6d75   :  { %12941 = vmatpush3.bf16.msra.mxu0 %v16830_v22 }
0x6d76   :  { %12942 = vmatprep.subr.bf16.mxu0 %v13522_v1 }
0x6d79   :  { %12943 = vmatpush3.bf16.msra.mxu0 %v16837_v48 }
0x6d7a   :  { %12944 = vmatprep.subr.bf16.mxu0 %v13522_v1 }
0x6d7d   :  { %12945 = vmatpush3.bf16.msra.mxu0 %v16844_v4 }
0x6d7e   :  { %12958 = vmatprep.subr.bf16.mxu0 %v13522_v1 }
0x6e43   :  { %v9563_v29 = vpop.f32.mrb[120].mxu0 }
0x6e44   :  { %v9564_v40 = vadd.f32 %v9563_v29, %v17176_v21  ;;  %v12924_v59 = vpop.f32.mrb[121].mxu0 }
0x6e45   :  { %v9566_v15 = vpop.f32.mrb[122].mxu0 }
0x6e46   :  { %13386 = vtanh.f32 %v9564_v40  ;;  %v9567_v19 = vadd.f32 %v9566_v15, %v17176_v21  ;;  %v12925_v7 = vpop.f32.mrb[123].mxu0  ;;  %v9807_v21 = vmul.f32 2.0, %v9468_v33 }
0x6e47   :  { %v13482_v7 = vld [vmem:[%s17346_s5 + $0x18] sm:$0xff]  }
0x6e48   :  { %13388 = vtanh.f32 %v9567_v19  ;;  %v13481_v19 = vld [vmem:[%s17346_s5 + $0x10] sm:$0xff]  }
0x6e50   :  { %v13387_v6 = vpop.eup %13386 }
0x6e51   :  { %v9617_v24 = vmul.f32 %v13387_v6, %v13387_v6 }
0x6e52   :  { %v13389_v63 = vpop.eup %13388 }
0x6e53   :  { %v9572_v41 = vpack.c.bf16 %v13389_v63, %v13387_v6  ;;  %v9618_v23 = vmul.f32 %v13389_v63, %v13389_v63 }
0x6e55   :  { %v9619_v45 = vpack.c.bf16 %v9618_v23, %v9617_v24  ;;  %12935 = vmatmul.mubr.msk.bf16.vlgmr.msra.gmra.mrb[48].mxu1 %vm199_vm2, %v9572_v41 }
0x6e56   :  { %12951 = vmatpush3.bf16.msra.mxu1 %v13474_v11  ;;  %12954 = vmatprep.mubr.msk.bf16.mxu1 %vm13523_vm0, %v13522_v1 }
0x6e57   :  { %12947 = vmatmul.mubr.msk.bf16.vlgmr.msra.gmra.mrb[124].mxu0 %vm199_vm2, %v9619_v45  ;;  %12952 = vmatprep.subr.bf16.mxu1 %v13522_v1 }
0x6e58   :  { %12959 = vmatpush3.bf16.msra.mxu0 %v13475_v30  ;;  %12966 = vmatprep.mubr.msk.bf16.mxu0 %vm13523_vm0, %v13522_v1 }
0x6e59   :  { %12960 = vmatprep.subr.bf16.mxu0 %v13522_v1 }
0x6e5a   :  { %12953 = vmatpush3.bf16.msra.mxu1 %v13476_v34 }
0x6e5b   :  { %12970 = vmatprep.subr.bf16.mxu1 %v13522_v1 }
0x6e5c   :  { %12961 = vmatpush3.bf16.msra.mxu0 %v13477_v8 }
0x6e5d   :  { %12962 = vmatprep.subr.bf16.mxu0 %v13522_v1 }
0x6e60   :  { %12963 = vmatpush3.bf16.msra.mxu0 %v13472_v12  ;;  %v9809_v12 = vadd.f32 %v9807_v21, %v17150_v58 }
0x6e61   :  { %12964 = vmatprep.subr.bf16.mxu0 %v13522_v1 }
0x6e64   :  { %12965 = vmatpush3.bf16.msra.mxu0 %v13473_v31 }
0x6f28   :  { %v9610_v35 = vpop.f32.mrb[48].mxu1 }
0x6f29   :  { %v9611_v49 = vadd.f32 %v17251_v60, %v9610_v35  ;;  %v12936_v37 = vpop.f32.mrb[49].mxu1 }
0x6f2a   :  { %v9613_v57 = vpop.f32.mrb[50].mxu1  ;;  %v17254_v27 = vpop.f32.mrb[124].mxu0 }
0x6f2b   :  { %v9664_v39 = vmul.f32 %v9611_v49, %v13810_v46  ;;  %v9811_v13 = vmul.f32 2.0, %v9611_v49  ;;  %v9614_v54 = vadd.f32 %v17251_v60, %v9613_v57  ;;  %v12937_v14 = vpop.f32.mrb[51].mxu1  ;;  %v12948_v61 = vpop.f32.mrb[125].mxu0 }
0x6f2c   :  { %v17259_v31 = vpop.f32.mrb[126].mxu0 }
0x6f2d   :  { %v9665_v33 = vmul.f32 %v9614_v54, %v13810_v46  ;;  %v9812_v17 = vmul.f32 2.0, %v9614_v54  ;;  %v12949_v38 = vpop.f32.mrb[127].mxu0  ;;  %v9813_v42 = vadd.f32 %v9811_v13, %v9809_v12  ;;  %v9666_v16 = vadd.f32 %v9664_v39, %v17095_v10 }
0x6f2e   :  { %v9280_v46 = vstv %s9279_s3 }
0x6f2f   :  { %v9667_v0 = vadd.f32 %v9665_v33, %v17098_v55  ;;  %v9814_v36 = vadd.f32 %v9812_v17, %v9810_v3 }
0x6f31   :  { %v9668_v5 = vpack.c.bf16 %v9667_v0, %v9666_v16 }
0x6f33   :  { %12955 = vmatmul.mubr.msk.bf16.vlgmr.msra.gmra.mrb[52].mxu1 %vm127_vm1, %v9668_v5 }
0x6f34   :  { %12971 = vmatpush3.bf16.msra.mxu1 %v16821_v47  ;;  %12978 = vmatprep.mubr.msk.bf16.mxu1 %vm13523_vm0, %v13522_v1  ;;  %v9281_v47 = vmul.f32 %v16853_v56, %v9280_v46  ;;  %v13479_v56 = vld [vmem:[%s17346_s5] sm:$0xff]  }
0x6f35   :  { %12972 = vmatprep.subr.bf16.mxu1 %v13522_v1 }
0x6f36   :  { %v9282_v58 = vadd.f32 %v16859_v9, %v9281_v47  ;;  %v13480_v9 = vld [vmem:[%s17346_s5 + $0x8] sm:$0xff]   ;;  %s9891_s5 = sshll.u32 %s13524_s0, 4  ;;  %s9892_s5 = int_to_ptr.vmem [resolvable:$true] %s9891_s5 }
0x6f37   :  { %s13495_s24 = scalar_lea.vmem %s9892_s5, 256  ;;  %p13500_p6 = scmp.lt.s32.totalorder %s9892_s5, %s9892_s5 }
0x6f38   :  { %12973 = vmatpush3.bf16.msra.mxu1 %v16830_v22  ;;  %p13496_p5 = scmp.ne.s32.totalorder %s9892_s5, %s13495_s24  ;;  %p13501_p7 = scmp.lt.s32.totalorder %s13495_s24, %s13495_s24 }
0x6f39   :  { %12974 = vmatprep.subr.bf16.mxu1 %v13522_v1 }
0x6f3a   :  { %p13502_p8 = por %p13501_p7, %p13500_p6 }
0x6f3c   :  { %12975 = vmatpush3.bf16.msra.mxu1 %v16837_v48  ;;  %p13503_p9 = pnand %p13502_p8, %p13496_p5 }
0x6f3d   :  { %12976 = vmatprep.subr.bf16.mxu1 %v13522_v1 }
0x6f40   :  { %12977 = vmatpush3.bf16.msra.mxu1 %v16844_v4 }
0x6f41   :  { %12982 = vmatprep.subr.bf16.mxu1 %v13522_v1 }
0x7006   :  { %v9706_v43 = vpop.f32.mrb[52].mxu1 }
0x7007   :  { %v9707_v32 = vadd.f32 %v9706_v43, %v9282_v58  ;;  %v12956_v25 = vpop.f32.mrb[53].mxu1 }
0x7008   :  { %v9709_v22 = vpop.f32.mrb[54].mxu1 }
0x7009   :  { %13390 = vtanh.f32 %v9707_v32  ;;  %v9710_v20 = vadd.f32 %v9709_v22, %v9282_v58  ;;  %v12957_v28 = vpop.f32.mrb[55].mxu1 }
0x700b   :  { %13392 = vtanh.f32 %v9710_v20 }
0x7013   :  { %v13391_v48 = vpop.eup %13390 }
0x7014   :  { %v9760_v40 = vmul.f32 %v13391_v48, %v13391_v48 }
0x7015   :  { %v13393_v29 = vpop.eup %13392 }
0x7016   :  { %v9715_v4 = vpack.c.bf16 %v13393_v29, %v13391_v48  ;;  %v9761_v59 = vmul.f32 %v13393_v29, %v13393_v29 }
0x7018   :  { %v9762_v15 = vpack.c.bf16 %v9761_v59, %v9760_v40  ;;  %12967 = vmatmul.mubr.msk.bf16.vlgmr.msra.gmra.mrb[128].mxu0 %vm199_vm2, %v9715_v4 }
0x701a   :  { %12979 = vmatmul.mubr.msk.bf16.vlgmr.msra.gmra.mrb[56].mxu1 %vm199_vm2, %v9762_v15 }
0x701b   :  { %12983 = vmatpush3.bf16.msra.mxu1 %v13479_v56  ;;  %12990 = vmatprep.mubr.msk.bf16.mxu1 %vm13523_vm0, %v13522_v1 }
0x701c   :  { %12984 = vmatprep.subr.bf16.mxu1 %v13522_v1 }
0x701f   :  { %12985 = vmatpush3.bf16.msra.mxu1 %v13480_v9 }
0x7020   :  { %12986 = vmatprep.subr.bf16.mxu1 %v13522_v1 }
0x7023   :  { %12987 = vmatpush3.bf16.msra.mxu1 %v13481_v19 }
0x7024   :  { %12988 = vmatprep.subr.bf16.mxu1 %v13522_v1 }
0x7027   :  { %12989 = vmatpush3.bf16.msra.mxu1 %v13482_v7 }
0x702a   :  { %12991 = vmatmul.mubr.msk.bf16.vlgmr.msra.gmra.mrb[56].mxu1 %vm199_vm2, %v9377_v2 }
0x70eb   :  { %v9753_v6 = vpop.f32.mrb[128].mxu0 }
0x70ec   :  { %v9754_v63 = vadd.f32 %v17251_v60, %v9753_v6  ;;  %v12968_v24 = vpop.f32.mrb[129].mxu0 }
0x70ed   :  { %v9756_v41 = vpop.f32.mrb[130].mxu0 }
0x70ee   :  { %v9815_v23 = vadd.f32 %v9813_v42, %v9754_v63  ;;  %v9757_v45 = vadd.f32 %v17251_v60, %v9756_v41  ;;  %v12969_v11 = vpop.f32.mrb[131].mxu0 }
0x70f0   :  { %v9817_v1 = vmul.f32 %v9815_v23, %v13869_v44  ;;  %v9816_v30 = vadd.f32 %v9814_v36, %v9757_v45 }
0x70f2   :  { %v9819_v34 = vadd.f32 %v9817_v1, %v17095_v10  ;;  %v9818_v18 = vmul.f32 %v9816_v30, %v13869_v44 }
0x70f4   :  { %9881 = vst.msk [vmem:[#allocation5] sm:$0xff] %vm127_vm1, %v9819_v34  ;;  %v9820_v53 = vadd.f32 %v9818_v18, %v17098_v55 }
0x70f6   :  { %9882 = vst.msk [vmem:[#allocation5 + $0x8] sm:$0xff] %vm127_vm1, %v9820_v53 }
0x70f7   :  { %13506 = shalt.err (!%p13503_p9)
}
0x70f8   :  { %s13507_s22 = scalar_lea.hbm %s17350_s9, 256 }
0x70f9   :  { %p13508_p10 = scmp.ne.s32.totalorder %s17350_s9, %s13507_s22  ;;  %p13511_p11 = scmp.lt.u32.totalorder %s13507_s22, %s17350_s9 }
0x70fb   :  { %p13513_p12 = pnand %p13511_p11, %p13508_p10 }
0x70fd   :  { %13516 = shalt.err (!%p13513_p12)
}
0x70fe   :  { %s13525_s29 = smov 128   ;;  %s13526_s2 = smov 8   ;;  %v9821_v10 = vmul.f32 2.0, %v17203_v62  ;;  %v9860_v55 = vpop.f32.mrb[56].mxu1  ;;  %v9822_v2 = vmul.f32 2.0, %v17207_v52  ;;  %v9867_v8 = vmul.f32 2.0, %v17254_v27 }
0x70ff   :  { %9897 = dma.vmem_to_hbm [thread:$0]  %s9892_s5, 256, %s17350_s9, [#allocation3], %s13525_s29, %s13525_s29, %s13526_s2   ;;  %v12992_v35 = vpop.f32.mrb[57].mxu1  ;;  %v9868_v60 = vmul.f32 2.0, %v17259_v31  ;;  %vm9883_vm3 = vcmask 7168  }
0x7100   :  { %v9861_v21 = vadd.f32 %v9860_v55, %v9821_v10  ;;  %s9877_s13 = smul.f32 %s17311_s23, %s13655_s14  ;;  %v9863_v50 = vpop.f32.mrb[58].mxu1 }
0x7101   :  { %v9864_v37 = vadd.f32 %v9863_v50, %v9822_v2  ;;  %v12993_v57 = vpop.f32.mrb[59].mxu1 }
0x7102   :  { %v9869_v49 = vadd.f32 %v9867_v8, %v9861_v21  ;;  %v9878_v54 = vstv %s9877_s13 }
0x7103   :  { %v9870_v13 = vadd.f32 %v9868_v60, %v9864_v37 }
0x7104   :  { %v9873_v39 = vmul.f32 %v9869_v49, %v13869_v44 }
0x7105   :  { %v9874_v14 = vmul.f32 %v9870_v13, %v13869_v44 }
0x7106   :  { %v9875_v62 = vadd.f32 %v9873_v39, %v17117_v51 }
0x7107   :  { %v9876_v27 = vadd.f32 %v9874_v14, %v17122_v26 }
0x7108   :  { %v9879_v52 = vsub.f32 %v9875_v62, %v9878_v54 }
0x7109   :  { %v9880_v61 = vsub.f32 %v9876_v27, %v9878_v54 }
0x710a   :  { %9884 = vst.msk [vmem:[%s17351_s10] sm:$0xff] %vm9883_vm3, %v9879_v52 }
0x710b   :  { %9885 = vst.msk [vmem:[%s17351_s10 + $0x8] sm:$0xff] %vm9883_vm3, %v9880_v61 }
0x710c   :  { %13519 = dma.done.wait [#allocation3], 256  }
0x710d   :  { %13520 = vsyncadd [#allocation3], 4294967040 }
0x710e   :  { %9905 = vsyncpa [#allocation3], 1 }
0x710f   :  { %9906 = vsyncpa [#allocation4], 1 }

</bundles_post_ra>
